<compile_context>
chip_gen: v6e
topology: v6e:2x2x1
jax: 0.10.0
libtpu: 0.0.40
codegen_flags: <defaults>
</compile_context>

<pallas_src>
import functools

import jax
import jax.numpy as jnp
from jax.experimental import pallas as pl
from jax.experimental.pallas import tpu as pltpu

PROFILE_OUT_LEN = 250
BODY_K = 25                      # first conv kernel width
PROF_K = 25                      # profile head conv kernel width
DIL_K = 3                        # dilated conv kernel width
N_DILATED = 9
DILATIONS = tuple(2 ** i for i in range(1, N_DILATED + 1))   # 2, 4, ..., 512

# MXU input dtype. float32 is exact and safe on every generation; on v6e/v7x
# set to jnp.bfloat16 for ~2-3x MXU throughput (accumulation stays f32 via
# preferred_element_type; weights are pre-cast host-side). Keep f32 on v5e.
MXU_DTYPE = jnp.float32


def _max_pad(L):
    """Zero-flank width of the VMEM activation scratch (rounded to 128 lanes)."""
    need = max([(BODY_K - 1) // 2, (PROF_K - 1) // 2]
               + [d for d in DILATIONS if d < L])
    return ((need + 127) // 128) * 128


# ---------------------------------------------------------------------------
# Fused kernel: conv0 + 9 dilated residual convs + profile head + counts head
# ---------------------------------------------------------------------------
def _bpnet_fused_kernel(x_ref, w0_ref, b0_ref, wd_ref, bd_ref, wp_ref, bp_ref,
                        wc_ref, bc_ref, ctrl_ref,
                        fp_ref, tot_ref,
                        xpad_ref, x0p_ref, *,
                        L, F, n_cell, maxpad, out_len, out_start):
    f32 = jnp.float32
    pad0 = (BODY_K - 1) // 2
    padp = (PROF_K - 1) // 2

    # Zero only the flank columns; they are never written by the network and
    # act as the 'same' conv padding. Center columns are overwritten below.
    xpad_ref[:, 0:maxpad] = jnp.zeros((F, maxpad), f32)
    xpad_ref[:, maxpad + L:maxpad + L + maxpad] = jnp.zeros((F, maxpad), f32)
    x0p_ref[:, 0:maxpad] = jnp.zeros((4, maxpad), f32)
    x0p_ref[:, maxpad + L:maxpad + L + maxpad] = jnp.zeros((4, maxpad), f32)

    # ---- Body, first layer: Conv1d(4 -> F, k=25, 'same') + ReLU ------------
    # im2col: stack the 25 shifted (4, L) windows on the sublane axis and do a
    # single (F, 100) @ (100, L) matmul (one MXU issue instead of 25).
    x0p_ref[:, maxpad:maxpad + L] = x_ref[0].astype(f32)          # (4, L)
    rhs0 = jnp.concatenate(
        [x0p_ref[:, maxpad + k - pad0: maxpad + k - pad0 + L]
         for k in range(BODY_K)], axis=0)                         # (100, L)
    acc = jnp.dot(w0_ref[...], rhs0.astype(MXU_DTYPE),
                  preferred_element_type=f32)                     # (F, L)
    xpad_ref[:, maxpad:maxpad + L] = jnp.maximum(acc + b0_ref[...], 0.0)

    # ---- Body, 9 dilated residual layers: x = x + ReLU(conv(x)) ------------
    # Packed weight column order is (center, left, right) so the d >= L
    # fallback uses the lane-aligned [0:F] slice.
    for i, d in enumerate(DILATIONS):
        x_cur = xpad_ref[:, maxpad:maxpad + L]                    # (F, L)
        if d < L:
            # Pack the 3 taps into one matmul: (F, 3F) @ (3F, L).
            xin = jnp.concatenate(
                [x_cur,                                           # center tap
                 xpad_ref[:, maxpad - d:maxpad - d + L],          # left  tap
                 xpad_ref[:, maxpad + d:maxpad + d + L]],         # right tap
                axis=0)                                           # (3F, L)
            w = wd_ref[i]                                         # (F, 3F)
        else:
            # Edge taps read only zero padding -> center tap (1x1 conv) only.
            xin = x_cur
            w = wd_ref[i][:, 0:F]                                 # (F, F)
        y = jnp.dot(w, xin.astype(MXU_DTYPE), preferred_element_type=f32)
        y = jnp.maximum(y + bd_ref[i], 0.0) + x_cur
        xpad_ref[:, maxpad:maxpad + L] = y

    # ---- Head, profile: Conv1d(F -> n_cell, k=25, 'same') on the center-
    #      cropped window, as ONE im2col matmul, plus the control bias track --
    rhsp = jnp.concatenate(
        [xpad_ref[:, maxpad + out_start + k - padp:
                  maxpad + out_start + k - padp + out_len]
         for k in range(PROF_K)], axis=0)                         # (25F, out_len)
    pacc = jnp.dot(wp_ref[...], rhsp.astype(MXU_DTYPE),
                   preferred_element_type=f32)                    # (n_cell, out_len)
    fp_ref[0] = (pacc + bp_ref[...] + ctrl_ref[0]).astype(fp_ref.dtype)

    # ---- Head, counts: mean over length, then Linear(F -> n_cell) ----------
    # TODO(synk): exact Head definition (bias usage for total counts) is not in
    # the reference source; total counts use GAP + Linear only.
    gap = jnp.mean(xpad_ref[:, maxpad:maxpad + L], axis=1, keepdims=True)  # (F,1)
    tot = jnp.dot(wc_ref[...], gap.astype(MXU_DTYPE),
                  preferred_element_type=f32) + bc_ref[...]                # (n_cell,1)
    tot_ref[0] = tot.astype(tot_ref.dtype)


# ---------------------------------------------------------------------------
# Wrapper
# ---------------------------------------------------------------------------
def _pack_params(params):
    """PyTorch-layout params -> kernel layout (im2col-packed, MXU dtype)."""
    F = params["conv0_b"].shape[0]
    n_cell = params["cnt_b"].shape[0]

    # conv0: (F, 4, 25) -> (F, 25, 4) -> (F, 100)   [columns = tap-major]
    w0 = jnp.transpose(params["conv0_w"], (0, 2, 1)).reshape(F, BODY_K * 4)

    # dilated convs: (F, F, 3) -> taps reordered to (center,left,right) -> (F, 3F)
    wd = jnp.stack(
        [jnp.transpose(params[f"dconv{i}_w"], (0, 2, 1))[:, (1, 0, 2), :]
         .reshape(F, DIL_K * F)
         for i in range(1, N_DILATED + 1)], axis=0)               # (9, F, 3F)
    bd = jnp.stack(
        [params[f"dconv{i}_b"].reshape(F, 1)
         for i in range(1, N_DILATED + 1)], axis=0)               # (9, F, 1)

    # profile head: (n_cell, F, 25) -> (n_cell, 25, F) -> (n_cell, 25F)
    wp = jnp.transpose(params["prof_w"], (0, 2, 1)).reshape(n_cell, PROF_K * F)

    return dict(
        w0=w0.astype(MXU_DTYPE),
        b0=params["conv0_b"].reshape(F, 1).astype(jnp.float32),
        wd=wd.astype(MXU_DTYPE), bd=bd.astype(jnp.float32),
        wp=wp.astype(MXU_DTYPE),
        bp=params["prof_b"].reshape(-1, 1).astype(jnp.float32),
        wc=params["cnt_w"].astype(MXU_DTYPE),                     # (n_cell, F)
        bc=params["cnt_b"].reshape(-1, 1).astype(jnp.float32),
    )


def bpnet_rep_forward(params, input_ncl, bias_ncl):
    """input_ncl: (B, 4, L) one-hot DNA; bias_ncl: (B, n_celltypes, 250).

    Returns (footprint, total): footprint (B, n_celltypes, 250), total (B, n_celltypes).
    """
    B, _, L = input_ncl.shape
    n_cell, F = params["cnt_w"].shape
    assert L >= PROFILE_OUT_LEN
    maxpad = _max_pad(L)
    out_start = (L - PROFILE_OUT_LEN) // 2

    p = _pack_params(params)
    x = input_ncl.astype(jnp.float32)
    ctrl = bias_ncl.astype(jnp.float32)

    kernel = functools.partial(
        _bpnet_fused_kernel, L=L, F=F, n_cell=n_cell, maxpad=maxpad,
        out_len=PROFILE_OUT_LEN, out_start=out_start)

    footprint, total3 = pl.pallas_call(
        kernel,
        out_shape=(
            jax.ShapeDtypeStruct((B, n_cell, PROFILE_OUT_LEN), jnp.float32),
            jax.ShapeDtypeStruct((B, n_cell, 1), jnp.float32),
        ),
        grid=(B,),
        in_specs=[
            pl.BlockSpec((1, 4, L), lambda i: (i, 0, 0)),                   # x (NCL)
            pl.BlockSpec((F, BODY_K * 4), lambda i: (0, 0)),                # w0 im2col
            pl.BlockSpec((F, 1), lambda i: (0, 0)),                         # b0
            pl.BlockSpec((N_DILATED, F, DIL_K * F), lambda i: (0, 0, 0)),   # wd packed
            pl.BlockSpec((N_DILATED, F, 1), lambda i: (0, 0, 0)),           # bd
            pl.BlockSpec((n_cell, PROF_K * F), lambda i: (0, 0)),           # wp im2col
            pl.BlockSpec((n_cell, 1), lambda i: (0, 0)),                    # bp
            pl.BlockSpec((n_cell, F), lambda i: (0, 0)),                    # wc
            pl.BlockSpec((n_cell, 1), lambda i: (0, 0)),                    # bc
            pl.BlockSpec((1, n_cell, PROFILE_OUT_LEN), lambda i: (i, 0, 0)),  # ctrl
        ],
        out_specs=(
            pl.BlockSpec((1, n_cell, PROFILE_OUT_LEN), lambda i: (i, 0, 0)),
            pl.BlockSpec((1, n_cell, 1), lambda i: (i, 0, 0)),
        ),
        scratch_shapes=[
            pltpu.VMEM((F, L + 2 * maxpad), jnp.float32),   # padded activation
            pltpu.VMEM((4, L + 2 * maxpad), jnp.float32),   # padded DNA input
        ],
        compiler_params=pltpu.CompilerParams(
            dimension_semantics=("parallel",)),
    )(x, p["w0"], p["b0"], p["wd"], p["bd"], p["wp"], p["bp"],
      p["wc"], p["bc"], ctrl)

    return footprint, total3[:, :, 0]


# ---------------------------------------------------------------------------
# Parameters (PyTorch Conv1d/Linear layout) and a pure-JAX reference
# ---------------------------------------------------------------------------
def init_params(key, *, n_celltypes, num_filters):
    ks = jax.random.split(key, 2 * (N_DILATED + 3))
    s = 0.05
    p = {}
    p["conv0_w"] = s * jax.random.normal(ks[0], (num_filters, 4, BODY_K), jnp.float32)
    p["conv0_b"] = 0.01 * jax.random.normal(ks[1], (num_filters,), jnp.float32)
    for i in range(1, N_DILATED + 1):
        p[f"dconv{i}_w"] = s * jax.random.normal(
            ks[2 * i], (num_filters, num_filters, DIL_K), jnp.float32)
        p[f"dconv{i}_b"] = 0.01 * jax.random.normal(ks[2 * i + 1], (num_filters,), jnp.float32)
    p["prof_w"] = s * jax.random.normal(ks[-4], (n_celltypes, num_filters, PROF_K), jnp.float32)
    p["prof_b"] = 0.01 * jax.random.normal(ks[-3], (n_celltypes,), jnp.float32)
    p["cnt_w"] = s * jax.random.normal(ks[-2], (n_celltypes, num_filters), jnp.float32)
    p["cnt_b"] = 0.01 * jax.random.normal(ks[-1], (n_celltypes,), jnp.float32)
    return p


def _conv1d_ref(x, w, b, dilation=1):
    K = w.shape[-1]
    pad = (K - 1) * dilation // 2
    y = jax.lax.conv_general_dilated(
        x, w, window_strides=(1,), padding=[(pad, pad)],
        rhs_dilation=(dilation,), dimension_numbers=("NCH", "OIH", "NCH"),
        precision=jax.lax.Precision.HIGHEST)
    return y + b[None, :, None]


def bpnet_rep_reference(params, input_ncl, bias_ncl):
    x = input_ncl.astype(jnp.float32)
    h = jnp.maximum(_conv1d_ref(x, params["conv0_w"], params["conv0_b"]), 0.0)
    for i, d in enumerate(DILATIONS):
        h = h + jnp.maximum(
            _conv1d_ref(h, params[f"dconv{i + 1}_w"], params[f"dconv{i + 1}_b"], d), 0.0)
    prof = _conv1d_ref(h, params["prof_w"], params["prof_b"])
    start = (prof.shape[-1] - PROFILE_OUT_LEN) // 2
    footprint = prof[:, :, start:start + PROFILE_OUT_LEN] + bias_ncl
    total = jnp.mean(h, axis=-1) @ params["cnt_w"].T + params["cnt_b"]
    return footprint, total


# ---------------------------------------------------------------------------
if __name__ == "__main__":
    B = 2
    SEQ_LEN = 256          # must be >= profile_out_len (250)
    N_CELLTYPES = 8
    NUM_FILTERS = 32

    key = jax.random.PRNGKey(0)
    k_param, k_x, k_bias = jax.random.split(key, 3)

    params = init_params(k_param, n_celltypes=N_CELLTYPES, num_filters=NUM_FILTERS)

    # one-hot-ish DNA input (B, 4, seq_len) and control bias track (B, n_cell, 250)
    x = jax.random.normal(k_x, (B, 4, SEQ_LEN), jnp.float32)
    bias = 0.1 * jax.random.normal(k_bias, (B, N_CELLTYPES, PROFILE_OUT_LEN), jnp.float32)

    fwd = jax.jit(bpnet_rep_forward)
    footprint, total = fwd(params, x, bias)
    jax.block_until_ready((footprint, total))

    assert footprint.shape == (B, N_CELLTYPES, PROFILE_OUT_LEN), footprint.shape
    assert total.shape == (B, N_CELLTYPES), total.shape
    assert bool(jnp.all(jnp.isfinite(footprint))) and bool(jnp.all(jnp.isfinite(total)))

    # Numerical check against a pure-JAX (lax.conv) reference.
    fp_ref, tot_ref = jax.jit(bpnet_rep_reference)(params, x, bias)
    max_fp_err = float(jnp.max(jnp.abs(footprint - fp_ref)))
    max_tot_err = float(jnp.max(jnp.abs(total - tot_ref)))
    assert jnp.allclose(footprint, fp_ref, atol=2e-2, rtol=2e-2), max_fp_err
    assert jnp.allclose(total, tot_ref, atol=2e-2, rtol=2e-2), max_tot_err

    print("KERNEL_OK")
</pallas_src>

<mosaic_0001>
module attributes {stable_mosaic.version = 11 : i64} {
  func.func @_bpnet_fused_kernel(%arg0: i32, %arg1: memref<1x4x256xf32, #tpu.memory_space<vmem>>, %arg2: memref<32x100xf32, #tpu.memory_space<vmem>>, %arg3: memref<32x1xf32, #tpu.memory_space<vmem>>, %arg4: memref<9x32x96xf32, #tpu.memory_space<vmem>>, %arg5: memref<9x32x1xf32, #tpu.memory_space<vmem>>, %arg6: memref<8x800xf32, #tpu.memory_space<vmem>>, %arg7: memref<8x1xf32, #tpu.memory_space<vmem>>, %arg8: memref<8x32xf32, #tpu.memory_space<vmem>>, %arg9: memref<8x1xf32, #tpu.memory_space<vmem>>, %arg10: memref<1x8x250xf32, #tpu.memory_space<vmem>>, %arg11: memref<1x8x250xf32, #tpu.memory_space<vmem>>, %arg12: memref<1x8x1xf32, #tpu.memory_space<vmem>>, %arg13: memref<32x512xf32, #tpu.memory_space<vmem>>, %arg14: memref<4x512xf32, #tpu.memory_space<vmem>>) attributes {dimension_semantics = [#tpu.dimension_semantics<parallel>], iteration_bounds = array<i64: 2>, scalar_prefetch = 0 : i64, scratch_operands = 2 : i64, tpu.core_type = #tpu.core_type<tc>, window_params = [{transform_indices = @transform_0, window_bounds = array<i64: 1, 4, 256>}, {pipeline_mode = #tpu.pipeline_mode<synchronous>, transform_indices = @transform_1, window_bounds = array<i64: 32, 100>}, {pipeline_mode = #tpu.pipeline_mode<synchronous>, transform_indices = @transform_2, window_bounds = array<i64: 32, 1>}, {pipeline_mode = #tpu.pipeline_mode<synchronous>, transform_indices = @transform_3, window_bounds = array<i64: 9, 32, 96>}, {pipeline_mode = #tpu.pipeline_mode<synchronous>, transform_indices = @transform_4, window_bounds = array<i64: 9, 32, 1>}, {pipeline_mode = #tpu.pipeline_mode<synchronous>, transform_indices = @transform_5, window_bounds = array<i64: 8, 800>}, {pipeline_mode = #tpu.pipeline_mode<synchronous>, transform_indices = @transform_6, window_bounds = array<i64: 8, 1>}, {pipeline_mode = #tpu.pipeline_mode<synchronous>, transform_indices = @transform_7, window_bounds = array<i64: 8, 32>}, {pipeline_mode = #tpu.pipeline_mode<synchronous>, transform_indices = @transform_8, window_bounds = array<i64: 8, 1>}, {transform_indices = @transform_9, window_bounds = array<i64: 1, 8, 250>}, {transform_indices = @transform_10, window_bounds = array<i64: 1, 8, 250>}, {transform_indices = @transform_11, window_bounds = array<i64: 1, 8, 1>}]} {
    %cst = arith.constant 0.000000e+00 : f32
    %0 = vector.broadcast %cst : f32 to vector<32x128xf32>
    %c0 = arith.constant 0 : index
    %c0_0 = arith.constant 0 : index
    %1 = vector.load %arg13[%c0, %c0_0] : memref<32x512xf32, #tpu.memory_space<vmem>>, vector<32x128xf32>
    tpu.vector_store %arg13[%c0, %c0_0], %0 {strides = array<i32>} : memref<32x512xf32, #tpu.memory_space<vmem>>, vector<32x128xf32>,
    %cst_1 = arith.constant 0.000000e+00 : f32
    %2 = vector.broadcast %cst_1 : f32 to vector<32x128xf32>
    %c0_2 = arith.constant 0 : index
    %c384 = arith.constant 384 : index
    %3 = vector.load %arg13[%c0_2, %c384] : memref<32x512xf32, #tpu.memory_space<vmem>>, vector<32x128xf32>
    tpu.vector_store %arg13[%c0_2, %c384], %2 {strides = array<i32>} : memref<32x512xf32, #tpu.memory_space<vmem>>, vector<32x128xf32>,
    %cst_3 = arith.constant 0.000000e+00 : f32
    %4 = vector.broadcast %cst_3 : f32 to vector<4x128xf32>
    %c0_4 = arith.constant 0 : index
    %c0_5 = arith.constant 0 : index
    %5 = vector.load %arg14[%c0_4, %c0_5] : memref<4x512xf32, #tpu.memory_space<vmem>>, vector<4x128xf32>
    tpu.vector_store %arg14[%c0_4, %c0_5], %4 {strides = array<i32>} : memref<4x512xf32, #tpu.memory_space<vmem>>, vector<4x128xf32>,
    %cst_6 = arith.constant 0.000000e+00 : f32
    %6 = vector.broadcast %cst_6 : f32 to vector<4x128xf32>
    %c0_7 = arith.constant 0 : index
    %c384_8 = arith.constant 384 : index
    %7 = vector.load %arg14[%c0_7, %c384_8] : memref<4x512xf32, #tpu.memory_space<vmem>>, vector<4x128xf32>
    tpu.vector_store %arg14[%c0_7, %c384_8], %6 {strides = array<i32>} : memref<4x512xf32, #tpu.memory_space<vmem>>, vector<4x128xf32>,
    %c0_9 = arith.constant 0 : index
    %c0_10 = arith.constant 0 : index
    %c0_11 = arith.constant 0 : index
    %8 = vector.load %arg1[%c0_9, %c0_10, %c0_11] : memref<1x4x256xf32, #tpu.memory_space<vmem>>, vector<1x4x256xf32>
    %9 = vector.shape_cast %8 : vector<1x4x256xf32> to vector<4x256xf32>
    %c0_12 = arith.constant 0 : index
    %c128 = arith.constant 128 : index
    %10 = vector.load %arg14[%c0_12, %c128] : memref<4x512xf32, #tpu.memory_space<vmem>>, vector<4x256xf32>
    tpu.vector_store %arg14[%c0_12, %c128], %9 {strides = array<i32>} : memref<4x512xf32, #tpu.memory_space<vmem>>, vector<4x256xf32>,
    %c0_13 = arith.constant 0 : index
    %c116 = arith.constant 116 : index
    %11 = vector.load %arg14[%c0_13, %c116] : memref<4x512xf32, #tpu.memory_space<vmem>>, vector<4x256xf32>
    %c0_14 = arith.constant 0 : index
    %c117 = arith.constant 117 : index
    %12 = vector.load %arg14[%c0_14, %c117] : memref<4x512xf32, #tpu.memory_space<vmem>>, vector<4x256xf32>
    %c0_15 = arith.constant 0 : index
    %c118 = arith.constant 118 : index
    %13 = vector.load %arg14[%c0_15, %c118] : memref<4x512xf32, #tpu.memory_space<vmem>>, vector<4x256xf32>
    %c0_16 = arith.constant 0 : index
    %c119 = arith.constant 119 : index
    %14 = vector.load %arg14[%c0_16, %c119] : memref<4x512xf32, #tpu.memory_space<vmem>>, vector<4x256xf32>
    %c0_17 = arith.constant 0 : index
    %c120 = arith.constant 120 : index
    %15 = vector.load %arg14[%c0_17, %c120] : memref<4x512xf32, #tpu.memory_space<vmem>>, vector<4x256xf32>
    %c0_18 = arith.constant 0 : index
    %c121 = arith.constant 121 : index
    %16 = vector.load %arg14[%c0_18, %c121] : memref<4x512xf32, #tpu.memory_space<vmem>>, vector<4x256xf32>
    %c0_19 = arith.constant 0 : index
    %c122 = arith.constant 122 : index
    %17 = vector.load %arg14[%c0_19, %c122] : memref<4x512xf32, #tpu.memory_space<vmem>>, vector<4x256xf32>
    %c0_20 = arith.constant 0 : index
    %c123 = arith.constant 123 : index
    %18 = vector.load %arg14[%c0_20, %c123] : memref<4x512xf32, #tpu.memory_space<vmem>>, vector<4x256xf32>
    %c0_21 = arith.constant 0 : index
    %c124 = arith.constant 124 : index
    %19 = vector.load %arg14[%c0_21, %c124] : memref<4x512xf32, #tpu.memory_space<vmem>>, vector<4x256xf32>
    %c0_22 = arith.constant 0 : index
    %c125 = arith.constant 125 : index
    %20 = vector.load %arg14[%c0_22, %c125] : memref<4x512xf32, #tpu.memory_space<vmem>>, vector<4x256xf32>
    %c0_23 = arith.constant 0 : index
    %c126 = arith.constant 126 : index
    %21 = vector.load %arg14[%c0_23, %c126] : memref<4x512xf32, #tpu.memory_space<vmem>>, vector<4x256xf32>
    %c0_24 = arith.constant 0 : index
    %c127 = arith.constant 127 : index
    %22 = vector.load %arg14[%c0_24, %c127] : memref<4x512xf32, #tpu.memory_space<vmem>>, vector<4x256xf32>
    %c0_25 = arith.constant 0 : index
    %c128_26 = arith.constant 128 : index
    %23 = vector.load %arg14[%c0_25, %c128_26] : memref<4x512xf32, #tpu.memory_space<vmem>>, vector<4x256xf32>
    %c0_27 = arith.constant 0 : index
    %c129 = arith.constant 129 : index
    %24 = vector.load %arg14[%c0_27, %c129] : memref<4x512xf32, #tpu.memory_space<vmem>>, vector<4x256xf32>
    %c0_28 = arith.constant 0 : index
    %c130 = arith.constant 130 : index
    %25 = vector.load %arg14[%c0_28, %c130] : memref<4x512xf32, #tpu.memory_space<vmem>>, vector<4x256xf32>
    %c0_29 = arith.constant 0 : index
    %c131 = arith.constant 131 : index
    %26 = vector.load %arg14[%c0_29, %c131] : memref<4x512xf32, #tpu.memory_space<vmem>>, vector<4x256xf32>
    %c0_30 = arith.constant 0 : index
    %c132 = arith.constant 132 : index
    %27 = vector.load %arg14[%c0_30, %c132] : memref<4x512xf32, #tpu.memory_space<vmem>>, vector<4x256xf32>
    %c0_31 = arith.constant 0 : index
    %c133 = arith.constant 133 : index
    %28 = vector.load %arg14[%c0_31, %c133] : memref<4x512xf32, #tpu.memory_space<vmem>>, vector<4x256xf32>
    %c0_32 = arith.constant 0 : index
    %c134 = arith.constant 134 : index
    %29 = vector.load %arg14[%c0_32, %c134] : memref<4x512xf32, #tpu.memory_space<vmem>>, vector<4x256xf32>
    %c0_33 = arith.constant 0 : index
    %c135 = arith.constant 135 : index
    %30 = vector.load %arg14[%c0_33, %c135] : memref<4x512xf32, #tpu.memory_space<vmem>>, vector<4x256xf32>
    %c0_34 = arith.constant 0 : index
    %c136 = arith.constant 136 : index
    %31 = vector.load %arg14[%c0_34, %c136] : memref<4x512xf32, #tpu.memory_space<vmem>>, vector<4x256xf32>
    %c0_35 = arith.constant 0 : index
    %c137 = arith.constant 137 : index
    %32 = vector.load %arg14[%c0_35, %c137] : memref<4x512xf32, #tpu.memory_space<vmem>>, vector<4x256xf32>
    %c0_36 = arith.constant 0 : index
    %c138 = arith.constant 138 : index
    %33 = vector.load %arg14[%c0_36, %c138] : memref<4x512xf32, #tpu.memory_space<vmem>>, vector<4x256xf32>
    %c0_37 = arith.constant 0 : index
    %c139 = arith.constant 139 : index
    %34 = vector.load %arg14[%c0_37, %c139] : memref<4x512xf32, #tpu.memory_space<vmem>>, vector<4x256xf32>
    %c0_38 = arith.constant 0 : index
    %c140 = arith.constant 140 : index
    %35 = vector.load %arg14[%c0_38, %c140] : memref<4x512xf32, #tpu.memory_space<vmem>>, vector<4x256xf32>
    %36 = tpu.concatenate %11, %12, %13, %14, %15, %16, %17, %18, %19, %20, %21, %22, %23, %24, %25, %26 in 0 : vector<4x256xf32>, vector<4x256xf32>, vector<4x256xf32>, vector<4x256xf32>, vector<4x256xf32>, vector<4x256xf32>, vector<4x256xf32>, vector<4x256xf32>, vector<4x256xf32>, vector<4x256xf32>, vector<4x256xf32>, vector<4x256xf32>, vector<4x256xf32>, vector<4x256xf32>, vector<4x256xf32>, vector<4x256xf32> -> vector<64x256xf32>
    %37 = tpu.concatenate %27, %28, %29, %30, %31, %32, %33, %34, %35 in 0 : vector<4x256xf32>, vector<4x256xf32>, vector<4x256xf32>, vector<4x256xf32>, vector<4x256xf32>, vector<4x256xf32>, vector<4x256xf32>, vector<4x256xf32>, vector<4x256xf32> -> vector<36x256xf32>
    %38 = tpu.concatenate %36, %37 in 0 : vector<64x256xf32>, vector<36x256xf32> -> vector<100x256xf32>
    %c0_39 = arith.constant 0 : index
    %c0_40 = arith.constant 0 : index
    %39 = vector.load %arg2[%c0_39, %c0_40] : memref<32x100xf32, #tpu.memory_space<vmem>>, vector<32x100xf32>
    %cst_41 = arith.constant dense<0.000000e+00> : vector<32x256xf32>
    %40 = tpu.matmul %39, %38, %cst_41 {dimension_numbers = #tpu.dot_dimension_numbers<[1], [0], [0], [1], [0, 0, 1, 1], [], []>} : vector<32x100xf32>, vector<100x256xf32>, vector<32x256xf32> -> vector<32x256xf32>
    %c0_42 = arith.constant 0 : index
    %c0_43 = arith.constant 0 : index
    %41 = vector.load %arg3[%c0_42, %c0_43] : memref<32x1xf32, #tpu.memory_space<vmem>>, vector<32x1xf32>
    %42 = vector.broadcast %41 : vector<32x1xf32> to vector<32x256xf32>
    %43 = arith.addf %40, %42 : vector<32x256xf32>
    %cst_44 = arith.constant 0.000000e+00 : f32
    %44 = vector.broadcast %cst_44 : f32 to vector<32x256xf32>
    %45 = arith.maximumf %43, %44 : vector<32x256xf32>
    %c0_45 = arith.constant 0 : index
    %c128_46 = arith.constant 128 : index
    %46 = vector.load %arg13[%c0_45, %c128_46] : memref<32x512xf32, #tpu.memory_space<vmem>>, vector<32x256xf32>
    tpu.vector_store %arg13[%c0_45, %c128_46], %45 {strides = array<i32>} : memref<32x512xf32, #tpu.memory_space<vmem>>, vector<32x256xf32>,
    %c0_47 = arith.constant 0 : index
    %c128_48 = arith.constant 128 : index
    %47 = vector.load %arg13[%c0_47, %c128_48] : memref<32x512xf32, #tpu.memory_space<vmem>>, vector<32x256xf32>
    %c0_49 = arith.constant 0 : index
    %c126_50 = arith.constant 126 : index
    %48 = vector.load %arg13[%c0_49, %c126_50] : memref<32x512xf32, #tpu.memory_space<vmem>>, vector<32x256xf32>
    %c0_51 = arith.constant 0 : index
    %c130_52 = arith.constant 130 : index
    %49 = vector.load %arg13[%c0_51, %c130_52] : memref<32x512xf32, #tpu.memory_space<vmem>>, vector<32x256xf32>
    %50 = tpu.concatenate %47, %48, %49 in 0 : vector<32x256xf32>, vector<32x256xf32>, vector<32x256xf32> -> vector<96x256xf32>
    %c0_53 = arith.constant 0 : index
    %c0_54 = arith.constant 0 : index
    %c0_55 = arith.constant 0 : index
    %51 = vector.load %arg4[%c0_53, %c0_54, %c0_55] : memref<9x32x96xf32, #tpu.memory_space<vmem>>, vector<1x32x96xf32>
    %52 = vector.shape_cast %51 : vector<1x32x96xf32> to vector<32x96xf32>
    %cst_56 = arith.constant dense<0.000000e+00> : vector<32x256xf32>
    %53 = tpu.matmul %52, %50, %cst_56 {dimension_numbers = #tpu.dot_dimension_numbers<[1], [0], [0], [1], [0, 0, 1, 1], [], []>} : vector<32x96xf32>, vector<96x256xf32>, vector<32x256xf32> -> vector<32x256xf32>
    %c0_57 = arith.constant 0 : index
    %c0_58 = arith.constant 0 : index
    %c0_59 = arith.constant 0 : index
    %54 = vector.load %arg5[%c0_57, %c0_58, %c0_59] : memref<9x32x1xf32, #tpu.memory_space<vmem>>, vector<1x32x1xf32>
    %55 = vector.shape_cast %54 : vector<1x32x1xf32> to vector<32x1xf32>
    %56 = vector.broadcast %55 : vector<32x1xf32> to vector<32x256xf32>
    %57 = arith.addf %53, %56 : vector<32x256xf32>
    %cst_60 = arith.constant 0.000000e+00 : f32
    %58 = vector.broadcast %cst_60 : f32 to vector<32x256xf32>
    %59 = arith.maximumf %57, %58 : vector<32x256xf32>
    %60 = arith.addf %59, %47 : vector<32x256xf32>
    %c0_61 = arith.constant 0 : index
    %c128_62 = arith.constant 128 : index
    %61 = vector.load %arg13[%c0_61, %c128_62] : memref<32x512xf32, #tpu.memory_space<vmem>>, vector<32x256xf32>
    tpu.vector_store %arg13[%c0_61, %c128_62], %60 {strides = array<i32>} : memref<32x512xf32, #tpu.memory_space<vmem>>, vector<32x256xf32>,
    %c0_63 = arith.constant 0 : index
    %c128_64 = arith.constant 128 : index
    %62 = vector.load %arg13[%c0_63, %c128_64] : memref<32x512xf32, #tpu.memory_space<vmem>>, vector<32x256xf32>
    %c0_65 = arith.constant 0 : index
    %c124_66 = arith.constant 124 : index
    %63 = vector.load %arg13[%c0_65, %c124_66] : memref<32x512xf32, #tpu.memory_space<vmem>>, vector<32x256xf32>
    %c0_67 = arith.constant 0 : index
    %c132_68 = arith.constant 132 : index
    %64 = vector.load %arg13[%c0_67, %c132_68] : memref<32x512xf32, #tpu.memory_space<vmem>>, vector<32x256xf32>
    %65 = tpu.concatenate %62, %63, %64 in 0 : vector<32x256xf32>, vector<32x256xf32>, vector<32x256xf32> -> vector<96x256xf32>
    %c1 = arith.constant 1 : index
    %c0_69 = arith.constant 0 : index
    %c0_70 = arith.constant 0 : index
    %66 = vector.load %arg4[%c1, %c0_69, %c0_70] : memref<9x32x96xf32, #tpu.memory_space<vmem>>, vector<1x32x96xf32>
    %67 = vector.shape_cast %66 : vector<1x32x96xf32> to vector<32x96xf32>
    %cst_71 = arith.constant dense<0.000000e+00> : vector<32x256xf32>
    %68 = tpu.matmul %67, %65, %cst_71 {dimension_numbers = #tpu.dot_dimension_numbers<[1], [0], [0], [1], [0, 0, 1, 1], [], []>} : vector<32x96xf32>, vector<96x256xf32>, vector<32x256xf32> -> vector<32x256xf32>
    %c1_72 = arith.constant 1 : index
    %c0_73 = arith.constant 0 : index
    %c0_74 = arith.constant 0 : index
    %69 = vector.load %arg5[%c1_72, %c0_73, %c0_74] : memref<9x32x1xf32, #tpu.memory_space<vmem>>, vector<1x32x1xf32>
    %70 = vector.shape_cast %69 : vector<1x32x1xf32> to vector<32x1xf32>
    %71 = vector.broadcast %70 : vector<32x1xf32> to vector<32x256xf32>
    %72 = arith.addf %68, %71 : vector<32x256xf32>
    %cst_75 = arith.constant 0.000000e+00 : f32
    %73 = vector.broadcast %cst_75 : f32 to vector<32x256xf32>
    %74 = arith.maximumf %72, %73 : vector<32x256xf32>
    %75 = arith.addf %74, %62 : vector<32x256xf32>
    %c0_76 = arith.constant 0 : index
    %c128_77 = arith.constant 128 : index
    %76 = vector.load %arg13[%c0_76, %c128_77] : memref<32x512xf32, #tpu.memory_space<vmem>>, vector<32x256xf32>
    tpu.vector_store %arg13[%c0_76, %c128_77], %75 {strides = array<i32>} : memref<32x512xf32, #tpu.memory_space<vmem>>, vector<32x256xf32>,
    %c0_78 = arith.constant 0 : index
    %c128_79 = arith.constant 128 : index
    %77 = vector.load %arg13[%c0_78, %c128_79] : memref<32x512xf32, #tpu.memory_space<vmem>>, vector<32x256xf32>
    %c0_80 = arith.constant 0 : index
    %c120_81 = arith.constant 120 : index
    %78 = vector.load %arg13[%c0_80, %c120_81] : memref<32x512xf32, #tpu.memory_space<vmem>>, vector<32x256xf32>
    %c0_82 = arith.constant 0 : index
    %c136_83 = arith.constant 136 : index
    %79 = vector.load %arg13[%c0_82, %c136_83] : memref<32x512xf32, #tpu.memory_space<vmem>>, vector<32x256xf32>
    %80 = tpu.concatenate %77, %78, %79 in 0 : vector<32x256xf32>, vector<32x256xf32>, vector<32x256xf32> -> vector<96x256xf32>
    %c2 = arith.constant 2 : index
    %c0_84 = arith.constant 0 : index
    %c0_85 = arith.constant 0 : index
    %81 = vector.load %arg4[%c2, %c0_84, %c0_85] : memref<9x32x96xf32, #tpu.memory_space<vmem>>, vector<1x32x96xf32>
    %82 = vector.shape_cast %81 : vector<1x32x96xf32> to vector<32x96xf32>
    %cst_86 = arith.constant dense<0.000000e+00> : vector<32x256xf32>
    %83 = tpu.matmul %82, %80, %cst_86 {dimension_numbers = #tpu.dot_dimension_numbers<[1], [0], [0], [1], [0, 0, 1, 1], [], []>} : vector<32x96xf32>, vector<96x256xf32>, vector<32x256xf32> -> vector<32x256xf32>
    %c2_87 = arith.constant 2 : index
    %c0_88 = arith.constant 0 : index
    %c0_89 = arith.constant 0 : index
    %84 = vector.load %arg5[%c2_87, %c0_88, %c0_89] : memref<9x32x1xf32, #tpu.memory_space<vmem>>, vector<1x32x1xf32>
    %85 = vector.shape_cast %84 : vector<1x32x1xf32> to vector<32x1xf32>
    %86 = vector.broadcast %85 : vector<32x1xf32> to vector<32x256xf32>
    %87 = arith.addf %83, %86 : vector<32x256xf32>
    %cst_90 = arith.constant 0.000000e+00 : f32
    %88 = vector.broadcast %cst_90 : f32 to vector<32x256xf32>
    %89 = arith.maximumf %87, %88 : vector<32x256xf32>
    %90 = arith.addf %89, %77 : vector<32x256xf32>
    %c0_91 = arith.constant 0 : index
    %c128_92 = arith.constant 128 : index
    %91 = vector.load %arg13[%c0_91, %c128_92] : memref<32x512xf32, #tpu.memory_space<vmem>>, vector<32x256xf32>
    tpu.vector_store %arg13[%c0_91, %c128_92], %90 {strides = array<i32>} : memref<32x512xf32, #tpu.memory_space<vmem>>, vector<32x256xf32>,
    %c0_93 = arith.constant 0 : index
    %c128_94 = arith.constant 128 : index
    %92 = vector.load %arg13[%c0_93, %c128_94] : memref<32x512xf32, #tpu.memory_space<vmem>>, vector<32x256xf32>
    %c0_95 = arith.constant 0 : index
    %c112 = arith.constant 112 : index
    %93 = vector.load %arg13[%c0_95, %c112] : memref<32x512xf32, #tpu.memory_space<vmem>>, vector<32x256xf32>
    %c0_96 = arith.constant 0 : index
    %c144 = arith.constant 144 : index
    %94 = vector.load %arg13[%c0_96, %c144] : memref<32x512xf32, #tpu.memory_space<vmem>>, vector<32x256xf32>
    %95 = tpu.concatenate %92, %93, %94 in 0 : vector<32x256xf32>, vector<32x256xf32>, vector<32x256xf32> -> vector<96x256xf32>
    %c3 = arith.constant 3 : index
    %c0_97 = arith.constant 0 : index
    %c0_98 = arith.constant 0 : index
    %96 = vector.load %arg4[%c3, %c0_97, %c0_98] : memref<9x32x96xf32, #tpu.memory_space<vmem>>, vector<1x32x96xf32>
    %97 = vector.shape_cast %96 : vector<1x32x96xf32> to vector<32x96xf32>
    %cst_99 = arith.constant dense<0.000000e+00> : vector<32x256xf32>
    %98 = tpu.matmul %97, %95, %cst_99 {dimension_numbers = #tpu.dot_dimension_numbers<[1], [0], [0], [1], [0, 0, 1, 1], [], []>} : vector<32x96xf32>, vector<96x256xf32>, vector<32x256xf32> -> vector<32x256xf32>
    %c3_100 = arith.constant 3 : index
    %c0_101 = arith.constant 0 : index
    %c0_102 = arith.constant 0 : index
    %99 = vector.load %arg5[%c3_100, %c0_101, %c0_102] : memref<9x32x1xf32, #tpu.memory_space<vmem>>, vector<1x32x1xf32>
    %100 = vector.shape_cast %99 : vector<1x32x1xf32> to vector<32x1xf32>
    %101 = vector.broadcast %100 : vector<32x1xf32> to vector<32x256xf32>
    %102 = arith.addf %98, %101 : vector<32x256xf32>
    %cst_103 = arith.constant 0.000000e+00 : f32
    %103 = vector.broadcast %cst_103 : f32 to vector<32x256xf32>
    %104 = arith.maximumf %102, %103 : vector<32x256xf32>
    %105 = arith.addf %104, %92 : vector<32x256xf32>
    %c0_104 = arith.constant 0 : index
    %c128_105 = arith.constant 128 : index
    %106 = vector.load %arg13[%c0_104, %c128_105] : memref<32x512xf32, #tpu.memory_space<vmem>>, vector<32x256xf32>
    tpu.vector_store %arg13[%c0_104, %c128_105], %105 {strides = array<i32>} : memref<32x512xf32, #tpu.memory_space<vmem>>, vector<32x256xf32>,
    %c0_106 = arith.constant 0 : index
    %c128_107 = arith.constant 128 : index
    %107 = vector.load %arg13[%c0_106, %c128_107] : memref<32x512xf32, #tpu.memory_space<vmem>>, vector<32x256xf32>
    %c0_108 = arith.constant 0 : index
    %c96 = arith.constant 96 : index
    %108 = vector.load %arg13[%c0_108, %c96] : memref<32x512xf32, #tpu.memory_space<vmem>>, vector<32x256xf32>
    %c0_109 = arith.constant 0 : index
    %c160 = arith.constant 160 : index
    %109 = vector.load %arg13[%c0_109, %c160] : memref<32x512xf32, #tpu.memory_space<vmem>>, vector<32x256xf32>
    %110 = tpu.concatenate %107, %108, %109 in 0 : vector<32x256xf32>, vector<32x256xf32>, vector<32x256xf32> -> vector<96x256xf32>
    %c4 = arith.constant 4 : index
    %c0_110 = arith.constant 0 : index
    %c0_111 = arith.constant 0 : index
    %111 = vector.load %arg4[%c4, %c0_110, %c0_111] : memref<9x32x96xf32, #tpu.memory_space<vmem>>, vector<1x32x96xf32>
    %112 = vector.shape_cast %111 : vector<1x32x96xf32> to vector<32x96xf32>
    %cst_112 = arith.constant dense<0.000000e+00> : vector<32x256xf32>
    %113 = tpu.matmul %112, %110, %cst_112 {dimension_numbers = #tpu.dot_dimension_numbers<[1], [0], [0], [1], [0, 0, 1, 1], [], []>} : vector<32x96xf32>, vector<96x256xf32>, vector<32x256xf32> -> vector<32x256xf32>
    %c4_113 = arith.constant 4 : index
    %c0_114 = arith.constant 0 : index
    %c0_115 = arith.constant 0 : index
    %114 = vector.load %arg5[%c4_113, %c0_114, %c0_115] : memref<9x32x1xf32, #tpu.memory_space<vmem>>, vector<1x32x1xf32>
    %115 = vector.shape_cast %114 : vector<1x32x1xf32> to vector<32x1xf32>
    %116 = vector.broadcast %115 : vector<32x1xf32> to vector<32x256xf32>
    %117 = arith.addf %113, %116 : vector<32x256xf32>
    %cst_116 = arith.constant 0.000000e+00 : f32
    %118 = vector.broadcast %cst_116 : f32 to vector<32x256xf32>
    %119 = arith.maximumf %117, %118 : vector<32x256xf32>
    %120 = arith.addf %119, %107 : vector<32x256xf32>
    %c0_117 = arith.constant 0 : index
    %c128_118 = arith.constant 128 : index
    %121 = vector.load %arg13[%c0_117, %c128_118] : memref<32x512xf32, #tpu.memory_space<vmem>>, vector<32x256xf32>
    tpu.vector_store %arg13[%c0_117, %c128_118], %120 {strides = array<i32>} : memref<32x512xf32, #tpu.memory_space<vmem>>, vector<32x256xf32>,
    %c0_119 = arith.constant 0 : index
    %c128_120 = arith.constant 128 : index
    %122 = vector.load %arg13[%c0_119, %c128_120] : memref<32x512xf32, #tpu.memory_space<vmem>>, vector<32x256xf32>
    %c0_121 = arith.constant 0 : index
    %c64 = arith.constant 64 : index
    %123 = vector.load %arg13[%c0_121, %c64] : memref<32x512xf32, #tpu.memory_space<vmem>>, vector<32x256xf32>
    %c0_122 = arith.constant 0 : index
    %c192 = arith.constant 192 : index
    %124 = vector.load %arg13[%c0_122, %c192] : memref<32x512xf32, #tpu.memory_space<vmem>>, vector<32x256xf32>
    %125 = tpu.concatenate %122, %123, %124 in 0 : vector<32x256xf32>, vector<32x256xf32>, vector<32x256xf32> -> vector<96x256xf32>
    %c5 = arith.constant 5 : index
    %c0_123 = arith.constant 0 : index
    %c0_124 = arith.constant 0 : index
    %126 = vector.load %arg4[%c5, %c0_123, %c0_124] : memref<9x32x96xf32, #tpu.memory_space<vmem>>, vector<1x32x96xf32>
    %127 = vector.shape_cast %126 : vector<1x32x96xf32> to vector<32x96xf32>
    %cst_125 = arith.constant dense<0.000000e+00> : vector<32x256xf32>
    %128 = tpu.matmul %127, %125, %cst_125 {dimension_numbers = #tpu.dot_dimension_numbers<[1], [0], [0], [1], [0, 0, 1, 1], [], []>} : vector<32x96xf32>, vector<96x256xf32>, vector<32x256xf32> -> vector<32x256xf32>
    %c5_126 = arith.constant 5 : index
    %c0_127 = arith.constant 0 : index
    %c0_128 = arith.constant 0 : index
    %129 = vector.load %arg5[%c5_126, %c0_127, %c0_128] : memref<9x32x1xf32, #tpu.memory_space<vmem>>, vector<1x32x1xf32>
    %130 = vector.shape_cast %129 : vector<1x32x1xf32> to vector<32x1xf32>
    %131 = vector.broadcast %130 : vector<32x1xf32> to vector<32x256xf32>
    %132 = arith.addf %128, %131 : vector<32x256xf32>
    %cst_129 = arith.constant 0.000000e+00 : f32
    %133 = vector.broadcast %cst_129 : f32 to vector<32x256xf32>
    %134 = arith.maximumf %132, %133 : vector<32x256xf32>
    %135 = arith.addf %134, %122 : vector<32x256xf32>
    %c0_130 = arith.constant 0 : index
    %c128_131 = arith.constant 128 : index
    %136 = vector.load %arg13[%c0_130, %c128_131] : memref<32x512xf32, #tpu.memory_space<vmem>>, vector<32x256xf32>
    tpu.vector_store %arg13[%c0_130, %c128_131], %135 {strides = array<i32>} : memref<32x512xf32, #tpu.memory_space<vmem>>, vector<32x256xf32>,
    %c0_132 = arith.constant 0 : index
    %c128_133 = arith.constant 128 : index
    %137 = vector.load %arg13[%c0_132, %c128_133] : memref<32x512xf32, #tpu.memory_space<vmem>>, vector<32x256xf32>
    %c0_134 = arith.constant 0 : index
    %c0_135 = arith.constant 0 : index
    %138 = vector.load %arg13[%c0_134, %c0_135] : memref<32x512xf32, #tpu.memory_space<vmem>>, vector<32x256xf32>
    %c0_136 = arith.constant 0 : index
    %c256 = arith.constant 256 : index
    %139 = vector.load %arg13[%c0_136, %c256] : memref<32x512xf32, #tpu.memory_space<vmem>>, vector<32x256xf32>
    %140 = tpu.concatenate %137, %138, %139 in 0 : vector<32x256xf32>, vector<32x256xf32>, vector<32x256xf32> -> vector<96x256xf32>
    %c6 = arith.constant 6 : index
    %c0_137 = arith.constant 0 : index
    %c0_138 = arith.constant 0 : index
    %141 = vector.load %arg4[%c6, %c0_137, %c0_138] : memref<9x32x96xf32, #tpu.memory_space<vmem>>, vector<1x32x96xf32>
    %142 = vector.shape_cast %141 : vector<1x32x96xf32> to vector<32x96xf32>
    %cst_139 = arith.constant dense<0.000000e+00> : vector<32x256xf32>
    %143 = tpu.matmul %142, %140, %cst_139 {dimension_numbers = #tpu.dot_dimension_numbers<[1], [0], [0], [1], [0, 0, 1, 1], [], []>} : vector<32x96xf32>, vector<96x256xf32>, vector<32x256xf32> -> vector<32x256xf32>
    %c6_140 = arith.constant 6 : index
    %c0_141 = arith.constant 0 : index
    %c0_142 = arith.constant 0 : index
    %144 = vector.load %arg5[%c6_140, %c0_141, %c0_142] : memref<9x32x1xf32, #tpu.memory_space<vmem>>, vector<1x32x1xf32>
    %145 = vector.shape_cast %144 : vector<1x32x1xf32> to vector<32x1xf32>
    %146 = vector.broadcast %145 : vector<32x1xf32> to vector<32x256xf32>
    %147 = arith.addf %143, %146 : vector<32x256xf32>
    %cst_143 = arith.constant 0.000000e+00 : f32
    %148 = vector.broadcast %cst_143 : f32 to vector<32x256xf32>
    %149 = arith.maximumf %147, %148 : vector<32x256xf32>
    %150 = arith.addf %149, %137 : vector<32x256xf32>
    %c0_144 = arith.constant 0 : index
    %c128_145 = arith.constant 128 : index
    %151 = vector.load %arg13[%c0_144, %c128_145] : memref<32x512xf32, #tpu.memory_space<vmem>>, vector<32x256xf32>
    tpu.vector_store %arg13[%c0_144, %c128_145], %150 {strides = array<i32>} : memref<32x512xf32, #tpu.memory_space<vmem>>, vector<32x256xf32>,
    %c0_146 = arith.constant 0 : index
    %c128_147 = arith.constant 128 : index
    %152 = vector.load %arg13[%c0_146, %c128_147] : memref<32x512xf32, #tpu.memory_space<vmem>>, vector<32x256xf32>
    %c7 = arith.constant 7 : index
    %c0_148 = arith.constant 0 : index
    %c0_149 = arith.constant 0 : index
    %153 = vector.load %arg4[%c7, %c0_148, %c0_149] : memref<9x32x96xf32, #tpu.memory_space<vmem>>, vector<1x32x96xf32>
    %154 = vector.shape_cast %153 : vector<1x32x96xf32> to vector<32x96xf32>
    %155 = vector.extract_strided_slice %154 {offsets = [0, 0], sizes = [32, 32], strides = [1, 1]} : vector<32x96xf32> to vector<32x32xf32>
    %cst_150 = arith.constant dense<0.000000e+00> : vector<32x256xf32>
    %156 = tpu.matmul %155, %152, %cst_150 {dimension_numbers = #tpu.dot_dimension_numbers<[1], [0], [0], [1], [0, 0, 1, 1], [], []>} : vector<32x32xf32>, vector<32x256xf32>, vector<32x256xf32> -> vector<32x256xf32>
    %c7_151 = arith.constant 7 : index
    %c0_152 = arith.constant 0 : index
    %c0_153 = arith.constant 0 : index
    %157 = vector.load %arg5[%c7_151, %c0_152, %c0_153] : memref<9x32x1xf32, #tpu.memory_space<vmem>>, vector<1x32x1xf32>
    %158 = vector.shape_cast %157 : vector<1x32x1xf32> to vector<32x1xf32>
    %159 = vector.broadcast %158 : vector<32x1xf32> to vector<32x256xf32>
    %160 = arith.addf %156, %159 : vector<32x256xf32>
    %cst_154 = arith.constant 0.000000e+00 : f32
    %161 = vector.broadcast %cst_154 : f32 to vector<32x256xf32>
    %162 = arith.maximumf %160, %161 : vector<32x256xf32>
    %163 = arith.addf %162, %152 : vector<32x256xf32>
    %c0_155 = arith.constant 0 : index
    %c128_156 = arith.constant 128 : index
    %164 = vector.load %arg13[%c0_155, %c128_156] : memref<32x512xf32, #tpu.memory_space<vmem>>, vector<32x256xf32>
    tpu.vector_store %arg13[%c0_155, %c128_156], %163 {strides = array<i32>} : memref<32x512xf32, #tpu.memory_space<vmem>>, vector<32x256xf32>,
    %c0_157 = arith.constant 0 : index
    %c128_158 = arith.constant 128 : index
    %165 = vector.load %arg13[%c0_157, %c128_158] : memref<32x512xf32, #tpu.memory_space<vmem>>, vector<32x256xf32>
    %c8 = arith.constant 8 : index
    %c0_159 = arith.constant 0 : index
    %c0_160 = arith.constant 0 : index
    %166 = vector.load %arg4[%c8, %c0_159, %c0_160] : memref<9x32x96xf32, #tpu.memory_space<vmem>>, vector<1x32x96xf32>
    %167 = vector.shape_cast %166 : vector<1x32x96xf32> to vector<32x96xf32>
    %168 = vector.extract_strided_slice %167 {offsets = [0, 0], sizes = [32, 32], strides = [1, 1]} : vector<32x96xf32> to vector<32x32xf32>
    %cst_161 = arith.constant dense<0.000000e+00> : vector<32x256xf32>
    %169 = tpu.matmul %168, %165, %cst_161 {dimension_numbers = #tpu.dot_dimension_numbers<[1], [0], [0], [1], [0, 0, 1, 1], [], []>} : vector<32x32xf32>, vector<32x256xf32>, vector<32x256xf32> -> vector<32x256xf32>
    %c8_162 = arith.constant 8 : index
    %c0_163 = arith.constant 0 : index
    %c0_164 = arith.constant 0 : index
    %170 = vector.load %arg5[%c8_162, %c0_163, %c0_164] : memref<9x32x1xf32, #tpu.memory_space<vmem>>, vector<1x32x1xf32>
    %171 = vector.shape_cast %170 : vector<1x32x1xf32> to vector<32x1xf32>
    %172 = vector.broadcast %171 : vector<32x1xf32> to vector<32x256xf32>
    %173 = arith.addf %169, %172 : vector<32x256xf32>
    %cst_165 = arith.constant 0.000000e+00 : f32
    %174 = vector.broadcast %cst_165 : f32 to vector<32x256xf32>
    %175 = arith.maximumf %173, %174 : vector<32x256xf32>
    %176 = arith.addf %175, %165 : vector<32x256xf32>
    %c0_166 = arith.constant 0 : index
    %c128_167 = arith.constant 128 : index
    %177 = vector.load %arg13[%c0_166, %c128_167] : memref<32x512xf32, #tpu.memory_space<vmem>>, vector<32x256xf32>
    tpu.vector_store %arg13[%c0_166, %c128_167], %176 {strides = array<i32>} : memref<32x512xf32, #tpu.memory_space<vmem>>, vector<32x256xf32>,
    %c0_168 = arith.constant 0 : index
    %c119_169 = arith.constant 119 : index
    %178 = vector.load %arg13[%c0_168, %c119_169] : memref<32x512xf32, #tpu.memory_space<vmem>>, vector<32x250xf32>
    %c0_170 = arith.constant 0 : index
    %c120_171 = arith.constant 120 : index
    %179 = vector.load %arg13[%c0_170, %c120_171] : memref<32x512xf32, #tpu.memory_space<vmem>>, vector<32x250xf32>
    %c0_172 = arith.constant 0 : index
    %c121_173 = arith.constant 121 : index
    %180 = vector.load %arg13[%c0_172, %c121_173] : memref<32x512xf32, #tpu.memory_space<vmem>>, vector<32x250xf32>
    %c0_174 = arith.constant 0 : index
    %c122_175 = arith.constant 122 : index
    %181 = vector.load %arg13[%c0_174, %c122_175] : memref<32x512xf32, #tpu.memory_space<vmem>>, vector<32x250xf32>
    %c0_176 = arith.constant 0 : index
    %c123_177 = arith.constant 123 : index
    %182 = vector.load %arg13[%c0_176, %c123_177] : memref<32x512xf32, #tpu.memory_space<vmem>>, vector<32x250xf32>
    %c0_178 = arith.constant 0 : index
    %c124_179 = arith.constant 124 : index
    %183 = vector.load %arg13[%c0_178, %c124_179] : memref<32x512xf32, #tpu.memory_space<vmem>>, vector<32x250xf32>
    %c0_180 = arith.constant 0 : index
    %c125_181 = arith.constant 125 : index
    %184 = vector.load %arg13[%c0_180, %c125_181] : memref<32x512xf32, #tpu.memory_space<vmem>>, vector<32x250xf32>
    %c0_182 = arith.constant 0 : index
    %c126_183 = arith.constant 126 : index
    %185 = vector.load %arg13[%c0_182, %c126_183] : memref<32x512xf32, #tpu.memory_space<vmem>>, vector<32x250xf32>
    %c0_184 = arith.constant 0 : index
    %c127_185 = arith.constant 127 : index
    %186 = vector.load %arg13[%c0_184, %c127_185] : memref<32x512xf32, #tpu.memory_space<vmem>>, vector<32x250xf32>
    %c0_186 = arith.constant 0 : index
    %c128_187 = arith.constant 128 : index
    %187 = vector.load %arg13[%c0_186, %c128_187] : memref<32x512xf32, #tpu.memory_space<vmem>>, vector<32x250xf32>
    %c0_188 = arith.constant 0 : index
    %c129_189 = arith.constant 129 : index
    %188 = vector.load %arg13[%c0_188, %c129_189] : memref<32x512xf32, #tpu.memory_space<vmem>>, vector<32x250xf32>
    %c0_190 = arith.constant 0 : index
    %c130_191 = arith.constant 130 : index
    %189 = vector.load %arg13[%c0_190, %c130_191] : memref<32x512xf32, #tpu.memory_space<vmem>>, vector<32x250xf32>
    %c0_192 = arith.constant 0 : index
    %c131_193 = arith.constant 131 : index
    %190 = vector.load %arg13[%c0_192, %c131_193] : memref<32x512xf32, #tpu.memory_space<vmem>>, vector<32x250xf32>
    %c0_194 = arith.constant 0 : index
    %c132_195 = arith.constant 132 : index
    %191 = vector.load %arg13[%c0_194, %c132_195] : memref<32x512xf32, #tpu.memory_space<vmem>>, vector<32x250xf32>
    %c0_196 = arith.constant 0 : index
    %c133_197 = arith.constant 133 : index
    %192 = vector.load %arg13[%c0_196, %c133_197] : memref<32x512xf32, #tpu.memory_space<vmem>>, vector<32x250xf32>
    %c0_198 = arith.constant 0 : index
    %c134_199 = arith.constant 134 : index
    %193 = vector.load %arg13[%c0_198, %c134_199] : memref<32x512xf32, #tpu.memory_space<vmem>>, vector<32x250xf32>
    %c0_200 = arith.constant 0 : index
    %c135_201 = arith.constant 135 : index
    %194 = vector.load %arg13[%c0_200, %c135_201] : memref<32x512xf32, #tpu.memory_space<vmem>>, vector<32x250xf32>
    %c0_202 = arith.constant 0 : index
    %c136_203 = arith.constant 136 : index
    %195 = vector.load %arg13[%c0_202, %c136_203] : memref<32x512xf32, #tpu.memory_space<vmem>>, vector<32x250xf32>
    %c0_204 = arith.constant 0 : index
    %c137_205 = arith.constant 137 : index
    %196 = vector.load %arg13[%c0_204, %c137_205] : memref<32x512xf32, #tpu.memory_space<vmem>>, vector<32x250xf32>
    %c0_206 = arith.constant 0 : index
    %c138_207 = arith.constant 138 : index
    %197 = vector.load %arg13[%c0_206, %c138_207] : memref<32x512xf32, #tpu.memory_space<vmem>>, vector<32x250xf32>
    %c0_208 = arith.constant 0 : index
    %c139_209 = arith.constant 139 : index
    %198 = vector.load %arg13[%c0_208, %c139_209] : memref<32x512xf32, #tpu.memory_space<vmem>>, vector<32x250xf32>
    %c0_210 = arith.constant 0 : index
    %c140_211 = arith.constant 140 : index
    %199 = vector.load %arg13[%c0_210, %c140_211] : memref<32x512xf32, #tpu.memory_space<vmem>>, vector<32x250xf32>
    %c0_212 = arith.constant 0 : index
    %c141 = arith.constant 141 : index
    %200 = vector.load %arg13[%c0_212, %c141] : memref<32x512xf32, #tpu.memory_space<vmem>>, vector<32x250xf32>
    %c0_213 = arith.constant 0 : index
    %c142 = arith.constant 142 : index
    %201 = vector.load %arg13[%c0_213, %c142] : memref<32x512xf32, #tpu.memory_space<vmem>>, vector<32x250xf32>
    %c0_214 = arith.constant 0 : index
    %c143 = arith.constant 143 : index
    %202 = vector.load %arg13[%c0_214, %c143] : memref<32x512xf32, #tpu.memory_space<vmem>>, vector<32x250xf32>
    %203 = tpu.concatenate %178, %179, %180, %181, %182, %183, %184, %185, %186, %187, %188, %189, %190, %191, %192, %193 in 0 : vector<32x250xf32>, vector<32x250xf32>, vector<32x250xf32>, vector<32x250xf32>, vector<32x250xf32>, vector<32x250xf32>, vector<32x250xf32>, vector<32x250xf32>, vector<32x250xf32>, vector<32x250xf32>, vector<32x250xf32>, vector<32x250xf32>, vector<32x250xf32>, vector<32x250xf32>, vector<32x250xf32>, vector<32x250xf32> -> vector<512x250xf32>
    %204 = tpu.concatenate %194, %195, %196, %197, %198, %199, %200, %201, %202 in 0 : vector<32x250xf32>, vector<32x250xf32>, vector<32x250xf32>, vector<32x250xf32>, vector<32x250xf32>, vector<32x250xf32>, vector<32x250xf32>, vector<32x250xf32>, vector<32x250xf32> -> vector<288x250xf32>
    %205 = tpu.concatenate %203, %204 in 0 : vector<512x250xf32>, vector<288x250xf32> -> vector<800x250xf32>
    %c0_215 = arith.constant 0 : index
    %c0_216 = arith.constant 0 : index
    %206 = vector.load %arg6[%c0_215, %c0_216] : memref<8x800xf32, #tpu.memory_space<vmem>>, vector<8x800xf32>
    %cst_217 = arith.constant dense<0.000000e+00> : vector<8x250xf32>
    %207 = tpu.matmul %206, %205, %cst_217 {dimension_numbers = #tpu.dot_dimension_numbers<[1], [0], [0], [1], [0, 0, 1, 1], [], []>} : vector<8x800xf32>, vector<800x250xf32>, vector<8x250xf32> -> vector<8x250xf32>
    %c0_218 = arith.constant 0 : index
    %c0_219 = arith.constant 0 : index
    %208 = vector.load %arg7[%c0_218, %c0_219] : memref<8x1xf32, #tpu.memory_space<vmem>>, vector<8x1xf32>
    %209 = vector.broadcast %208 : vector<8x1xf32> to vector<8x250xf32>
    %210 = arith.addf %207, %209 : vector<8x250xf32>
    %c0_220 = arith.constant 0 : index
    %c0_221 = arith.constant 0 : index
    %c0_222 = arith.constant 0 : index
    %211 = vector.load %arg10[%c0_220, %c0_221, %c0_222] : memref<1x8x250xf32, #tpu.memory_space<vmem>>, vector<1x8x250xf32>
    %212 = vector.shape_cast %211 : vector<1x8x250xf32> to vector<8x250xf32>
    %213 = arith.addf %210, %212 : vector<8x250xf32>
    %c0_223 = arith.constant 0 : index
    %c0_224 = arith.constant 0 : index
    %c0_225 = arith.constant 0 : index
    %214 = vector.load %arg11[%c0_223, %c0_224, %c0_225] : memref<1x8x250xf32, #tpu.memory_space<vmem>>, vector<1x8x250xf32>
    %215 = vector.shape_cast %214 : vector<1x8x250xf32> to vector<8x250xf32>
    %216 = vector.shape_cast %213 : vector<8x250xf32> to vector<1x8x250xf32>
    tpu.vector_store %arg11[%c0_223, %c0_224, %c0_225], %216 {strides = array<i32>} : memref<1x8x250xf32, #tpu.memory_space<vmem>>, vector<1x8x250xf32>,
    %c0_226 = arith.constant 0 : index
    %c128_227 = arith.constant 128 : index
    %217 = vector.load %arg13[%c0_226, %c128_227] : memref<32x512xf32, #tpu.memory_space<vmem>>, vector<32x256xf32>
    %cst_228 = arith.constant dense<0.000000e+00> : vector<32xf32>
    %218 = vector.multi_reduction <add>, %217, %cst_228 [1] : vector<32x256xf32> to vector<32xf32>
    %219 = vector.shape_cast %218 : vector<32xf32> to vector<32x1xf32>
    %cst_229 = arith.constant 2.560000e+02 : f32
    %220 = vector.broadcast %cst_229 : f32 to vector<32x1xf32>
    %221 = arith.divf %219, %220 : vector<32x1xf32>
    %c0_230 = arith.constant 0 : index
    %c0_231 = arith.constant 0 : index
    %222 = vector.load %arg8[%c0_230, %c0_231] : memref<8x32xf32, #tpu.memory_space<vmem>>, vector<8x32xf32>
    %cst_232 = arith.constant dense<0.000000e+00> : vector<8x1xf32>
    %223 = tpu.matmul %222, %221, %cst_232 {dimension_numbers = #tpu.dot_dimension_numbers<[1], [0], [0], [1], [0, 0, 1, 1], [], []>} : vector<8x32xf32>, vector<32x1xf32>, vector<8x1xf32> -> vector<8x1xf32>
    %c0_233 = arith.constant 0 : index
    %c0_234 = arith.constant 0 : index
    %224 = vector.load %arg9[%c0_233, %c0_234] : memref<8x1xf32, #tpu.memory_space<vmem>>, vector<8x1xf32>
    %225 = arith.addf %223, %224 : vector<8x1xf32>
    %c0_235 = arith.constant 0 : index
    %c0_236 = arith.constant 0 : index
    %c0_237 = arith.constant 0 : index
    %226 = vector.load %arg12[%c0_235, %c0_236, %c0_237] : memref<1x8x1xf32, #tpu.memory_space<vmem>>, vector<1x8x1xf32>
    %227 = vector.shape_cast %226 : vector<1x8x1xf32> to vector<8x1xf32>
    %228 = vector.shape_cast %225 : vector<8x1xf32> to vector<1x8x1xf32>
    tpu.vector_store %arg12[%c0_235, %c0_236, %c0_237], %228 {strides = array<i32>} : memref<1x8x1xf32, #tpu.memory_space<vmem>>, vector<1x8x1xf32>,
    return
  }
  func.func @transform_0(%arg0: i32) -> (i32, i32, i32) {
    %c0_i32 = arith.constant 0 : i32
    %c0_i32_0 = arith.constant 0 : i32
    %c0_i32_1 = arith.constant 0 : i32
    return %arg0, %c0_i32, %c0_i32_0 : i32, i32, i32
  }
  func.func @transform_1(%arg0: i32) -> (i32, i32) {
    %c0_i32 = arith.constant 0 : i32
    %c0_i32_0 = arith.constant 0 : i32
    %c0_i32_1 = arith.constant 0 : i32
    return %c0_i32, %c0_i32_0 : i32, i32
  }
  func.func @transform_2(%arg0: i32) -> (i32, i32) {
    %c0_i32 = arith.constant 0 : i32
    %c0_i32_0 = arith.constant 0 : i32
    %c0_i32_1 = arith.constant 0 : i32
    return %c0_i32, %c0_i32_0 : i32, i32
  }
  func.func @transform_3(%arg0: i32) -> (i32, i32, i32) {
    %c0_i32 = arith.constant 0 : i32
    %c0_i32_0 = arith.constant 0 : i32
    %c0_i32_1 = arith.constant 0 : i32
    %c0_i32_2 = arith.constant 0 : i32
    return %c0_i32, %c0_i32_0, %c0_i32_1 : i32, i32, i32
  }
  func.func @transform_4(%arg0: i32) -> (i32, i32, i32) {
    %c0_i32 = arith.constant 0 : i32
    %c0_i32_0 = arith.constant 0 : i32
    %c0_i32_1 = arith.constant 0 : i32
    %c0_i32_2 = arith.constant 0 : i32
    return %c0_i32, %c0_i32_0, %c0_i32_1 : i32, i32, i32
  }
  func.func @transform_5(%arg0: i32) -> (i32, i32) {
    %c0_i32 = arith.constant 0 : i32
    %c0_i32_0 = arith.constant 0 : i32
    %c0_i32_1 = arith.constant 0 : i32
    return %c0_i32, %c0_i32_0 : i32, i32
  }
  func.func @transform_6(%arg0: i32) -> (i32, i32) {
    %c0_i32 = arith.constant 0 : i32
    %c0_i32_0 = arith.constant 0 : i32
    %c0_i32_1 = arith.constant 0 : i32
    return %c0_i32, %c0_i32_0 : i32, i32
  }
  func.func @transform_7(%arg0: i32) -> (i32, i32) {
    %c0_i32 = arith.constant 0 : i32
    %c0_i32_0 = arith.constant 0 : i32
    %c0_i32_1 = arith.constant 0 : i32
    return %c0_i32, %c0_i32_0 : i32, i32
  }
  func.func @transform_8(%arg0: i32) -> (i32, i32) {
    %c0_i32 = arith.constant 0 : i32
    %c0_i32_0 = arith.constant 0 : i32
    %c0_i32_1 = arith.constant 0 : i32
    return %c0_i32, %c0_i32_0 : i32, i32
  }
  func.func @transform_9(%arg0: i32) -> (i32, i32, i32) {
    %c0_i32 = arith.constant 0 : i32
    %c0_i32_0 = arith.constant 0 : i32
    %c0_i32_1 = arith.constant 0 : i32
    return %arg0, %c0_i32, %c0_i32_0 : i32, i32, i32
  }
  func.func @transform_10(%arg0: i32) -> (i32, i32, i32) {
    %c0_i32 = arith.constant 0 : i32
    %c0_i32_0 = arith.constant 0 : i32
    %c0_i32_1 = arith.constant 0 : i32
    return %arg0, %c0_i32, %c0_i32_0 : i32, i32, i32
  }
  func.func @transform_11(%arg0: i32) -> (i32, i32, i32) {
    %c0_i32 = arith.constant 0 : i32
    %c0_i32_0 = arith.constant 0 : i32
    %c0_i32_1 = arith.constant 0 : i32
    return %arg0, %c0_i32, %c0_i32_0 : i32, i32, i32
  }
}

</mosaic_0001>

<bundles_post_ra>
// kernel: bpnet_rep_forward.1
= control target key start
LH: loop header
LB: loop body
LE: loop exit
PB: predicated region body
PF: predicated region fallthrough
CT: control target
= control target key end

     0   :  { %s11496_s0 = inlined_call_operand.vmem [shape: f32[2,4,256], index: 0, kind: input, shape index: {}]   ;;  %s11497_s1 = inlined_call_operand.vmem [shape: f32[32,100], index: 1, kind: input, shape index: {}]   ;;  %s11498_s2 = inlined_call_operand.vmem [shape: f32[32,1], index: 2, kind: input, shape index: {}]   ;;  %s11499_s3 = inlined_call_operand.vmem [shape: f32[9,32,96], index: 3, kind: input, shape index: {}]   ;;  %s11500_s4 = inlined_call_operand.vmem [shape: f32[9,32,1], index: 4, kind: input, shape index: {}]   ;;  %s11501_s5 = inlined_call_operand.vmem [shape: f32[8,800], index: 5, kind: input, shape index: {}]   ;;  %s11502_s6 = inlined_call_operand.vmem [shape: f32[8,1], index: 6, kind: input, shape index: {}]   ;;  %s11503_s7 = inlined_call_operand.vmem [shape: f32[8,32], index: 7, kind: input, shape index: {}]   ;;  %s11504_s8 = inlined_call_operand.vmem [shape: f32[8,1], index: 8, kind: input, shape index: {}]   ;;  %s11505_s9 = inlined_call_operand.vmem [shape: f32[2,8,250], index: 9, kind: input, shape index: {}]   ;;  %s11506_s10 = inlined_call_operand.hbm [shape: f32[2,8,250], index: 10, kind: output, shape index: {0}]   ;;  %s11507_s11 = inlined_call_operand.vmem [shape: f32[2,8,1], index: 11, kind: output, shape index: {1}]  }
   0x1   :  { %11811 = sst [smem:[#allocation210_spill]] %s11496_s0 }
   0x2   :  { %11812 = sst [smem:[#allocation211_spill]] %s11497_s1 }
   0x3   :  { %11813 = sst [smem:[#allocation212_spill]] %s11498_s2 }
   0x4   :  { %11814 = sst [smem:[#allocation213_spill]] %s11499_s3 }
   0x5   :  { %17 = vsyncpa [#allocation5], 0 }
   0x6   :  { %19 = vsyncpa [#allocation5 + $0x1], 0  ;;  %s6548_s17 = smov 0   ;;  %s6550_s18 = smov 0  }
   0x7   :  { %s6552_s19 = smov 0   ;;  %s6554_s20 = smov 0  }
   0x8 LB: > { %11815 = sst [smem:[#allocation7_spill]] %s6453_s19  ;;  %s6569_s21 = sadd.s32 4294967295, %s6457_s20   ;;  %s6457_s20 = sphi %s6554_s20, %s12639_s20   ;;  %s6453_s19 = sphi %s6552_s19, %s12641_s19   ;;  %s6449_s18 = sphi %s6550_s18, %s12643_s18   ;;  %s6445_s17 = sphi %s6548_s17, %s12642_s17  }
   0x9   : > { %s5820_s22 = sadd.s32 4294967294, %s6457_s20   ;;  %s6573_s23 = sadd.s32 1, %s6457_s20  }
   0xa   : > { %11816 = sst [smem:[#allocation8_spill]] %s6573_s23  ;;  %s252_s24 = sadd.s32 1, %s6453_s19 }
   0xb   : > { %s249_s25 = ssub.s32 %s6457_s20, %s6573_s23  ;;  %p262_p0 = scmp.ne.s32.totalorder %s6453_s19, %s6449_s18 }
   0xc   : > { %p250_p1 = scmp.eq.s32.totalorder %s249_s25, 0  ;;  %p263_p2 = scmp.eq.s32.totalorder %s6569_s21, 1 }
   0xd   : > { %p268_p3 = scmp.ne.s32.totalorder %s6449_s18, %s6445_s17  ;;  %p269_p4 = scmp.eq.s32.totalorder %s5820_s22, 1 }
   0xe   : > { %s6584_s26 = scalar_select %p250_p1, %s6453_s19, %s252_s24  }
   0xf   : > { %p6586_p5 = por %p263_p2, %p262_p0  ;;  %p6590_p6 = por %p269_p4, %p268_p3 }
  0x10   : > { %11817 = sst [smem:[#allocation9_spill]] %s6584_s26  ;;  %p5823_p7 = scmp.ge.s32.totalorder %s6457_s20, 1 }
  0x11   : > { %s11819_s28 = scalar_select %p6590_p6, 1, 0 }
  0x12   : > { %p353_p8 = scmp.lt.s32.totalorder %s6457_s20, 3 }
  0x13   : > { %11820 = sst [smem:[#allocation10_spill]] %s11819_s28 }
  0x14   : > { %p354_p9 = pnand %p5823_p7, %p353_p8 }
  0x16   : > { %357 = sbr.rel (%p354_p9) target bundleno = 5071 (0x13cf), region = 60 }
  0x1b   : > { %v11549_v0 = vmov 0.0   ;;  %p402_p10 = scmp.lt.s32.totalorder %s6569_s21, 1  ;;  %s11821_s0 = sld [smem:[#allocation210_spill]]  ;;  %vm623_vm0 = vcmask 1043456   ;;  %vm445_vm1 = vcmask 1039360   ;;  %vm529_vm2 = vcmask 982016  }
  0x1c   : > { %425 = vst [vmem:[#allocation3 + $0xc] sm:$0xf] %v11549_v0  ;;  %424 = vst [vmem:[#allocation3] sm:$0xf] %v11549_v0  ;;  %1061 = vmatprep.mubr.f32.mxu0 %v11549_v0  ;;  %1620 = vmatprep.mubr.f32.mxu1 %v11549_v0  ;;  %s11538_s15 = smov 120   ;;  %s11529_s16 = smov 121  }
  0x1d   : > { %s6602_s29 = scalar_select %p402_p10, %s6569_s21, 1  ;;  %vm505_vm3 = vcmask 998400   ;;  %vm517_vm4 = vcmask 990208   ;;  %vm493_vm5 = vcmask 1006592   ;;  %vm481_vm6 = vcmask 1014784  }
  0x1e   : > { %s11532_s22 = smov 122   ;;  %s11540_s24 = smov 124   ;;  %vm457_vm7 = vcmask 1031168   ;;  %vm469_vm8 = vcmask 1022976   ;;  %vm11543_vm9 = vcmask 932864   ;;  %vm11593_vm10 = vcmask 924672  }
  0x1f   : > { %s11508_s30 = sshll.u32 %s6602_s29, 3  ;;  %s11534_s25 = smov 123   ;;  %vm577_vm11 = vcmask 949248   ;;  %vm11531_vm12 = vcmask 941056   ;;  %vm541_vm13 = vcmask 973824   ;;  %vm553_vm14 = vcmask 965632  }
  0x20   : > { %s11509_s12 = smov 126   ;;  %s11511_s13 = smov 125   ;;  %vm565_vm15 = vcmask 957440  }
  0x21   : > { %s406_s14 = scalar_lea.vmem %s11821_s0, %s11508_s30  ;;  %s11517_s30 = smov 114  }
  0x22   : > { %v6610_v1 = vld [vmem:[%s406_s14] sm:$0xff]  ;;  %s11513_s14 = smov 127   ;;  %s11825_s2 = sld [smem:[#allocation212_spill]] }
  0x23   : > { %v6612_v2 = vld [vmem:[#allocation3 + $0xc] sm:$0xf]  ;;  %427 = vst [vmem:[#allocation3 + $0x4] sm:$0xff] %v6610_v1  ;;  %v6626_v4 = vcombine.high %v6610_v1, %v6610_v1  ;;  %v584_v5 = vcombine.low %v6610_v1, %v6610_v1  ;;  %s11826_s1 = sld [smem:[#allocation211_spill]]  ;;  %s6483_s23 = smov 32  }
  0x24   : > { %730 = vrot.lane.b32.xlu1 %v6612_v2, %s11538_s15  ;;  %v585_v3 = vcombine.low %v6612_v2, %v6612_v2  ;;  %s11827_s3 = sld [smem:[#allocation213_spill]]  ;;  %s11832_s0 = smov 122  }
  0x25   : > { %s11833_s19 = smov 121   ;;  %s11885_s26 = smov 119  }
  0x26   : > { %719 = vrot.lane.b32.xlu0 %v585_v3, %s11529_s16  ;;  %s11889_s28 = smov 115  }
  0x28   : > { %708 = vrot.lane.b32.xlu1 %v6612_v2, %s11532_s22 }
  0x2a   : > { %726 = vrot.lane.b32.xlu0 %v6610_v1, %s11538_s15  ;;  %v6677_v6 = vld [vmem:[#allocation3] sm:$0xff]  ;;  %v6687_v8 = vld [vmem:[#allocation3 + $0x8] sm:$0xf] }
  0x2b   : > { %v6684_v7 = vcombine.high %v6677_v6, %v6677_v6  ;;  %v6695_v9 = vcombine.low %v6687_v8, %v6687_v8  ;;  %v6703_v10 = vcombine.low %v6677_v6, %v6677_v6 }
  0x2c   : > { %704 = vrot.lane.b32.xlu1 %v6610_v1, %s11532_s22 }
  0x2e   : > { %728 = vrot.lane.b32.xlu0 %v6626_v4, %s11538_s15 }
  0x30   : > { %717 = vrot.lane.b32.xlu1 %v6610_v1, %s11529_s16 }
  0x32   : > { %706 = vrot.lane.b32.xlu0 %v6626_v4, %s11532_s22 }
  0x34   : > { %682 = vrot.lane.b32.xlu1 %v6610_v1, %s11540_s24 }
  0x36   : > { %715 = vrot.lane.b32.xlu0 %v584_v5, %s11529_s16 }
  0x38   : > { %686 = vrot.lane.b32.xlu1 %v6612_v2, %s11540_s24 }
  0x3a   : > { %684 = vrot.lane.b32.xlu0 %v6626_v4, %s11540_s24 }
  0x3c   : > { %695 = vrot.lane.b32.xlu1 %v6610_v1, %s11534_s25 }
  0x3e   : > { %693 = vrot.lane.b32.xlu0 %v584_v5, %s11534_s25 }
  0x40   : > { %660 = vrot.lane.b32.xlu1 %v6610_v1, %s11509_s12 }
  0x42   : > { %697 = vrot.lane.b32.xlu0 %v585_v3, %s11534_s25 }
  0x44   : > { %664 = vrot.lane.b32.xlu1 %v6612_v2, %s11509_s12 }
  0x46   : > { %662 = vrot.lane.b32.xlu0 %v6626_v4, %s11509_s12  ;;  %s11515_s12 = smov 113  }
  0x48   : > { %673 = vrot.lane.b32.xlu1 %v6610_v1, %s11511_s13 }
  0x4a   : > { %671 = vrot.lane.b32.xlu0 %v584_v5, %s11511_s13 }
  0x4c   : > { %649 = vrot.lane.b32.xlu1 %v584_v5, %s11513_s14 }
  0x4e   : > { %675 = vrot.lane.b32.xlu0 %v585_v3, %s11511_s13  ;;  %s11521_s13 = smov 116  }
  0x50   : > { %653 = vrot.lane.b32.xlu1 %v585_v3, %s11513_s14 }
  0x52   : > { %651 = vrot.lane.b32.xlu0 %v6610_v1, %s11513_s14  ;;  %s11519_s14 = smov 115  }
  0x54   : > { %599 = vrot.lane.b32.xlu1 %v6610_v1, %s11517_s30 }
  0x56   : > { %601 = vrot.lane.b32.xlu0 %v6626_v4, %s11517_s30 }
  0x58   : > { %603 = vrot.lane.b32.xlu1 %v6612_v2, %s11517_s30  ;;  %s11523_s30 = smov 117  }
  0x5a   : > { %611 = vrot.lane.b32.xlu0 %v584_v5, %s11515_s12 }
  0x5c   : > { %613 = vrot.lane.b32.xlu1 %v6610_v1, %s11515_s12 }
  0x5e   : > { %615 = vrot.lane.b32.xlu0 %v585_v3, %s11515_s12  ;;  %s11525_s12 = smov 118  }
  0x60   : > { %573 = vrot.lane.b32.xlu1 %v6610_v1, %s11521_s13 }
  0x62   : > { %575 = vrot.lane.b32.xlu0 %v6626_v4, %s11521_s13  ;;  %s11536_s13 = smov 112  }
  0x64   : > { %586 = vrot.lane.b32.xlu1 %v584_v5, %s11519_s14 }
  0x66   : > { %588 = vrot.lane.b32.xlu0 %v6610_v1, %s11519_s14 }
  0x68   : > { %590 = vrot.lane.b32.xlu1 %v585_v3, %s11519_s14  ;;  %s11527_s14 = smov 119  }
  0x6a   : > { %549 = vrot.lane.b32.xlu0 %v6684_v7, %s11525_s12 }
  0x6c   : > { %551 = vrot.lane.b32.xlu1 %v6687_v8, %s11525_s12 }
  0x6e   : > { %561 = vrot.lane.b32.xlu0 %v6677_v6, %s11523_s30 }
  0x70   : > { %563 = vrot.lane.b32.xlu1 %v6695_v9, %s11523_s30 }
  0x72   : > { %547 = vrot.lane.b32.xlu0 %v6677_v6, %s11525_s12  ;;  %s11823_s12 = smov 125  }
  0x74   : > { %559 = vrot.lane.b32.xlu1 %v6703_v10, %s11523_s30  ;;  %s11822_s30 = smov 126  }
  0x76   : > { %525 = vrot.lane.b32.xlu0 %v6684_v7, %s11538_s15 }
  0x78   : > { %527 = vrot.lane.b32.xlu1 %v6687_v8, %s11538_s15 }
  0x7a   : > { %537 = vrot.lane.b32.xlu0 %v6677_v6, %s11527_s14 }
  0x7c   : > { %539 = vrot.lane.b32.xlu1 %v6695_v9, %s11527_s14 }
  0x7e   : > { %523 = vrot.lane.b32.xlu0 %v6677_v6, %s11538_s15  ;;  %s11610_s15 = smov 9  }
  0x80   : > { %535 = vrot.lane.b32.xlu1 %v6703_v10, %s11527_s14  ;;  %s11824_s14 = smov 127  }
  0x82   : > { %501 = vrot.lane.b32.xlu0 %v6684_v7, %s11532_s22 }
  0x84   : > { %503 = vrot.lane.b32.xlu1 %v6687_v8, %s11532_s22 }
  0x86   : > { %513 = vrot.lane.b32.xlu0 %v6677_v6, %s11529_s16 }
  0x88   : > { %515 = vrot.lane.b32.xlu1 %v6695_v9, %s11529_s16 }
  0x8a   : > { %499 = vrot.lane.b32.xlu0 %v6677_v6, %s11532_s22  ;;  %s11830_s22 = smov 112  }
  0x8c   : > { %511 = vrot.lane.b32.xlu1 %v6703_v10, %s11529_s16  ;;  %s6476_s16 = smov 12  }
  0x96   : > { %v731_v11 = vpop.permute.xlu1 %730 }
  0x97   : > { %786 = vrot.lane.b32.xlu0 %v731_v11, %s11536_s13 }
  0x98   : > { %v720_v12 = vpop.permute.xlu0 %719 }
  0x9a   : > { %v709_v13 = vpop.permute.xlu1 %708 }
  0x9b   : > { %v745_v14 = vsel %vm623_vm0, %v709_v13, %v720_v12 }
  0x9c   : > { %v727_v15 = vpop.permute.xlu0 %726  ;;  %780 = vrot.lane.b32.xlu1 %v745_v14, %s11536_s13 }
  0x9e   : > { %v705_v16 = vpop.permute.xlu1 %704 }
  0xa0   : > { %v729_v17 = vpop.permute.xlu0 %728 }
  0xa1   : > { %v732_v42 = vsel %vm529_vm2, %v727_v15, %v729_v17  ;;  %v733_v46 = vsel %vm529_vm2, %v729_v17, %v731_v11 }
  0xa2   : > { %v718_v18 = vpop.permute.xlu1 %717 }
  0xa3   : > { %v722_v45 = vsel %vm517_vm4, %v718_v18, %v720_v12 }
  0xa4   : > { %v707_v19 = vpop.permute.xlu0 %706 }
  0xa5   : > { %v711_v43 = vsel %vm505_vm3, %v707_v19, %v709_v13  ;;  %v710_v52 = vsel %vm505_vm3, %v705_v16, %v707_v19 }
  0xa6   : > { %v683_v20 = vpop.permute.xlu1 %682  ;;  %v744_v49 = vsel %vm623_vm0, %v711_v43, %v722_v45 }
  0xa8   : > { %v716_v21 = vpop.permute.xlu0 %715 }
  0xa9   : > { %v721_v48 = vsel %vm517_vm4, %v716_v21, %v718_v18 }
  0xaa   : > { %v687_v22 = vpop.permute.xlu1 %686  ;;  %v743_v54 = vsel %vm623_vm0, %v710_v52, %v721_v48 }
  0xac   : > { %v685_v23 = vpop.permute.xlu0 %684 }
  0xad   : > { %v688_v53 = vsel %vm481_vm6, %v683_v20, %v685_v23  ;;  %v689_v59 = vsel %vm481_vm6, %v685_v23, %v687_v22 }
  0xae   : > { %v696_v24 = vpop.permute.xlu1 %695 }
  0xb0   : > { %v694_v25 = vpop.permute.xlu0 %693 }
  0xb1   : > { %v699_v50 = vsel %vm493_vm5, %v694_v25, %v696_v24 }
  0xb2   : > { %v661_v26 = vpop.permute.xlu1 %660  ;;  %v740_v57 = vsel %vm623_vm0, %v688_v53, %v699_v50 }
  0xb4   : > { %v698_v27 = vpop.permute.xlu0 %697 }
  0xb5   : > { %v742_v28 = vsel %vm623_vm0, %v687_v22, %v698_v27  ;;  %v700_v56 = vsel %vm493_vm5, %v696_v24, %v698_v27 }
  0xb6   : > { %v665_v29 = vpop.permute.xlu1 %664  ;;  %774 = vrot.lane.b32.xlu0 %v742_v28, %s11536_s13  ;;  %v741_v62 = vsel %vm623_vm0, %v689_v59, %v700_v56 }
  0xb8   : > { %v663_v30 = vpop.permute.xlu0 %662 }
  0xb9   : > { %v667_v61 = vsel %vm457_vm7, %v663_v30, %v665_v29  ;;  %v666_v5 = vsel %vm457_vm7, %v661_v26, %v663_v30 }
  0xba   : > { %v674_v31 = vpop.permute.xlu1 %673 }
  0xbc   : > { %v672_v32 = vpop.permute.xlu0 %671 }
  0xbe   : > { %v650_v33 = vpop.permute.xlu1 %649 }
  0xc0   : > { %v676_v34 = vpop.permute.xlu0 %675 }
  0xc1   : > { %v739_v35 = vsel %vm623_vm0, %v665_v29, %v676_v34  ;;  %v678_v58 = vsel %vm469_vm8, %v674_v31, %v676_v34 }
  0xc2   : > { %v654_v36 = vpop.permute.xlu1 %653  ;;  %768 = vrot.lane.b32.xlu1 %v739_v35, %s11536_s13  ;;  %v738_v3 = vsel %vm623_vm0, %v667_v61, %v678_v58 }
  0xc3   : > { %v736_v37 = vsel %vm623_vm0, %v6612_v2, %v654_v36  ;;  %v677_v2 = vsel %vm469_vm8, %v672_v32, %v674_v31 }
  0xc4   : > { %v652_v38 = vpop.permute.xlu0 %651  ;;  %762 = vrot.lane.b32.xlu0 %v736_v37, %s11536_s13  ;;  %v737_v11 = vsel %vm623_vm0, %v666_v5, %v677_v2 }
  0xc5   : > { %v656_v39 = vsel %vm445_vm1, %v652_v38, %v654_v36 }
  0xc6   : > { %v735_v40 = vsel %vm623_vm0, %v6626_v4, %v656_v39  ;;  %v6746_v41 = vpop.permute.xlu1 %599  ;;  %v655_v4 = vsel %vm445_vm1, %v650_v33, %v652_v38 }
  0xc7   : > { %760 = vrot.lane.b32.xlu1 %v735_v40, %s11536_s13  ;;  %v734_v13 = vsel %vm623_vm0, %v6610_v1, %v655_v4 }
  0xc8   : > { %782 = vrot.lane.b32.xlu0 %v732_v42, %s11536_s13  ;;  %v6752_v44 = vpop.permute.xlu0 %601 }
  0xc9   : > { %v606_v29 = vsel %vm11543_vm9, %v6746_v41, %v6752_v44 }
  0xca   : > { %v604_v47 = vpop.permute.xlu1 %603 }
  0xcb   : > { %784 = vrot.lane.b32.xlu1 %v733_v46, %s11536_s13  ;;  %v607_v22 = vsel %vm11543_vm9, %v6752_v44, %v604_v47  ;;  %vm929_vm9 = vcmask 97280  }
  0xcc   : > { %778 = vrot.lane.b32.xlu0 %v744_v49, %s11536_s13  ;;  %v6761_v51 = vpop.permute.xlu0 %611 }
  0xce   : > { %v614_v55 = vpop.permute.xlu1 %613 }
  0xcf   : > { %776 = vrot.lane.b32.xlu1 %v743_v54, %s11536_s13 }
  0xd0   : > { %770 = vrot.lane.b32.xlu0 %v740_v57, %s11536_s13  ;;  %v616_v60 = vpop.permute.xlu0 %615 }
  0xd1   : > { %v619_v23 = vsel %vm11593_vm10, %v614_v55, %v616_v60 }
  0xd2   : > { %v574_v63 = vpop.permute.xlu1 %573  ;;  %v647_v25 = vsel %vm623_vm0, %v607_v22, %v619_v23 }
  0xd3   : > { %772 = vrot.lane.b32.xlu1 %v741_v62, %s11536_s13 }
  0xd4   : > { %766 = vrot.lane.b32.xlu0 %v738_v3, %s11536_s13  ;;  %v576_v14 = vpop.permute.xlu0 %575 }
  0xd5   : > { %v578_v26 = vsel %vm577_vm11, %v574_v63, %v576_v14 }
  0xd6   : > { %v587_v12 = vpop.permute.xlu1 %586 }
  0xd7   : > { %764 = vrot.lane.b32.xlu1 %v737_v11, %s11536_s13  ;;  %v642_v34 = vsel %vm623_vm0, %v574_v63, %v587_v12 }
  0xd8   : > { %758 = vrot.lane.b32.xlu0 %v734_v13, %s11536_s13  ;;  %v589_v16 = vpop.permute.xlu0 %588  ;;  %s6478_s13 = smov 2  }
  0xd9   : > { %v593_v27 = vsel %vm11531_vm12, %v587_v12, %v589_v16 }
  0xda   : > { %v591_v15 = vpop.permute.xlu1 %590  ;;  %v643_v30 = vsel %vm623_vm0, %v578_v26, %v593_v27 }
  0xdb   : > { %479 = vrot.lane.b32.xlu1 %v6687_v8, %s11540_s24  ;;  %v594_v35 = vsel %vm11531_vm12, %v589_v16, %v591_v15  ;;  %vm788_vm12 = vcmask 916480  }
  0xdc   : > { %477 = vrot.lane.b32.xlu0 %v6684_v7, %s11540_s24  ;;  %v550_v1 = vpop.permute.xlu0 %549  ;;  %v644_v42 = vsel %vm623_vm0, %v576_v14, %v594_v35 }
  0xde   : > { %v552_v17 = vpop.permute.xlu1 %551 }
  0xdf   : > { %491 = vrot.lane.b32.xlu1 %v6695_v9, %s11534_s25  ;;  %v555_v43 = vsel %vm553_vm14, %v550_v1, %v552_v17 }
  0xe0   : > { %489 = vrot.lane.b32.xlu0 %v6677_v6, %s11534_s25  ;;  %v562_v19 = vpop.permute.xlu0 %561 }
  0xe2   : > { %v564_v18 = vpop.permute.xlu1 %563 }
  0xe3   : > { %487 = vrot.lane.b32.xlu1 %v6703_v10, %s11534_s25  ;;  %v641_v37 = vsel %vm623_vm0, %v552_v17, %v564_v18  ;;  %v567_v44 = vsel %vm565_vm15, %v562_v19, %v564_v18  ;;  %s11828_s25 = smov 124  }
  0xe4   : > { %475 = vrot.lane.b32.xlu0 %v6677_v6, %s11540_s24  ;;  %v548_v21 = vpop.permute.xlu0 %547  ;;  %v640_v48 = vsel %vm623_vm0, %v555_v43, %v567_v44  ;;  %s11829_s24 = smov 120  }
  0xe5   : > { %v554_v49 = vsel %vm553_vm14, %v548_v21, %v550_v1 }
  0xe6   : > { %v560_v20 = vpop.permute.xlu1 %559 }
  0xe7   : > { %455 = vrot.lane.b32.xlu1 %v6687_v8, %s11822_s30  ;;  %v566_v50 = vsel %vm565_vm15, %v560_v20, %v562_v19 }
  0xe8   : > { %453 = vrot.lane.b32.xlu0 %v6684_v7, %s11822_s30  ;;  %v526_v28 = vpop.permute.xlu0 %525  ;;  %v639_v53 = vsel %vm623_vm0, %v554_v49, %v566_v50 }
  0xea   : > { %v528_v24 = vpop.permute.xlu1 %527 }
  0xeb   : > { %467 = vrot.lane.b32.xlu1 %v6695_v9, %s11823_s12  ;;  %v531_v38 = vsel %vm529_vm2, %v526_v28, %v528_v24 }
  0xec   : > { %465 = vrot.lane.b32.xlu0 %v6677_v6, %s11823_s12  ;;  %v538_v32 = vpop.permute.xlu0 %537 }
  0xee   : > { %v540_v31 = vpop.permute.xlu1 %539 }
  0xef   : > { %463 = vrot.lane.b32.xlu1 %v6703_v10, %s11823_s12  ;;  %v543_v40 = vsel %vm541_vm13, %v538_v32, %v540_v31  ;;  %v638_v57 = vsel %vm623_vm0, %v528_v24, %v540_v31 }
  0xf0   : > { %451 = vrot.lane.b32.xlu0 %v6677_v6, %s11822_s30  ;;  %v524_v39 = vpop.permute.xlu0 %523 }
  0xf1   : > { %v530_v45 = vsel %vm529_vm2, %v524_v39, %v526_v28 }
  0xf2   : > { %v536_v36 = vpop.permute.xlu1 %535 }
  0xf3   : > { %443 = vrot.lane.b32.xlu1 %v6695_v9, %s11824_s14  ;;  %v618_v9 = vsel %vm11593_vm10, %v6761_v51, %v614_v55  ;;  %v542_v46 = vsel %vm541_vm13, %v536_v36, %v538_v32  ;;  %vm2581_vm10 = vcmask 523264  }
  0xf4   : > { %441 = vrot.lane.b32.xlu0 %v6677_v6, %s11824_s14  ;;  %v646_v33 = vsel %vm623_vm0, %v606_v29, %v618_v9  ;;  %v636_v52 = vsel %vm623_vm0, %v530_v45, %v542_v46 }
  0xf6   : > { %v504_v47 = vpop.permute.xlu1 %503 }
  0xf7   : > { %897 = vrot.lane.b32.xlu1 %v647_v25, %s6476_s16 }
  0xf8   : > { %439 = vrot.lane.b32.xlu0 %v6703_v10, %s11824_s14  ;;  %v645_v10 = vsel %vm623_vm0, %v6746_v41, %v6761_v51  ;;  %v637_v41 = vsel %vm623_vm0, %v531_v38, %v543_v40  ;;  %v502_v51 = vpop.permute.xlu0 %501 }
  0xf9   : > { %v507_v58 = vsel %vm505_vm3, %v502_v51, %v504_v47 }
  0xfa   : > { %v516_v54 = vpop.permute.xlu1 %515 }
  0xfb   : > { %889 = vrot.lane.b32.xlu1 %v643_v30, %s6476_s16  ;;  %v635_v55 = vsel %vm623_vm0, %v504_v47, %v516_v54 }
  0xfc   : > { %895 = vrot.lane.b32.xlu0 %v646_v33, %s6476_s16  ;;  %v514_v56 = vpop.permute.xlu0 %513 }
  0xfd   : > { %v519_v59 = vsel %vm517_vm4, %v514_v56, %v516_v54 }
  0xfe   : > { %v634_v60 = vsel %vm623_vm0, %v507_v58, %v519_v59  ;;  %v512_v62 = vpop.permute.xlu1 %511 }
  0xff   : > { %887 = vrot.lane.b32.xlu1 %v642_v34, %s6476_s16  ;;  %v518_v33 = vsel %vm517_vm4, %v512_v62, %v514_v56 }
 0x100   : > { %893 = vrot.lane.b32.xlu0 %v645_v10, %s6476_s16  ;;  %v500_v61 = vpop.permute.xlu0 %499 }
 0x101   : > { %v506_v32 = vsel %vm505_vm3, %v500_v61, %v502_v51 }
 0x102   : > { %v633_v10 = vsel %vm623_vm0, %v506_v32, %v518_v33 }
 0x103   : > { %885 = vrot.lane.b32.xlu1 %v641_v37, %s6476_s16 }
 0x104   : > { %891 = vrot.lane.b32.xlu0 %v644_v42, %s6476_s16 }
 0x107   : > { %877 = vrot.lane.b32.xlu1 %v637_v41, %s6476_s16 }
 0x108   : > { %883 = vrot.lane.b32.xlu0 %v640_v48, %s6476_s16 }
 0x109   : > { %v787_v63 = vpop.permute.xlu0 %786 }
 0x10b   : > { %875 = vrot.lane.b32.xlu1 %v636_v52, %s6476_s16 }
 0x10c   : > { %881 = vrot.lane.b32.xlu0 %v639_v53, %s6476_s16 }
 0x10e   : > { %v781_v2 = vpop.permute.xlu1 %780 }
 0x10f   : > { %873 = vrot.lane.b32.xlu1 %v635_v55, %s6476_s16 }
 0x110   : > { %879 = vrot.lane.b32.xlu0 %v638_v57, %s6476_s16 }
 0x114   : > { %871 = vrot.lane.b32.xlu0 %v634_v60, %s6476_s16 }
 0x128   : > { %v775_v3 = vpop.permute.xlu0 %774 }
 0x134   : > { %v769_v4 = vpop.permute.xlu1 %768 }
 0x136   : > { %v763_v5 = vpop.permute.xlu0 %762 }
 0x139   : > { %v761_v11 = vpop.permute.xlu1 %760 }
 0x13a   : > { %v783_v12 = vpop.permute.xlu0 %782  ;;  %v790_v13 = vsel %vm788_vm12, %v761_v11, %v763_v5 }
 0x13b   : > { %903 = vrot.lane.b32.xlu0 %v790_v13, %s6476_s16  ;;  %923 = vrot.lane.b32.xlu1 %v783_v12, %s6476_s16 }
 0x13d   : > { %v785_v14 = vpop.permute.xlu1 %784 }
 0x13e   : > { %v779_v15 = vpop.permute.xlu0 %778  ;;  %v798_v16 = vsel %vm788_vm12, %v785_v14, %v787_v63  ;;  %v797_v17 = vsel %vm788_vm12, %v783_v12, %v785_v14 }
 0x13f   : > { %927 = vrot.lane.b32.xlu0 %v798_v16, %s6476_s16  ;;  %925 = vrot.lane.b32.xlu1 %v797_v17, %s6476_s16  ;;  %v796_v26 = vsel %vm788_vm12, %v779_v15, %v781_v2 }
 0x141   : > { %v777_v1 = vpop.permute.xlu1 %776 }
 0x142   : > { %v771_v18 = vpop.permute.xlu0 %770  ;;  %v795_v24 = vsel %vm788_vm12, %v777_v1, %v779_v15 }
 0x143   : > { %917 = vrot.lane.b32.xlu0 %v777_v1, %s6476_s16  ;;  %911 = vrot.lane.b32.xlu1 %v771_v18, %s6476_s16 }
 0x145   : > { %v773_v19 = vpop.permute.xlu1 %772 }
 0x146   : > { %v767_v20 = vpop.permute.xlu0 %766  ;;  %v794_v28 = vsel %vm788_vm12, %v773_v19, %v775_v3  ;;  %v793_v9 = vsel %vm788_vm12, %v771_v18, %v773_v19  ;;  %v806_v3 = vld [vmem:[%s11825_s2 + $0x18] sm:$0xff] }
 0x147   : > { %v792_v35 = vsel %vm788_vm12, %v767_v20, %v769_v4  ;;  %v803_v4 = vld [vmem:[%s11825_s2] sm:$0xff] }
 0x149   : > { %v765_v21 = vpop.permute.xlu1 %764 }
 0x14a   : > { %905 = vrot.lane.b32.xlu0 %v765_v21, %s6476_s16  ;;  %v759_v22 = vpop.permute.xlu0 %758  ;;  %v791_v31 = vsel %vm788_vm12, %v765_v21, %v767_v20 }
 0x14b   : > { %899 = vrot.lane.b32.xlu1 %v759_v22, %s6476_s16  ;;  %v789_v38 = vsel %vm788_vm12, %v759_v22, %v761_v11 }
 0x14d   : > { %v480_v23 = vpop.permute.xlu1 %479 }
 0x14e   : > { %919 = vrot.lane.b32.xlu0 %v795_v24, %s6476_s16  ;;  %v478_v25 = vpop.permute.xlu0 %477 }
 0x14f   : > { %921 = vrot.lane.b32.xlu1 %v796_v26, %s6476_s16  ;;  %v483_v40 = vsel %vm481_vm6, %v478_v25, %v480_v23 }
 0x151   : > { %v492_v27 = vpop.permute.xlu1 %491 }
 0x152   : > { %915 = vrot.lane.b32.xlu0 %v794_v28, %s6476_s16  ;;  %v490_v29 = vpop.permute.xlu0 %489  ;;  %v632_v43 = vsel %vm623_vm0, %v480_v23, %v492_v27 }
 0x153   : > { %913 = vrot.lane.b32.xlu1 %v793_v9, %s6476_s16  ;;  %v495_v39 = vsel %vm493_vm5, %v490_v29, %v492_v27 }
 0x154   : > { %v631_v41 = vsel %vm623_vm0, %v483_v40, %v495_v39 }
 0x155   : > { %v488_v30 = vpop.permute.xlu1 %487 }
 0x156   : > { %907 = vrot.lane.b32.xlu0 %v791_v31, %s6476_s16  ;;  %v476_v34 = vpop.permute.xlu0 %475  ;;  %v494_v45 = vsel %vm493_vm5, %v488_v30, %v490_v29 }
 0x157   : > { %909 = vrot.lane.b32.xlu1 %v792_v35, %s6476_s16  ;;  %v482_v46 = vsel %vm481_vm6, %v476_v34, %v478_v25 }
 0x158   : > { %v630_v53 = vsel %vm623_vm0, %v482_v46, %v494_v45 }
 0x159   : > { %v456_v36 = vpop.permute.xlu1 %455 }
 0x15a   : > { %869 = vrot.lane.b32.xlu0 %v633_v10, %s6476_s16  ;;  %v454_v37 = vpop.permute.xlu0 %453 }
 0x15b   : > { %901 = vrot.lane.b32.xlu1 %v789_v38, %s6476_s16  ;;  %v459_v47 = vsel %vm457_vm7, %v454_v37, %v456_v36 }
 0x15d   : > { %v468_v42 = vpop.permute.xlu1 %467 }
 0x15e   : > { %867 = vrot.lane.b32.xlu0 %v632_v43, %s6476_s16  ;;  %v466_v44 = vpop.permute.xlu0 %465  ;;  %v629_v58 = vsel %vm623_vm0, %v456_v36, %v468_v42 }
 0x15f   : > { %v471_v48 = vsel %vm469_vm8, %v466_v44, %v468_v42  ;;  %865 = vrot.lane.b32.xlu1 %v631_v41, %s6476_s16 }
 0x160   : > { %v628_v49 = vsel %vm623_vm0, %v459_v47, %v471_v48 }
 0x161   : > { %v464_v50 = vpop.permute.xlu1 %463 }
 0x162   : > { %v470_v51 = vsel %vm469_vm8, %v464_v50, %v466_v44  ;;  %859 = vrot.lane.b32.xlu0 %v628_v49, %s6476_s16  ;;  %v452_v52 = vpop.permute.xlu0 %451 }
 0x163   : > { %v458_v54 = vsel %vm457_vm7, %v452_v52, %v454_v37  ;;  %863 = vrot.lane.b32.xlu1 %v630_v53, %s6476_s16 }
 0x164   : > { %v627_v55 = vsel %vm623_vm0, %v458_v54, %v470_v51 }
 0x165   : > { %v444_v56 = vpop.permute.xlu1 %443 }
 0x166   : > { %857 = vrot.lane.b32.xlu0 %v627_v55, %s6476_s16  ;;  %v442_v57 = vpop.permute.xlu0 %441  ;;  %v626_v60 = vsel %vm623_vm0, %v6687_v8, %v444_v56  ;;  %v6477_v8 = vmov 0  }
 0x167   : > { %v447_v59 = vsel %vm445_vm1, %v442_v57, %v444_v56  ;;  %861 = vrot.lane.b32.xlu1 %v629_v58, %s6476_s16  ;;  %6029 = vset.pattern.permute.xlu0 %v6477_v8 }
 0x168   : > { %v625_v61 = vsel %vm623_vm0, %v6684_v7, %v447_v59  ;;  %v805_v7 = vld [vmem:[%s11825_s2 + $0x10] sm:$0xff]  ;;  %6030 = vset.pattern.permute.xlu1 %v6477_v8 }
 0x169   : > { %v898_v11 = vpop.permute.xlu1 %897 }
 0x16a   : > { %855 = vrot.lane.b32.xlu0 %v626_v60, %s6476_s16  ;;  %v440_v62 = vpop.permute.xlu0 %439 }
 0x16b   : > { %v446_v63 = vsel %vm445_vm1, %v440_v62, %v442_v57  ;;  %853 = vrot.lane.b32.xlu1 %v625_v61, %s6476_s16 }
 0x16c   : > { %v624_v2 = vsel %vm623_vm0, %v6677_v6, %v446_v63  ;;  %v804_v6 = vld [vmem:[%s11825_s2 + $0x8] sm:$0xff]  ;;  %s6481_s2 = smov 16  }
 0x16d   : > { %v890_v13 = vpop.permute.xlu1 %889 }
 0x16e   : > { %824 = vperm.xlu0 %6029, %v806_v3   ;;  %v896_v5 = vpop.permute.xlu0 %895 }
 0x16f   : > { %851 = vrot.lane.b32.xlu1 %v624_v2, %s6476_s16  ;;  %v945_v48 = vsel %vm929_vm9, %v896_v5, %v898_v11  ;;  %v799_v11 = vld [vmem:[%s11826_s1] sm:$0xff]  ;;  %s6482_s16 = smov 96  }
 0x171   : > { %v888_v15 = vpop.permute.xlu1 %887 }
 0x172   : > { %809 = vperm.xlu0 %6029, %v803_v4   ;;  %v894_v12 = vpop.permute.xlu0 %893  ;;  %v942_v52 = vsel %vm929_vm9, %v888_v15, %v890_v13  ;;  %v802_v15 = vld [vmem:[%s11826_s1 + $0x18] sm:$0xff] }
 0x173   : > { %819 = vperm.xlu1 %6030, %v805_v7   ;;  %v944_v50 = vsel %vm929_vm9, %v894_v12, %v896_v5 }
 0x175   : > { %v886_v17 = vpop.permute.xlu1 %885 }
 0x176   : > { %v892_v14 = vpop.permute.xlu0 %891  ;;  %6032 = vrot.lane.b32.xlu0 %v11549_v0, %s11822_s30 }
 0x177   : > { %814 = vperm.xlu1 %6030, %v804_v6   ;;  %v943_v51 = vsel %vm929_vm9, %v890_v13, %v892_v14  ;;  %v800_v13 = vld [vmem:[%s11826_s1 + $0x8] sm:$0xff]  ;;  %v801_v14 = vld [vmem:[%s11826_s1 + $0x10] sm:$0xff]  ;;  %s6480_s1 = smov 8  }
 0x179   : > { %v878_v1 = vpop.permute.xlu1 %877 }
 0x17a   : > { %v884_v16 = vpop.permute.xlu0 %883 }
 0x17b   : > { %6037 = vrot.lane.b32.xlu1 %v11549_v0, %s11822_s30  ;;  %v941_v54 = vsel %vm929_vm9, %v884_v16, %v886_v17 }
 0x17d   : > { %v876_v19 = vpop.permute.xlu1 %875 }
 0x17e   : > { %v882_v18 = vpop.permute.xlu0 %881  ;;  %v938_v58 = vsel %vm929_vm9, %v876_v19, %v878_v1 }
 0x17f   : > { %v940_v56 = vsel %vm929_vm9, %v882_v18, %v884_v16  ;;  %6042 = vrot.lane.b32.xlu1 %v11549_v0, %s6478_s13 }
 0x181   : > { %v874_v21 = vpop.permute.xlu1 %873 }
 0x182   : > { %v880_v20 = vpop.permute.xlu0 %879 }
 0x183   : > { %v939_v57 = vsel %vm929_vm9, %v878_v1, %v880_v20 }
 0x186   : > { %v6940_v22 = vpop.permute.xlu0 %871 }
 0x187   : > { %v937_v60 = vsel %vm929_vm9, %v6940_v22, %v874_v21 }
 0x1ad   : > { %v924_v23 = vpop.permute.xlu1 %923  ;;  %v904_v24 = vpop.permute.xlu0 %903 }
 0x1b1   : > { %v926_v25 = vpop.permute.xlu1 %925  ;;  %v928_v26 = vpop.permute.xlu0 %927 }
 0x1b2   : > { %v955_v27 = vsel %vm929_vm9, %v926_v25, %v928_v26  ;;  %v954_v28 = vsel %vm929_vm9, %v924_v23, %v926_v25 }
 0x1b3   : > { %5830 = vmatprep.subr.msk.mxu0 %vm623_vm0, %v955_v27 }
 0x1b4   : > { %5831 = vmatpush1.msk.msra.mxu0 %vm623_vm0, %v954_v28  ;;  %vm980_vm0 = vcmask 818176  }
 0x1b5   : > { %v918_v29 = vpop.permute.xlu0 %917  ;;  %v912_v9 = vpop.permute.xlu1 %911 }
 0x1bc   : > { %v906_v30 = vpop.permute.xlu0 %905 }
 0x1bd   : > { %v900_v31 = vpop.permute.xlu1 %899 }
 0x1c0   : > { %v920_v32 = vpop.permute.xlu0 %919 }
 0x1c1   : > { %v922_v33 = vpop.permute.xlu1 %921  ;;  %v952_v35 = vsel %vm929_vm9, %v918_v29, %v920_v32 }
 0x1c2   : > { %v953_v34 = vsel %vm929_vm9, %v920_v32, %v922_v33 }
 0x1c3   : > { %1005 = vmatprep.subr.mxu0 %v953_v34 }
 0x1c4   : > { %1006 = vmatpush1.msra.mxu0 %v952_v35  ;;  %v916_v36 = vpop.permute.xlu0 %915 }
 0x1c5   : > { %v914_v10 = vpop.permute.xlu1 %913 }
 0x1c6   : > { %v951_v37 = vsel %vm929_vm9, %v914_v10, %v916_v36  ;;  %v950_v38 = vsel %vm929_vm9, %v912_v9, %v914_v10 }
 0x1c7   : > { %1007 = vmatprep.subr.mxu0 %v951_v37 }
 0x1c8   : > { %1008 = vmatpush1.msra.mxu0 %v950_v38  ;;  %v908_v39 = vpop.permute.xlu0 %907 }
 0x1c9   : > { %v910_v40 = vpop.permute.xlu1 %909  ;;  %v948_v43 = vsel %vm929_vm9, %v906_v30, %v908_v39 }
 0x1ca   : > { %v949_v42 = vsel %vm929_vm9, %v908_v39, %v910_v40 }
 0x1cb   : > { %1009 = vmatprep.subr.mxu0 %v949_v42  ;;  %v1238_v42 = vld [vmem:[%s11500_s4 + $0x18] sm:$0xff] }
 0x1cc   : > { %1010 = vmatpush1.msra.mxu0 %v948_v43  ;;  %v870_v44 = vpop.permute.xlu0 %869  ;;  %v1237_v43 = vld [vmem:[%s11500_s4 + $0x10] sm:$0xff] }
 0x1cd   : > { %v902_v41 = vpop.permute.xlu1 %901  ;;  %v936_v62 = vsel %vm929_vm9, %v870_v44, %v6940_v22  ;;  %v1236_v44 = vld [vmem:[%s11500_s4 + $0x8] sm:$0xff] }
 0x1ce   : > { %v947_v45 = vsel %vm929_vm9, %v902_v41, %v904_v24  ;;  %v946_v46 = vsel %vm929_vm9, %v900_v31, %v902_v41  ;;  %v1235_v41 = vld [vmem:[%s11500_s4] sm:$0xff] }
 0x1cf   : > { %1011 = vmatprep.subr.mxu0 %v947_v45 }
 0x1d0   : > { %1012 = vmatpush1.msra.mxu0 %v946_v46  ;;  %v868_v47 = vpop.permute.xlu0 %867 }
 0x1d1   : > { %v866_v49 = vpop.permute.xlu1 %865  ;;  %1013 = vmatprep.subr.mxu0 %v945_v48 }
 0x1d2   : > { %1014 = vmatpush1.msra.mxu0 %v944_v50  ;;  %v935_v63 = vsel %vm929_vm9, %v866_v49, %v868_v47 }
 0x1d3   : > { %1015 = vmatprep.subr.mxu0 %v943_v51 }
 0x1d4   : > { %1016 = vmatpush1.msra.mxu0 %v942_v52  ;;  %v860_v53 = vpop.permute.xlu0 %859 }
 0x1d5   : > { %v864_v55 = vpop.permute.xlu1 %863  ;;  %1017 = vmatprep.subr.mxu0 %v941_v54 }
 0x1d6   : > { %1018 = vmatpush1.msra.mxu0 %v940_v56  ;;  %v934_v2 = vsel %vm929_vm9, %v864_v55, %v866_v49 }
 0x1d7   : > { %1019 = vmatprep.subr.mxu0 %v939_v57 }
 0x1d8   : > { %1020 = vmatpush1.msra.mxu0 %v938_v58  ;;  %v858_v59 = vpop.permute.xlu0 %857 }
 0x1d9   : > { %v862_v61 = vpop.permute.xlu1 %861  ;;  %1021 = vmatprep.subr.mxu0 %v937_v60  ;;  %v932_v4 = vsel %vm929_vm9, %v858_v59, %v860_v53 }
 0x1da   : > { %1022 = vmatpush1.msra.mxu0 %v936_v62  ;;  %v933_v7 = vsel %vm929_vm9, %v860_v53, %v862_v61 }
 0x1db   : > { %1023 = vmatprep.subr.mxu0 %v935_v63 }
 0x1dc   : > { %1024 = vmatpush1.msra.mxu0 %v934_v2  ;;  %v856_v3 = vpop.permute.xlu0 %855 }
 0x1dd   : > { %v854_v8 = vpop.permute.xlu1 %853  ;;  %1025 = vmatprep.subr.mxu0 %v933_v7 }
 0x1de   : > { %1026 = vmatpush1.msra.mxu0 %v932_v4  ;;  %v931_v6 = vsel %vm929_vm9, %v854_v8, %v856_v3 }
 0x1df   : > { %1027 = vmatprep.subr.mxu0 %v931_v6 }
 0x1e1   : > { %v852_v5 = vpop.permute.xlu1 %851 }
 0x1e2   : > { %v930_v12 = vsel %vm929_vm9, %v852_v5, %v854_v8  ;;  %vm1162_vm9 = vcmask 15360  }
 0x1e3   : > { %1028 = vmatpush1.msra.mxu0 %v930_v12 }
 0x1e4   : > { %5832 = vmatmul.mubr.msk.f32.vlgmr.msra.gmra.mxu0 %vm980_vm0, %v799_v11 }
 0x1e5   : > { %1067 = vmatprep.mubr.f32.mxu0 %v11549_v0 }
 0x1e8   : > { %5833 = vmatmul.mubr.msk.f32.gmra.mxu0 %vm980_vm0, %v800_v13 }
 0x1e9   : > { %1073 = vmatprep.mubr.f32.mxu0 %v11549_v0  ;;  %v825_v16 = vpop.permute.xlu0 %824 }
 0x1ec   : > { %5834 = vmatmul.mubr.msk.f32.gmra.mxu0 %vm980_vm0, %v801_v14 }
 0x1ed   : > { %1079 = vmatprep.mubr.f32.mxu0 %v11549_v0  ;;  %v810_v1 = vpop.permute.xlu0 %809 }
 0x1ee   : > { %v820_v17 = vpop.permute.xlu1 %819 }
 0x1f0   : > { %5835 = vmatmul.mubr.msk.f32.gmra.mxu0 %vm980_vm0, %v802_v15  ;;  %vm1259_vm0 = vcmask 785408  }
 0x1f1   : > { %1336 = vmatprep.mubr.f32.mxu0 %v11549_v0  ;;  %v6033_v46 = vpop.permute.xlu0 %6032 }
 0x1f2   : > { %v815_v21 = vpop.permute.xlu1 %814  ;;  %v6034_v57 = vunpack.i.l.bf16 %v6033_v46  ;;  %v6035_v60 = vunpack.i.h.bf16 %v6033_v46 }
 0x1f6   : > { %v6038_v45 = vpop.permute.xlu1 %6037 }
 0x1f7   : > { %v6039_v63 = vunpack.i.l.bf16 %v6038_v45  ;;  %v6040_v4 = vunpack.i.h.bf16 %v6038_v45 }
 0x1fa   : > { %v6043_v47 = vpop.permute.xlu1 %6042 }
 0x1fb   : > { %v6044_v12 = vunpack.i.l.bf16 %v6043_v47 }
 0x2a4   : > { %v1063_v18 = vpop.f32.mrf.mxu0 }
 0x2a5   : > { %v1064_v19 = vadd.f32 %v1063_v18, %v810_v1 }
 0x2a6   : > { %v1065_v20 = vpop.f32.mrf.mxu0 }
 0x2a7   : > { %v6992_v22 = vmax.f32 %v1064_v19, 0.0  ;;  %v1066_v23 = vadd.f32 %v1065_v20, %v810_v1 }
 0x2a8   : > { %v1069_v24 = vpop.f32.mrf.mxu0 }
 0x2a9   : > { %v6994_v25 = vmax.f32 %v1066_v23, 0.0  ;;  %v1070_v26 = vadd.f32 %v1069_v24, %v815_v21  ;;  %1191 = vrot.lane.b32.xlu0 %v6992_v22, %s11822_s30 }
 0x2aa   : > { %v1071_v27 = vpop.f32.mrf.mxu0 }
 0x2ab   : > { %v6998_v28 = vmax.f32 %v1070_v26, 0.0  ;;  %v1072_v29 = vadd.f32 %v1071_v27, %v815_v21  ;;  %1193 = vrot.lane.b32.xlu1 %v6994_v25, %s11822_s30 }
 0x2ac   : > { %v1075_v9 = vpop.f32.mrf.mxu0 }
 0x2ad   : > { %v1076_v30 = vadd.f32 %v1075_v9, %v820_v17  ;;  %1197 = vrot.lane.b32.xlu0 %v6998_v28, %s11822_s30  ;;  %v7004_v32 = vmax.f32 %v1072_v29, 0.0  ;;  %v1231_v9 = vld [vmem:[%s11827_s3] sm:$0xff] }
 0x2ae   : > { %v1077_v31 = vpop.f32.mrf.mxu0 }
 0x2af   : > { %v7006_v33 = vmax.f32 %v1076_v30, 0.0  ;;  %v1078_v36 = vadd.f32 %v1077_v31, %v820_v17  ;;  %v6045_v17 = vunpack.i.h.bf16 %v6043_v47  ;;  %v1232_v30 = vld [vmem:[%s11827_s3 + $0x8] sm:$0xff]  ;;  %v1233_v31 = vld [vmem:[%s11827_s3 + $0x10] sm:$0xff] }
 0x2b0   : > { %v1081_v34 = vpop.f32.mrf.mxu0 }
 0x2b1   : > { %v1082_v35 = vadd.f32 %v1081_v34, %v825_v16  ;;  %1203 = vrot.lane.b32.xlu1 %v7006_v33, %s11822_s30  ;;  %1199 = vrot.lane.b32.xlu0 %v7004_v32, %s11822_s30  ;;  %v7018_v38 = vmax.f32 %v1078_v36, 0.0  ;;  %v1234_v34 = vld [vmem:[%s11827_s3 + $0x18] sm:$0xff] }
 0x2b2   : > { %v1083_v37 = vpop.f32.mrf.mxu0 }
 0x2b3   : > { %v7012_v10 = vmax.f32 %v1082_v35, 0.0  ;;  %v1084_v39 = vadd.f32 %v1083_v37, %v825_v16 }
 0x2b5   : > { %1209 = vrot.lane.b32.xlu1 %v7012_v10, %s11822_s30  ;;  %1152 = vrot.lane.b32.xlu0 %v7006_v33, %s6478_s13  ;;  %v7024_v40 = vmax.f32 %v1084_v39, 0.0 }
 0x2b9   : > { %1158 = vrot.lane.b32.xlu1 %v7012_v10, %s6478_s13  ;;  %1205 = vrot.lane.b32.xlu0 %v7018_v38, %s11822_s30 }
 0x2bd   : > { %1211 = vrot.lane.b32.xlu1 %v7024_v40, %s11822_s30  ;;  %1146 = vrot.lane.b32.xlu0 %v6998_v28, %s6478_s13 }
 0x2c1   : > { %1154 = vrot.lane.b32.xlu1 %v7018_v38, %s6478_s13  ;;  %1160 = vrot.lane.b32.xlu0 %v7024_v40, %s6478_s13 }
 0x2c5   : > { %1148 = vrot.lane.b32.xlu1 %v7004_v32, %s6478_s13  ;;  %1144 = vrot.lane.b32.xlu0 %v11549_v0, %s6478_s13 }
 0x2c9   : > { %1140 = vrot.lane.b32.xlu1 %v6992_v22, %s6478_s13  ;;  %1142 = vrot.lane.b32.xlu0 %v6994_v25, %s6478_s13 }
 0x2cd   : > { %1138 = vrot.lane.b32.xlu1 %v11549_v0, %s6478_s13  ;;  %1256 = vperm.xlu0 %6029, %v1238_v42   ;;  %s6479_s13 = smov 4  }
 0x2d1   : > { %1251 = vperm.xlu1 %6030, %v1237_v43   ;;  %1246 = vperm.xlu0 %6029, %v1236_v44  }
 0x2d5   : > { %1241 = vperm.xlu1 %6030, %v1235_v41   ;;  %6052 = vrot.lane.b32.xlu0 %v11549_v0, %s11828_s25 }
 0x2d9   : > { %6047 = vrot.lane.b32.xlu1 %v11549_v0, %s11828_s25  ;;  %6057 = vrot.lane.b32.xlu0 %v11549_v0, %s6479_s13 }
 0x31b   : > { %v1192_v48 = vpop.permute.xlu0 %1191 }
 0x31d   : > { %v1194_v49 = vpop.permute.xlu1 %1193 }
 0x31e   : > { %v1216_v11 = vsel %vm457_vm7, %v1194_v49, %v6040_v4  ;;  %v1215_v15 = vsel %vm457_vm7, %v1192_v48, %v1194_v49  ;;  %v5844_v4 = vld [vmem:[%s11500_s4 + $0x20] sm:$0xff] }
 0x31f   : > { %v1198_v50 = vpop.permute.xlu0 %1197 }
 0x323   : > { %v1204_v51 = vpop.permute.xlu1 %1203  ;;  %v1200_v52 = vpop.permute.xlu0 %1199 }
 0x324   : > { %v1218_v6 = vsel %vm457_vm7, %v1200_v52, %v6039_v63  ;;  %v1217_v5 = vsel %vm457_vm7, %v1198_v50, %v1200_v52 }
 0x327   : > { %v1210_v53 = vpop.permute.xlu1 %1209  ;;  %v1153_v54 = vpop.permute.xlu0 %1152 }
 0x328   : > { %v1167_v21 = vsel %vm1162_vm9, %v6045_v17, %v1153_v54 }
 0x32b   : > { %v1159_v55 = vpop.permute.xlu1 %1158  ;;  %v1206_v56 = vpop.permute.xlu0 %1205 }
 0x32c   : > { %v1220_v2 = vsel %vm457_vm7, %v1206_v56, %v6035_v60  ;;  %v1219_v8 = vsel %vm457_vm7, %v1204_v51, %v1206_v56  ;;  %v1169_v1 = vsel %vm1162_vm9, %v6044_v12, %v1159_v55 }
 0x32f   : > { %v1212_v58 = vpop.permute.xlu1 %1211  ;;  %v1147_v59 = vpop.permute.xlu0 %1146 }
 0x330   : > { %v1222_v61 = vsel %vm457_vm7, %v1212_v58, %v6034_v57  ;;  %v1221_v62 = vsel %vm457_vm7, %v1210_v53, %v1212_v58 }
 0x331   : > { %1280 = vmatprep.subr.mxu0 %v1222_v61 }
 0x332   : > { %1281 = vmatpush1.msra.mxu0 %v1221_v62 }
 0x333   : > { %v1155_v3 = vpop.permute.xlu1 %1154  ;;  %v1161_v7 = vpop.permute.xlu0 %1160  ;;  %1282 = vmatprep.subr.mxu0 %v1220_v2 }
 0x334   : > { %1283 = vmatpush1.msra.mxu0 %v1219_v8  ;;  %v1170_v16 = vsel %vm1162_vm9, %v1159_v55, %v1161_v7  ;;  %v1168_v18 = vsel %vm1162_vm9, %v1153_v54, %v1155_v3  ;;  %v5845_v8 = vld [vmem:[%s11500_s4 + $0x28] sm:$0xff] }
 0x335   : > { %1284 = vmatprep.subr.mxu0 %v1218_v6 }
 0x336   : > { %1285 = vmatpush1.msra.mxu0 %v1217_v5 }
 0x337   : > { %v1149_v13 = vpop.permute.xlu1 %1148  ;;  %v1145_v14 = vpop.permute.xlu0 %1144  ;;  %1286 = vmatprep.subr.mxu0 %v1216_v11 }
 0x338   : > { %1287 = vmatpush1.msra.mxu0 %v1215_v15  ;;  %v1166_v23 = vsel %vm1162_vm9, %v1147_v59, %v1149_v13  ;;  %v1165_v24 = vsel %vm1162_vm9, %v1145_v14, %v1147_v59 }
 0x339   : > { %1288 = vmatprep.subr.mxu0 %v1170_v16 }
 0x33a   : > { %1289 = vmatpush1.msra.mxu0 %v1169_v1 }
 0x33b   : > { %v1141_v19 = vpop.permute.xlu1 %1140  ;;  %v1143_v20 = vpop.permute.xlu0 %1142  ;;  %1290 = vmatprep.subr.mxu0 %v1168_v18 }
 0x33c   : > { %1291 = vmatpush1.msra.mxu0 %v1167_v21  ;;  %v1164_v26 = vsel %vm1162_vm9, %v1141_v19, %v1143_v20 }
 0x33d   : > { %1292 = vmatprep.subr.mxu0 %v1166_v23 }
 0x33e   : > { %1293 = vmatpush1.msra.mxu0 %v1165_v24 }
 0x33f   : > { %v1139_v27 = vpop.permute.xlu1 %1138  ;;  %1294 = vmatprep.subr.mxu0 %v1164_v26 }
 0x340   : > { %v1163_v29 = vsel %vm1162_vm9, %v1139_v27, %v1141_v19  ;;  %vm1445_vm9 = vcmask 31744  }
 0x341   : > { %1295 = vmatpush1.msra.mxu0 %v1163_v29 }
 0x342   : > { %1296 = vmatprep.subr.mxu0 %v7024_v40 }
 0x343   : > { %1297 = vmatpush1.msra.mxu0 %v7012_v10 }
 0x344   : > { %1298 = vmatprep.subr.mxu0 %v7018_v38 }
 0x345   : > { %1299 = vmatpush1.msra.mxu0 %v7006_v33 }
 0x346   : > { %1300 = vmatprep.subr.mxu0 %v7004_v32 }
 0x347   : > { %1301 = vmatpush1.msra.mxu0 %v6998_v28 }
 0x348   : > { %1302 = vmatprep.subr.mxu0 %v6994_v25  ;;  %v1257_v36 = vpop.permute.xlu0 %1256 }
 0x349   : > { %1303 = vmatpush1.msra.mxu0 %v6992_v22 }
 0x34a   : > { %5836 = vmatmul.mubr.msk.f32.vlgmr.msra.gmra.mxu0 %vm1259_vm0, %v1231_v9 }
 0x34b   : > { %1342 = vmatprep.mubr.f32.mxu0 %v11549_v0 }
 0x34c   : > { %v1252_v35 = vpop.permute.xlu1 %1251  ;;  %v1247_v45 = vpop.permute.xlu0 %1246 }
 0x34e   : > { %5837 = vmatmul.mubr.msk.f32.gmra.mxu0 %vm1259_vm0, %v1232_v30 }
 0x34f   : > { %1348 = vmatprep.mubr.f32.mxu0 %v11549_v0 }
 0x350   : > { %v1242_v37 = vpop.permute.xlu1 %1241  ;;  %v6053_v6 = vpop.permute.xlu0 %6052 }
 0x351   : > { %v6054_v29 = vunpack.i.l.bf16 %v6053_v6 }
 0x352   : > { %5838 = vmatmul.mubr.msk.f32.gmra.mxu0 %vm1259_vm0, %v1233_v31 }
 0x353   : > { %1354 = vmatprep.mubr.f32.mxu0 %v11549_v0 }
 0x354   : > { %v6048_v5 = vpop.permute.xlu1 %6047  ;;  %v6058_v11 = vpop.permute.xlu0 %6057 }
 0x355   : > { %v6049_v20 = vunpack.i.l.bf16 %v6048_v5  ;;  %v6050_v24 = vunpack.i.h.bf16 %v6048_v5 }
 0x356   : > { %5839 = vmatmul.mubr.msk.f32.gmra.mxu0 %vm1259_vm0, %v1234_v34 }
 0x357   : > { %1904 = vmatprep.mubr.f32.mxu0 %v11549_v0 }
 0x40a   : > { %v1338_v39 = vpop.f32.mrf.mxu0 }
 0x40b   : > { %v1339_v42 = vadd.f32 %v1338_v39, %v1242_v37 }
 0x40c   : > { %v1340_v43 = vpop.f32.mrf.mxu0 }
 0x40d   : > { %v1361_v44 = vmax.f32 %v1339_v42, 0.0  ;;  %v1341_v41 = vadd.f32 %v1340_v43, %v1242_v37  ;;  %v6059_v42 = vunpack.i.l.bf16 %v6058_v11 }
 0x40e   : > { %v1344_v46 = vpop.f32.mrf.mxu0 }
 0x40f   : > { %v7107_v47 = vadd.f32 %v1361_v44, %v6992_v22  ;;  %v1362_v48 = vmax.f32 %v1341_v41, 0.0  ;;  %v1345_v49 = vadd.f32 %v1344_v46, %v1247_v45  ;;  %v6060_v46 = vunpack.i.h.bf16 %v6058_v11 }
 0x410   : > { %v1346_v50 = vpop.f32.mrf.mxu0 }
 0x411   : > { %v7110_v51 = vadd.f32 %v1362_v48, %v6994_v25  ;;  %v1363_v52 = vmax.f32 %v1345_v49, 0.0  ;;  %v1347_v53 = vadd.f32 %v1346_v50, %v1247_v45  ;;  %1474 = vrot.lane.b32.xlu1 %v7107_v47, %s11828_s25 }
 0x412   : > { %v1350_v54 = vpop.f32.mrf.mxu0 }
 0x413   : > { %v7115_v55 = vadd.f32 %v1363_v52, %v6998_v28  ;;  %v1364_v56 = vmax.f32 %v1347_v53, 0.0  ;;  %v1351_v57 = vadd.f32 %v1350_v54, %v1252_v35  ;;  %1476 = vrot.lane.b32.xlu0 %v7110_v51, %s11828_s25 }
 0x414   : > { %v1352_v22 = vpop.f32.mrf.mxu0 }
 0x415   : > { %v1365_v58 = vmax.f32 %v1351_v57, 0.0  ;;  %1480 = vrot.lane.b32.xlu1 %v7115_v55, %s11828_s25  ;;  %v7122_v59 = vadd.f32 %v1364_v56, %v7004_v32  ;;  %v1353_v61 = vadd.f32 %v1352_v22, %v1252_v35  ;;  %v6055_v35 = vunpack.i.h.bf16 %v6053_v6 }
 0x416   : > { %v1356_v25 = vpop.f32.mrf.mxu0 }
 0x417   : > { %v7125_v60 = vadd.f32 %v1365_v58, %v7006_v33  ;;  %v1357_v28 = vadd.f32 %v1356_v25, %v1257_v36  ;;  %v1366_v2 = vmax.f32 %v1353_v61, 0.0  ;;  %v5840_v25 = vld [vmem:[%s11827_s3 + $0x20] sm:$0xff]  ;;  %v5841_v61 = vld [vmem:[%s11827_s3 + $0x28] sm:$0xff] }
 0x418   : > { %v1358_v62 = vpop.f32.mrf.mxu0 }
 0x419   : > { %v1367_v63 = vmax.f32 %v1357_v28, 0.0  ;;  %1486 = vrot.lane.b32.xlu0 %v7125_v60, %s11828_s25  ;;  %1482 = vrot.lane.b32.xlu1 %v7122_v59, %s11828_s25  ;;  %v1359_v7 = vadd.f32 %v1358_v62, %v1257_v36  ;;  %v7139_v32 = vadd.f32 %v1366_v2, %v7018_v38  ;;  %v5847_v38 = vld [vmem:[%s11500_s4 + $0x38] sm:$0xff]  ;;  %v5842_v28 = vld [vmem:[%s11827_s3 + $0x30] sm:$0xff] }
 0x41a   : > { %v5843_v62 = vld [vmem:[%s11827_s3 + $0x38] sm:$0xff] }
 0x41b   : > { %v7132_v3 = vadd.f32 %v1367_v63, %v7012_v10  ;;  %v1368_v33 = vmax.f32 %v1359_v7, 0.0 }
 0x41d   : > { %1492 = vrot.lane.b32.xlu0 %v7132_v3, %s11828_s25  ;;  %1435 = vrot.lane.b32.xlu1 %v7125_v60, %s6479_s13  ;;  %v7146_v10 = vadd.f32 %v1368_v33, %v7024_v40  ;;  %v5846_v40 = vld [vmem:[%s11500_s4 + $0x30] sm:$0xff] }
 0x421   : > { %1441 = vrot.lane.b32.xlu0 %v7132_v3, %s6479_s13  ;;  %1488 = vrot.lane.b32.xlu1 %v7139_v32, %s11828_s25 }
 0x425   : > { %1494 = vrot.lane.b32.xlu0 %v7146_v10, %s11828_s25  ;;  %1429 = vrot.lane.b32.xlu1 %v7115_v55, %s6479_s13 }
 0x429   : > { %1437 = vrot.lane.b32.xlu0 %v7139_v32, %s6479_s13  ;;  %1443 = vrot.lane.b32.xlu1 %v7146_v10, %s6479_s13 }
 0x42d   : > { %1431 = vrot.lane.b32.xlu0 %v7122_v59, %s6479_s13  ;;  %1427 = vrot.lane.b32.xlu1 %v11549_v0, %s6479_s13 }
 0x431   : > { %1423 = vrot.lane.b32.xlu0 %v7107_v47, %s6479_s13  ;;  %1425 = vrot.lane.b32.xlu1 %v7110_v51, %s6479_s13 }
 0x435   : > { %1421 = vrot.lane.b32.xlu0 %v11549_v0, %s6479_s13  ;;  %1541 = vperm.xlu1 %6030, %v5847_v38   ;;  %s11831_s13 = smov 123  }
 0x439   : > { %1536 = vperm.xlu0 %6029, %v5846_v40   ;;  %1531 = vperm.xlu1 %6030, %v5845_v8  }
 0x43d   : > { %1526 = vperm.xlu0 %6029, %v5844_v4   ;;  %6067 = vrot.lane.b32.xlu1 %v11549_v0, %s11829_s24 }
 0x441   : > { %6062 = vrot.lane.b32.xlu0 %v11549_v0, %s11829_s24  ;;  %6072 = vrot.lane.b32.xlu1 %v11549_v0, %s6480_s1 }
 0x483   : > { %v1475_v12 = vpop.permute.xlu1 %1474 }
 0x485   : > { %v1477_v13 = vpop.permute.xlu0 %1476 }
 0x486   : > { %v1499_v39 = vsel %vm481_vm6, %v1477_v13, %v6055_v35  ;;  %v1498_v41 = vsel %vm481_vm6, %v1475_v12, %v1477_v13  ;;  %v5856_v35 = vld [vmem:[%s11500_s4 + $0x40] sm:$0xff] }
 0x487   : > { %v1481_v14 = vpop.permute.xlu1 %1480 }
 0x48b   : > { %v1487_v15 = vpop.permute.xlu0 %1486  ;;  %v1483_v16 = vpop.permute.xlu1 %1482 }
 0x48c   : > { %v1501_v36 = vsel %vm481_vm6, %v1483_v16, %v6054_v29  ;;  %v1500_v37 = vsel %vm481_vm6, %v1481_v14, %v1483_v16 }
 0x48f   : > { %v1493_v17 = vpop.permute.xlu0 %1492  ;;  %v1436_v1 = vpop.permute.xlu1 %1435 }
 0x490   : > { %v1450_v53 = vsel %vm1445_vm9, %v6060_v46, %v1436_v1 }
 0x493   : > { %v1442_v18 = vpop.permute.xlu0 %1441  ;;  %v1489_v19 = vpop.permute.xlu1 %1488 }
 0x494   : > { %v1503_v9 = vsel %vm481_vm6, %v1489_v19, %v6050_v24  ;;  %v1502_v34 = vsel %vm481_vm6, %v1487_v15, %v1489_v19  ;;  %v1452_v48 = vsel %vm1445_vm9, %v6059_v42, %v1442_v18 }
 0x497   : > { %v1495_v21 = vpop.permute.xlu0 %1494  ;;  %v1430_v23 = vpop.permute.xlu1 %1429 }
 0x498   : > { %v1505_v26 = vsel %vm481_vm6, %v1495_v21, %v6049_v20  ;;  %v1504_v27 = vsel %vm481_vm6, %v1493_v17, %v1495_v21 }
 0x499   : > { %1564 = vmatprep.subr.mxu1 %v1505_v26 }
 0x49a   : > { %1565 = vmatpush1.msra.mxu1 %v1504_v27 }
 0x49b   : > { %v1438_v30 = vpop.permute.xlu0 %1437  ;;  %1566 = vmatprep.subr.mxu1 %v1503_v9  ;;  %v1444_v31 = vpop.permute.xlu1 %1443 }
 0x49c   : > { %1567 = vmatpush1.msra.mxu1 %v1502_v34  ;;  %v1453_v45 = vsel %vm1445_vm9, %v1442_v18, %v1444_v31  ;;  %v1451_v49 = vsel %vm1445_vm9, %v1436_v1, %v1438_v30  ;;  %v5857_v34 = vld [vmem:[%s11500_s4 + $0x48] sm:$0xff] }
 0x49d   : > { %1568 = vmatprep.subr.mxu1 %v1501_v36 }
 0x49e   : > { %1569 = vmatpush1.msra.mxu1 %v1500_v37 }
 0x49f   : > { %v1432_v43 = vpop.permute.xlu0 %1431  ;;  %1570 = vmatprep.subr.mxu1 %v1499_v39  ;;  %v1428_v44 = vpop.permute.xlu1 %1427 }
 0x4a0   : > { %1571 = vmatpush1.msra.mxu1 %v1498_v41  ;;  %v1449_v54 = vsel %vm1445_vm9, %v1430_v23, %v1432_v43  ;;  %v1448_v56 = vsel %vm1445_vm9, %v1428_v44, %v1430_v23 }
 0x4a1   : > { %1572 = vmatprep.subr.mxu1 %v1453_v45 }
 0x4a2   : > { %1573 = vmatpush1.msra.mxu1 %v1452_v48 }
 0x4a3   : > { %v1424_v50 = vpop.permute.xlu0 %1423  ;;  %1574 = vmatprep.subr.mxu1 %v1451_v49  ;;  %v1426_v52 = vpop.permute.xlu1 %1425 }
 0x4a4   : > { %1575 = vmatpush1.msra.mxu1 %v1450_v53  ;;  %v1447_v57 = vsel %vm1445_vm9, %v1424_v50, %v1426_v52 }
 0x4a5   : > { %1576 = vmatprep.subr.mxu1 %v1449_v54 }
 0x4a6   : > { %1577 = vmatpush1.msra.mxu1 %v1448_v56 }
 0x4a7   : > { %v1422_v22 = vpop.permute.xlu0 %1421  ;;  %1578 = vmatprep.subr.mxu1 %v1447_v57 }
 0x4a8   : > { %v1446_v58 = vsel %vm1445_vm9, %v1422_v22, %v1424_v50  ;;  %vm1729_vm9 = vcmask 64512  }
 0x4a9   : > { %1579 = vmatpush1.msra.mxu1 %v1446_v58 }
 0x4aa   : > { %1580 = vmatprep.subr.mxu1 %v7146_v10 }
 0x4ab   : > { %1581 = vmatpush1.msra.mxu1 %v7132_v3 }
 0x4ac   : > { %1582 = vmatprep.subr.mxu1 %v7139_v32 }
 0x4ad   : > { %1583 = vmatpush1.msra.mxu1 %v7125_v60 }
 0x4ae   : > { %1584 = vmatprep.subr.mxu1 %v7122_v59 }
 0x4af   : > { %1585 = vmatpush1.msra.mxu1 %v7115_v55 }
 0x4b0   : > { %1586 = vmatprep.subr.mxu1 %v7110_v51  ;;  %v1542_v2 = vpop.permute.xlu1 %1541 }
 0x4b1   : > { %1587 = vmatpush1.msra.mxu1 %v7107_v47 }
 0x4b2   : > { %5848 = vmatmul.mubr.msk.f32.vlgmr.msra.gmra.mxu1 %vm1259_vm0, %v5840_v25 }
 0x4b3   : > { %1626 = vmatprep.mubr.f32.mxu1 %v11549_v0 }
 0x4b4   : > { %v1537_v63 = vpop.permute.xlu0 %1536  ;;  %v1532_v6 = vpop.permute.xlu1 %1531 }
 0x4b6   : > { %5849 = vmatmul.mubr.msk.f32.gmra.mxu1 %vm1259_vm0, %v5841_v61 }
 0x4b7   : > { %1632 = vmatprep.mubr.f32.mxu1 %v11549_v0 }
 0x4b8   : > { %v1527_v7 = vpop.permute.xlu0 %1526  ;;  %v6068_v36 = vpop.permute.xlu1 %6067 }
 0x4b9   : > { %v6069_v58 = vunpack.i.l.bf16 %v6068_v36 }
 0x4ba   : > { %5850 = vmatmul.mubr.msk.f32.gmra.mxu1 %vm1259_vm0, %v5842_v28 }
 0x4bb   : > { %1638 = vmatprep.mubr.f32.mxu1 %v11549_v0 }
 0x4bc   : > { %v6063_v37 = vpop.permute.xlu0 %6062  ;;  %v6073_v39 = vpop.permute.xlu1 %6072 }
 0x4bd   : > { %v6064_v52 = vunpack.i.l.bf16 %v6063_v37  ;;  %v6065_v56 = vunpack.i.h.bf16 %v6063_v37 }
 0x4be   : > { %5851 = vmatmul.mubr.msk.f32.gmra.mxu1 %vm1259_vm0, %v5843_v62 }
 0x4bf   : > { %2188 = vmatprep.mubr.f32.mxu1 %v11549_v0 }
 0x572   : > { %v1622_v33 = vpop.f32.mrf.mxu1 }
 0x573   : > { %v1623_v38 = vadd.f32 %v1622_v33, %v1527_v7 }
 0x574   : > { %v1624_v40 = vpop.f32.mrf.mxu1 }
 0x575   : > { %v1645_v8 = vmax.f32 %v1623_v38, 0.0  ;;  %v1625_v4 = vadd.f32 %v1624_v40, %v1527_v7  ;;  %v6074_v38 = vunpack.i.l.bf16 %v6073_v39 }
 0x576   : > { %v1628_v5 = vpop.f32.mrf.mxu1 }
 0x577   : > { %v7229_v11 = vadd.f32 %v1645_v8, %v7107_v47  ;;  %v1646_v12 = vmax.f32 %v1625_v4, 0.0  ;;  %v1629_v13 = vadd.f32 %v1628_v5, %v1532_v6  ;;  %v6075_v5 = vunpack.i.h.bf16 %v6073_v39 }
 0x578   : > { %v1630_v14 = vpop.f32.mrf.mxu1 }
 0x579   : > { %v7232_v15 = vadd.f32 %v1646_v12, %v7110_v51  ;;  %v1647_v16 = vmax.f32 %v1629_v13, 0.0  ;;  %v1631_v17 = vadd.f32 %v1630_v14, %v1532_v6  ;;  %1758 = vrot.lane.b32.xlu0 %v7229_v11, %s11829_s24 }
 0x57a   : > { %v1634_v1 = vpop.f32.mrf.mxu1 }
 0x57b   : > { %v7237_v18 = vadd.f32 %v1647_v16, %v7115_v55  ;;  %v1648_v19 = vmax.f32 %v1631_v17, 0.0  ;;  %v1635_v20 = vadd.f32 %v1634_v1, %v1537_v63  ;;  %1760 = vrot.lane.b32.xlu1 %v7232_v15, %s11829_s24 }
 0x57c   : > { %v1636_v47 = vpop.f32.mrf.mxu1 }
 0x57d   : > { %v1649_v21 = vmax.f32 %v1635_v20, 0.0  ;;  %1764 = vrot.lane.b32.xlu0 %v7237_v18, %s11829_s24  ;;  %v7244_v23 = vadd.f32 %v1648_v19, %v7122_v59  ;;  %v1637_v26 = vadd.f32 %v1636_v47, %v1537_v63  ;;  %v6070_v63 = vunpack.i.h.bf16 %v6068_v36 }
 0x57e   : > { %v1640_v51 = vpop.f32.mrf.mxu1 }
 0x57f   : > { %v7247_v24 = vadd.f32 %v1649_v21, %v7125_v60  ;;  %v1641_v55 = vadd.f32 %v1640_v51, %v1542_v2  ;;  %v1650_v9 = vmax.f32 %v1637_v26, 0.0  ;;  %v5852_v51 = vld [vmem:[%s11827_s3 + $0x40] sm:$0xff]  ;;  %v5853_v26 = vld [vmem:[%s11827_s3 + $0x48] sm:$0xff] }
 0x580   : > { %v1642_v27 = vpop.f32.mrf.mxu1 }
 0x581   : > { %v1651_v29 = vmax.f32 %v1641_v55, 0.0  ;;  %1770 = vrot.lane.b32.xlu1 %v7247_v24, %s11829_s24  ;;  %1766 = vrot.lane.b32.xlu0 %v7244_v23, %s11829_s24  ;;  %v1643_v31 = vadd.f32 %v1642_v27, %v1542_v2  ;;  %v7261_v59 = vadd.f32 %v1650_v9, %v7139_v32  ;;  %v5859_v32 = vld [vmem:[%s11500_s4 + $0x58] sm:$0xff]  ;;  %v5854_v55 = vld [vmem:[%s11827_s3 + $0x50] sm:$0xff] }
 0x582   : > { %v5855_v27 = vld [vmem:[%s11827_s3 + $0x58] sm:$0xff] }
 0x583   : > { %v7254_v30 = vadd.f32 %v1651_v29, %v7132_v3  ;;  %v1652_v60 = vmax.f32 %v1643_v31, 0.0 }
 0x585   : > { %1776 = vrot.lane.b32.xlu1 %v7254_v30, %s11829_s24  ;;  %1719 = vrot.lane.b32.xlu0 %v7247_v24, %s6480_s1  ;;  %v7268_v3 = vadd.f32 %v1652_v60, %v7146_v10  ;;  %v5858_v10 = vld [vmem:[%s11500_s4 + $0x50] sm:$0xff] }
 0x589   : > { %1725 = vrot.lane.b32.xlu1 %v7254_v30, %s6480_s1  ;;  %1772 = vrot.lane.b32.xlu0 %v7261_v59, %s11829_s24 }
 0x58d   : > { %1778 = vrot.lane.b32.xlu1 %v7268_v3, %s11829_s24  ;;  %1713 = vrot.lane.b32.xlu0 %v7237_v18, %s6480_s1 }
 0x591   : > { %1721 = vrot.lane.b32.xlu1 %v7261_v59, %s6480_s1  ;;  %1727 = vrot.lane.b32.xlu0 %v7268_v3, %s6480_s1 }
 0x595   : > { %1715 = vrot.lane.b32.xlu1 %v7244_v23, %s6480_s1  ;;  %1711 = vrot.lane.b32.xlu0 %v11549_v0, %s6480_s1 }
 0x599   : > { %1707 = vrot.lane.b32.xlu1 %v7229_v11, %s6480_s1  ;;  %1709 = vrot.lane.b32.xlu0 %v7232_v15, %s6480_s1 }
 0x59d   : > { %1705 = vrot.lane.b32.xlu1 %v11549_v0, %s6480_s1  ;;  %1825 = vperm.xlu0 %6029, %v5859_v32   ;;  %s11862_s1 = smov 64  }
 0x5a1   : > { %1820 = vperm.xlu1 %6030, %v5858_v10   ;;  %1815 = vperm.xlu0 %6029, %v5857_v34  }
 0x5a5   : > { %1810 = vperm.xlu1 %6030, %v5856_v35   ;;  %6082 = vrot.lane.b32.xlu0 %v11549_v0, %s11830_s22 }
 0x5a9   : > { %6077 = vrot.lane.b32.xlu1 %v11549_v0, %s11830_s22  ;;  %6087 = vrot.lane.b32.xlu0 %v11549_v0, %s6481_s2 }
 0x5eb   : > { %v1759_v42 = vpop.permute.xlu0 %1758 }
 0x5ed   : > { %v1761_v43 = vpop.permute.xlu1 %1760 }
 0x5ee   : > { %v1783_v33 = vsel %vm529_vm2, %v1761_v43, %v6070_v63  ;;  %v1782_v4 = vsel %vm529_vm2, %v1759_v42, %v1761_v43  ;;  %v5868_v63 = vld [vmem:[%s11500_s4 + $0x60] sm:$0xff] }
 0x5ef   : > { %v1765_v44 = vpop.permute.xlu0 %1764 }
 0x5f3   : > { %v1767_v41 = vpop.permute.xlu0 %1766  ;;  %v1771_v45 = vpop.permute.xlu1 %1770 }
 0x5f4   : > { %v1785_v2 = vsel %vm529_vm2, %v1767_v41, %v6069_v58  ;;  %v1784_v7 = vsel %vm529_vm2, %v1765_v44, %v1767_v41 }
 0x5f7   : > { %v1720_v46 = vpop.permute.xlu0 %1719  ;;  %v1777_v48 = vpop.permute.xlu1 %1776 }
 0x5f8   : > { %v1734_v17 = vsel %vm1729_vm9, %v6075_v5, %v1720_v46 }
 0x5fb   : > { %v1773_v49 = vpop.permute.xlu0 %1772  ;;  %v1726_v50 = vpop.permute.xlu1 %1725 }
 0x5fc   : > { %v1787_v25 = vsel %vm529_vm2, %v1773_v49, %v6065_v56  ;;  %v1786_v62 = vsel %vm529_vm2, %v1771_v45, %v1773_v49  ;;  %v1736_v12 = vsel %vm1729_vm9, %v6074_v38, %v1726_v50 }
 0x5ff   : > { %v1714_v53 = vpop.permute.xlu0 %1713  ;;  %v1779_v54 = vpop.permute.xlu1 %1778 }
 0x600   : > { %v1789_v57 = vsel %vm529_vm2, %v1779_v54, %v6064_v52  ;;  %v1788_v22 = vsel %vm529_vm2, %v1777_v48, %v1779_v54 }
 0x601   : > { %1848 = vmatprep.subr.mxu0 %v1789_v57 }
 0x602   : > { %1849 = vmatpush1.msra.mxu0 %v1788_v22 }
 0x603   : > { %v1728_v61 = vpop.permute.xlu0 %1727  ;;  %1850 = vmatprep.subr.mxu0 %v1787_v25  ;;  %v1722_v28 = vpop.permute.xlu1 %1721 }
 0x604   : > { %1851 = vmatpush1.msra.mxu0 %v1786_v62  ;;  %v1737_v6 = vsel %vm1729_vm9, %v1726_v50, %v1728_v61  ;;  %v1735_v13 = vsel %vm1729_vm9, %v1720_v46, %v1722_v28  ;;  %v5869_v62 = vld [vmem:[%s11500_s4 + $0x68] sm:$0xff] }
 0x605   : > { %1852 = vmatprep.subr.mxu0 %v1785_v2 }
 0x606   : > { %1853 = vmatpush1.msra.mxu0 %v1784_v7 }
 0x607   : > { %v1712_v40 = vpop.permute.xlu0 %1711  ;;  %v1716_v8 = vpop.permute.xlu1 %1715  ;;  %1854 = vmatprep.subr.mxu0 %v1783_v33 }
 0x608   : > { %1855 = vmatpush1.msra.mxu0 %v1782_v4  ;;  %v1733_v1 = vsel %vm1729_vm9, %v1714_v53, %v1716_v8  ;;  %v1732_v19 = vsel %vm1729_vm9, %v1712_v40, %v1714_v53 }
 0x609   : > { %1856 = vmatprep.subr.mxu0 %v1737_v6 }
 0x60a   : > { %1857 = vmatpush1.msra.mxu0 %v1736_v12 }
 0x60b   : > { %v1710_v14 = vpop.permute.xlu0 %1709  ;;  %v1708_v16 = vpop.permute.xlu1 %1707  ;;  %1858 = vmatprep.subr.mxu0 %v1735_v13 }
 0x60c   : > { %1859 = vmatpush1.msra.mxu0 %v1734_v17  ;;  %v1731_v20 = vsel %vm1729_vm9, %v1708_v16, %v1710_v14 }
 0x60d   : > { %1860 = vmatprep.subr.mxu0 %v1733_v1 }
 0x60e   : > { %1861 = vmatpush1.msra.mxu0 %v1732_v19 }
 0x60f   : > { %v1706_v47 = vpop.permute.xlu1 %1705  ;;  %1862 = vmatprep.subr.mxu0 %v1731_v20 }
 0x610   : > { %v1730_v21 = vsel %vm1729_vm9, %v1706_v47, %v1708_v16  ;;  %vm2013_vm9 = vcmask 130048  }
 0x611   : > { %1863 = vmatpush1.msra.mxu0 %v1730_v21 }
 0x612   : > { %1864 = vmatprep.subr.mxu0 %v7268_v3 }
 0x613   : > { %1865 = vmatpush1.msra.mxu0 %v7254_v30 }
 0x614   : > { %1866 = vmatprep.subr.mxu0 %v7261_v59 }
 0x615   : > { %1867 = vmatpush1.msra.mxu0 %v7247_v24 }
 0x616   : > { %1868 = vmatprep.subr.mxu0 %v7244_v23 }
 0x617   : > { %1869 = vmatpush1.msra.mxu0 %v7237_v18 }
 0x618   : > { %1870 = vmatprep.subr.mxu0 %v7232_v15  ;;  %v1826_v9 = vpop.permute.xlu0 %1825 }
 0x619   : > { %1871 = vmatpush1.msra.mxu0 %v7229_v11 }
 0x61a   : > { %5860 = vmatmul.mubr.msk.f32.vlgmr.msra.gmra.mxu0 %vm1259_vm0, %v5852_v51 }
 0x61b   : > { %1910 = vmatprep.mubr.f32.mxu0 %v11549_v0 }
 0x61c   : > { %v1821_v29 = vpop.permute.xlu1 %1820  ;;  %v1816_v36 = vpop.permute.xlu0 %1815 }
 0x61e   : > { %5861 = vmatmul.mubr.msk.f32.gmra.mxu0 %vm1259_vm0, %v5853_v26 }
 0x61f   : > { %1916 = vmatprep.mubr.f32.mxu0 %v11549_v0 }
 0x620   : > { %v1811_v31 = vpop.permute.xlu1 %1810  ;;  %v6083_v2 = vpop.permute.xlu0 %6082 }
 0x621   : > { %v6084_v21 = vunpack.i.l.bf16 %v6083_v2 }
 0x622   : > { %5862 = vmatmul.mubr.msk.f32.gmra.mxu0 %vm1259_vm0, %v5854_v55 }
 0x623   : > { %1922 = vmatprep.mubr.f32.mxu0 %v11549_v0 }
 0x624   : > { %v6078_v7 = vpop.permute.xlu1 %6077  ;;  %v6088_v33 = vpop.permute.xlu0 %6087 }
 0x625   : > { %v6079_v16 = vunpack.i.l.bf16 %v6078_v7  ;;  %v6080_v19 = vunpack.i.h.bf16 %v6078_v7 }
 0x626   : > { %5863 = vmatmul.mubr.msk.f32.gmra.mxu0 %vm1259_vm0, %v5855_v27 }
 0x627   : > { %2472 = vmatprep.mubr.f32.mxu0 %v11549_v0 }
 0x6da   : > { %v1906_v60 = vpop.f32.mrf.mxu0 }
 0x6db   : > { %v1907_v32 = vadd.f32 %v1906_v60, %v1811_v31 }
 0x6dc   : > { %v1908_v10 = vpop.f32.mrf.mxu0 }
 0x6dd   : > { %v1929_v34 = vmax.f32 %v1907_v32, 0.0  ;;  %v1909_v35 = vadd.f32 %v1908_v10, %v1811_v31  ;;  %v6089_v32 = vunpack.i.l.bf16 %v6088_v33 }
 0x6de   : > { %v1912_v37 = vpop.f32.mrf.mxu0 }
 0x6df   : > { %v7351_v39 = vadd.f32 %v1929_v34, %v7229_v11  ;;  %v1930_v42 = vmax.f32 %v1909_v35, 0.0  ;;  %v1913_v43 = vadd.f32 %v1912_v37, %v1816_v36  ;;  %v6090_v37 = vunpack.i.h.bf16 %v6088_v33 }
 0x6e0   : > { %v1914_v44 = vpop.f32.mrf.mxu0 }
 0x6e1   : > { %v7354_v41 = vadd.f32 %v1930_v42, %v7232_v15  ;;  %v1931_v45 = vmax.f32 %v1913_v43, 0.0  ;;  %v1915_v46 = vadd.f32 %v1914_v44, %v1816_v36  ;;  %2042 = vrot.lane.b32.xlu1 %v7351_v39, %s11830_s22 }
 0x6e2   : > { %v1918_v48 = vpop.f32.mrf.mxu0 }
 0x6e3   : > { %v7359_v49 = vadd.f32 %v1931_v45, %v7237_v18  ;;  %v1932_v50 = vmax.f32 %v1915_v46, 0.0  ;;  %v1919_v52 = vadd.f32 %v1918_v48, %v1821_v29  ;;  %2044 = vrot.lane.b32.xlu0 %v7354_v41, %s11830_s22 }
 0x6e4   : > { %v1920_v11 = vpop.f32.mrf.mxu0 }
 0x6e5   : > { %v1933_v53 = vmax.f32 %v1919_v52, 0.0  ;;  %2048 = vrot.lane.b32.xlu1 %v7359_v49, %s11830_s22  ;;  %v7366_v54 = vadd.f32 %v1932_v50, %v7244_v23  ;;  %v1921_v57 = vadd.f32 %v1920_v11, %v1821_v29  ;;  %v6085_v29 = vunpack.i.h.bf16 %v6083_v2 }
 0x6e6   : > { %v1924_v15 = vpop.f32.mrf.mxu0 }
 0x6e7   : > { %v7369_v56 = vadd.f32 %v1933_v53, %v7247_v24  ;;  %v1925_v18 = vadd.f32 %v1924_v15, %v1826_v9  ;;  %v1934_v25 = vmax.f32 %v1921_v57, 0.0  ;;  %v5864_v15 = vld [vmem:[%s11827_s3 + $0x60] sm:$0xff]  ;;  %v5865_v57 = vld [vmem:[%s11827_s3 + $0x68] sm:$0xff] }
 0x6e8   : > { %v1926_v22 = vpop.f32.mrf.mxu0 }
 0x6e9   : > { %v1935_v58 = vmax.f32 %v1925_v18, 0.0  ;;  %2054 = vrot.lane.b32.xlu0 %v7369_v56, %s11830_s22  ;;  %2050 = vrot.lane.b32.xlu1 %v7366_v54, %s11830_s22  ;;  %v1927_v28 = vadd.f32 %v1926_v22, %v1826_v9  ;;  %v7383_v23 = vadd.f32 %v1934_v25, %v7261_v59  ;;  %v5871_v59 = vld [vmem:[%s11500_s4 + $0x78] sm:$0xff]  ;;  %v5866_v18 = vld [vmem:[%s11827_s3 + $0x70] sm:$0xff] }
 0x6ea   : > { %v5867_v22 = vld [vmem:[%s11827_s3 + $0x78] sm:$0xff] }
 0x6eb   : > { %v7376_v61 = vadd.f32 %v1935_v58, %v7254_v30  ;;  %v1936_v24 = vmax.f32 %v1927_v28, 0.0 }
 0x6ed   : > { %2060 = vrot.lane.b32.xlu0 %v7376_v61, %s11830_s22  ;;  %2003 = vrot.lane.b32.xlu1 %v7369_v56, %s6481_s2  ;;  %v7390_v30 = vadd.f32 %v1936_v24, %v7268_v3  ;;  %v5870_v3 = vld [vmem:[%s11500_s4 + $0x70] sm:$0xff] }
 0x6f1   : > { %2009 = vrot.lane.b32.xlu0 %v7376_v61, %s6481_s2  ;;  %2056 = vrot.lane.b32.xlu1 %v7383_v23, %s11830_s22 }
 0x6f5   : > { %2062 = vrot.lane.b32.xlu0 %v7390_v30, %s11830_s22  ;;  %1997 = vrot.lane.b32.xlu1 %v7359_v49, %s6481_s2 }
 0x6f9   : > { %2005 = vrot.lane.b32.xlu0 %v7383_v23, %s6481_s2  ;;  %2011 = vrot.lane.b32.xlu1 %v7390_v30, %s6481_s2 }
 0x6fd   : > { %1999 = vrot.lane.b32.xlu0 %v7366_v54, %s6481_s2  ;;  %1995 = vrot.lane.b32.xlu1 %v11549_v0, %s6481_s2 }
 0x701   : > { %1991 = vrot.lane.b32.xlu0 %v7351_v39, %s6481_s2  ;;  %1993 = vrot.lane.b32.xlu1 %v7354_v41, %s6481_s2 }
 0x705   : > { %1989 = vrot.lane.b32.xlu0 %v11549_v0, %s6481_s2  ;;  %2109 = vperm.xlu1 %6030, %v5871_v59   ;;  %s11546_s2 = smov 64  }
 0x709   : > { %2104 = vperm.xlu0 %6029, %v5870_v3   ;;  %2099 = vperm.xlu1 %6030, %v5869_v62  }
 0x70d   : > { %2094 = vperm.xlu0 %6029, %v5868_v63   ;;  %6097 = vrot.lane.b32.xlu1 %v11549_v0, %s6482_s16 }
 0x711   : > { %6092 = vrot.lane.b32.xlu0 %v11549_v0, %s6482_s16 }
 0x753   : > { %v2043_v38 = vpop.permute.xlu1 %2042 }
 0x755   : > { %v2045_v40 = vpop.permute.xlu0 %2044 }
 0x756   : > { %v2067_v60 = vsel %vm788_vm12, %v2045_v40, %v6085_v29  ;;  %v2066_v35 = vsel %vm788_vm12, %v2043_v38, %v2045_v40  ;;  %v5881_v29 = vld [vmem:[%s11500_s4 + $0x88] sm:$0xff] }
 0x757   : > { %v2049_v8 = vpop.permute.xlu1 %2048 }
 0x75b   : > { %v2055_v4 = vpop.permute.xlu0 %2054  ;;  %v2051_v6 = vpop.permute.xlu1 %2050 }
 0x75c   : > { %v2069_v9 = vsel %vm788_vm12, %v2051_v6, %v6084_v21  ;;  %v2068_v31 = vsel %vm788_vm12, %v2049_v8, %v2051_v6 }
 0x75f   : > { %v2061_v5 = vpop.permute.xlu0 %2060  ;;  %v2004_v12 = vpop.permute.xlu1 %2003 }
 0x760   : > { %v2018_v46 = vsel %vm2013_vm9, %v6090_v37, %v2004_v12  ;;  %v5917_v37 = vld [vmem:[%s11500_s4 + $0xe8] sm:$0xff] }
 0x763   : > { %v2010_v13 = vpop.permute.xlu0 %2009  ;;  %v2057_v14 = vpop.permute.xlu1 %2056 }
 0x764   : > { %v2071_v51 = vsel %vm788_vm12, %v2057_v14, %v6080_v19  ;;  %v2070_v27 = vsel %vm788_vm12, %v2055_v4, %v2057_v14  ;;  %v2020_v42 = vsel %vm2013_vm9, %v6089_v32, %v2010_v13  ;;  %v5894_v32 = vld [vmem:[%s11500_s4 + $0xb0] sm:$0xff] }
 0x767   : > { %v2063_v17 = vpop.permute.xlu0 %2062  ;;  %v1998_v1 = vpop.permute.xlu1 %1997 }
 0x768   : > { %v2073_v20 = vsel %vm788_vm12, %v2063_v17, %v6079_v16  ;;  %v2072_v47 = vsel %vm788_vm12, %v2061_v5, %v2063_v17 }
 0x769   : > { %2132 = vmatprep.subr.mxu1 %v2073_v20 }
 0x76a   : > { %2133 = vmatpush1.msra.mxu1 %v2072_v47 }
 0x76b   : > { %v2006_v26 = vpop.permute.xlu0 %2005  ;;  %2134 = vmatprep.subr.mxu1 %v2071_v51  ;;  %v2012_v55 = vpop.permute.xlu1 %2011 }
 0x76c   : > { %2135 = vmatpush1.msra.mxu1 %v2070_v27  ;;  %v2021_v36 = vsel %vm2013_vm9, %v2010_v13, %v2012_v55  ;;  %v2019_v43 = vsel %vm2013_vm9, %v2004_v12, %v2006_v26 }
 0x76d   : > { %2136 = vmatprep.subr.mxu1 %v2069_v9  ;;  %v5893_v9 = vld [vmem:[%s11500_s4 + $0xa8] sm:$0xff] }
 0x76e   : > { %2137 = vmatpush1.msra.mxu1 %v2068_v31  ;;  %v5892_v31 = vld [vmem:[%s11500_s4 + $0xa0] sm:$0xff] }
 0x76f   : > { %v2000_v10 = vpop.permute.xlu0 %1999  ;;  %2138 = vmatprep.subr.mxu1 %v2067_v60  ;;  %v1996_v34 = vpop.permute.xlu1 %1995  ;;  %v5895_v60 = vld [vmem:[%s11500_s4 + $0xb8] sm:$0xff] }
 0x770   : > { %2139 = vmatpush1.msra.mxu1 %v2066_v35  ;;  %v2017_v48 = vsel %vm2013_vm9, %v1998_v1, %v2000_v10  ;;  %v2016_v50 = vsel %vm2013_vm9, %v1996_v34, %v1998_v1  ;;  %v5905_v10 = vld [vmem:[%s11500_s4 + $0xc8] sm:$0xff]  ;;  %v5904_v34 = vld [vmem:[%s11500_s4 + $0xc0] sm:$0xff]  ;;  %v5907_v35 = vld [vmem:[%s11500_s4 + $0xd8] sm:$0xff] }
 0x771   : > { %2140 = vmatprep.subr.mxu1 %v2021_v36  ;;  %v5906_v36 = vld [vmem:[%s11500_s4 + $0xd0] sm:$0xff] }
 0x772   : > { %2141 = vmatpush1.msra.mxu1 %v2020_v42  ;;  %v5916_v42 = vld [vmem:[%s11500_s4 + $0xe0] sm:$0xff] }
 0x773   : > { %v1992_v44 = vpop.permute.xlu0 %1991  ;;  %2142 = vmatprep.subr.mxu1 %v2019_v43  ;;  %v1994_v45 = vpop.permute.xlu1 %1993  ;;  %v5919_v43 = vld [vmem:[%s11500_s4 + $0xf8] sm:$0xff] }
 0x774   : > { %2143 = vmatpush1.msra.mxu1 %v2018_v46  ;;  %v2015_v52 = vsel %vm2013_vm9, %v1992_v44, %v1994_v45  ;;  %v5929_v45 = vld [vmem:[%s11500_s4 + $0x108] sm:$0xff]  ;;  %v5928_v46 = vld [vmem:[%s11500_s4 + $0x100] sm:$0xff] }
 0x775   : > { %2144 = vmatprep.subr.mxu1 %v2017_v48  ;;  %v5931_v48 = vld [vmem:[%s11500_s4 + $0x118] sm:$0xff] }
 0x776   : > { %2145 = vmatpush1.msra.mxu1 %v2016_v50  ;;  %v5930_v50 = vld [vmem:[%s11500_s4 + $0x110] sm:$0xff] }
 0x777   : > { %v1990_v11 = vpop.permute.xlu0 %1989  ;;  %2146 = vmatprep.subr.mxu1 %v2015_v52 }
 0x778   : > { %v2014_v53 = vsel %vm2013_vm9, %v1990_v11, %v1992_v44  ;;  %v5918_v44 = vld [vmem:[%s11500_s4 + $0xf0] sm:$0xff]  ;;  %vm2297_vm9 = vcmask 261120  }
 0x779   : > { %2147 = vmatpush1.msra.mxu1 %v2014_v53 }
 0x77a   : > { %2148 = vmatprep.subr.mxu1 %v7390_v30 }
 0x77b   : > { %2149 = vmatpush1.msra.mxu1 %v7376_v61 }
 0x77c   : > { %2150 = vmatprep.subr.mxu1 %v7383_v23 }
 0x77d   : > { %2151 = vmatpush1.msra.mxu1 %v7369_v56 }
 0x77e   : > { %2152 = vmatprep.subr.mxu1 %v7366_v54 }
 0x77f   : > { %2153 = vmatpush1.msra.mxu1 %v7359_v49 }
 0x780   : > { %2154 = vmatprep.subr.mxu1 %v7354_v41  ;;  %v2110_v25 = vpop.permute.xlu1 %2109 }
 0x781   : > { %2155 = vmatpush1.msra.mxu1 %v7351_v39 }
 0x782   : > { %5872 = vmatmul.mubr.msk.f32.vlgmr.msra.gmra.mxu1 %vm1259_vm0, %v5864_v15 }
 0x783   : > { %2194 = vmatprep.mubr.f32.mxu1 %v11549_v0 }
 0x784   : > { %v2105_v58 = vpop.permute.xlu0 %2104  ;;  %v2100_v2 = vpop.permute.xlu1 %2099 }
 0x786   : > { %5873 = vmatmul.mubr.msk.f32.gmra.mxu1 %vm1259_vm0, %v5865_v57 }
 0x787   : > { %2200 = vmatprep.mubr.f32.mxu1 %v11549_v0 }
 0x788   : > { %v2095_v28 = vpop.permute.xlu0 %2094  ;;  %v6098_v11 = vpop.permute.xlu1 %6097 }
 0x78a   : > { %5874 = vmatmul.mubr.msk.f32.gmra.mxu1 %vm1259_vm0, %v5866_v18 }
 0x78b   : > { %2206 = vmatprep.mubr.f32.mxu1 %v11549_v0 }
 0x78c   : > { %v6093_v52 = vpop.permute.xlu0 %6092 }
 0x78e   : > { %5875 = vmatmul.mubr.msk.f32.gmra.mxu1 %vm1259_vm0, %v5867_v22 }
 0x78f   : > { %2756 = vmatprep.mubr.f32.mxu1 %v11549_v0 }
 0x842   : > { %v2190_v24 = vpop.f32.mrf.mxu1 }
 0x843   : > { %v2191_v59 = vadd.f32 %v2190_v24, %v2095_v28 }
 0x844   : > { %v2192_v3 = vpop.f32.mrf.mxu1 }
 0x845   : > { %v2213_v62 = vmax.f32 %v2191_v59, 0.0  ;;  %v2193_v63 = vadd.f32 %v2192_v3, %v2095_v28  ;;  %v6094_v59 = vunpack.i.l.bf16 %v6093_v52 }
 0x846   : > { %v2196_v7 = vpop.f32.mrf.mxu1 }
 0x847   : > { %v7471_v33 = vadd.f32 %v2213_v62, %v7351_v39  ;;  %v2214_v38 = vmax.f32 %v2193_v63, 0.0  ;;  %v2197_v40 = vadd.f32 %v2196_v7, %v2100_v2  ;;  %v6095_v63 = vunpack.i.h.bf16 %v6093_v52 }
 0x848   : > { %v2198_v8 = vpop.f32.mrf.mxu1 }
 0x849   : > { %v7474_v4 = vadd.f32 %v2214_v38, %v7354_v41  ;;  %v2215_v6 = vmax.f32 %v2197_v40, 0.0  ;;  %v2199_v5 = vadd.f32 %v2198_v8, %v2100_v2  ;;  %2326 = vrot.lane.b32.xlu0 %v7471_v33, %s6482_s16  ;;  %v6100_v38 = vunpack.i.h.bf16 %v6098_v11 }
 0x84a   : > { %v2202_v12 = vpop.f32.mrf.mxu1  ;;  %v6099_v40 = vunpack.i.l.bf16 %v6098_v11 }
 0x84b   : > { %v7479_v13 = vadd.f32 %v2215_v6, %v7359_v49  ;;  %v2216_v14 = vmax.f32 %v2199_v5, 0.0  ;;  %v2203_v16 = vadd.f32 %v2202_v12, %v2105_v58  ;;  %2328 = vrot.lane.b32.xlu1 %v7474_v4, %s6482_s16 }
 0x84c   : > { %v2204_v39 = vpop.f32.mrf.mxu1 }
 0x84d   : > { %v2217_v17 = vmax.f32 %v2203_v16, 0.0  ;;  %v2205_v1 = vadd.f32 %v2204_v39, %v2105_v58  ;;  %2332 = vrot.lane.b32.xlu0 %v7479_v13, %s6482_s16  ;;  %v7486_v19 = vadd.f32 %v2216_v14, %v7366_v54 }
 0x84e   : > { %v2208_v41 = vpop.f32.mrf.mxu1 }
 0x84f   : > { %v7489_v20 = vadd.f32 %v2217_v17, %v7369_v56  ;;  %v2218_v49 = vmax.f32 %v2205_v1, 0.0  ;;  %v2209_v47 = vadd.f32 %v2208_v41, %v2110_v25 }
 0x850   : > { %v2210_v21 = vpop.f32.mrf.mxu1 }
 0x851   : > { %v2219_v51 = vmax.f32 %v2209_v47, 0.0  ;;  %2338 = vrot.lane.b32.xlu1 %v7489_v20, %s6482_s16  ;;  %2334 = vrot.lane.b32.xlu0 %v7486_v19, %s6482_s16  ;;  %v7496_v26 = vadd.f32 %v2218_v49, %v7383_v23  ;;  %v2211_v54 = vadd.f32 %v2210_v21, %v2110_v25  ;;  %v5883_v23 = vld [vmem:[%s11500_s4 + $0x98] sm:$0xff] }
 0x853   : > { %v7499_v55 = vadd.f32 %v2219_v51, %v7376_v61  ;;  %v2220_v56 = vmax.f32 %v2211_v54, 0.0  ;;  %v5882_v61 = vld [vmem:[%s11500_s4 + $0x90] sm:$0xff] }
 0x855   : > { %2344 = vrot.lane.b32.xlu1 %v7499_v55, %s6482_s16  ;;  %2340 = vrot.lane.b32.xlu0 %v7496_v26, %s6482_s16  ;;  %v7508_v27 = vadd.f32 %v2220_v56, %v7390_v30  ;;  %v5880_v30 = vld [vmem:[%s11500_s4 + $0x80] sm:$0xff] }
 0x859   : > { %2293 = vrot.lane.b32.xlu1 %v7499_v55, %s6483_s23  ;;  %2287 = vrot.lane.b32.xlu0 %v7489_v20, %s6483_s23 }
 0x85d   : > { %2346 = vrot.lane.b32.xlu1 %v7508_v27, %s6482_s16  ;;  %2281 = vrot.lane.b32.xlu0 %v7479_v13, %s6483_s23  ;;  %s11886_s16 = smov 118  }
 0x861   : > { %6102 = vrot.lane.b32.xlu1 %v11549_v0, %s6483_s23  ;;  %2295 = vrot.lane.b32.xlu0 %v7508_v27, %s6483_s23 }
 0x865   : > { %2289 = vrot.lane.b32.xlu1 %v7496_v26, %s6483_s23  ;;  %6107 = vrot.lane.b32.xlu0 %v11549_v0, %s6483_s23 }
 0x869   : > { %2283 = vrot.lane.b32.xlu1 %v7486_v19, %s6483_s23  ;;  %2277 = vrot.lane.b32.xlu0 %v7474_v4, %s6483_s23 }
 0x86d   : > { %2275 = vrot.lane.b32.xlu1 %v7471_v33, %s6483_s23  ;;  %2388 = vperm.xlu0 %6029, %v5882_v61   ;;  %s11887_s23 = smov 117  }
 0x871   : > { %2393 = vperm.xlu1 %6030, %v5883_v23   ;;  %2378 = vperm.xlu0 %6029, %v5880_v30  }
 0x875   : > { %2383 = vperm.xlu1 %6030, %v5881_v29   ;;  %6117 = vrot.lane.b32.xlu0 %v11549_v0, %s11546_s2 }
 0x879   : > { %6112 = vrot.lane.b32.xlu1 %v11549_v0, %s11546_s2  ;;  %6122 = vrot.lane.b32.xlu0 %v11549_v0, %s11546_s2 }
 0x87d   : > { %6127 = vrot.lane.b32.xlu1 %v11549_v0, %s11546_s2  ;;  %2667 = vperm.xlu0 %6029, %v5893_v9   ;;  %s11890_s2 = smov 114  }
 0x881   : > { %2662 = vperm.xlu1 %6030, %v5892_v31   ;;  %2677 = vperm.xlu0 %6029, %v5895_v60  }
 0x885   : > { %2672 = vperm.xlu1 %6030, %v5894_v32   ;;  %2842 = vperm.xlu0 %6029, %v5905_v10  }
 0x889   : > { %2837 = vperm.xlu1 %6030, %v5904_v34   ;;  %2852 = vperm.xlu0 %6029, %v5907_v35   ;;  %v5876_v35 = vld [vmem:[%s11827_s3 + $0x80] sm:$0xff] }
 0x88d   : > { %2847 = vperm.xlu1 %6030, %v5906_v36   ;;  %3005 = vperm.xlu0 %6029, %v5917_v37  }
 0x891   : > { %3000 = vperm.xlu1 %6030, %v5916_v42   ;;  %3015 = vperm.xlu0 %6029, %v5919_v43   ;;  %v5877_v42 = vld [vmem:[%s11827_s3 + $0x88] sm:$0xff] }
 0x895   : > { %3010 = vperm.xlu1 %6030, %v5918_v44   ;;  %3168 = vperm.xlu0 %6029, %v5929_v45   ;;  %v5878_v45 = vld [vmem:[%s11827_s3 + $0x90] sm:$0xff] }
 0x899   : > { %3163 = vperm.xlu1 %6030, %v5928_v46   ;;  %3178 = vperm.xlu0 %6029, %v5931_v48  }
 0x89d   : > { %3173 = vperm.xlu1 %6030, %v5930_v50   ;;  %6137 = vrot.lane.b32.xlu0 %v11549_v0, %s11824_s14  ;;  %v5879_v50 = vld [vmem:[%s11827_s3 + $0x98] sm:$0xff] }
 0x8a1   : > { %6132 = vrot.lane.b32.xlu1 %v11549_v0, %s11824_s14  ;;  %6147 = vrot.lane.b32.xlu0 %v11549_v0, %s11822_s30 }
 0x8a5   : > { %6142 = vrot.lane.b32.xlu1 %v11549_v0, %s11822_s30  ;;  %6157 = vrot.lane.b32.xlu0 %v11549_v0, %s11823_s12 }
 0x8a9   : > { %6152 = vrot.lane.b32.xlu1 %v11549_v0, %s11823_s12  ;;  %6167 = vrot.lane.b32.xlu0 %v11549_v0, %s11828_s25 }
 0x8ad   : > { %6162 = vrot.lane.b32.xlu1 %v11549_v0, %s11828_s25  ;;  %6177 = vrot.lane.b32.xlu0 %v11549_v0, %s11831_s13 }
 0x8b1   : > { %6172 = vrot.lane.b32.xlu1 %v11549_v0, %s11831_s13  ;;  %6187 = vrot.lane.b32.xlu0 %v11549_v0, %s11832_s0 }
 0x8b5   : > { %6182 = vrot.lane.b32.xlu1 %v11549_v0, %s11832_s0  ;;  %6197 = vrot.lane.b32.xlu0 %v11549_v0, %s11833_s19 }
 0x8b9   : > { %6192 = vrot.lane.b32.xlu1 %v11549_v0, %s11833_s19  ;;  %6207 = vrot.lane.b32.xlu0 %v11549_v0, %s11829_s24 }
 0x8bb   : > { %v2327_v53 = vpop.permute.xlu0 %2326 }
 0x8bd   : > { %6202 = vrot.lane.b32.xlu1 %v11549_v0, %s11829_s24  ;;  %6217 = vrot.lane.b32.xlu0 %v11549_v0, %s11824_s14  ;;  %v2329_v15 = vpop.permute.xlu1 %2328 }
 0x8be   : > { %v2351_v17 = vsel %vm1259_vm0, %v2329_v15, %v6100_v38  ;;  %v2350_v47 = vsel %vm1259_vm0, %v2327_v53, %v2329_v15 }
 0x8bf   : > { %v2333_v57 = vpop.permute.xlu0 %2332 }
 0x8c1   : > { %6212 = vrot.lane.b32.xlu1 %v11549_v0, %s11824_s14  ;;  %6227 = vrot.lane.b32.xlu0 %v11549_v0, %s11822_s30 }
 0x8c3   : > { %v2335_v18 = vpop.permute.xlu0 %2334  ;;  %v2339_v22 = vpop.permute.xlu1 %2338 }
 0x8c4   : > { %v2353_v14 = vsel %vm1259_vm0, %v2335_v18, %v6099_v40  ;;  %v2352_v39 = vsel %vm1259_vm0, %v2333_v57, %v2335_v18 }
 0x8c5   : > { %6222 = vrot.lane.b32.xlu1 %v11549_v0, %s11822_s30  ;;  %6237 = vrot.lane.b32.xlu0 %v11549_v0, %s11823_s12 }
 0x8c7   : > { %v2341_v58 = vpop.permute.xlu0 %2340  ;;  %v2345_v25 = vpop.permute.xlu1 %2344 }
 0x8c8   : > { %v2355_v8 = vsel %vm1259_vm0, %v2341_v58, %v6095_v63  ;;  %v2354_v12 = vsel %vm1259_vm0, %v2339_v22, %v2341_v58 }
 0x8c9   : > { %6232 = vrot.lane.b32.xlu1 %v11549_v0, %s11823_s12  ;;  %6247 = vrot.lane.b32.xlu0 %v11549_v0, %s11828_s25 }
 0x8cb   : > { %v2288_v28 = vpop.permute.xlu0 %2287  ;;  %v2294_v24 = vpop.permute.xlu1 %2293 }
 0x8cd   : > { %6242 = vrot.lane.b32.xlu1 %v11549_v0, %s11828_s25  ;;  %6257 = vrot.lane.b32.xlu0 %v11549_v0, %s11831_s13 }
 0x8cf   : > { %v2282_v3 = vpop.permute.xlu0 %2281  ;;  %v2347_v62 = vpop.permute.xlu1 %2346 }
 0x8d0   : > { %v2357_v2 = vsel %vm1259_vm0, %v2347_v62, %v6094_v59  ;;  %v2356_v7 = vsel %vm1259_vm0, %v2345_v25, %v2347_v62 }
 0x8d1   : > { %2416 = vmatprep.subr.mxu0 %v2357_v2  ;;  %6252 = vrot.lane.b32.xlu1 %v11549_v0, %s11831_s13 }
 0x8d2   : > { %2417 = vmatpush1.msra.mxu0 %v2356_v7  ;;  %6267 = vrot.lane.b32.xlu0 %v11549_v0, %s11832_s0 }
 0x8d3   : > { %v2296_v6 = vpop.permute.xlu0 %2295  ;;  %2418 = vmatprep.subr.mxu0 %v2355_v8  ;;  %v6103_v5 = vpop.permute.xlu1 %6102 }
 0x8d4   : > { %2419 = vmatpush1.msra.mxu0 %v2354_v12  ;;  %v6104_v16 = vunpack.i.l.bf16 %v6103_v5  ;;  %v6105_v1 = vunpack.i.h.bf16 %v6103_v5  ;;  %v2305_v21 = vsel %vm2297_vm9, %v2294_v24, %v2296_v6 }
 0x8d5   : > { %2420 = vmatprep.subr.mxu0 %v2353_v14  ;;  %6262 = vrot.lane.b32.xlu1 %v11549_v0, %s11832_s0 }
 0x8d6   : > { %2421 = vmatpush1.msra.mxu0 %v2352_v39  ;;  %6277 = vrot.lane.b32.xlu0 %v11549_v0, %s11833_s19  ;;  %v2304_v54 = vsel %vm2297_vm9, %v6104_v16, %v2294_v24  ;;  %v2302_v23 = vsel %vm2297_vm9, %v6105_v1, %v2288_v28 }
 0x8d7   : > { %v6108_v41 = vpop.permute.xlu0 %6107  ;;  %v2290_v49 = vpop.permute.xlu1 %2289  ;;  %2422 = vmatprep.subr.mxu0 %v2351_v17 }
 0x8d8   : > { %2423 = vmatpush1.msra.mxu0 %v2350_v47  ;;  %v6109_v51 = vunpack.i.l.bf16 %v6108_v41  ;;  %v2303_v56 = vsel %vm2297_vm9, %v2288_v28, %v2290_v49  ;;  %v6110_v9 = vunpack.i.h.bf16 %v6108_v41 }
 0x8d9   : > { %2424 = vmatprep.subr.mxu0 %v2305_v21  ;;  %6272 = vrot.lane.b32.xlu1 %v11549_v0, %s11833_s19 }
 0x8da   : > { %2425 = vmatpush1.msra.mxu0 %v2304_v54  ;;  %6287 = vrot.lane.b32.xlu0 %v11549_v0, %s11829_s24  ;;  %v2300_v29 = vsel %vm2297_vm9, %v6109_v51, %v2282_v3 }
 0x8db   : > { %v2284_v61 = vpop.permute.xlu1 %2283  ;;  %2426 = vmatprep.subr.mxu0 %v2303_v56  ;;  %v2278_v31 = vpop.permute.xlu0 %2277 }
 0x8dc   : > { %2427 = vmatpush1.msra.mxu0 %v2302_v23  ;;  %v2301_v30 = vsel %vm2297_vm9, %v2282_v3, %v2284_v61 }
 0x8dd   : > { %2428 = vmatprep.subr.mxu0 %v2301_v30  ;;  %6282 = vrot.lane.b32.xlu1 %v11549_v0, %s11829_s24 }
 0x8de   : > { %2429 = vmatpush1.msra.mxu0 %v2300_v29  ;;  %6297 = vrot.lane.b32.xlu0 %v11549_v0, %s11830_s22 }
 0x8df   : > { %v2276_v60 = vpop.permute.xlu1 %2275 }
 0x8e0   : > { %v2299_v32 = vsel %vm2297_vm9, %v2276_v60, %v2278_v31  ;;  %v2298_v10 = vsel %vm2297_vm9, %v6110_v9, %v2276_v60 }
 0x8e1   : > { %2430 = vmatprep.subr.mxu0 %v2299_v32  ;;  %6292 = vrot.lane.b32.xlu1 %v11549_v0, %s11830_s22 }
 0x8e2   : > { %2431 = vmatpush1.msra.mxu0 %v2298_v10 }
 0x8e3   : > { %2432 = vmatprep.subr.mxu0 %v7508_v27 }
 0x8e4   : > { %2433 = vmatpush1.msra.mxu0 %v7499_v55 }
 0x8e5   : > { %2434 = vmatprep.subr.mxu0 %v7496_v26 }
 0x8e6   : > { %2435 = vmatpush1.msra.mxu0 %v7489_v20 }
 0x8e7   : > { %2436 = vmatprep.subr.mxu0 %v7486_v19 }
 0x8e8   : > { %v7677_v34 = vpop.permute.xlu0 %2388  ;;  %2437 = vmatpush1.msra.mxu0 %v7479_v13 }
 0x8e9   : > { %2438 = vmatprep.subr.mxu0 %v7474_v4 }
 0x8ea   : > { %2439 = vmatpush1.msra.mxu0 %v7471_v33 }
 0x8eb   : > { %5884 = vmatmul.mubr.msk.f32.vlgmr.msra.gmra.mxu0 %vm1259_vm0, %v5876_v35  ;;  %2875 = vmatprep.subr.mxu0 %v11549_v0 }
 0x8ec   : > { %v7687_v36 = vpop.permute.xlu0 %2378  ;;  %v7689_v37 = vpop.permute.xlu1 %2393  ;;  %2478 = vmatprep.mubr.f32.mxu0 %v11549_v0 }
 0x8ef   : > { %5885 = vmatmul.mubr.msk.f32.gmra.mxu0 %vm1259_vm0, %v5877_v42  ;;  %v4301_v42 = vld [vmem:[%s11502_s6] sm:$0xff] }
 0x8f0   : > { %v7696_v43 = vpop.permute.xlu0 %6117  ;;  %v7698_v44 = vpop.permute.xlu1 %2383  ;;  %2484 = vmatprep.mubr.f32.mxu0 %v11549_v0 }
 0x8f3   : > { %5886 = vmatmul.mubr.msk.f32.gmra.mxu0 %vm1259_vm0, %v5878_v45 }
 0x8f4   : > { %v7705_v46 = vpop.permute.xlu0 %6122  ;;  %v7707_v48 = vpop.permute.xlu1 %6112  ;;  %2490 = vmatprep.mubr.f32.mxu0 %v11549_v0 }
 0x8f7   : > { %5887 = vmatmul.mubr.msk.f32.gmra.mxu0 %vm1259_vm0, %v5879_v50 }
 0x8f8   : > { %v7714_v52 = vpop.permute.xlu0 %2667  ;;  %v7716_v11 = vpop.permute.xlu1 %6127  ;;  %2931 = vmatprep.mubr.f32.mxu0 %v11549_v0  ;;  %v11861_v0 = vmov 0.0  }
 0x8fc   : > { %v7719_v53 = vpop.permute.xlu0 %2677  ;;  %v7721_v15 = vpop.permute.xlu1 %2662 }
 0x900   : > { %v7723_v57 = vpop.permute.xlu0 %2842  ;;  %v7725_v18 = vpop.permute.xlu1 %2672 }
 0x904   : > { %v7727_v22 = vpop.permute.xlu0 %2852  ;;  %v7729_v58 = vpop.permute.xlu1 %2837 }
 0x908   : > { %v7731_v25 = vpop.permute.xlu0 %3005  ;;  %v7733_v28 = vpop.permute.xlu1 %2847 }
 0x90c   : > { %v7735_v24 = vpop.permute.xlu0 %3015  ;;  %v7737_v59 = vpop.permute.xlu1 %3000 }
 0x910   : > { %v7739_v3 = vpop.permute.xlu0 %3168  ;;  %v7741_v62 = vpop.permute.xlu1 %3010 }
 0x914   : > { %v7743_v63 = vpop.permute.xlu0 %3178  ;;  %v7745_v2 = vpop.permute.xlu1 %3163 }
 0x918   : > { %v7747_v7 = vpop.permute.xlu1 %3173  ;;  %v7749_v38 = vpop.permute.xlu0 %6137 }
 0x919   : > { %11834 = vst [vmem:[#allocation11_spill] sm:$0xff] %v7749_v38 }
 0x91c   : > { %v7751_v40 = vpop.permute.xlu1 %6132  ;;  %v7753_v8 = vpop.permute.xlu0 %6147 }
 0x91d   : > { %11835 = vst [vmem:[#allocation12_spill] sm:$0xff] %v7753_v8 }
 0x920   : > { %v7755_v6 = vpop.permute.xlu1 %6142  ;;  %v7757_v5 = vpop.permute.xlu0 %6157 }
 0x921   : > { %11836 = vst [vmem:[#allocation13_spill] sm:$0xff] %v7757_v5 }
 0x924   : > { %v7759_v12 = vpop.permute.xlu1 %6152  ;;  %v7761_v14 = vpop.permute.xlu0 %6167 }
 0x925   : > { %11837 = vst [vmem:[#allocation14_spill] sm:$0xff] %v7761_v14 }
 0x928   : > { %v7763_v16 = vpop.permute.xlu1 %6162  ;;  %v7765_v39 = vpop.permute.xlu0 %6177 }
 0x929   : > { %11838 = vst [vmem:[#allocation15_spill] sm:$0xff] %v7765_v39 }
 0x92c   : > { %v7767_v17 = vpop.permute.xlu1 %6172  ;;  %v7769_v1 = vpop.permute.xlu0 %6187 }
 0x92d   : > { %11839 = vst [vmem:[#allocation16_spill] sm:$0xff] %v7769_v1 }
 0x930   : > { %v7771_v41 = vpop.permute.xlu1 %6182  ;;  %v7773_v49 = vpop.permute.xlu0 %6197 }
 0x931   : > { %11840 = vst [vmem:[#allocation17_spill] sm:$0xff] %v7771_v41  ;;  %11841 = vst [vmem:[#allocation18_spill] sm:$0xff] %v7773_v49 }
 0x934   : > { %v7775_v47 = vpop.permute.xlu1 %6192  ;;  %v7777_v21 = vpop.permute.xlu0 %6207 }
 0x935   : > { %11842 = vst [vmem:[#allocation19_spill] sm:$0xff] %v7775_v47  ;;  %11843 = vst [vmem:[#allocation20_spill] sm:$0xff] %v7777_v21 }
 0x938   : > { %v7779_v51 = vpop.permute.xlu1 %6202  ;;  %v7781_v54 = vpop.permute.xlu0 %6217 }
 0x939   : > { %11844 = vst [vmem:[#allocation21_spill] sm:$0xff] %v7779_v51  ;;  %11845 = vst [vmem:[#allocation22_spill] sm:$0xff] %v7781_v54  ;;  %6307 = vrot.lane.b32.xlu0 %v7781_v54, %s11830_s22 }
 0x93c   : > { %v7785_v23 = vpop.permute.xlu1 %6212  ;;  %v7787_v30 = vpop.permute.xlu0 %6227 }
 0x93d   : > { %11846 = vst [vmem:[#allocation23_spill] sm:$0xff] %v7785_v23  ;;  %11847 = vst [vmem:[#allocation24_spill] sm:$0xff] %v7787_v30  ;;  %6302 = vrot.lane.b32.xlu1 %v7785_v23, %s11830_s22  ;;  %6317 = vrot.lane.b32.xlu0 %v7787_v30, %s11830_s22 }
 0x940   : > { %v7795_v32 = vpop.permute.xlu1 %6222  ;;  %v7797_v10 = vpop.permute.xlu0 %6237 }
 0x941   : > { %11848 = vst [vmem:[#allocation25_spill] sm:$0xff] %v7795_v32  ;;  %11849 = vst [vmem:[#allocation26_spill] sm:$0xff] %v7797_v10  ;;  %6312 = vrot.lane.b32.xlu1 %v7795_v32, %s11830_s22  ;;  %6327 = vrot.lane.b32.xlu0 %v7797_v10, %s11830_s22 }
 0x944   : > { %v7807_v31 = vpop.permute.xlu1 %6232  ;;  %v7809_v56 = vpop.permute.xlu0 %6247 }
 0x945   : > { %11850 = vst [vmem:[#allocation27_spill] sm:$0xff] %v7807_v31  ;;  %11851 = vst [vmem:[#allocation28_spill] sm:$0xff] %v7809_v56  ;;  %6322 = vrot.lane.b32.xlu1 %v7807_v31, %s11830_s22  ;;  %6337 = vrot.lane.b32.xlu0 %v7809_v56, %s11830_s22 }
 0x948   : > { %v7819_v50 = vpop.permute.xlu1 %6242  ;;  %v7821_v29 = vpop.permute.xlu0 %6257 }
 0x949   : > { %11852 = vst [vmem:[#allocation29_spill] sm:$0xff] %v7819_v50  ;;  %11853 = vst [vmem:[#allocation30_spill] sm:$0xff] %v7821_v29  ;;  %6332 = vrot.lane.b32.xlu1 %v7819_v50, %s11830_s22  ;;  %6347 = vrot.lane.b32.xlu0 %v7821_v29, %s11830_s22  ;;  %v6130_v50 = vunpack.i.h.bf16 %v7716_v11 }
 0x94c   : > { %v7831_v45 = vpop.permute.xlu1 %6252  ;;  %v7833_v9 = vpop.permute.xlu0 %6267 }
 0x94d   : > { %11854 = vst [vmem:[#allocation31_spill] sm:$0xff] %v7831_v45  ;;  %11855 = vst [vmem:[#allocation32_spill] sm:$0xff] %v7833_v9  ;;  %6342 = vrot.lane.b32.xlu1 %v7831_v45, %s11830_s22  ;;  %6357 = vrot.lane.b32.xlu0 %v7833_v9, %s11830_s22 }
 0x950   : > { %v7843_v35 = vpop.permute.xlu1 %6262  ;;  %v7845_v21 = vpop.permute.xlu0 %6277 }
 0x951   : > { %11856 = vst [vmem:[#allocation33_spill] sm:$0xff] %v7843_v35  ;;  %11857 = vst [vmem:[#allocation34_spill] sm:$0xff] %v7845_v21  ;;  %6352 = vrot.lane.b32.xlu1 %v7843_v35, %s11830_s22  ;;  %6367 = vrot.lane.b32.xlu0 %v7845_v21, %s11830_s22 }
 0x954   : > { %v7855_v61 = vpop.permute.xlu1 %6272  ;;  %v7857_v1 = vpop.permute.xlu0 %6287 }
 0x955   : > { %11858 = vst [vmem:[#allocation35_spill] sm:$0xff] %v7855_v61  ;;  %11859 = vst [vmem:[#allocation36_spill] sm:$0xff] %v7857_v1  ;;  %6362 = vrot.lane.b32.xlu1 %v7855_v61, %s11830_s22  ;;  %6377 = vrot.lane.b32.xlu0 %v7857_v1, %s11830_s22  ;;  %v6129_v61 = vunpack.i.l.bf16 %v7716_v11  ;;  %v6119_v11 = vunpack.i.l.bf16 %v7696_v43 }
 0x958   : > { %v7867_v60 = vpop.permute.xlu1 %6282 }
 0x959   : > { %11860 = vst [vmem:[#allocation37_spill] sm:$0xff] %v7867_v60  ;;  %6372 = vrot.lane.b32.xlu1 %v7867_v60, %s11830_s22  ;;  %6382 = vrot.lane.b32.xlu0 %v11861_v0, %s11610_s15 }
 0x95d   : > { %4304 = vperm.xlu1 %6030, %v4301_v42  }
 0x961   : > { %6387 = vrot.lane.b32.xlu1 %v11861_v0, %s11610_s15  ;;  %s11891_s15 = smov 113  }
 0x9ab   : > { %v2474_v14 = vpop.f32.mrf.mxu0 }
 0x9ac   : > { %v2475_v39 = vadd.f32 %v2474_v14, %v7687_v36 }
 0x9ad   : > { %v2476_v5 = vpop.f32.mrf.mxu0 }
 0x9ae   : > { %v2497_v49 = vmax.f32 %v2475_v39, 0.0  ;;  %v2477_v1 = vadd.f32 %v2476_v5, %v7687_v36 }
 0x9af   : > { %v2480_v8 = vpop.f32.mrf.mxu0 }
 0x9b0   : > { %v7887_v21 = vadd.f32 %v2497_v49, %v7471_v33  ;;  %v2498_v38 = vmax.f32 %v2477_v1, 0.0  ;;  %v2481_v9 = vadd.f32 %v2480_v8, %v7698_v44 }
 0x9b1   : > { %v2482_v29 = vpop.f32.mrf.mxu0 }
 0x9b2   : > { %v2483_v42 = vadd.f32 %v2482_v29, %v7698_v44  ;;  %2610 = vrot.lane.b32.xlu1 %v7887_v21, %s11862_s1  ;;  %2559 = vrot.lane.b32.xlu0 %v7887_v21, %s11862_s1  ;;  %v7896_v39 = vadd.f32 %v2498_v38, %v7474_v4  ;;  %v2499_v36 = vmax.f32 %v2481_v9, 0.0 }
 0x9b3   : > { %v2486_v14 = vpop.f32.mrf.mxu0 }
 0x9b4   : > { %v2500_v5 = vmax.f32 %v2483_v42, 0.0  ;;  %v2487_v33 = vadd.f32 %v2486_v14, %v7677_v34  ;;  %v7904_v44 = vadd.f32 %v2499_v36, %v7479_v13 }
 0x9b5   : > { %v2488_v1 = vpop.f32.mrf.mxu0 }
 0x9b6   : > { %2561 = vrot.lane.b32.xlu1 %v7896_v39, %s11862_s1  ;;  %2612 = vrot.lane.b32.xlu0 %v7896_v39, %s11862_s1  ;;  %v7907_v8 = vadd.f32 %v2500_v5, %v7486_v19  ;;  %v2501_v49 = vmax.f32 %v2487_v33, 0.0  ;;  %v2489_v29 = vadd.f32 %v2488_v1, %v7677_v34 }
 0x9b7   : > { %v2492_v4 = vpop.f32.mrf.mxu0 }
 0x9b8   : > { %v7914_v38 = vadd.f32 %v2501_v49, %v7489_v20  ;;  %v2493_v9 = vadd.f32 %v2492_v4, %v7689_v37  ;;  %v2502_v13 = vmax.f32 %v2489_v29, 0.0 }
 0x9b9   : > { %v2494_v42 = vpop.f32.mrf.mxu0 }
 0x9ba   : > { %2567 = vrot.lane.b32.xlu1 %v7907_v8, %s11862_s1  ;;  %2565 = vrot.lane.b32.xlu0 %v7904_v44, %s11862_s1  ;;  %v2503_v19 = vmax.f32 %v2493_v9, 0.0  ;;  %v7927_v20 = vadd.f32 %v2502_v13, %v7496_v26  ;;  %v2495_v14 = vadd.f32 %v2494_v42, %v7689_v37  ;;  %v7950_v37 = vpop.permute.xlu0 %6297 }
 0x9bb   : > { %11864 = vst [vmem:[#allocation39_spill] sm:$0xff] %v7950_v37 }
 0x9bc   : > { %v7930_v34 = vadd.f32 %v2503_v19, %v7499_v55  ;;  %v2504_v36 = vmax.f32 %v2495_v14, 0.0  ;;  %v7948_v55 = vpop.permute.xlu1 %6292 }
 0x9bd   : > { %11863 = vst [vmem:[#allocation38_spill] sm:$0xff] %v7948_v55 }
 0x9be   : > { %2571 = vrot.lane.b32.xlu1 %v7914_v38, %s11862_s1  ;;  %2616 = vrot.lane.b32.xlu0 %v7904_v44, %s11862_s1  ;;  %v7942_v26 = vadd.f32 %v2504_v36, %v7508_v27  ;;  %v7954_v33 = vpop.permute.xlu0 %6307 }
 0x9bf   : > { %11866 = vst [vmem:[#allocation41_spill] sm:$0xff] %v7954_v33 }
 0x9c0   : > { %v7952_v5 = vpop.permute.xlu1 %6302 }
 0x9c1   : > { %11865 = vst [vmem:[#allocation40_spill] sm:$0xff] %v7952_v5 }
 0x9c2   : > { %2622 = vrot.lane.b32.xlu1 %v7914_v38, %s11862_s1  ;;  %2618 = vrot.lane.b32.xlu0 %v7907_v8, %s11862_s1  ;;  %v7958_v49 = vpop.permute.xlu0 %6317 }
 0x9c3   : > { %11868 = vst [vmem:[#allocation43_spill] sm:$0xff] %v7958_v49 }
 0x9c4   : > { %v7956_v1 = vpop.permute.xlu1 %6312 }
 0x9c5   : > { %11867 = vst [vmem:[#allocation42_spill] sm:$0xff] %v7956_v1 }
 0x9c6   : > { %2577 = vrot.lane.b32.xlu1 %v7930_v34, %s11862_s1  ;;  %2573 = vrot.lane.b32.xlu0 %v7927_v20, %s11862_s1  ;;  %v7962_v4 = vpop.permute.xlu0 %6327 }
 0x9c7   : > { %11870 = vst [vmem:[#allocation45_spill] sm:$0xff] %v7962_v4 }
 0x9c8   : > { %v7960_v27 = vpop.permute.xlu1 %6322 }
 0x9c9   : > { %11869 = vst [vmem:[#allocation44_spill] sm:$0xff] %v7960_v27 }
 0x9ca   : > { %2628 = vrot.lane.b32.xlu1 %v7930_v34, %s11862_s1  ;;  %2624 = vrot.lane.b32.xlu0 %v7927_v20, %s11862_s1  ;;  %v7966_v9 = vpop.permute.xlu0 %6337 }
 0x9cb   : > { %11872 = vst [vmem:[#allocation47_spill] sm:$0xff] %v7966_v9 }
 0x9cc   : > { %v7964_v29 = vpop.permute.xlu1 %6332 }
 0x9cd   : > { %11871 = vst [vmem:[#allocation46_spill] sm:$0xff] %v7964_v29 }
 0x9ce   : > { %2630 = vrot.lane.b32.xlu1 %v7942_v26, %s11862_s1  ;;  %2579 = vrot.lane.b32.xlu0 %v7942_v26, %s11862_s1  ;;  %v7970_v19 = vpop.permute.xlu0 %6347  ;;  %s11888_s1 = smov 116  }
 0x9cf   : > { %11874 = vst [vmem:[#allocation49_spill] sm:$0xff] %v7970_v19 }
 0x9d0   : > { %v7968_v13 = vpop.permute.xlu1 %6342 }
 0x9d1   : > { %11873 = vst [vmem:[#allocation48_spill] sm:$0xff] %v7968_v13 }
 0x9d2   : > { %v7974_v14 = vpop.permute.xlu0 %6357 }
 0x9d3   : > { %11876 = vst [vmem:[#allocation51_spill] sm:$0xff] %v7974_v14 }
 0x9d4   : > { %v7972_v42 = vpop.permute.xlu1 %6352 }
 0x9d5   : > { %11875 = vst [vmem:[#allocation50_spill] sm:$0xff] %v7972_v42 }
 0x9d6   : > { %v7978_v33 = vpop.permute.xlu0 %6367 }
 0x9d7   : > { %11878 = vst [vmem:[#allocation53_spill] sm:$0xff] %v7978_v33 }
 0x9d8   : > { %v7976_v36 = vpop.permute.xlu1 %6362 }
 0x9d9   : > { %11877 = vst [vmem:[#allocation52_spill] sm:$0xff] %v7976_v36 }
 0x9da   : > { %v7982_v5 = vpop.permute.xlu0 %6377 }
 0x9db   : > { %11880 = vst [vmem:[#allocation55_spill] sm:$0xff] %v7982_v5  ;;  %v6124_v5 = vunpack.i.l.bf16 %v7705_v46 }
 0x9dc   : > { %v7980_v49 = vpop.permute.xlu1 %6372 }
 0x9dd   : > { %11879 = vst [vmem:[#allocation54_spill] sm:$0xff] %v7980_v49 }
 0x9de   : > { %v7986_v29 = vpop.permute.xlu0 %6382 }
 0x9df   : > { %11882 = vst [vmem:[#allocation57_spill] sm:$0xff] %v7986_v29  ;;  %v6125_v29 = vunpack.i.h.bf16 %v7705_v46 }
 0x9e0   : > { %v7984_v4 = vpop.permute.xlu1 %4304 }
 0x9e1   : > { %11881 = vst [vmem:[#allocation56_spill] sm:$0xff] %v7984_v4 }
 0x9e4   : > { %v7988_v9 = vpop.permute.xlu1 %6387 }
 0x9e5   : > { %11883 = vst [vmem:[#allocation58_spill] sm:$0xff] %v7988_v9 }
 0xa24   : > { %v2611_v13 = vpop.permute.xlu1 %2610  ;;  %v2560_v19 = vpop.permute.xlu0 %2559 }
 0xa28   : > { %v2562_v1 = vpop.permute.xlu1 %2561  ;;  %v2613_v42 = vpop.permute.xlu0 %2612 }
 0xa2c   : > { %v2568_v27 = vpop.permute.xlu1 %2567  ;;  %v2566_v14 = vpop.permute.xlu0 %2565 }
 0xa30   : > { %v2572_v37 = vpop.permute.xlu1 %2571  ;;  %v2617_v36 = vpop.permute.xlu0 %2616 }
 0xa34   : > { %v2623_v56 = vpop.permute.xlu1 %2622  ;;  %v2619_v33 = vpop.permute.xlu0 %2618 }
 0xa35   : > { %v2637_v31 = vsel %vm2581_vm10, %v2619_v33, %v6129_v61  ;;  %v2636_v46 = vsel %vm2581_vm10, %v2617_v36, %v2619_v33  ;;  %v5890_v33 = vld [vmem:[%s11827_s3 + $0xb0] sm:$0xff] }
 0xa38   : > { %v2578_v10 = vpop.permute.xlu1 %2577  ;;  %v2574_v49 = vpop.permute.xlu0 %2573 }
 0xa3c   : > { %v2629_v30 = vpop.permute.xlu1 %2628  ;;  %v2625_v4 = vpop.permute.xlu0 %2624 }
 0xa3d   : > { %v2639_v35 = vsel %vm2581_vm10, %v2625_v4, %v6125_v29  ;;  %v2638_v45 = vsel %vm2581_vm10, %v2623_v56, %v2625_v4 }
 0xa40   : > { %v2631_v54 = vpop.permute.xlu1 %2630  ;;  %v2580_v32 = vpop.permute.xlu0 %2579 }
 0xa41   : > { %v2641_v9 = vsel %vm2581_vm10, %v2631_v54, %v6124_v5  ;;  %v2640_v60 = vsel %vm2581_vm10, %v2629_v30, %v2631_v54  ;;  %v2635_v54 = vsel %vm2581_vm10, %v2613_v42, %v6130_v50  ;;  %v6120_v30 = vunpack.i.h.bf16 %v7696_v43 }
 0xa42   : > { %2700 = vmatprep.subr.mxu1 %v2641_v9  ;;  %v2589_v56 = vsel %vm2581_vm10, %v2578_v10, %v2580_v32  ;;  %v2585_v50 = vsel %vm2581_vm10, %v2566_v14, %v2568_v27  ;;  %v6114_v5 = vunpack.i.l.bf16 %v7707_v48  ;;  %v2583_v43 = vsel %vm2581_vm10, %v2560_v19, %v2562_v1  ;;  %v5891_v1 = vld [vmem:[%s11827_s3 + $0xb8] sm:$0xff] }
 0xa43   : > { %2701 = vmatpush1.msra.mxu1 %v2640_v60  ;;  %v2634_v60 = vsel %vm2581_vm10, %v2611_v13, %v2613_v42  ;;  %v2588_v61 = vsel %vm2581_vm10, %v6120_v30, %v2578_v10 }
 0xa44   : > { %2702 = vmatprep.subr.mxu1 %v2639_v35  ;;  %v6115_v35 = vunpack.i.h.bf16 %v7707_v48  ;;  %v2582_v10 = vsel %vm2581_vm10, %v6114_v5, %v2560_v19  ;;  %v5888_v48 = vld [vmem:[%s11827_s3 + $0xa0] sm:$0xff] }
 0xa45   : > { %2703 = vmatpush1.msra.mxu1 %v2638_v45  ;;  %v2586_v45 = vsel %vm2581_vm10, %v6119_v11, %v2572_v37 }
 0xa46   : > { %2704 = vmatprep.subr.mxu1 %v2637_v31  ;;  %v2587_v31 = vsel %vm2581_vm10, %v2572_v37, %v2574_v49  ;;  %v2584_v32 = vsel %vm2581_vm10, %v6115_v35, %v2566_v14  ;;  %v5889_v37 = vld [vmem:[%s11827_s3 + $0xa8] sm:$0xff]  ;;  %vm12100_vm10 = vcmask 924672  }
 0xa47   : > { %2705 = vmatpush1.msra.mxu1 %v2636_v46 }
 0xa48   : > { %2706 = vmatprep.subr.mxu1 %v2635_v54 }
 0xa49   : > { %2707 = vmatpush1.msra.mxu1 %v2634_v60 }
 0xa4a   : > { %2708 = vmatprep.subr.mxu1 %v2589_v56 }
 0xa4b   : > { %2709 = vmatpush1.msra.mxu1 %v2588_v61 }
 0xa4c   : > { %2710 = vmatprep.subr.mxu1 %v2587_v31 }
 0xa4d   : > { %2711 = vmatpush1.msra.mxu1 %v2586_v45 }
 0xa4e   : > { %2712 = vmatprep.subr.mxu1 %v2585_v50 }
 0xa4f   : > { %2713 = vmatpush1.msra.mxu1 %v2584_v32 }
 0xa50   : > { %2714 = vmatprep.subr.mxu1 %v2583_v43 }
 0xa51   : > { %2715 = vmatpush1.msra.mxu1 %v2582_v10 }
 0xa52   : > { %2716 = vmatprep.subr.mxu1 %v7942_v26 }
 0xa53   : > { %2717 = vmatpush1.msra.mxu1 %v7930_v34 }
 0xa54   : > { %2718 = vmatprep.subr.mxu1 %v7927_v20 }
 0xa55   : > { %2719 = vmatpush1.msra.mxu1 %v7914_v38 }
 0xa56   : > { %2720 = vmatprep.subr.mxu1 %v7907_v8 }
 0xa57   : > { %2721 = vmatpush1.msra.mxu1 %v7904_v44 }
 0xa58   : > { %2722 = vmatprep.subr.mxu1 %v7896_v39 }
 0xa59   : > { %2723 = vmatpush1.msra.mxu1 %v7887_v21 }
 0xa5a   : > { %5896 = vmatmul.mubr.msk.f32.vlgmr.msra.gmra.mxu1 %vm1259_vm0, %v5888_v48 }
 0xa5b   : > { %2762 = vmatprep.mubr.f32.mxu1 %v11861_v0 }
 0xa5e   : > { %5897 = vmatmul.mubr.msk.f32.gmra.mxu1 %vm1259_vm0, %v5889_v37 }
 0xa5f   : > { %2768 = vmatprep.mubr.f32.mxu1 %v11861_v0 }
 0xa62   : > { %5898 = vmatmul.mubr.msk.f32.gmra.mxu1 %vm1259_vm0, %v5890_v33 }
 0xa63   : > { %2774 = vmatprep.mubr.f32.mxu1 %v11861_v0 }
 0xa66   : > { %5899 = vmatmul.mubr.msk.f32.gmra.mxu1 %vm1259_vm0, %v5891_v1 }
 0xa67   : > { %3094 = vmatprep.mubr.f32.mxu1 %v11861_v0 }
 0xb1a   : > { %v2758_v49 = vpop.f32.mrf.mxu1 }
 0xb1c   : > { %v2760_v27 = vpop.f32.mrf.mxu1 }
 0xb1d   : > { %v2761_v54 = vadd.f32 %v2760_v27, %v7721_v15 }
 0xb1e   : > { %v2764_v4 = vpop.f32.mrf.mxu1 }
 0xb1f   : > { %v2782_v35 = vmax.f32 %v2761_v54, 0.0  ;;  %v2765_v50 = vadd.f32 %v2764_v4, %v7714_v52 }
 0xb20   : > { %v2766_v29 = vpop.f32.mrf.mxu1 }
 0xb21   : > { %v2767_v36 = vadd.f32 %v2766_v29, %v7714_v52 }
 0xb22   : > { %v2770_v9 = vpop.f32.mrf.mxu1 }
 0xb23   : > { %v2784_v11 = vmax.f32 %v2767_v36, 0.0  ;;  %v2771_v31 = vadd.f32 %v2770_v9, %v7725_v18 }
 0xb24   : > { %v2772_v13 = vpop.f32.mrf.mxu1 }
 0xb25   : > { %v2773_v42 = vadd.f32 %v2772_v13, %v7725_v18  ;;  %v8058_v32 = vadd.f32 %v2784_v11, %v7907_v8  ;;  %v8064_v18 = vadd.f32 %v2782_v35, %v7896_v39 }
 0xb26   : > { %v2776_v19 = vpop.f32.mrf.mxu1 }
 0xb27   : > { %v2786_v30 = vmax.f32 %v2773_v42, 0.0  ;;  %v2777_v56 = vadd.f32 %v2776_v19, %v7719_v53 }
 0xb28   : > { %v2778_v14 = vpop.f32.mrf.mxu1 }
 0xb29   : > { %v2779_v46 = vadd.f32 %v2778_v14, %v7719_v53  ;;  %v8052_v45 = vadd.f32 %v2786_v30, %v7927_v20  ;;  %v2787_v5 = vmax.f32 %v2777_v56, 0.0  ;;  %v2759_v53 = vadd.f32 %v2758_v49, %v7721_v15 }
 0xb2a   : > { %v2783_v20 = vmax.f32 %v2765_v50, 0.0 }
 0xb2b   : > { %v2788_v60 = vmax.f32 %v2779_v46, 0.0  ;;  %v2795_v52 = vadd.f32 %v2787_v5, %v7930_v34  ;;  %v2781_v8 = vmax.f32 %v2759_v53, 0.0  ;;  %v5903_v34 = vld [vmem:[%s11827_s3 + $0xd8] sm:$0xff] }
 0xb2c   : > { %v2791_v15 = vadd.f32 %v2783_v20, %v7904_v44  ;;  %v5900_v44 = vld [vmem:[%s11827_s3 + $0xc0] sm:$0xff] }
 0xb2d   : > { %v8048_v61 = vadd.f32 %v2788_v60, %v7942_v26  ;;  %v2785_v26 = vmax.f32 %v2771_v31, 0.0  ;;  %v2789_v39 = vadd.f32 %v2781_v8, %v7887_v21  ;;  %v5901_v21 = vld [vmem:[%s11827_s3 + $0xc8] sm:$0xff] }
 0xb2f   : > { %2876 = vmatpush1.msra.mxu0 %v8048_v61  ;;  %v2793_v43 = vadd.f32 %v2785_v26, %v7914_v38  ;;  %v5902_v38 = vld [vmem:[%s11827_s3 + $0xd0] sm:$0xff] }
 0xb30   : > { %2877 = vmatprep.subr.mxu0 %v11861_v0 }
 0xb31   : > { %2878 = vmatpush1.msra.mxu0 %v8052_v45 }
 0xb32   : > { %2879 = vmatprep.subr.mxu0 %v11861_v0 }
 0xb33   : > { %2880 = vmatpush1.msra.mxu0 %v8058_v32 }
 0xb34   : > { %2881 = vmatprep.subr.mxu0 %v11861_v0 }
 0xb35   : > { %2882 = vmatpush1.msra.mxu0 %v8064_v18 }
 0xb36   : > { %2883 = vmatprep.subr.mxu0 %v2795_v52 }
 0xb37   : > { %2884 = vmatpush1.msra.mxu0 %v11861_v0 }
 0xb38   : > { %2885 = vmatprep.subr.mxu0 %v2793_v43 }
 0xb39   : > { %2886 = vmatpush1.msra.mxu0 %v11861_v0 }
 0xb3a   : > { %2887 = vmatprep.subr.mxu0 %v2791_v15 }
 0xb3b   : > { %2888 = vmatpush1.msra.mxu0 %v11861_v0 }
 0xb3c   : > { %2889 = vmatprep.subr.mxu0 %v2789_v39 }
 0xb3d   : > { %2890 = vmatpush1.msra.mxu0 %v11861_v0 }
 0xb3e   : > { %2891 = vmatprep.subr.mxu0 %v8048_v61 }
 0xb3f   : > { %2892 = vmatpush1.msra.mxu0 %v2795_v52 }
 0xb40   : > { %2893 = vmatprep.subr.mxu0 %v8052_v45 }
 0xb41   : > { %2894 = vmatpush1.msra.mxu0 %v2793_v43 }
 0xb42   : > { %2895 = vmatprep.subr.mxu0 %v8058_v32 }
 0xb43   : > { %2896 = vmatpush1.msra.mxu0 %v2791_v15 }
 0xb44   : > { %2897 = vmatprep.subr.mxu0 %v8064_v18 }
 0xb45   : > { %2898 = vmatpush1.msra.mxu0 %v2789_v39 }
 0xb46   : > { %5908 = vmatmul.mubr.msk.f32.vlgmr.msra.gmra.mxu0 %vm1259_vm0, %v5900_v44 }
 0xb47   : > { %2937 = vmatprep.mubr.f32.mxu0 %v11861_v0 }
 0xb4a   : > { %5909 = vmatmul.mubr.msk.f32.gmra.mxu0 %vm1259_vm0, %v5901_v21 }
 0xb4b   : > { %2943 = vmatprep.mubr.f32.mxu0 %v11861_v0 }
 0xb4e   : > { %5910 = vmatmul.mubr.msk.f32.gmra.mxu0 %vm1259_vm0, %v5902_v38 }
 0xb4f   : > { %2949 = vmatprep.mubr.f32.mxu0 %v11861_v0 }
 0xb52   : > { %5911 = vmatmul.mubr.msk.f32.gmra.mxu0 %vm1259_vm0, %v5903_v34  ;;  %vm12105_vm0 = vcmask 932864  }
 0xb53   : > { %3257 = vmatprep.mubr.f32.mxu0 %v11861_v0 }
 0xc06   : > { %v2933_v10 = vpop.f32.mrf.mxu0 }
 0xc07   : > { %v2934_v60 = vadd.f32 %v2933_v10, %v7729_v58 }
 0xc08   : > { %v2935_v48 = vpop.f32.mrf.mxu0 }
 0xc09   : > { %v2936_v46 = vadd.f32 %v2935_v48, %v7729_v58 }
 0xc0a   : > { %v2939_v37 = vpop.f32.mrf.mxu0 }
 0xc0b   : > { %v2940_v14 = vadd.f32 %v2939_v37, %v7723_v57  ;;  %v2957_v50 = vmax.f32 %v2936_v46, 0.0 }
 0xc0c   : > { %v2941_v33 = vpop.f32.mrf.mxu0 }
 0xc0d   : > { %v2942_v19 = vadd.f32 %v2941_v33, %v7723_v57  ;;  %v2958_v35 = vmax.f32 %v2940_v14, 0.0  ;;  %v2965_v58 = vadd.f32 %v2957_v50, %v8064_v18  ;;  %v5915_v18 = vld [vmem:[%s11827_s3 + $0xf8] sm:$0xff] }
 0xc0e   : > { %v2945_v1 = vpop.f32.mrf.mxu0 }
 0xc0f   : > { %v2946_v9 = vadd.f32 %v2945_v1, %v7733_v28  ;;  %v2959_v11 = vmax.f32 %v2942_v19, 0.0  ;;  %v2966_v26 = vadd.f32 %v2958_v35, %v2791_v15  ;;  %v5927_v35 = vld [vmem:[%s11827_s3 + $0x118] sm:$0xff] }
 0xc10   : > { %v2947_v49 = vpop.f32.mrf.mxu0 }
 0xc11   : > { %v2948_v4 = vadd.f32 %v2947_v49, %v7733_v28  ;;  %v2960_v56 = vmax.f32 %v2946_v9, 0.0  ;;  %v2967_v57 = vadd.f32 %v2959_v11, %v8058_v32  ;;  %v5914_v32 = vld [vmem:[%s11827_s3 + $0xf0] sm:$0xff]  ;;  %v5925_v11 = vld [vmem:[%s11827_s3 + $0x108] sm:$0xff] }
 0xc12   : > { %v2951_v27 = vpop.f32.mrf.mxu0 }
 0xc13   : > { %v2952_v29 = vadd.f32 %v2951_v27, %v7727_v22  ;;  %v2961_v54 = vmax.f32 %v2948_v4, 0.0  ;;  %v2968_v53 = vadd.f32 %v2960_v56, %v2793_v43  ;;  %v5924_v56 = vld [vmem:[%s11827_s3 + $0x100] sm:$0xff] }
 0xc14   : > { %v2953_v13 = vpop.f32.mrf.mxu0 }
 0xc15   : > { %v2954_v42 = vadd.f32 %v2953_v13, %v7727_v22  ;;  %v2962_v36 = vmax.f32 %v2952_v29, 0.0  ;;  %v2969_v5 = vadd.f32 %v2961_v54, %v8052_v45  ;;  %v2956_v22 = vmax.f32 %v2934_v60, 0.0  ;;  %v5913_v45 = vld [vmem:[%s11827_s3 + $0xe8] sm:$0xff] }
 0xc17   : > { %v2963_v30 = vmax.f32 %v2954_v42, 0.0  ;;  %v2970_v28 = vadd.f32 %v2962_v36, %v2795_v52  ;;  %v2964_v20 = vadd.f32 %v2956_v22, %v2789_v39 }
 0xc19   : > { %v2971_v31 = vadd.f32 %v2963_v30, %v8048_v61  ;;  %v5912_v61 = vld [vmem:[%s11827_s3 + $0xe0] sm:$0xff] }
 0xc1b   : > { %3054 = vmatprep.subr.mxu1 %v2971_v31 }
 0xc1c   : > { %3055 = vmatpush1.msra.mxu1 %v2970_v28 }
 0xc1d   : > { %3056 = vmatprep.subr.mxu1 %v2969_v5 }
 0xc1e   : > { %3057 = vmatpush1.msra.mxu1 %v2968_v53 }
 0xc1f   : > { %3058 = vmatprep.subr.mxu1 %v2967_v57 }
 0xc20   : > { %3059 = vmatpush1.msra.mxu1 %v2966_v26 }
 0xc21   : > { %3060 = vmatprep.subr.mxu1 %v2965_v58 }
 0xc22   : > { %3061 = vmatpush1.msra.mxu1 %v2964_v20 }
 0xc23   : > { %5920 = vmatmul.mubr.msk.f32.vlgmr.msra.gmra.mxu1 %vm2297_vm9, %v5912_v61 }
 0xc24   : > { %3100 = vmatprep.mubr.f32.mxu1 %v11861_v0 }
 0xc27   : > { %5921 = vmatmul.mubr.msk.f32.gmra.mxu1 %vm2297_vm9, %v5913_v45 }
 0xc28   : > { %3106 = vmatprep.mubr.f32.mxu1 %v11861_v0 }
 0xc2b   : > { %5922 = vmatmul.mubr.msk.f32.gmra.mxu1 %vm2297_vm9, %v5914_v32 }
 0xc2c   : > { %3112 = vmatprep.mubr.f32.mxu1 %v11861_v0 }
 0xc2f   : > { %5923 = vmatmul.mubr.msk.f32.gmra.mxu1 %vm2297_vm9, %v5915_v18 }
 0xce3   : > { %v3096_v52 = vpop.f32.mrf.mxu1 }
 0xce4   : > { %v3097_v9 = vadd.f32 %v3096_v52, %v7737_v59 }
 0xce5   : > { %v3098_v8 = vpop.f32.mrf.mxu1 }
 0xce6   : > { %v3099_v27 = vadd.f32 %v3098_v8, %v7737_v59 }
 0xce7   : > { %v3102_v43 = vpop.f32.mrf.mxu1 }
 0xce8   : > { %v3103_v1 = vadd.f32 %v3102_v43, %v7731_v25  ;;  %v3120_v36 = vmax.f32 %v3099_v27, 0.0 }
 0xce9   : > { %v3104_v15 = vpop.f32.mrf.mxu1 }
 0xcea   : > { %v3105_v37 = vadd.f32 %v3104_v15, %v7731_v25  ;;  %v3121_v14 = vmax.f32 %v3103_v1, 0.0  ;;  %v3119_v25 = vmax.f32 %v3097_v9, 0.0  ;;  %v3128_v30 = vadd.f32 %v3120_v36, %v2965_v58 }
 0xceb   : > { %v3108_v39 = vpop.f32.mrf.mxu1 }
 0xcec   : > { %v3109_v10 = vadd.f32 %v3108_v39, %v7741_v62  ;;  %v3122_v19 = vmax.f32 %v3105_v37, 0.0  ;;  %v8153_v59 = vadd.f32 %v3121_v14, %v2966_v26  ;;  %v3127_v60 = vadd.f32 %v3119_v25, %v2964_v20 }
 0xced   : > { %v3110_v44 = vpop.f32.mrf.mxu1 }
 0xcee   : > { %v3111_v38 = vadd.f32 %v3110_v44, %v7741_v62  ;;  %v3123_v13 = vmax.f32 %v3109_v10, 0.0  ;;  %v8150_v54 = vadd.f32 %v3122_v19, %v2967_v57 }
 0xcef   : > { %v3114_v21 = vpop.f32.mrf.mxu1 }
 0xcf0   : > { %v3115_v34 = vadd.f32 %v3114_v21, %v7735_v24  ;;  %v3124_v4 = vmax.f32 %v3111_v38, 0.0 }
 0xcf1   : > { %v3116_v48 = vpop.f32.mrf.mxu1 }
 0xcf2   : > { %v3117_v33 = vadd.f32 %v3116_v48, %v7735_v24  ;;  %v3125_v49 = vmax.f32 %v3115_v34, 0.0  ;;  %v8144_v46 = vadd.f32 %v3124_v4, %v2969_v5  ;;  %v8147_v24 = vadd.f32 %v3123_v13, %v2968_v53 }
 0xcf4   : > { %v3126_v29 = vmax.f32 %v3117_v33, 0.0  ;;  %v8142_v62 = vadd.f32 %v3125_v49, %v2970_v28 }
 0xcf6   : > { %v8140_v42 = vadd.f32 %v3126_v29, %v2971_v31  ;;  %v5926_v31 = vld [vmem:[%s11827_s3 + $0x110] sm:$0xff]  ;;  %s11893_s3 = smov 9  }
 0xcf8   : > { %3217 = vmatprep.subr.mxu0 %v8140_v42 }
 0xcf9   : > { %3218 = vmatpush1.msra.mxu0 %v8142_v62 }
 0xcfa   : > { %3219 = vmatprep.subr.mxu0 %v8144_v46 }
 0xcfb   : > { %3220 = vmatpush1.msra.mxu0 %v8147_v24 }
 0xcfc   : > { %3221 = vmatprep.subr.mxu0 %v8150_v54 }
 0xcfd   : > { %3222 = vmatpush1.msra.mxu0 %v8153_v59 }
 0xcfe   : > { %3223 = vmatprep.subr.mxu0 %v3128_v30 }
 0xcff   : > { %3224 = vmatpush1.msra.mxu0 %v3127_v60 }
 0xd00   : > { %5932 = vmatmul.mubr.msk.f32.vlgmr.msra.gmra.mxu0 %vm2297_vm9, %v5924_v56 }
 0xd01   : > { %3263 = vmatprep.mubr.f32.mxu0 %v11861_v0 }
 0xd04   : > { %5933 = vmatmul.mubr.msk.f32.gmra.mxu0 %vm2297_vm9, %v5925_v11 }
 0xd05   : > { %3269 = vmatprep.mubr.f32.mxu0 %v11861_v0 }
 0xd08   : > { %5934 = vmatmul.mubr.msk.f32.gmra.mxu0 %vm2297_vm9, %v5926_v31 }
 0xd09   : > { %3275 = vmatprep.mubr.f32.mxu0 %v11861_v0 }
 0xd0c   : > { %5935 = vmatmul.mubr.msk.f32.gmra.mxu0 %vm2297_vm9, %v5927_v35 }
 0xdc0   : > { %v3259_v28 = vpop.f32.mrf.mxu0 }
 0xdc1   : > { %v3260_v50 = vadd.f32 %v3259_v28, %v7745_v2 }
 0xdc2   : > { %v3261_v53 = vpop.f32.mrf.mxu0 }
 0xdc3   : > { %v3282_v5 = vmax.f32 %v3260_v50, 0.0  ;;  %v3262_v57 = vadd.f32 %v3261_v53, %v7745_v2 }
 0xdc4   : > { %v3265_v2 = vpop.f32.mrf.mxu0 }
 0xdc5   : > { %v8178_v22 = vadd.f32 %v3282_v5, %v3127_v60  ;;  %v3283_v26 = vmax.f32 %v3262_v57, 0.0  ;;  %v3266_v20 = vadd.f32 %v3265_v2, %v7739_v3 }
 0xdc6   : > { %v3267_v43 = vpop.f32.mrf.mxu0 }
 0xdc7   : > { %11884 = vst [vmem:[#allocation59_spill] sm:$0xff] %v8178_v22  ;;  %3598 = vrot.lane.b32.xlu1 %v8178_v22, %s11885_s26  ;;  %3344 = vrot.lane.b32.xlu0 %v8178_v22, %s11824_s14  ;;  %v8213_v58 = vadd.f32 %v3283_v26, %v3128_v30  ;;  %v3284_v61 = vmax.f32 %v3266_v20, 0.0  ;;  %v3268_v15 = vadd.f32 %v3267_v43, %v7739_v3 }
 0xdc8   : > { %v3271_v20 = vpop.f32.mrf.mxu0 }
 0xdc9   : > { %11892 = vst [vmem:[#allocation60_spill] sm:$0xff] %v8213_v58  ;;  %v8285_v45 = vadd.f32 %v3284_v61, %v8153_v59  ;;  %v3285_v21 = vmax.f32 %v3268_v15, 0.0  ;;  %v3272_v61 = vadd.f32 %v3271_v20, %v7747_v7 }
 0xdcb   : > { %3618 = vrot.lane.b32.xlu1 %v8178_v22, %s11886_s16  ;;  %3376 = vrot.lane.b32.xlu0 %v8178_v22, %s11822_s30  ;;  %v8337_v3 = vadd.f32 %v3285_v21, %v8150_v54  ;;  %v3286_v21 = vmax.f32 %v3272_v61, 0.0 }
 0xdcd   : > { %v8477_v20 = vadd.f32 %v3286_v21, %v8147_v24 }
 0xdcf   : > { %3638 = vrot.lane.b32.xlu1 %v8178_v22, %s11887_s23  ;;  %3408 = vrot.lane.b32.xlu0 %v8178_v22, %s11823_s12 }
 0xdd3   : > { %3658 = vrot.lane.b32.xlu1 %v8178_v22, %s11888_s1  ;;  %3440 = vrot.lane.b32.xlu0 %v8178_v22, %s11828_s25 }
 0xdd7   : > { %3678 = vrot.lane.b32.xlu1 %v8178_v22, %s11889_s28  ;;  %3472 = vrot.lane.b32.xlu0 %v8178_v22, %s11831_s13 }
 0xddb   : > { %3698 = vrot.lane.b32.xlu1 %v8178_v22, %s11890_s2  ;;  %3504 = vrot.lane.b32.xlu0 %v8178_v22, %s11832_s0 }
 0xddf   : > { %3718 = vrot.lane.b32.xlu1 %v8178_v22, %s11891_s15  ;;  %3536 = vrot.lane.b32.xlu0 %v8178_v22, %s11833_s19 }
 0xde3   : > { %3750 = vrot.lane.b32.xlu1 %v8178_v22, %s11824_s14  ;;  %3568 = vrot.lane.b32.xlu0 %v8178_v22, %s11829_s24 }
 0xde7   : > { %3782 = vrot.lane.b32.xlu1 %v8178_v22, %s11822_s30  ;;  %3600 = vrot.lane.b32.xlu0 %v8213_v58, %s11885_s26 }
 0xdeb   : > { %3814 = vrot.lane.b32.xlu1 %v8178_v22, %s11823_s12  ;;  %3620 = vrot.lane.b32.xlu0 %v8213_v58, %s11886_s16 }
 0xdef   : > { %3846 = vrot.lane.b32.xlu1 %v8178_v22, %s11828_s25  ;;  %3640 = vrot.lane.b32.xlu0 %v8213_v58, %s11887_s23 }
 0xdf3   : > { %3878 = vrot.lane.b32.xlu1 %v8178_v22, %s11831_s13  ;;  %3660 = vrot.lane.b32.xlu0 %v8213_v58, %s11888_s1 }
 0xdf7   : > { %3910 = vrot.lane.b32.xlu1 %v8178_v22, %s11832_s0  ;;  %3680 = vrot.lane.b32.xlu0 %v8213_v58, %s11889_s28 }
 0xdfb   : > { %3942 = vrot.lane.b32.xlu1 %v8178_v22, %s11833_s19  ;;  %3700 = vrot.lane.b32.xlu0 %v8213_v58, %s11890_s2 }
 0xdff   : > { %3974 = vrot.lane.b32.xlu1 %v8178_v22, %s11829_s24  ;;  %3720 = vrot.lane.b32.xlu0 %v8213_v58, %s11891_s15 }
 0xe03   : > { %4006 = vrot.lane.b32.xlu1 %v8178_v22, %s11830_s22  ;;  %3752 = vrot.lane.b32.xlu0 %v8213_v58, %s11824_s14 }
 0xe07   : > { %4309 = vrot.lane.b32.xlu1 %v8178_v22, %s11893_s3  ;;  %3784 = vrot.lane.b32.xlu0 %v8213_v58, %s11822_s30 }
 0xe0b   : > { %3346 = vrot.lane.b32.xlu1 %v8213_v58, %s11824_s14  ;;  %3816 = vrot.lane.b32.xlu0 %v8213_v58, %s11823_s12 }
 0xe0f   : > { %3378 = vrot.lane.b32.xlu1 %v8213_v58, %s11822_s30  ;;  %3848 = vrot.lane.b32.xlu0 %v8213_v58, %s11828_s25 }
 0xe13   : > { %3410 = vrot.lane.b32.xlu1 %v8213_v58, %s11823_s12  ;;  %3880 = vrot.lane.b32.xlu0 %v8213_v58, %s11831_s13 }
 0xe17   : > { %3442 = vrot.lane.b32.xlu1 %v8213_v58, %s11828_s25  ;;  %3912 = vrot.lane.b32.xlu0 %v8213_v58, %s11832_s0 }
 0xe1b   : > { %3474 = vrot.lane.b32.xlu1 %v8213_v58, %s11831_s13  ;;  %3944 = vrot.lane.b32.xlu0 %v8213_v58, %s11833_s19 }
 0xe1f   : > { %3506 = vrot.lane.b32.xlu1 %v8213_v58, %s11832_s0  ;;  %3976 = vrot.lane.b32.xlu0 %v8213_v58, %s11829_s24 }
 0xe23   : > { %3538 = vrot.lane.b32.xlu1 %v8213_v58, %s11833_s19  ;;  %4008 = vrot.lane.b32.xlu0 %v8213_v58, %s11830_s22 }
 0xe27   : > { %3570 = vrot.lane.b32.xlu1 %v8213_v58, %s11829_s24  ;;  %4311 = vrot.lane.b32.xlu0 %v8213_v58, %s11893_s3 }
 0xe2b   : > { %3602 = vrot.lane.b32.xlu1 %v8285_v45, %s11885_s26  ;;  %3350 = vrot.lane.b32.xlu0 %v8285_v45, %s11824_s14 }
 0xe2f   : > { %3622 = vrot.lane.b32.xlu1 %v8285_v45, %s11886_s16  ;;  %3382 = vrot.lane.b32.xlu0 %v8285_v45, %s11822_s30 }
 0xe33   : > { %3642 = vrot.lane.b32.xlu1 %v8285_v45, %s11887_s23  ;;  %3414 = vrot.lane.b32.xlu0 %v8285_v45, %s11823_s12 }
 0xe37   : > { %3662 = vrot.lane.b32.xlu1 %v8285_v45, %s11888_s1  ;;  %3446 = vrot.lane.b32.xlu0 %v8285_v45, %s11828_s25 }
 0xe39   : > { %v8303_v32 = vpop.permute.xlu1 %3598  ;;  %v8305_v18 = vpop.permute.xlu0 %3344 }
 0xe3b   : > { %3682 = vrot.lane.b32.xlu1 %v8285_v45, %s11889_s28  ;;  %3478 = vrot.lane.b32.xlu0 %v8285_v45, %s11831_s13 }
 0xe3d   : > { %v8311_v52 = vpop.permute.xlu1 %3618  ;;  %v8313_v8 = vpop.permute.xlu0 %3376 }
 0xe3f   : > { %3702 = vrot.lane.b32.xlu1 %v8285_v45, %s11890_s2  ;;  %3510 = vrot.lane.b32.xlu0 %v8285_v45, %s11832_s0 }
 0xe41   : > { %v8320_v39 = vpop.permute.xlu1 %3638  ;;  %v8322_v44 = vpop.permute.xlu0 %3408 }
 0xe43   : > { %3722 = vrot.lane.b32.xlu1 %v8285_v45, %s11891_s15  ;;  %3542 = vrot.lane.b32.xlu0 %v8285_v45, %s11833_s19 }
 0xe45   : > { %v8328_v38 = vpop.permute.xlu1 %3658  ;;  %v8330_v34 = vpop.permute.xlu0 %3440 }
 0xe47   : > { %4315 = vrot.lane.b32.xlu1 %v8285_v45, %s11893_s3  ;;  %3574 = vrot.lane.b32.xlu0 %v8285_v45, %s11829_s24 }
 0xe49   : > { %v8339_v10 = vpop.permute.xlu1 %3678  ;;  %v8341_v48 = vpop.permute.xlu0 %3472 }
 0xe4b   : > { %3352 = vrot.lane.b32.xlu1 %v8337_v3, %s11824_s14  ;;  %3756 = vrot.lane.b32.xlu0 %v8285_v45, %s11824_s14 }
 0xe4d   : > { %v8347_v37 = vpop.permute.xlu1 %3698  ;;  %v8349_v33 = vpop.permute.xlu0 %3504 }
 0xe4f   : > { %3384 = vrot.lane.b32.xlu1 %v8337_v3, %s11822_s30  ;;  %3788 = vrot.lane.b32.xlu0 %v8285_v45, %s11822_s30 }
 0xe51   : > { %v8355_v1 = vpop.permute.xlu1 %3718  ;;  %v8357_v49 = vpop.permute.xlu0 %3536 }
 0xe53   : > { %3416 = vrot.lane.b32.xlu1 %v8337_v3, %s11823_s12  ;;  %3820 = vrot.lane.b32.xlu0 %v8285_v45, %s11823_s12 }
 0xe55   : > { %v8363_v27 = vpop.permute.xlu1 %3750  ;;  %v8365_v4 = vpop.permute.xlu0 %3568 }
 0xe56   : > { %11894 = vst [vmem:[#allocation61_spill] sm:$0xff] %v8365_v4 }
 0xe57   : > { %3448 = vrot.lane.b32.xlu1 %v8337_v3, %s11828_s25  ;;  %3852 = vrot.lane.b32.xlu0 %v8285_v45, %s11828_s25 }
 0xe59   : > { %v8371_v29 = vpop.permute.xlu1 %3782  ;;  %v8373_v9 = vpop.permute.xlu0 %3600 }
 0xe5a   : > { %11895 = vst [vmem:[#allocation62_spill] sm:$0xff] %v8373_v9  ;;  %v3273_v9 = vpop.f32.mrf.mxu0 }
 0xe5b   : > { %3480 = vrot.lane.b32.xlu1 %v8337_v3, %s11831_s13  ;;  %3884 = vrot.lane.b32.xlu0 %v8285_v45, %s11831_s13 }
 0xe5d   : > { %v8379_v13 = vpop.permute.xlu1 %3814  ;;  %v8381_v19 = vpop.permute.xlu0 %3620 }
 0xe5e   : > { %11896 = vst [vmem:[#allocation63_spill] sm:$0xff] %v8381_v19 }
 0xe5f   : > { %3512 = vrot.lane.b32.xlu1 %v8337_v3, %s11832_s0  ;;  %3916 = vrot.lane.b32.xlu0 %v8285_v45, %s11832_s0 }
 0xe61   : > { %v8387_v14 = vpop.permute.xlu1 %3846  ;;  %v8389_v36 = vpop.permute.xlu0 %3640 }
 0xe62   : > { %11897 = vst [vmem:[#allocation64_spill] sm:$0xff] %v8389_v36 }
 0xe63   : > { %3544 = vrot.lane.b32.xlu1 %v8337_v3, %s11833_s19  ;;  %3948 = vrot.lane.b32.xlu0 %v8285_v45, %s11833_s19 }
 0xe65   : > { %v8395_v25 = vpop.permute.xlu1 %3878  ;;  %v8397_v54 = vpop.permute.xlu0 %3660 }
 0xe66   : > { %11898 = vst [vmem:[#allocation65_spill] sm:$0xff] %v8397_v54 }
 0xe67   : > { %3576 = vrot.lane.b32.xlu1 %v8337_v3, %s11829_s24  ;;  %3980 = vrot.lane.b32.xlu0 %v8285_v45, %s11829_s24 }
 0xe69   : > { %v8403_v59 = vpop.permute.xlu1 %3910  ;;  %v8405_v30 = vpop.permute.xlu0 %3680 }
 0xe6b   : > { %3758 = vrot.lane.b32.xlu1 %v8337_v3, %s11824_s14  ;;  %4012 = vrot.lane.b32.xlu0 %v8285_v45, %s11830_s22 }
 0xe6d   : > { %v8411_v60 = vpop.permute.xlu1 %3942  ;;  %v8413_v56 = vpop.permute.xlu0 %3700 }
 0xe6f   : > { %3790 = vrot.lane.b32.xlu1 %v8337_v3, %s11822_s30  ;;  %3604 = vrot.lane.b32.xlu0 %v8337_v3, %s11885_s26 }
 0xe71   : > { %v8419_v11 = vpop.permute.xlu1 %3974  ;;  %v8421_v31 = vpop.permute.xlu0 %3720 }
 0xe73   : > { %3822 = vrot.lane.b32.xlu1 %v8337_v3, %s11823_s12  ;;  %3624 = vrot.lane.b32.xlu0 %v8337_v3, %s11886_s16 }
 0xe75   : > { %v8427_v35 = vpop.permute.xlu1 %4006  ;;  %v8429_v28 = vpop.permute.xlu0 %3752 }
 0xe77   : > { %3854 = vrot.lane.b32.xlu1 %v8337_v3, %s11828_s25  ;;  %3644 = vrot.lane.b32.xlu0 %v8337_v3, %s11887_s23 }
 0xe79   : > { %v8435_v50 = vpop.permute.xlu1 %4309  ;;  %v8437_v5 = vpop.permute.xlu0 %3784 }
 0xe7a   : > { %11899 = vst [vmem:[#allocation66_spill] sm:$0xff] %v8435_v50 }
 0xe7b   : > { %3886 = vrot.lane.b32.xlu1 %v8337_v3, %s11831_s13  ;;  %3664 = vrot.lane.b32.xlu0 %v8337_v3, %s11888_s1 }
 0xe7d   : > { %v8443_v53 = vpop.permute.xlu1 %3346  ;;  %v8445_v57 = vpop.permute.xlu0 %3816 }
 0xe7f   : > { %3918 = vrot.lane.b32.xlu1 %v8337_v3, %s11832_s0  ;;  %3684 = vrot.lane.b32.xlu0 %v8337_v3, %s11889_s28 }
 0xe81   : > { %v8451_v26 = vpop.permute.xlu1 %3378  ;;  %v8453_v2 = vpop.permute.xlu0 %3848 }
 0xe83   : > { %3950 = vrot.lane.b32.xlu1 %v8337_v3, %s11833_s19  ;;  %3704 = vrot.lane.b32.xlu0 %v8337_v3, %s11890_s2 }
 0xe85   : > { %v8460_v43 = vpop.permute.xlu1 %3410  ;;  %v8462_v15 = vpop.permute.xlu0 %3880 }
 0xe87   : > { %3982 = vrot.lane.b32.xlu1 %v8337_v3, %s11829_s24  ;;  %3724 = vrot.lane.b32.xlu0 %v8337_v3, %s11891_s15 }
 0xe89   : > { %v8468_v0 = vpop.permute.xlu1 %3442  ;;  %v8470_v58 = vpop.permute.xlu0 %3912 }
 0xe8b   : > { %4014 = vrot.lane.b32.xlu1 %v8337_v3, %s11830_s22  ;;  %4317 = vrot.lane.b32.xlu0 %v8337_v3, %s11893_s3 }
 0xe8d   : > { %v8479_v22 = vpop.permute.xlu1 %3474  ;;  %v8481_v50 = vpop.permute.xlu0 %3944 }
 0xe8f   : > { %3356 = vrot.lane.b32.xlu1 %v8477_v20, %s11824_s14  ;;  %3762 = vrot.lane.b32.xlu0 %v8477_v20, %s11824_s14 }
 0xe91   : > { %v8487_v61 = vpop.permute.xlu1 %3506  ;;  %v8489_v23 = vpop.permute.xlu0 %3976 }
 0xe93   : > { %3388 = vrot.lane.b32.xlu1 %v8477_v20, %s11822_s30  ;;  %3794 = vrot.lane.b32.xlu0 %v8477_v20, %s11822_s30 }
 0xe95   : > { %v8495_v24 = vpop.permute.xlu1 %3538  ;;  %v8497_v21 = vpop.permute.xlu0 %4008 }
 0xe96   : > { %11900 = vst [vmem:[#allocation67_spill] sm:$0xff] %v8497_v21 }
 0xe97   : > { %3420 = vrot.lane.b32.xlu1 %v8477_v20, %s11823_s12  ;;  %3826 = vrot.lane.b32.xlu0 %v8477_v20, %s11823_s12 }
 0xe99   : > { %v8503_v55 = vpop.permute.xlu1 %3570  ;;  %v8505_v54 = vpop.permute.xlu0 %4311 }
 0xe9a   : > { %11901 = vst [vmem:[#allocation68_spill] sm:$0xff] %v8505_v54 }
 0xe9b   : > { %3452 = vrot.lane.b32.xlu1 %v8477_v20, %s11828_s25  ;;  %3858 = vrot.lane.b32.xlu0 %v8477_v20, %s11828_s25 }
 0xe9d   : > { %v8511_v36 = vpop.permute.xlu1 %3602  ;;  %v8513_v51 = vpop.permute.xlu0 %3350 }
 0xe9e   : > { %11902 = vst [vmem:[#allocation69_spill] sm:$0xff] %v8511_v36  ;;  %11903 = vst [vmem:[#allocation70_spill] sm:$0xff] %v8513_v51 }
 0xe9f   : > { %3484 = vrot.lane.b32.xlu1 %v8477_v20, %s11831_s13  ;;  %3890 = vrot.lane.b32.xlu0 %v8477_v20, %s11831_s13 }
 0xea1   : > { %v8519_v21 = vpop.permute.xlu1 %3622  ;;  %v8521_v19 = vpop.permute.xlu0 %3382 }
 0xea2   : > { %11904 = vst [vmem:[#allocation71_spill] sm:$0xff] %v8519_v21  ;;  %11905 = vst [vmem:[#allocation72_spill] sm:$0xff] %v8521_v19 }
 0xea3   : > { %3516 = vrot.lane.b32.xlu1 %v8477_v20, %s11832_s0  ;;  %3922 = vrot.lane.b32.xlu0 %v8477_v20, %s11832_s0 }
 0xea5   : > { %v8527_v54 = vpop.permute.xlu1 %3642  ;;  %v8529_v36 = vpop.permute.xlu0 %3414 }
 0xea6   : > { %11906 = vst [vmem:[#allocation73_spill] sm:$0xff] %v8527_v54  ;;  %11907 = vst [vmem:[#allocation74_spill] sm:$0xff] %v8529_v36 }
 0xea7   : > { %3548 = vrot.lane.b32.xlu1 %v8477_v20, %s11833_s19  ;;  %3954 = vrot.lane.b32.xlu0 %v8477_v20, %s11833_s19 }
 0xea9   : > { %v8535_v51 = vpop.permute.xlu1 %3662  ;;  %v8537_v21 = vpop.permute.xlu0 %3446 }
 0xeaa   : > { %11908 = vst [vmem:[#allocation75_spill] sm:$0xff] %v8535_v51  ;;  %11909 = vst [vmem:[#allocation76_spill] sm:$0xff] %v8537_v21 }
 0xeab   : > { %3580 = vrot.lane.b32.xlu1 %v8477_v20, %s11829_s24  ;;  %3986 = vrot.lane.b32.xlu0 %v8477_v20, %s11829_s24 }
 0xead   : > { %v8543_v19 = vpop.permute.xlu1 %3682  ;;  %v8545_v54 = vpop.permute.xlu0 %3478 }
 0xeae   : > { %11910 = vst [vmem:[#allocation77_spill] sm:$0xff] %v8543_v19  ;;  %11911 = vst [vmem:[#allocation78_spill] sm:$0xff] %v8545_v54 }
 0xeaf   : > { %3606 = vrot.lane.b32.xlu1 %v8477_v20, %s11885_s26  ;;  %4018 = vrot.lane.b32.xlu0 %v8477_v20, %s11830_s22 }
 0xeb1   : > { %v8551_v36 = vpop.permute.xlu1 %3702  ;;  %v8553_v51 = vpop.permute.xlu0 %3510 }
 0xeb2   : > { %11912 = vst [vmem:[#allocation79_spill] sm:$0xff] %v8551_v36  ;;  %11913 = vst [vmem:[#allocation80_spill] sm:$0xff] %v8553_v51 }
 0xeb3   : > { %3626 = vrot.lane.b32.xlu1 %v8477_v20, %s11886_s16  ;;  %4321 = vrot.lane.b32.xlu0 %v8477_v20, %s11893_s3 }
 0xeb5   : > { %v8559_v21 = vpop.permute.xlu1 %3722  ;;  %v8561_v19 = vpop.permute.xlu0 %3542 }
 0xeb6   : > { %11914 = vst [vmem:[#allocation81_spill] sm:$0xff] %v8559_v21  ;;  %11915 = vst [vmem:[#allocation82_spill] sm:$0xff] %v8561_v19  ;;  %v3274_v19 = vadd.f32 %v3273_v9, %v7747_v7 }
 0xeb7   : > { %3646 = vrot.lane.b32.xlu1 %v8477_v20, %s11887_s23 }
 0xeb9   : > { %v8565_v54 = vpop.permute.xlu1 %4315  ;;  %v8567_v47 = vpop.permute.xlu0 %3574 }
 0xeba   : > { %11916 = vst [vmem:[#allocation83_spill] sm:$0xff] %v8565_v54  ;;  %11917 = vst [vmem:[#allocation84_spill] sm:$0xff] %v8567_v47  ;;  %v3287_v54 = vmax.f32 %v3274_v19, 0.0  ;;  %v5612_v19 = vadd.f32 %v8337_v3, %v8285_v45 }
 0xebb   : > { %3666 = vrot.lane.b32.xlu1 %v8477_v20, %s11888_s1 }
 0xebd   : > { %v8571_v51 = vpop.permute.xlu1 %3352  ;;  %v8573_v36 = vpop.permute.xlu0 %3756 }
 0xebe   : > { %11918 = vst [vmem:[#allocation85_spill] sm:$0xff] %v8571_v51  ;;  %11919 = vst [vmem:[#allocation86_spill] sm:$0xff] %v8573_v36  ;;  %v8591_v36 = vadd.f32 %v3287_v54, %v8144_v46 }
 0xebf   : > { %3686 = vrot.lane.b32.xlu1 %v8477_v20, %s11889_s28 }
 0xec1   : > { %v8578_v21 = vpop.permute.xlu1 %3384  ;;  %v8580_v41 = vpop.permute.xlu0 %3788 }
 0xec2   : > { %11920 = vst [vmem:[#allocation87_spill] sm:$0xff] %v8580_v41 }
 0xec3   : > { %3706 = vrot.lane.b32.xlu1 %v8477_v20, %s11890_s2 }
 0xec5   : > { %v8584_v47 = vpop.permute.xlu1 %3416  ;;  %v8586_v4 = vpop.permute.xlu0 %3820 }
 0xec6   : > { %11921 = vst [vmem:[#allocation88_spill] sm:$0xff] %v8586_v4 }
 0xec7   : > { %3726 = vrot.lane.b32.xlu1 %v8477_v20, %s11891_s15 }
 0xec9   : > { %v8593_v51 = vpop.permute.xlu1 %3448  ;;  %v8597_v7 = vpop.permute.xlu0 %3852 }
 0xeca   : > { %11922 = vst [vmem:[#allocation89_spill] sm:$0xff] %v8597_v7 }
 0xecb   : > { %3764 = vrot.lane.b32.xlu1 %v8591_v36, %s11824_s14 }
 0xecd   : > { %v8599_v9 = vpop.permute.xlu1 %3480  ;;  %v8607_v46 = vpop.permute.xlu0 %3884 }
 0xece   : > { %11923 = vst [vmem:[#allocation90_spill] sm:$0xff] %v8607_v46 }
 0xecf   : > { %3796 = vrot.lane.b32.xlu1 %v8591_v36, %s11822_s30 }
 0xed1   : > { %v8605_v4 = vpop.permute.xlu1 %3512  ;;  %v8615_v7 = vpop.permute.xlu0 %3916 }
 0xed2   : > { %5613 = vadd.xlane.f32.xlu0 %v5612_v19  ;;  %11925 = vst [vmem:[#allocation92_spill] sm:$0xff] %v8615_v7 }
 0xed3   : > { %3828 = vrot.lane.b32.xlu1 %v8591_v36, %s11823_s12 }
 0xed5   : > { %v8611_v54 = vpop.permute.xlu1 %3544  ;;  %v8623_v3 = vpop.permute.xlu0 %3948 }
 0xed6   : > { %11924 = vst [vmem:[#allocation91_spill] sm:$0xff] %v8611_v54  ;;  %11928 = vst [vmem:[#allocation95_spill] sm:$0xff] %v8623_v3 }
 0xed7   : > { %3860 = vrot.lane.b32.xlu1 %v8591_v36, %s11828_s25 }
 0xed9   : > { %v8617_v41 = vpop.permute.xlu1 %3576  ;;  %v8631_v46 = vpop.permute.xlu0 %3980 }
 0xeda   : > { %11926 = vst [vmem:[#allocation93_spill] sm:$0xff] %v8617_v41  ;;  %11930 = vst [vmem:[#allocation97_spill] sm:$0xff] %v8631_v46  ;;  %v3277_v41 = vpop.f32.mrf.mxu0 }
 0xedb   : > { %3892 = vrot.lane.b32.xlu1 %v8591_v36, %s11831_s13  ;;  %v3278_v3 = vadd.f32 %v3277_v41, %v7743_v63 }
 0xedd   : > { %v8621_v45 = vpop.permute.xlu1 %3758  ;;  %v8642_v54 = vpop.permute.xlu0 %4012  ;;  %v3288_v46 = vmax.f32 %v3278_v3, 0.0 }
 0xede   : > { %11927 = vst [vmem:[#allocation94_spill] sm:$0xff] %v8621_v45 }
 0xedf   : > { %3924 = vrot.lane.b32.xlu1 %v8591_v36, %s11832_s0  ;;  %v8655_v41 = vadd.f32 %v3288_v46, %v8142_v62 }
 0xee1   : > { %v8627_v19 = vpop.permute.xlu1 %3790 }
 0xee2   : > { %11929 = vst [vmem:[#allocation96_spill] sm:$0xff] %v8627_v19 }
 0xee3   : > { %3956 = vrot.lane.b32.xlu1 %v8591_v36, %s11833_s19 }
 0xee5   : > { %v8633_v7 = vpop.permute.xlu1 %3822 }
 0xee6   : > { %11931 = vst [vmem:[#allocation98_spill] sm:$0xff] %v8633_v7 }
 0xee7   : > { %3988 = vrot.lane.b32.xlu1 %v8591_v36, %s11829_s24 }
 0xee8   : > { %3358 = vrot.lane.b32.xlu0 %v8591_v36, %s11824_s14 }
 0xee9   : > { %v8640_v45 = vpop.permute.xlu1 %3854 }
 0xeea   : > { %11932 = vst [vmem:[#allocation99_spill] sm:$0xff] %v8640_v45  ;;  %v8657_v45 = vpop.permute.xlu0 %3604 }
 0xeeb   : > { %4020 = vrot.lane.b32.xlu1 %v8591_v36, %s11830_s22  ;;  %11934 = vst [vmem:[#allocation101_spill] sm:$0xff] %v8657_v45 }
 0xeec   : > { %3390 = vrot.lane.b32.xlu0 %v8591_v36, %s11822_s30 }
 0xeed   : > { %v8648_v7 = vpop.permute.xlu1 %3886 }
 0xeee   : > { %11933 = vst [vmem:[#allocation100_spill] sm:$0xff] %v8648_v7  ;;  %v8667_v7 = vpop.permute.xlu0 %3624 }
 0xeef   : > { %4323 = vrot.lane.b32.xlu1 %v8591_v36, %s11893_s3  ;;  %11937 = vst [vmem:[#allocation104_spill] sm:$0xff] %v8667_v7 }
 0xef0   : > { %3422 = vrot.lane.b32.xlu0 %v8591_v36, %s11823_s12 }
 0xef1   : > { %v8659_v19 = vpop.permute.xlu1 %3918 }
 0xef2   : > { %11935 = vst [vmem:[#allocation102_spill] sm:$0xff] %v8659_v19  ;;  %v8679_v46 = vpop.permute.xlu0 %3644 }
 0xef3   : > { %3362 = vrot.lane.b32.xlu1 %v8655_v41, %s11824_s14  ;;  %11939 = vst [vmem:[#allocation106_spill] sm:$0xff] %v8679_v46 }
 0xef4   : > { %3454 = vrot.lane.b32.xlu0 %v8591_v36, %s11828_s25 }
 0xef5   : > { %v8665_v3 = vpop.permute.xlu1 %3950 }
 0xef6   : > { %11936 = vst [vmem:[#allocation103_spill] sm:$0xff] %v8665_v3  ;;  %v8689_v7 = vpop.permute.xlu0 %3664 }
 0xef7   : > { %3394 = vrot.lane.b32.xlu1 %v8655_v41, %s11822_s30  ;;  %11942 = vst [vmem:[#allocation109_spill] sm:$0xff] %v8689_v7 }
 0xef8   : > { %3486 = vrot.lane.b32.xlu0 %v8591_v36, %s11831_s13 }
 0xef9   : > { %v8673_v62 = vpop.permute.xlu1 %3982 }
 0xefa   : > { %11938 = vst [vmem:[#allocation105_spill] sm:$0xff] %v8673_v62 }
 0xefb   : > { %3426 = vrot.lane.b32.xlu1 %v8655_v41, %s11823_s12 }
 0xefc   : > { %3518 = vrot.lane.b32.xlu0 %v8591_v36, %s11832_s0 }
 0xefd   : > { %v8681_v19 = vpop.permute.xlu1 %4014 }
 0xefe   : > { %11940 = vst [vmem:[#allocation107_spill] sm:$0xff] %v8681_v19  ;;  %v8701_v19 = vpop.permute.xlu0 %3684 }
 0xeff   : > { %3458 = vrot.lane.b32.xlu1 %v8655_v41, %s11828_s25  ;;  %11944 = vst [vmem:[#allocation111_spill] sm:$0xff] %v8701_v19 }
 0xf00   : > { %3550 = vrot.lane.b32.xlu0 %v8591_v36, %s11833_s19 }
 0xf01   : > { %v8687_v3 = vpop.permute.xlu1 %3356 }
 0xf02   : > { %11941 = vst [vmem:[#allocation108_spill] sm:$0xff] %v8687_v3  ;;  %v8711_v7 = vpop.permute.xlu0 %3704 }
 0xf03   : > { %3490 = vrot.lane.b32.xlu1 %v8655_v41, %s11831_s13  ;;  %11947 = vst [vmem:[#allocation114_spill] sm:$0xff] %v8711_v7  ;;  %v3279_v7 = vpop.f32.mrf.mxu0 }
 0xf04   : > { %3582 = vrot.lane.b32.xlu0 %v8591_v36, %s11829_s24 }
 0xf05   : > { %v8695_v62 = vpop.permute.xlu1 %3388 }
 0xf06   : > { %11943 = vst [vmem:[#allocation110_spill] sm:$0xff] %v8695_v62 }
 0xf07   : > { %3522 = vrot.lane.b32.xlu1 %v8655_v41, %s11832_s0 }
 0xf08   : > { %3608 = vrot.lane.b32.xlu0 %v8591_v36, %s11885_s26 }
 0xf09   : > { %v8703_v46 = vpop.permute.xlu1 %3420 }
 0xf0a   : > { %11945 = vst [vmem:[#allocation112_spill] sm:$0xff] %v8703_v46  ;;  %v8723_v46 = vpop.permute.xlu0 %3724 }
 0xf0b   : > { %3554 = vrot.lane.b32.xlu1 %v8655_v41, %s11833_s19  ;;  %11949 = vst [vmem:[#allocation116_spill] sm:$0xff] %v8723_v46 }
 0xf0c   : > { %3628 = vrot.lane.b32.xlu0 %v8591_v36, %s11886_s16 }
 0xf0d   : > { %v8709_v3 = vpop.permute.xlu1 %3452 }
 0xf0e   : > { %11946 = vst [vmem:[#allocation113_spill] sm:$0xff] %v8709_v3 }
 0xf0f   : > { %3586 = vrot.lane.b32.xlu1 %v8655_v41, %s11829_s24 }
 0xf10   : > { %3648 = vrot.lane.b32.xlu0 %v8591_v36, %s11887_s23 }
 0xf11   : > { %v8717_v62 = vpop.permute.xlu1 %3484 }
 0xf12   : > { %11948 = vst [vmem:[#allocation115_spill] sm:$0xff] %v8717_v62  ;;  %v8733_v62 = vpop.permute.xlu0 %4317 }
 0xf13   : > { %3610 = vrot.lane.b32.xlu1 %v8655_v41, %s11885_s26  ;;  %11952 = vst [vmem:[#allocation119_spill] sm:$0xff] %v8733_v62 }
 0xf14   : > { %3668 = vrot.lane.b32.xlu0 %v8591_v36, %s11888_s1 }
 0xf15   : > { %v8725_v19 = vpop.permute.xlu1 %3516 }
 0xf16   : > { %11950 = vst [vmem:[#allocation117_spill] sm:$0xff] %v8725_v19  ;;  %v3280_v19 = vadd.f32 %v3279_v7, %v7743_v63 }
 0xf17   : > { %3630 = vrot.lane.b32.xlu1 %v8655_v41, %s11886_s16 }
 0xf18   : > { %3688 = vrot.lane.b32.xlu0 %v8591_v36, %s11889_s28  ;;  %v3289_v62 = vmax.f32 %v3280_v19, 0.0 }
 0xf19   : > { %v8731_v3 = vpop.permute.xlu1 %3548 }
 0xf1a   : > { %11951 = vst [vmem:[#allocation118_spill] sm:$0xff] %v8731_v3  ;;  %v8746_v3 = vpop.permute.xlu0 %3762  ;;  %v8757_v63 = vadd.f32 %v3289_v62, %v8140_v42 }
 0xf1b   : > { %3650 = vrot.lane.b32.xlu1 %v8655_v41, %s11887_s23  ;;  %11954 = vst [vmem:[#allocation121_spill] sm:$0xff] %v8746_v3 }
 0xf1c   : > { %3708 = vrot.lane.b32.xlu0 %v8591_v36, %s11890_s2 }
 0xf1d   : > { %v8739_v46 = vpop.permute.xlu1 %3580 }
 0xf1e   : > { %11953 = vst [vmem:[#allocation120_spill] sm:$0xff] %v8739_v46  ;;  %v8759_v7 = vpop.permute.xlu0 %3794 }
 0xf1f   : > { %3670 = vrot.lane.b32.xlu1 %v8655_v41, %s11888_s1  ;;  %11957 = vst [vmem:[#allocation124_spill] sm:$0xff] %v8759_v7 }
 0xf20   : > { %3728 = vrot.lane.b32.xlu0 %v8591_v36, %s11891_s15 }
 0xf21   : > { %v8748_v45 = vpop.permute.xlu1 %3606 }
 0xf22   : > { %11955 = vst [vmem:[#allocation122_spill] sm:$0xff] %v8748_v45  ;;  %v8771_v3 = vpop.permute.xlu0 %3826 }
 0xf23   : > { %3690 = vrot.lane.b32.xlu1 %v8655_v41, %s11889_s28  ;;  %11959 = vst [vmem:[#allocation126_spill] sm:$0xff] %v8771_v3 }
 0xf24   : > { %4327 = vrot.lane.b32.xlu0 %v8655_v41, %s11893_s3 }
 0xf25   : > { %v8754_v46 = vpop.permute.xlu1 %3626 }
 0xf26   : > { %11956 = vst [vmem:[#allocation123_spill] sm:$0xff] %v8754_v46  ;;  %v8781_v7 = vpop.permute.xlu0 %3858 }
 0xf27   : > { %3710 = vrot.lane.b32.xlu1 %v8655_v41, %s11890_s2  ;;  %11962 = vst [vmem:[#allocation129_spill] sm:$0xff] %v8781_v7 }
 0xf28   : > { %3364 = vrot.lane.b32.xlu0 %v8757_v63, %s11824_s14 }
 0xf29   : > { %v8765_v19 = vpop.permute.xlu1 %3646 }
 0xf2a   : > { %11958 = vst [vmem:[#allocation125_spill] sm:$0xff] %v8765_v19  ;;  %v8793_v3 = vpop.permute.xlu0 %3890 }
 0xf2b   : > { %3730 = vrot.lane.b32.xlu1 %v8655_v41, %s11891_s15  ;;  %11964 = vst [vmem:[#allocation131_spill] sm:$0xff] %v8793_v3 }
 0xf2c   : > { %3396 = vrot.lane.b32.xlu0 %v8757_v63, %s11822_s30 }
 0xf2d   : > { %v8773_v42 = vpop.permute.xlu1 %3666 }
 0xf2e   : > { %11960 = vst [vmem:[#allocation127_spill] sm:$0xff] %v8773_v42  ;;  %v8803_v45 = vpop.permute.xlu0 %3922 }
 0xf2f   : > { %3768 = vrot.lane.b32.xlu1 %v8655_v41, %s11824_s14  ;;  %11966 = vst [vmem:[#allocation133_spill] sm:$0xff] %v8803_v45 }
 0xf30   : > { %3428 = vrot.lane.b32.xlu0 %v8757_v63, %s11823_s12 }
 0xf31   : > { %v8779_v62 = vpop.permute.xlu1 %3686 }
 0xf32   : > { %11961 = vst [vmem:[#allocation128_spill] sm:$0xff] %v8779_v62  ;;  %v8815_v3 = vpop.permute.xlu0 %3954 }
 0xf33   : > { %3800 = vrot.lane.b32.xlu1 %v8655_v41, %s11822_s30  ;;  %11968 = vst [vmem:[#allocation135_spill] sm:$0xff] %v8815_v3 }
 0xf34   : > { %3460 = vrot.lane.b32.xlu0 %v8757_v63, %s11828_s25 }
 0xf35   : > { %v8787_v19 = vpop.permute.xlu1 %3706 }
 0xf36   : > { %11963 = vst [vmem:[#allocation130_spill] sm:$0xff] %v8787_v19 }
 0xf37   : > { %3832 = vrot.lane.b32.xlu1 %v8655_v41, %s11823_s12 }
 0xf38   : > { %3492 = vrot.lane.b32.xlu0 %v8757_v63, %s11831_s13 }
 0xf39   : > { %v8795_v46 = vpop.permute.xlu1 %3726 }
 0xf3b   : > { %3864 = vrot.lane.b32.xlu1 %v8655_v41, %s11828_s25 }
 0xf3c   : > { %3524 = vrot.lane.b32.xlu0 %v8757_v63, %s11832_s0 }
 0xf3d   : > { %v8801_v7 = vpop.permute.xlu1 %3764 }
 0xf3e   : > { %11965 = vst [vmem:[#allocation132_spill] sm:$0xff] %v8801_v7  ;;  %v8825_v7 = vpop.permute.xlu0 %3986 }
 0xf3f   : > { %3896 = vrot.lane.b32.xlu1 %v8655_v41, %s11831_s13  ;;  %11971 = vst [vmem:[#allocation138_spill] sm:$0xff] %v8825_v7 }
 0xf40   : > { %3556 = vrot.lane.b32.xlu0 %v8757_v63, %s11833_s19 }
 0xf41   : > { %v8809_v42 = vpop.permute.xlu1 %3796 }
 0xf42   : > { %11967 = vst [vmem:[#allocation134_spill] sm:$0xff] %v8809_v42  ;;  %v8837_v3 = vpop.permute.xlu0 %4018 }
 0xf43   : > { %3928 = vrot.lane.b32.xlu1 %v8655_v41, %s11832_s0  ;;  %11973 = vst [vmem:[#allocation140_spill] sm:$0xff] %v8837_v3 }
 0xf44   : > { %3588 = vrot.lane.b32.xlu0 %v8757_v63, %s11829_s24 }
 0xf45   : > { %v8817_v62 = vpop.permute.xlu1 %3828 }
 0xf46   : > { %11969 = vst [vmem:[#allocation136_spill] sm:$0xff] %v8817_v62 }
 0xf47   : > { %3960 = vrot.lane.b32.xlu1 %v8655_v41, %s11833_s19 }
 0xf48   : > { %3612 = vrot.lane.b32.xlu0 %v8757_v63, %s11885_s26  ;;  %s5945_s26 = sshll.u32 %s6569_s21, 8  ;;  %s6487_s21 = smov [#allocation4]  }
 0xf49   : > { %v8823_v45 = vpop.permute.xlu1 %3860 }
 0xf4a   : > { %11970 = vst [vmem:[#allocation137_spill] sm:$0xff] %v8823_v45  ;;  %v8845_v45 = vpop.permute.xlu0 %4321 }
 0xf4b   : > { %3992 = vrot.lane.b32.xlu1 %v8655_v41, %s11829_s24  ;;  %11976 = vst [vmem:[#allocation143_spill] sm:$0xff] %v8845_v45 }
 0xf4c   : > { %3632 = vrot.lane.b32.xlu0 %v8757_v63, %s11886_s16 }
 0xf4d   : > { %v8831_v42 = vpop.permute.xlu1 %3892 }
 0xf4e   : > { %11972 = vst [vmem:[#allocation139_spill] sm:$0xff] %v8831_v42 }
 0xf4f   : > { %4024 = vrot.lane.b32.xlu1 %v8655_v41, %s11830_s22 }
 0xf50   : > { %3652 = vrot.lane.b32.xlu0 %v8757_v63, %s11887_s23 }
 0xf51   : > { %v8839_v62 = vpop.permute.xlu1 %3924 }
 0xf52   : > { %11974 = vst [vmem:[#allocation141_spill] sm:$0xff] %v8839_v62 }
 0xf54   : > { %3672 = vrot.lane.b32.xlu0 %v8757_v63, %s11888_s1 }
 0xf55   : > { %v8843_v7 = vpop.permute.xlu1 %3956 }
 0xf56   : > { %11975 = vst [vmem:[#allocation142_spill] sm:$0xff] %v8843_v7 }
 0xf58   : > { %3692 = vrot.lane.b32.xlu0 %v8757_v63, %s11889_s28  ;;  %s5720_s28 = scalar_lea.hbm %s11506_s10, %s5945_s26 }
 0xf59   : > { %v8851_v19 = vpop.permute.xlu1 %3988 }
 0xf5a   : > { %11978 = vst [vmem:[#allocation145_spill] sm:$0xff] %v8851_v19 }
 0xf5b   : > { %v8849_v42 = vpop.xlane.xlu0 %5613 }
 0xf5c   : > { %11977 = vst [vmem:[#allocation144_spill] sm:$0xff] %v8849_v42  ;;  %3712 = vrot.lane.b32.xlu0 %v8757_v63, %s11890_s2  ;;  %s393_s2 = sand.u32 1, %s6449_s18  }
 0xf5d   : > { %v8859_v62 = vpop.permute.xlu1 %4020 }
 0xf5e   : > { %11980 = vst [vmem:[#allocation147_spill] sm:$0xff] %v8859_v62 }
 0xf5f   : > { %v8855_v3 = vpop.permute.xlu0 %3358 }
 0xf60   : > { %11979 = vst [vmem:[#allocation146_spill] sm:$0xff] %v8855_v3  ;;  %3732 = vrot.lane.b32.xlu0 %v8757_v63, %s11891_s15 }
 0xf61   : > { %v8867_v42 = vpop.permute.xlu1 %4323 }
 0xf62   : > { %11983 = vst [vmem:[#allocation150_spill] sm:$0xff] %v8867_v42 }
 0xf63   : > { %v8861_v7 = vpop.permute.xlu0 %3390 }
 0xf64   : > { %11981 = vst [vmem:[#allocation148_spill] sm:$0xff] %v8861_v7  ;;  %3770 = vrot.lane.b32.xlu0 %v8757_v63, %s11824_s14 }
 0xf65   : > { %v8875_v3 = vpop.permute.xlu1 %3362 }
 0xf66   : > { %11985 = vst [vmem:[#allocation152_spill] sm:$0xff] %v8875_v3 }
 0xf67   : > { %v8865_v45 = vpop.permute.xlu0 %3422 }
 0xf68   : > { %11982 = vst [vmem:[#allocation149_spill] sm:$0xff] %v8865_v45  ;;  %3802 = vrot.lane.b32.xlu0 %v8757_v63, %s11822_s30  ;;  %v5615_v45 = vadd.f32 %v8591_v36, %v8477_v20  ;;  %s5944_s30 = sshll.u32 %s6602_s29, 4 }
 0xf69   : > { %v8885_v7 = vpop.permute.xlu1 %3394 }
 0xf6a   : > { %11988 = vst [vmem:[#allocation155_spill] sm:$0xff] %v8885_v7 }
 0xf6b   : > { %v8871_v19 = vpop.permute.xlu0 %3454 }
 0xf6c   : > { %11984 = vst [vmem:[#allocation151_spill] sm:$0xff] %v8871_v19  ;;  %3834 = vrot.lane.b32.xlu0 %v8757_v63, %s11823_s12  ;;  %s5824_s12 = sshll.u32 %s393_s2, 4 }
 0xf6d   : > { %v8893_v3 = vpop.permute.xlu1 %3426 }
 0xf6e   : > { %11990 = vst [vmem:[#allocation157_spill] sm:$0xff] %v8893_v3 }
 0xf6f   : > { %v8877_v62 = vpop.permute.xlu0 %3486 }
 0xf70   : > { %11986 = vst [vmem:[#allocation153_spill] sm:$0xff] %v8877_v62  ;;  %3866 = vrot.lane.b32.xlu0 %v8757_v63, %s11828_s25 }
 0xf71   : > { %v8901_v20 = vpop.permute.xlu1 %3458 }
 0xf72   : > { %11993 = vst [vmem:[#allocation160_spill] sm:$0xff] %v8901_v20 }
 0xf73   : > { %5616 = vadd.xlane.f32.xlu1 %v5615_v45  ;;  %v8883_v42 = vpop.permute.xlu0 %3518 }
 0xf74   : > { %11987 = vst [vmem:[#allocation154_spill] sm:$0xff] %v8883_v42  ;;  %3898 = vrot.lane.b32.xlu0 %v8757_v63, %s11831_s13  ;;  %s411_s13 = scalar_lea.vmem %s11505_s9, %s5944_s30  ;;  %s5704_s30 = scalar_lea.sflag [#allocation5], %s393_s2 }
 0xf75   : > { %v8911_v3 = vpop.permute.xlu1 %3490 }
 0xf76   : > { %11995 = vst [vmem:[#allocation162_spill] sm:$0xff] %v8911_v3 }
 0xf77   : > { %v8889_v19 = vpop.permute.xlu0 %3550 }
 0xf78   : > { %11989 = vst [vmem:[#allocation156_spill] sm:$0xff] %v8889_v19  ;;  %3930 = vrot.lane.b32.xlu0 %v8757_v63, %s11832_s0  ;;  %s12637_s0 = sshll.u32 %s6602_s29, 3  ;;  %s395_s29 = scalar_lea.vmem [#allocation4], %s5824_s12 }
 0xf79   : > { %v8919_v20 = vpop.permute.xlu1 %3522  ;;  %s5722_s16 = sshll.u32 %s395_s29, 4  ;;  %s6401_s12 = sshll.u32 %s6487_s21, 4  ;;  %s5723_s16 = int_to_ptr.vmem [resolvable:$true] %s5722_s16  ;;  %s6402_s12 = int_to_ptr.vmem [resolvable:$false] %s6401_s12 }
 0xf7a   : > { %11998 = vst [vmem:[#allocation165_spill] sm:$0xff] %v8919_v20  ;;  %s6397_s14 = scalar_lea.vmem %s5723_s16, 256  ;;  %s6403_s25 = scalar_lea.vmem %s6402_s12, 512 }
 0xf7b   : > { %v8895_v62 = vpop.permute.xlu0 %3582  ;;  %p6398_p11 = scmp.ne.s32.totalorder %s5723_s16, %s6397_s14  ;;  %p6404_p0 = scmp.lt.s32.totalorder %s5723_s16, %s6402_s12 }
 0xf7c   : > { %11991 = vst [vmem:[#allocation158_spill] sm:$0xff] %v8895_v62  ;;  %3962 = vrot.lane.b32.xlu0 %v8757_v63, %s11833_s19  ;;  %p6405_p1 = scmp.lt.s32.totalorder %s6403_s25, %s6397_s14 }
 0xf7d   : > { %v8927_v62 = vpop.permute.xlu1 %3554  ;;  %p6399_p12 = pnand %p6398_p11, %p6586_p5 }
 0xf7e   : > { %12000 = vst [vmem:[#allocation167_spill] sm:$0xff] %v8927_v62  ;;  %p6406_p2 = por %p6405_p1, %p6404_p0 }
 0xf7f   : > { %v8899_v36 = vpop.permute.xlu0 %3608  ;;  %p6400_p13 = pneg %p6399_p12 }
 0xf80   : > { %11992 = vst [vmem:[#allocation159_spill] sm:$0xff] %v8899_v36  ;;  %3994 = vrot.lane.b32.xlu0 %v8757_v63, %s11829_s24 }
 0xf81   : > { %v8935_v19 = vpop.permute.xlu1 %3586  ;;  %p6407_p3 = pnand %p6406_p2, %p6400_p13 }
 0xf82   : > { %12002 = vst [vmem:[#allocation169_spill] sm:$0xff] %v8935_v19  ;;  %v5618_v19 = vadd.f32 %v8757_v63, %v8655_v41 }
 0xf83   : > { %v8905_v45 = vpop.permute.xlu0 %3628 }
 0xf84   : > { %11994 = vst [vmem:[#allocation161_spill] sm:$0xff] %v8905_v45  ;;  %4329 = vrot.lane.b32.xlu1 %v8757_v63, %s11893_s3  ;;  %4026 = vrot.lane.b32.xlu0 %v8757_v63, %s11830_s22  ;;  %v3902_v63 = vsel %vm493_vm5, %v8395_v25, %v8462_v15  ;;  %v3966_v25 = vsel %vm517_vm4, %v8411_v60, %v8481_v50 }
 0xf85   : > { %v8943_v42 = vpop.permute.xlu1 %3610  ;;  %v3367_v60 = vsel %vm445_vm1, %v8305_v18, %v8443_v53 }
 0xf87   : > { %v8913_v7 = vpop.permute.xlu0 %3648 }
 0xf88   : > { %11996 = vst [vmem:[#allocation163_spill] sm:$0xff] %v8913_v7  ;;  %4667 = vrot.lane.b32.xlu1 %v8355_v1, %s11893_s3 }
 0xf8b   : > { %v8917_v36 = vpop.permute.xlu0 %3668 }
 0xf8c   : > { %11997 = vst [vmem:[#allocation164_spill] sm:$0xff] %v8917_v36  ;;  %4643 = vrot.lane.b32.xlu1 %v8347_v37, %s11893_s3  ;;  %v3774_v36 = vsel %vm445_vm1, %v8363_v27, %v8429_v28  ;;  %v3838_v27 = vsel %vm469_vm8, %v8379_v13, %v8445_v57  ;;  %v3934_v13 = vsel %vm505_vm3, %v8403_v59, %v8470_v58 }
 0xf8f   : > { %v8923_v45 = vpop.permute.xlu0 %3688 }
 0xf90   : > { %11999 = vst [vmem:[#allocation166_spill] sm:$0xff] %v8923_v45  ;;  %4619 = vrot.lane.b32.xlu1 %v8339_v10, %s11893_s3  ;;  %v8956_v45 = vpop.permute.xlu1 %3630 }
 0xf93   : > { %v8929_v3 = vpop.permute.xlu0 %3708 }
 0xf94   : > { %12001 = vst [vmem:[#allocation168_spill] sm:$0xff] %v8929_v3  ;;  %4671 = vrot.lane.b32.xlu1 %v8421_v31, %s11893_s3 }
 0xf97   : > { %v8933_v7 = vpop.permute.xlu0 %3728 }
 0xf98   : > { %4647 = vrot.lane.b32.xlu1 %v8413_v56, %s11893_s3 }
 0xf9b   : > { %v8939_v20 = vpop.permute.xlu0 %4327 }
 0xf9c   : > { %12003 = vst [vmem:[#allocation170_spill] sm:$0xff] %v8939_v20  ;;  %4623 = vrot.lane.b32.xlu1 %v8405_v30, %s11893_s3  ;;  %v3806_v20 = vsel %vm457_vm7, %v8371_v29, %v8437_v5  ;;  %v3870_v29 = vsel %vm481_vm6, %v8387_v14, %v8453_v2 }
 0xf9f   : > { %v8945_v62 = vpop.permute.xlu0 %3364 }
 0xfa0   : > { %4030 = vrot.lane.b32.xlu1 %v3774_v36, %s11830_s22  ;;  %v8965_v36 = vpop.permute.xlu1 %3650 }
 0xfa3   : > { %5619 = vadd.xlane.f32.xlu0 %v5618_v19  ;;  %v8958_v3 = vpop.permute.xlu0 %3396 }
 0xfa4   : > { %12004 = vst [vmem:[#allocation171_spill] sm:$0xff] %v8958_v3  ;;  %4054 = vrot.lane.b32.xlu1 %v3806_v20, %s11830_s22  ;;  %v8976_v19 = vpop.permute.xlu1 %3670  ;;  %v12146_v3 = vld [vmem:[#allocation92_spill] sm:$0xff] }
 0xfa7   : > { %v8967_v41 = vpop.permute.xlu0 %3428 }
 0xfa8   : > { %4078 = vrot.lane.b32.xlu1 %v3838_v27, %s11830_s22  ;;  %12005 = vst [vmem:[#allocation172_spill] sm:$0xff] %v8967_v41  ;;  %v8985_v27 = vpop.permute.xlu1 %3690 }
 0xfab   : > { %v8978_v20 = vpop.permute.xlu0 %3460 }
 0xfac   : > { %4102 = vrot.lane.b32.xlu1 %v3870_v29, %s11830_s22  ;;  %12006 = vst [vmem:[#allocation173_spill] sm:$0xff] %v8978_v20  ;;  %v3998_v29 = vsel %vm529_vm2, %v8419_v11, %v8489_v23  ;;  %v8998_v59 = vpop.permute.xlu1 %3710  ;;  %v3495_v20 = vsel %vm493_vm5, %v8341_v48, %v8479_v22 }
 0xfaf   : > { %v8987_v14 = vpop.permute.xlu0 %3492 }
 0xfb0   : > { %4126 = vrot.lane.b32.xlu1 %v3902_v63, %s11830_s22  ;;  %12007 = vst [vmem:[#allocation174_spill] sm:$0xff] %v8987_v14 }
 0xfb3   : > { %v9000_v63 = vpop.permute.xlu0 %3524 }
 0xfb4   : > { %4150 = vrot.lane.b32.xlu1 %v3934_v13, %s11830_s22  ;;  %12008 = vst [vmem:[#allocation175_spill] sm:$0xff] %v9000_v63  ;;  %v9011_v13 = vpop.permute.xlu1 %3730 }
 0xfb7   : > { %v9013_v11 = vpop.permute.xlu0 %3556 }
 0xfb8   : > { %4174 = vrot.lane.b32.xlu1 %v3966_v25, %s11830_s22  ;;  %12009 = vst [vmem:[#allocation176_spill] sm:$0xff] %v9013_v11  ;;  %v3399_v25 = vsel %vm457_vm7, %v8313_v8, %v8451_v26  ;;  %v6134_v11 = vunpack.i.l.bf16 %v7751_v40 }
 0xfb9   : > { %4523 = vrot.lane.b32.xlu0 %v8303_v32, %s11893_s3 }
 0xfba   : > { %v3366_v14 = vsel %vm445_vm1, %v6134_v11, %v8305_v18  ;;  %v6154_v18 = vunpack.i.l.bf16 %v7759_v12 }
 0xfbb   : > { %v9026_v63 = vpop.permute.xlu0 %3588 }
 0xfbc   : > { %4198 = vrot.lane.b32.xlu1 %v3998_v29, %s11830_s22  ;;  %v3431_v29 = vsel %vm469_vm8, %v8322_v44, %v8460_v43  ;;  %12011 = vst [vmem:[#allocation178_spill] sm:$0xff] %v9026_v63 }
 0xfbd   : > { %4547 = vrot.lane.b32.xlu0 %v8311_v52, %s11893_s3 }
 0xfc0   : > { %4333 = vrot.lane.b32.xlu1 %v3367_v60, %s11893_s3  ;;  %v9024_v60 = vpop.permute.xlu1 %3768 }
 0xfc1   : > { %4571 = vrot.lane.b32.xlu0 %v8320_v39, %s11893_s3  ;;  %12010 = vst [vmem:[#allocation177_spill] sm:$0xff] %v9024_v60  ;;  %v6144_v60 = vunpack.i.l.bf16 %v7755_v6 }
 0xfc4   : > { %4357 = vrot.lane.b32.xlu1 %v3399_v25, %s11893_s3  ;;  %v3463_v25 = vsel %vm481_vm6, %v8330_v34, %v8468_v0  ;;  %v9040_v63 = vpop.permute.xlu1 %3800 }
 0xfc5   : > { %4595 = vrot.lane.b32.xlu0 %v8328_v38, %s11893_s3  ;;  %12012 = vst [vmem:[#allocation179_spill] sm:$0xff] %v9040_v63 }
 0xfc8   : > { %4381 = vrot.lane.b32.xlu1 %v3431_v29, %s11893_s3  ;;  %v9042_v29 = vpop.permute.xlu0 %3612  ;;  %v9055_v11 = vpop.permute.xlu1 %3832 }
 0xfc9   : > { %4691 = vrot.lane.b32.xlu0 %v8427_v35, %s11893_s3  ;;  %12013 = vst [vmem:[#allocation180_spill] sm:$0xff] %v9042_v29  ;;  %12014 = vst [vmem:[#allocation181_spill] sm:$0xff] %v9055_v11 }
 0xfcc   : > { %4405 = vrot.lane.b32.xlu1 %v3463_v25, %s11893_s3  ;;  %v3398_v25 = vsel %vm457_vm7, %v6144_v60, %v8313_v8  ;;  %v9057_v63 = vpop.permute.xlu0 %3632  ;;  %v6164_v8 = vunpack.i.l.bf16 %v7763_v16  ;;  %v3559_v60 = vsel %vm517_vm4, %v8357_v49, %v8495_v24  ;;  %v9072_v11 = vpop.permute.xlu1 %3864 }
 0xfcd   : > { %4331 = vrot.lane.b32.xlu0 %v3366_v14, %s11893_s3  ;;  %v3527_v14 = vsel %vm505_vm3, %v8349_v33, %v8487_v61  ;;  %12015 = vst [vmem:[#allocation182_spill] sm:$0xff] %v9057_v63  ;;  %12016 = vst [vmem:[#allocation183_spill] sm:$0xff] %v9072_v11 }
 0xfd0   : > { %4429 = vrot.lane.b32.xlu1 %v3495_v20, %s11893_s3  ;;  %v3430_v20 = vsel %vm469_vm8, %v6154_v18, %v8322_v44  ;;  %v9074_v44 = vpop.permute.xlu0 %3652  ;;  %v12018_v18 = vld [vmem:[#allocation61_spill] sm:$0xff]  ;;  %v9087_v11 = vpop.permute.xlu1 %3896 }
 0xfd1   : > { %4355 = vrot.lane.b32.xlu0 %v3398_v25, %s11893_s3  ;;  %v3462_v25 = vsel %vm481_vm6, %v6164_v8, %v8330_v34  ;;  %12017 = vst [vmem:[#allocation184_spill] sm:$0xff] %v9074_v44  ;;  %v12019_v34 = vld [vmem:[#allocation17_spill] sm:$0xff]  ;;  %12021 = vst [vmem:[#allocation61_spill] sm:$0xff] %v9087_v11 }
 0xfd2   : > { %v6184_v8 = vunpack.i.l.bf16 %v12019_v34  ;;  %v12025_v11 = vld [vmem:[#allocation21_spill] sm:$0xff] }
 0xfd4   : > { %4453 = vrot.lane.b32.xlu1 %v3527_v14, %s11893_s3  ;;  %v6174_v14 = vunpack.i.l.bf16 %v7767_v17  ;;  %v9089_v44 = vpop.permute.xlu0 %3672 }
 0xfd5   : > { %4379 = vrot.lane.b32.xlu0 %v3430_v20, %s11893_s3  ;;  %v3591_v20 = vsel %vm529_vm2, %v12018_v18, %v8503_v55  ;;  %12022 = vst [vmem:[#allocation17_spill] sm:$0xff] %v9089_v44  ;;  %v9104_v44 = vpop.permute.xlu1 %3928 }
 0xfd8   : > { %4477 = vrot.lane.b32.xlu1 %v3559_v60, %s11893_s3  ;;  %v3494_v60 = vsel %vm493_vm5, %v6174_v14, %v8341_v48  ;;  %v12023_v48 = vld [vmem:[#allocation19_spill] sm:$0xff] }
 0xfd9   : > { %4403 = vrot.lane.b32.xlu0 %v3462_v25, %s11893_s3  ;;  %v12020_v25 = vld [vmem:[#allocation62_spill] sm:$0xff]  ;;  %v6194_v14 = vunpack.i.l.bf16 %v12023_v48 }
 0xfda   : > { %v3614_v63 = vsel %vm541_vm13, %v8303_v32, %v12020_v25  ;;  %12026 = vst [vmem:[#allocation62_spill] sm:$0xff] %v9104_v44  ;;  %v12032_v44 = vld [vmem:[#allocation38_spill] sm:$0xff] }
 0xfdb   : > { %v3558_v32 = vsel %vm517_vm4, %v6194_v14, %v8357_v49  ;;  %v12029_v49 = vld [vmem:[#allocation65_spill] sm:$0xff]  ;;  %v9118_v14 = vpop.permute.xlu1 %3960 }
 0xfdc   : > { %4501 = vrot.lane.b32.xlu1 %v3591_v20, %s11893_s3  ;;  %v3526_v20 = vsel %vm505_vm3, %v6184_v8, %v8349_v33  ;;  %v9106_v33 = vpop.permute.xlu0 %3692  ;;  %v12028_v8 = vld [vmem:[#allocation64_spill] sm:$0xff] }
 0xfdd   : > { %4427 = vrot.lane.b32.xlu0 %v3494_v60, %s11893_s3  ;;  %v12024_v60 = vld [vmem:[#allocation63_spill] sm:$0xff]  ;;  %12027 = vst [vmem:[#allocation19_spill] sm:$0xff] %v9106_v33  ;;  %v6294_v33 = vunpack.i.l.bf16 %v12032_v44 }
 0xfde   : > { %v3634_v29 = vsel %vm553_vm14, %v8311_v52, %v12024_v60  ;;  %12030 = vst [vmem:[#allocation63_spill] sm:$0xff] %v9118_v14 }
 0xfe0   : > { %4525 = vrot.lane.b32.xlu1 %v3614_v63, %s11893_s3  ;;  %v6204_v63 = vunpack.i.l.bf16 %v12025_v11 }
 0xfe1   : > { %4451 = vrot.lane.b32.xlu0 %v3526_v20, %s11893_s3  ;;  %v3654_v20 = vsel %vm565_vm15, %v8320_v39, %v12028_v8  ;;  %v12033_v39 = vld [vmem:[#allocation67_spill] sm:$0xff] }
 0xfe2   : > { %v3590_v52 = vsel %vm529_vm2, %v6204_v63, %v12018_v18  ;;  %v4223_v18 = vsel %vm788_vm12, %v12033_v39, %v6294_v33  ;;  %v12039_v33 = vld [vmem:[#allocation71_spill] sm:$0xff] }
 0xfe4   : > { %4549 = vrot.lane.b32.xlu1 %v3634_v29, %s11893_s3  ;;  %v3674_v29 = vsel %vm577_vm11, %v8328_v38, %v12029_v49  ;;  %v9131_v38 = vpop.permute.xlu1 %3992 }
 0xfe5   : > { %4475 = vrot.lane.b32.xlu0 %v3558_v32, %s11893_s3  ;;  %v9120_v32 = vpop.permute.xlu0 %3712  ;;  %12034 = vst [vmem:[#allocation64_spill] sm:$0xff] %v9131_v38  ;;  %v12044_v38 = vld [vmem:[#allocation75_spill] sm:$0xff] }
 0xfe6   : > { %12031 = vst [vmem:[#allocation21_spill] sm:$0xff] %v9120_v32 }
 0xfe8   : > { %4573 = vrot.lane.b32.xlu1 %v3654_v20, %s11893_s3  ;;  %v12036_v20 = vld [vmem:[#allocation69_spill] sm:$0xff] }
 0xfe9   : > { %4499 = vrot.lane.b32.xlu0 %v3590_v52, %s11893_s3  ;;  %v9133_v63 = vpop.permute.xlu0 %3732  ;;  %v9139_v52 = vpop.permute.xlu1 %4024 }
 0xfea   : > { %12035 = vst [vmem:[#allocation65_spill] sm:$0xff] %v9133_v63  ;;  %12037 = vst [vmem:[#allocation38_spill] sm:$0xff] %v9139_v52  ;;  %v6135_v63 = vunpack.i.h.bf16 %v7751_v40 }
 0xfec   : > { %4597 = vrot.lane.b32.xlu1 %v3674_v29, %s11893_s3  ;;  %v12041_v29 = vld [vmem:[#allocation73_spill] sm:$0xff] }
 0xfed   : > { %4335 = vrot.lane.b32.xlu0 %v8443_v53, %s11893_s3  ;;  %v9141_v53 = vpop.permute.xlu0 %3770 }
 0xfee   : > { %12038 = vst [vmem:[#allocation67_spill] sm:$0xff] %v9141_v53  ;;  %v12138_v53 = vld [vmem:[#allocation111_spill] sm:$0xff] }
 0xff0   : > { %4695 = vrot.lane.b32.xlu1 %v4223_v18, %s11893_s3 }
 0xff1   : > { %4359 = vrot.lane.b32.xlu0 %v8451_v26, %s11893_s3  ;;  %v9153_v18 = vpop.permute.xlu0 %3802 }
 0xff2   : > { %12042 = vst [vmem:[#allocation71_spill] sm:$0xff] %v9153_v18 }
 0xff4   : > { %4529 = vrot.lane.b32.xlu1 %v12036_v20, %s11893_s3 }
 0xff5   : > { %4383 = vrot.lane.b32.xlu0 %v8460_v43, %s11893_s3  ;;  %v9161_v14 = vpop.permute.xlu0 %3834 }
 0xff6   : > { %12045 = vst [vmem:[#allocation75_spill] sm:$0xff] %v9161_v14 }
 0xff8   : > { %4553 = vrot.lane.b32.xlu1 %v12039_v33, %s11893_s3 }
 0xff9   : > { %4407 = vrot.lane.b32.xlu0 %v8468_v0, %s11893_s3  ;;  %v9175_v32 = vpop.permute.xlu0 %3866 }
 0xffc   : > { %v9147_v26 = vpop.xlane.xlu1 %5616  ;;  %4577 = vrot.lane.b32.xlu1 %v12041_v29, %s11893_s3 }
 0xffd   : > { %12040 = vst [vmem:[#allocation69_spill] sm:$0xff] %v9147_v26  ;;  %4431 = vrot.lane.b32.xlu0 %v8479_v22, %s11893_s3  ;;  %v12047_v26 = vld [vmem:[#allocation81_spill] sm:$0xff]  ;;  %v9186_v14 = vpop.permute.xlu0 %3898 }
0x1000   : > { %v9155_v43 = vpop.permute.xlu1 %4329  ;;  %4601 = vrot.lane.b32.xlu1 %v12044_v38, %s11893_s3 }
0x1001   : > { %12043 = vst [vmem:[#allocation73_spill] sm:$0xff] %v9155_v43  ;;  %4455 = vrot.lane.b32.xlu0 %v8487_v61, %s11893_s3  ;;  %v12049_v43 = vld [vmem:[#allocation79_spill] sm:$0xff] }
0x1002   : > { %12050 = vst [vmem:[#allocation79_spill] sm:$0xff] %v9175_v32 }
0x1004   : > { %v9163_v0 = vpop.permute.xlu1 %4667  ;;  %4673 = vrot.lane.b32.xlu1 %v12047_v26, %s11893_s3 }
0x1005   : > { %12046 = vst [vmem:[#allocation185_spill] sm:$0xff] %v9163_v0  ;;  %4479 = vrot.lane.b32.xlu0 %v8495_v24, %s11893_s3  ;;  %v12052_v0 = vld [vmem:[#allocation77_spill] sm:$0xff]  ;;  %v12053_v24 = vld [vmem:[#allocation70_spill] sm:$0xff] }
0x1006   : > { %12054 = vst [vmem:[#allocation77_spill] sm:$0xff] %v9186_v14 }
0x1008   : > { %v9169_v22 = vpop.permute.xlu1 %4643  ;;  %4649 = vrot.lane.b32.xlu1 %v12049_v43, %s11893_s3 }
0x1009   : > { %12048 = vst [vmem:[#allocation81_spill] sm:$0xff] %v9169_v22  ;;  %4503 = vrot.lane.b32.xlu0 %v8503_v55, %s11893_s3  ;;  %v3368_v22 = vsel %vm445_vm1, %v6135_v63, %v12053_v24  ;;  %v6145_v55 = vunpack.i.h.bf16 %v7755_v6  ;;  %v9202_v63 = vpop.permute.xlu0 %3930 }
0x100a   : > { %12058 = vst [vmem:[#allocation187_spill] sm:$0xff] %v9202_v63 }
0x100c   : > { %v9177_v61 = vpop.permute.xlu1 %4619  ;;  %4625 = vrot.lane.b32.xlu1 %v12052_v0, %s11893_s3 }
0x100d   : > { %12051 = vst [vmem:[#allocation186_spill] sm:$0xff] %v9177_v61  ;;  %4527 = vrot.lane.b32.xlu0 %v12020_v25, %s11893_s3  ;;  %v12056_v61 = vld [vmem:[#allocation72_spill] sm:$0xff]  ;;  %v6155_v25 = vunpack.i.h.bf16 %v7759_v12 }
0x100e   : > { %v3400_v40 = vsel %vm457_vm7, %v6145_v55, %v12056_v61  ;;  %v12061_v55 = vld [vmem:[#allocation76_spill] sm:$0xff] }
0x1010   : > { %v9188_v18 = vpop.permute.xlu1 %4671  ;;  %4337 = vrot.lane.b32.xlu1 %v3368_v22, %s11893_s3  ;;  %v12059_v22 = vld [vmem:[#allocation74_spill] sm:$0xff] }
0x1011   : > { %12055 = vst [vmem:[#allocation70_spill] sm:$0xff] %v9188_v18  ;;  %4551 = vrot.lane.b32.xlu0 %v12024_v60, %s11893_s3  ;;  %v3432_v6 = vsel %vm469_vm8, %v6155_v25, %v12059_v22  ;;  %v6165_v60 = vunpack.i.h.bf16 %v7763_v16  ;;  %v12066_v16 = vld [vmem:[#allocation78_spill] sm:$0xff] }
0x1013   : > { %v3464_v12 = vsel %vm481_vm6, %v6165_v60, %v12061_v55  ;;  %v12068_v60 = vld [vmem:[#allocation25_spill] sm:$0xff] }
0x1014   : > { %v9196_v32 = vpop.permute.xlu1 %4647  ;;  %4361 = vrot.lane.b32.xlu1 %v3400_v40, %s11893_s3  ;;  %v9214_v40 = vpop.permute.xlu0 %3962 }
0x1015   : > { %12057 = vst [vmem:[#allocation72_spill] sm:$0xff] %v9196_v32  ;;  %4575 = vrot.lane.b32.xlu0 %v12028_v8, %s11893_s3  ;;  %12062 = vst [vmem:[#allocation76_spill] sm:$0xff] %v9214_v40  ;;  %v12064_v32 = vld [vmem:[#allocation23_spill] sm:$0xff]  ;;  %v6185_v40 = vunpack.i.h.bf16 %v12019_v34  ;;  %v12075_v34 = vld [vmem:[#allocation82_spill] sm:$0xff] }
0x1016   : > { %v12065_v25 = vunpack.i.l.bf16 %v12064_v32 }
0x1018   : > { %v9206_v18 = vpop.permute.xlu1 %4623  ;;  %4385 = vrot.lane.b32.xlu1 %v3432_v6, %s11893_s3  ;;  %v6175_v6 = vunpack.i.h.bf16 %v7767_v17  ;;  %v12071_v17 = vld [vmem:[#allocation80_spill] sm:$0xff] }
0x1019   : > { %12060 = vst [vmem:[#allocation74_spill] sm:$0xff] %v9206_v18  ;;  %4599 = vrot.lane.b32.xlu0 %v12029_v49, %s11893_s3  ;;  %v3775_v18 = vsel %vm445_vm1, %v8429_v28, %v12065_v25  ;;  %v9236_v28 = vpop.permute.xlu0 %3994 }
0x101a   : > { %v3496_v49 = vsel %vm493_vm5, %v6175_v6, %v12066_v16  ;;  %12070 = vst [vmem:[#allocation78_spill] sm:$0xff] %v9236_v28  ;;  %v12073_v6 = vld [vmem:[#allocation27_spill] sm:$0xff] }
0x101c   : > { %v9216_v8 = vpop.permute.xlu1 %4030  ;;  %4409 = vrot.lane.b32.xlu1 %v3464_v12, %s11893_s3 }
0x101d   : > { %12063 = vst [vmem:[#allocation188_spill] sm:$0xff] %v9216_v8  ;;  %4032 = vrot.lane.b32.xlu0 %v3775_v18, %s11830_s22  ;;  %v12069_v8 = vunpack.i.l.bf16 %v12068_v60  ;;  %v3528_v18 = vsel %vm505_vm3, %v6185_v40, %v12071_v17  ;;  %v12078_v40 = vld [vmem:[#allocation29_spill] sm:$0xff] }
0x101f   : > { %v3807_v12 = vsel %vm457_vm7, %v8437_v5, %v12069_v8  ;;  %v6195_v5 = vunpack.i.h.bf16 %v12023_v48  ;;  %v12080_v48 = vld [vmem:[#allocation84_spill] sm:$0xff] }
0x1020   : > { %v9227_v63 = vpop.permute.xlu1 %4054  ;;  %4433 = vrot.lane.b32.xlu1 %v3496_v49, %s11893_s3  ;;  %v12074_v49 = vunpack.i.l.bf16 %v12073_v6 }
0x1021   : > { %12067 = vst [vmem:[#allocation23_spill] sm:$0xff] %v9227_v63  ;;  %4056 = vrot.lane.b32.xlu0 %v3807_v12, %s11830_s22  ;;  %v3560_v8 = vsel %vm517_vm4, %v6195_v5, %v12075_v34  ;;  %v9251_v12 = vpop.permute.xlu0 %4026 }
0x1022   : > { %v3839_v63 = vsel %vm469_vm8, %v8445_v57, %v12074_v49  ;;  %12076 = vst [vmem:[#allocation80_spill] sm:$0xff] %v9251_v12  ;;  %v6205_v57 = vunpack.i.h.bf16 %v12025_v11  ;;  %v12086_v11 = vld [vmem:[#allocation85_spill] sm:$0xff] }
0x1024   : > { %v9240_v25 = vpop.permute.xlu1 %4078  ;;  %4457 = vrot.lane.b32.xlu1 %v3528_v18, %s11893_s3  ;;  %v12079_v18 = vunpack.i.l.bf16 %v12078_v40 }
0x1025   : > { %12072 = vst [vmem:[#allocation25_spill] sm:$0xff] %v9240_v25  ;;  %4080 = vrot.lane.b32.xlu0 %v3839_v63, %s11830_s22  ;;  %v3592_v63 = vsel %vm529_vm2, %v6205_v57, %v12080_v48 }
0x1026   : > { %v3871_v25 = vsel %vm481_vm6, %v8453_v2, %v12079_v18  ;;  %v12088_v18 = vld [vmem:[#allocation33_spill] sm:$0xff] }
0x1027   : > { %v12089_v57 = vunpack.i.l.bf16 %v12088_v18 }
0x1028   : > { %v9253_v28 = vpop.permute.xlu1 %4102  ;;  %4481 = vrot.lane.b32.xlu1 %v3560_v8, %s11893_s3 }
0x1029   : > { %12077 = vst [vmem:[#allocation27_spill] sm:$0xff] %v9253_v28  ;;  %4104 = vrot.lane.b32.xlu0 %v3871_v25, %s11830_s22  ;;  %v12083_v28 = vld [vmem:[#allocation31_spill] sm:$0xff] }
0x102a   : > { %v12084_v8 = vunpack.i.l.bf16 %v12083_v28 }
0x102c   : > { %v9264_v49 = vpop.permute.xlu1 %4126  ;;  %4505 = vrot.lane.b32.xlu1 %v3592_v63, %s11893_s3  ;;  %v9267_v5 = vpop.xlane.xlu0 %5619  ;;  %v3903_v12 = vsel %vm493_vm5, %v8462_v15, %v12084_v8  ;;  %v3935_v63 = vsel %vm505_vm3, %v8470_v58, %v12089_v57  ;;  %v12096_v57 = vld [vmem:[#allocation37_spill] sm:$0xff] }
0x102d   : > { %12081 = vst [vmem:[#allocation82_spill] sm:$0xff] %v9264_v49  ;;  %12082 = vst [vmem:[#allocation29_spill] sm:$0xff] %v9267_v5  ;;  %4128 = vrot.lane.b32.xlu0 %v3903_v12, %s11830_s22  ;;  %v12092_v12 = vld [vmem:[#allocation35_spill] sm:$0xff] }
0x102e   : > { %v12093_v8 = vunpack.i.l.bf16 %v12092_v12 }
0x1030   : > { %v9274_v2 = vpop.permute.xlu1 %4150  ;;  %4341 = vrot.lane.b32.xlu1 %v12086_v11, %s11893_s3  ;;  %v9278_v25 = vpop.permute.xlu0 %4523  ;;  %v3967_v49 = vsel %vm517_vm4, %v8481_v50, %v12093_v8 }
0x1031   : > { %12085 = vst [vmem:[#allocation84_spill] sm:$0xff] %v9274_v2  ;;  %12087 = vst [vmem:[#allocation31_spill] sm:$0xff] %v9278_v25  ;;  %4152 = vrot.lane.b32.xlu0 %v3935_v63, %s11830_s22  ;;  %v12097_v63 = vunpack.i.l.bf16 %v12096_v57 }
0x1033   : > { %v3999_v2 = vsel %vm529_vm2, %v8489_v23, %v12097_v63 }
0x1034   : > { %v9285_v5 = vpop.permute.xlu1 %4174  ;;  %4365 = vrot.lane.b32.xlu1 %v8578_v21, %s11893_s3  ;;  %v9289_v15 = vpop.permute.xlu0 %4547 }
0x1035   : > { %12090 = vst [vmem:[#allocation85_spill] sm:$0xff] %v9285_v5  ;;  %12091 = vst [vmem:[#allocation33_spill] sm:$0xff] %v9289_v15  ;;  %4176 = vrot.lane.b32.xlu0 %v3967_v49, %s11830_s22  ;;  %v3734_v49 = vsel %vm12100_vm10, %v8355_v1, %v8421_v31  ;;  %v3714_v31 = vsel %vm12105_vm0, %v8347_v37, %v8413_v56  ;;  %vm12109_vm10 = vcmask 941056   ;;  %v12133_v5 = vld [vmem:[#allocation114_spill] sm:$0xff]  ;;  %vm12191_vm0 = vcmask 924672  }
0x1038   : > { %v9296_v25 = vpop.permute.xlu1 %4198  ;;  %4389 = vrot.lane.b32.xlu1 %v8584_v47, %s11893_s3  ;;  %v9300_v58 = vpop.permute.xlu0 %4571 }
0x1039   : > { %12094 = vst [vmem:[#allocation35_spill] sm:$0xff] %v9296_v25  ;;  %12095 = vst [vmem:[#allocation189_spill] sm:$0xff] %v9300_v58  ;;  %4200 = vrot.lane.b32.xlu0 %v3999_v2, %s11830_s22  ;;  %v4222_v2 = vsel %vm788_vm12, %v8427_v35, %v12033_v39  ;;  %v3694_v39 = vsel %vm12109_vm10, %v8339_v10, %v8405_v30  ;;  %v12111_v25 = vld [vmem:[#allocation93_spill] sm:$0xff]  ;;  %v12121_v58 = vld [vmem:[#allocation86_spill] sm:$0xff]  ;;  %vm12200_vm10 = vcmask 932864  }
0x103a   : > { %v12116_v10 = vld [vmem:[#allocation109_spill] sm:$0xff] }
0x103c   : > { %v9307_v15 = vpop.permute.xlu1 %4333  ;;  %4413 = vrot.lane.b32.xlu1 %v8593_v51, %s11893_s3  ;;  %v9311_v50 = vpop.permute.xlu0 %4595 }
0x103d   : > { %12098 = vst [vmem:[#allocation37_spill] sm:$0xff] %v9307_v15  ;;  %12099 = vst [vmem:[#allocation190_spill] sm:$0xff] %v9311_v50  ;;  %4669 = vrot.lane.b32.xlu0 %v3734_v49, %s11893_s3 }
0x1040   : > { %v9317_v8 = vpop.permute.xlu1 %4357  ;;  %4437 = vrot.lane.b32.xlu1 %v8599_v9, %s11893_s3  ;;  %v9321_v23 = vpop.permute.xlu0 %4691 }
0x1041   : > { %12101 = vst [vmem:[#allocation191_spill] sm:$0xff] %v9317_v8  ;;  %12102 = vst [vmem:[#allocation192_spill] sm:$0xff] %v9321_v23  ;;  %4693 = vrot.lane.b32.xlu0 %v4222_v2, %s11893_s3  ;;  %v12107_v23 = vld [vmem:[#allocation91_spill] sm:$0xff] }
0x1044   : > { %v9327_v63 = vpop.permute.xlu1 %4381  ;;  %4461 = vrot.lane.b32.xlu1 %v8605_v4, %s11893_s3  ;;  %v9331_v1 = vpop.permute.xlu0 %4331 }
0x1045   : > { %12103 = vst [vmem:[#allocation193_spill] sm:$0xff] %v9327_v63  ;;  %12104 = vst [vmem:[#allocation194_spill] sm:$0xff] %v9331_v1  ;;  %4645 = vrot.lane.b32.xlu0 %v3714_v31, %s11893_s3  ;;  %v12114_v31 = vld [vmem:[#allocation101_spill] sm:$0xff] }
0x1048   : > { %v9337_v49 = vpop.permute.xlu1 %4405  ;;  %4485 = vrot.lane.b32.xlu1 %v12107_v23, %s11893_s3  ;;  %v9341_v35 = vpop.permute.xlu0 %4355 }
0x1049   : > { %12106 = vst [vmem:[#allocation195_spill] sm:$0xff] %v9337_v49  ;;  %12108 = vst [vmem:[#allocation91_spill] sm:$0xff] %v9341_v35  ;;  %4621 = vrot.lane.b32.xlu0 %v3694_v39, %s11893_s3  ;;  %v12118_v39 = vld [vmem:[#allocation104_spill] sm:$0xff] }
0x104a   : > { %v12125_v35 = vld [vmem:[#allocation96_spill] sm:$0xff] }
0x104c   : > { %v9347_v2 = vpop.permute.xlu1 %4429  ;;  %4509 = vrot.lane.b32.xlu1 %v12111_v25, %s11893_s3  ;;  %v9351_v37 = vpop.permute.xlu0 %4379 }
0x104d   : > { %12110 = vst [vmem:[#allocation196_spill] sm:$0xff] %v9347_v2  ;;  %12112 = vst [vmem:[#allocation93_spill] sm:$0xff] %v9351_v37  ;;  %4697 = vrot.lane.b32.xlu0 %v8642_v54, %s11893_s3  ;;  %v12120_v2 = vld [vmem:[#allocation94_spill] sm:$0xff]  ;;  %v12128_v37 = vld [vmem:[#allocation116_spill] sm:$0xff] }
0x104e   : > { %v3776_v1 = vsel %vm445_vm1, %v12121_v58, %v12120_v2 }
0x1050   : > { %v9355_v56 = vpop.permute.xlu1 %4453  ;;  %4533 = vrot.lane.b32.xlu1 %v12114_v31, %s11893_s3  ;;  %v9359_v50 = vpop.permute.xlu0 %4403 }
0x1051   : > { %12113 = vst [vmem:[#allocation197_spill] sm:$0xff] %v9355_v56  ;;  %12115 = vst [vmem:[#allocation101_spill] sm:$0xff] %v9359_v50  ;;  %4605 = vrot.lane.b32.xlu0 %v12116_v10, %s11893_s3  ;;  %v12123_v50 = vld [vmem:[#allocation106_spill] sm:$0xff] }
0x1054   : > { %v9363_v30 = vpop.permute.xlu1 %4477  ;;  %4557 = vrot.lane.b32.xlu1 %v12118_v39, %s11893_s3  ;;  %v9367_v49 = vpop.permute.xlu0 %4427 }
0x1055   : > { %12117 = vst [vmem:[#allocation109_spill] sm:$0xff] %v9363_v30  ;;  %12119 = vst [vmem:[#allocation104_spill] sm:$0xff] %v9367_v49  ;;  %4036 = vrot.lane.b32.xlu0 %v3776_v1, %s11830_s22  ;;  %v12126_v30 = vld [vmem:[#allocation87_spill] sm:$0xff]  ;;  %v12130_v1 = vld [vmem:[#allocation98_spill] sm:$0xff] }
0x1056   : > { %v3808_v8 = vsel %vm457_vm7, %v12126_v30, %v12125_v35 }
0x1058   : > { %v9373_v56 = vpop.permute.xlu1 %4501  ;;  %4581 = vrot.lane.b32.xlu1 %v12123_v50, %s11893_s3  ;;  %v9377_v15 = vpop.permute.xlu0 %4451 }
0x1059   : > { %12122 = vst [vmem:[#allocation94_spill] sm:$0xff] %v9373_v56  ;;  %12124 = vst [vmem:[#allocation86_spill] sm:$0xff] %v9377_v15  ;;  %4060 = vrot.lane.b32.xlu0 %v3808_v8, %s11830_s22  ;;  %v12131_v56 = vld [vmem:[#allocation88_spill] sm:$0xff]  ;;  %v12135_v8 = vld [vmem:[#allocation99_spill] sm:$0xff] }
0x105a   : > { %v3840_v63 = vsel %vm469_vm8, %v12131_v56, %v12130_v1 }
0x105c   : > { %v9383_v49 = vpop.permute.xlu1 %4525  ;;  %4677 = vrot.lane.b32.xlu1 %v12128_v37, %s11893_s3  ;;  %v9387_v58 = vpop.permute.xlu0 %4475 }
0x105d   : > { %12127 = vst [vmem:[#allocation106_spill] sm:$0xff] %v9383_v49  ;;  %12129 = vst [vmem:[#allocation96_spill] sm:$0xff] %v9387_v58  ;;  %4084 = vrot.lane.b32.xlu0 %v3840_v63, %s11830_s22  ;;  %v12136_v49 = vld [vmem:[#allocation89_spill] sm:$0xff]  ;;  %v12140_v63 = vld [vmem:[#allocation100_spill] sm:$0xff] }
0x105e   : > { %v3872_v14 = vsel %vm481_vm6, %v12136_v49, %v12135_v8 }
0x1060   : > { %v9393_v15 = vpop.permute.xlu1 %4549  ;;  %4653 = vrot.lane.b32.xlu1 %v12133_v5, %s11893_s3  ;;  %v9397_v30 = vpop.permute.xlu0 %4499 }
0x1061   : > { %12132 = vst [vmem:[#allocation87_spill] sm:$0xff] %v9393_v15  ;;  %12134 = vst [vmem:[#allocation116_spill] sm:$0xff] %v9397_v30  ;;  %4108 = vrot.lane.b32.xlu0 %v3872_v14, %s11830_s22  ;;  %v12141_v15 = vld [vmem:[#allocation90_spill] sm:$0xff]  ;;  %v12142_v30 = vunpack.i.h.bf16 %v12064_v32 }
0x1062   : > { %v3904_v52 = vsel %vm493_vm5, %v12141_v15, %v12140_v63  ;;  %v12147_v15 = vunpack.i.h.bf16 %v12068_v60 }
0x1063   : > { %v3777_v49 = vsel %vm445_vm1, %v12120_v2, %v12142_v30  ;;  %v12150_v30 = vld [vmem:[#allocation103_spill] sm:$0xff] }
0x1064   : > { %v9403_v58 = vpop.permute.xlu1 %4573  ;;  %4629 = vrot.lane.b32.xlu1 %v12138_v53, %s11893_s3  ;;  %v9407_v56 = vpop.permute.xlu0 %4335  ;;  %v3809_v32 = vsel %vm457_vm7, %v12125_v35, %v12147_v15  ;;  %v12155_v15 = vld [vmem:[#allocation105_spill] sm:$0xff] }
0x1065   : > { %12137 = vst [vmem:[#allocation98_spill] sm:$0xff] %v9403_v58  ;;  %12139 = vst [vmem:[#allocation88_spill] sm:$0xff] %v9407_v56  ;;  %4132 = vrot.lane.b32.xlu0 %v3904_v52, %s11830_s22  ;;  %v12145_v58 = vld [vmem:[#allocation102_spill] sm:$0xff] }
0x1066   : > { %v3936_v56 = vsel %vm505_vm3, %v12146_v3, %v12145_v58  ;;  %v12152_v3 = vunpack.i.h.bf16 %v12073_v6 }
0x1068   : > { %v9417_v41 = vpop.permute.xlu1 %4597  ;;  %4038 = vrot.lane.b32.xlu1 %v3777_v49, %s11830_s22  ;;  %v9420_v14 = vpop.permute.xlu0 %4359  ;;  %v12151_v49 = vld [vmem:[#allocation95_spill] sm:$0xff]  ;;  %v3841_v60 = vsel %vm469_vm8, %v12130_v1, %v12152_v3  ;;  %v3369_v3 = vsel %vm445_vm1, %v12053_v24, %v12086_v11  ;;  %v12163_v24 = vunpack.i.h.bf16 %v12088_v18 }
0x1069   : > { %12143 = vst [vmem:[#allocation114_spill] sm:$0xff] %v9417_v41  ;;  %12144 = vst [vmem:[#allocation99_spill] sm:$0xff] %v9420_v14  ;;  %4156 = vrot.lane.b32.xlu0 %v3936_v56, %s11830_s22  ;;  %v3968_v41 = vsel %vm517_vm4, %v12151_v49, %v12150_v30  ;;  %v12157_v49 = vunpack.i.h.bf16 %v12078_v40 }
0x106c   : > { %v9430_v52 = vpop.permute.xlu1 %4695  ;;  %4062 = vrot.lane.b32.xlu1 %v3809_v32, %s11830_s22  ;;  %v9433_v2 = vpop.permute.xlu0 %4383  ;;  %v12156_v32 = vld [vmem:[#allocation97_spill] sm:$0xff] }
0x106d   : > { %12148 = vst [vmem:[#allocation89_spill] sm:$0xff] %v9430_v52  ;;  %12149 = vst [vmem:[#allocation111_spill] sm:$0xff] %v9433_v2  ;;  %4180 = vrot.lane.b32.xlu0 %v3968_v41, %s11830_s22  ;;  %v4000_v52 = vsel %vm529_vm2, %v12156_v32, %v12155_v15  ;;  %v3873_v41 = vsel %vm481_vm6, %v12135_v8, %v12157_v49  ;;  %v3401_v32 = vsel %vm457_vm7, %v12056_v61, %v8578_v21 }
0x106e   : > { %v3433_v49 = vsel %vm469_vm8, %v12059_v22, %v8584_v47  ;;  %v12166_v21 = vunpack.i.h.bf16 %v12092_v12  ;;  %v12169_v47 = vunpack.i.h.bf16 %v12096_v57 }
0x1070   : > { %v9443_v56 = vpop.permute.xlu1 %4529  ;;  %4086 = vrot.lane.b32.xlu1 %v3841_v60, %s11830_s22  ;;  %v9446_v35 = vpop.permute.xlu0 %4407  ;;  %v12160_v60 = vunpack.i.h.bf16 %v12083_v28  ;;  %v3937_v28 = vsel %vm505_vm3, %v12145_v58, %v12163_v24  ;;  %v3969_v61 = vsel %vm517_vm4, %v12150_v30, %v12166_v21  ;;  %v4001_v22 = vsel %vm529_vm2, %v12155_v15, %v12169_v47  ;;  %v12178_v24 = vld [vmem:[#allocation130_spill] sm:$0xff] }
0x1071   : > { %12153 = vst [vmem:[#allocation100_spill] sm:$0xff] %v9443_v56  ;;  %12154 = vst [vmem:[#allocation90_spill] sm:$0xff] %v9446_v35  ;;  %4204 = vrot.lane.b32.xlu0 %v4000_v52, %s11830_s22 }
0x1072   : > { %v3905_v40 = vsel %vm493_vm5, %v12140_v63, %v12160_v60  ;;  %v6295_v60 = vunpack.i.h.bf16 %v12032_v44 }
0x1074   : > { %v9456_v6 = vpop.permute.xlu1 %4553  ;;  %4110 = vrot.lane.b32.xlu1 %v3873_v41, %s11830_s22  ;;  %v9459_v1 = vpop.permute.xlu0 %4431  ;;  %v3465_v41 = vsel %vm481_vm6, %v12061_v55, %v8593_v51  ;;  %v12172_v51 = vld [vmem:[#allocation107_spill] sm:$0xff] }
0x1075   : > { %12158 = vst [vmem:[#allocation102_spill] sm:$0xff] %v9456_v6  ;;  %12159 = vst [vmem:[#allocation92_spill] sm:$0xff] %v9459_v1  ;;  %4339 = vrot.lane.b32.xlu0 %v3369_v3, %s11893_s3  ;;  %v3497_v3 = vsel %vm493_vm5, %v12066_v16, %v8599_v9  ;;  %v4225_v55 = vsel %vm788_vm12, %v12172_v51, %v6295_v60  ;;  %v3561_v16 = vsel %vm517_vm4, %v12075_v34, %v12107_v23  ;;  %v12189_v60 = vld [vmem:[#allocation166_spill] sm:$0xff] }
0x1076   : > { %v3615_v23 = vsel %vm541_vm13, %v12036_v20, %v12114_v31  ;;  %v3655_v31 = vsel %vm565_vm15, %v12041_v29, %v12123_v50  ;;  %v3735_v50 = vsel %vm12191_vm0, %v12047_v26, %v12128_v37  ;;  %vm12206_vm0 = vcmask 941056  }
0x1078   : > { %v9469_v52 = vpop.permute.xlu1 %4577  ;;  %4134 = vrot.lane.b32.xlu1 %v3905_v40, %s11830_s22  ;;  %v9472_v8 = vpop.permute.xlu0 %4455  ;;  %v3529_v40 = vsel %vm505_vm3, %v12071_v17, %v8605_v4  ;;  %v3593_v17 = vsel %vm529_vm2, %v12080_v48, %v12111_v25  ;;  %v3635_v25 = vsel %vm553_vm14, %v12039_v33, %v12118_v39  ;;  %v3675_v39 = vsel %vm577_vm11, %v12044_v38, %v12116_v10 }
0x1079   : > { %12161 = vst [vmem:[#allocation103_spill] sm:$0xff] %v9469_v52  ;;  %12162 = vst [vmem:[#allocation95_spill] sm:$0xff] %v9472_v8  ;;  %4363 = vrot.lane.b32.xlu0 %v3401_v32, %s11893_s3  ;;  %v4224_v10 = vsel %vm788_vm12, %v8642_v54, %v12172_v51  ;;  %v12201_v54 = vld [vmem:[#allocation24_spill] sm:$0xff] }
0x107a   : > { %v12202_v51 = vunpack.i.l.bf16 %v12201_v54  ;;  %v12237_v8 = vld [vmem:[#allocation108_spill] sm:$0xff] }
0x107c   : > { %v9482_v11 = vpop.permute.xlu1 %4601  ;;  %4158 = vrot.lane.b32.xlu1 %v3937_v28, %s11830_s22  ;;  %v9485_v63 = vpop.permute.xlu0 %4479 }
0x107d   : > { %12164 = vst [vmem:[#allocation105_spill] sm:$0xff] %v9482_v11  ;;  %12165 = vst [vmem:[#allocation97_spill] sm:$0xff] %v9485_v63  ;;  %4387 = vrot.lane.b32.xlu0 %v3433_v49, %s11893_s3  ;;  %v12181_v49 = vld [vmem:[#allocation128_spill] sm:$0xff] }
0x1080   : > { %v9495_v18 = vpop.permute.xlu1 %4673  ;;  %4182 = vrot.lane.b32.xlu1 %v3969_v61, %s11830_s22  ;;  %v9498_v58 = vpop.permute.xlu0 %4503  ;;  %v12183_v61 = vld [vmem:[#allocation127_spill] sm:$0xff] }
0x1081   : > { %12167 = vst [vmem:[#allocation198_spill] sm:$0xff] %v9495_v18  ;;  %12168 = vst [vmem:[#allocation199_spill] sm:$0xff] %v9498_v58  ;;  %4411 = vrot.lane.b32.xlu0 %v3465_v41, %s11893_s3 }
0x1084   : > { %v9508_v12 = vpop.permute.xlu1 %4649  ;;  %4206 = vrot.lane.b32.xlu1 %v4001_v22, %s11830_s22  ;;  %v9511_v30 = vpop.permute.xlu0 %4527  ;;  %v12186_v22 = vld [vmem:[#allocation168_spill] sm:$0xff] }
0x1085   : > { %12170 = vst [vmem:[#allocation200_spill] sm:$0xff] %v9508_v12  ;;  %12171 = vst [vmem:[#allocation201_spill] sm:$0xff] %v9511_v30  ;;  %4435 = vrot.lane.b32.xlu0 %v3497_v3, %s11893_s3 }
0x1088   : > { %v9520_v57 = vpop.permute.xlu1 %4625  ;;  %4701 = vrot.lane.b32.xlu1 %v4225_v55, %s11893_s3  ;;  %v9523_v15 = vpop.permute.xlu0 %4551 }
0x1089   : > { %12173 = vst [vmem:[#allocation107_spill] sm:$0xff] %v9520_v57  ;;  %12174 = vst [vmem:[#allocation202_spill] sm:$0xff] %v9523_v15  ;;  %4459 = vrot.lane.b32.xlu0 %v3529_v40, %s11893_s3  ;;  %v12193_v40 = vld [vmem:[#allocation164_spill] sm:$0xff]  ;;  %v12215_v57 = vld [vmem:[#allocation137_spill] sm:$0xff] }
0x108c   : > { %v9529_v9 = vpop.permute.xlu1 %4337  ;;  %4679 = vrot.lane.b32.xlu1 %v8795_v46, %s11893_s3  ;;  %v9533_v44 = vpop.permute.xlu0 %4575 }
0x108d   : > { %12175 = vst [vmem:[#allocation203_spill] sm:$0xff] %v9529_v9  ;;  %12176 = vst [vmem:[#allocation204_spill] sm:$0xff] %v9533_v44  ;;  %4483 = vrot.lane.b32.xlu0 %v3561_v16, %s11893_s3  ;;  %v12195_v16 = vld [vmem:[#allocation22_spill] sm:$0xff]  ;;  %v12241_v44 = vld [vmem:[#allocation145_spill] sm:$0xff] }
0x1090   : > { %v9539_v32 = vpop.permute.xlu1 %4361  ;;  %4655 = vrot.lane.b32.xlu1 %v12178_v24, %s11893_s3  ;;  %v9543_v4 = vpop.permute.xlu0 %4599 }
0x1091   : > { %12177 = vst [vmem:[#allocation205_spill] sm:$0xff] %v9539_v32  ;;  %12179 = vst [vmem:[#allocation130_spill] sm:$0xff] %v9543_v4  ;;  %4507 = vrot.lane.b32.xlu0 %v3593_v17, %s11893_s3  ;;  %v12196_v17 = vunpack.i.l.bf16 %v12195_v16 }
0x1094   : > { %v9549_v28 = vpop.permute.xlu1 %4385  ;;  %4631 = vrot.lane.b32.xlu1 %v12181_v49, %s11893_s3  ;;  %v9553_v34 = vpop.permute.xlu0 %4032 }
0x1095   : > { %12180 = vst [vmem:[#allocation206_spill] sm:$0xff] %v9549_v28  ;;  %4531 = vrot.lane.b32.xlu0 %v3615_v23, %s11893_s3  ;;  %v12197_v23 = vld [vmem:[#allocation132_spill] sm:$0xff] }
0x1096   : > { %v3779_v26 = vsel %vm445_vm1, %v12197_v23, %v12196_v17 }
0x1098   : > { %v9559_v21 = vpop.permute.xlu1 %4409  ;;  %4607 = vrot.lane.b32.xlu1 %v12183_v61, %s11893_s3  ;;  %v9563_v48 = vpop.permute.xlu0 %4056 }
0x1099   : > { %12182 = vst [vmem:[#allocation128_spill] sm:$0xff] %v9559_v21  ;;  %4555 = vrot.lane.b32.xlu0 %v3635_v25, %s11893_s3 }
0x109c   : > { %v9569_v41 = vpop.permute.xlu1 %4433  ;;  %4683 = vrot.lane.b32.xlu1 %v8933_v7, %s11893_s3  ;;  %v9573_v20 = vpop.permute.xlu0 %4080 }
0x109d   : > { %12184 = vst [vmem:[#allocation127_spill] sm:$0xff] %v9569_v41  ;;  %4579 = vrot.lane.b32.xlu0 %v3655_v31, %s11893_s3  ;;  %v3715_v31 = vsel %vm12200_vm10, %v12049_v43, %v12133_v5  ;;  %v12207_v43 = vld [vmem:[#allocation26_spill] sm:$0xff]  ;;  %vm12327_vm10 = vcmask 924672  }
0x109e   : > { %v12208_v5 = vunpack.i.l.bf16 %v12207_v43  ;;  %v12234_v41 = vld [vmem:[#allocation142_spill] sm:$0xff] }
0x10a0   : > { %v9579_v47 = vpop.permute.xlu1 %4457  ;;  %4659 = vrot.lane.b32.xlu1 %v12186_v22, %s11893_s3  ;;  %v9583_v33 = vpop.permute.xlu0 %4104 }
0x10a1   : > { %12185 = vst [vmem:[#allocation207_spill] sm:$0xff] %v9579_v47  ;;  %12187 = vst [vmem:[#allocation168_spill] sm:$0xff] %v9583_v33  ;;  %4603 = vrot.lane.b32.xlu0 %v3675_v39, %s11893_s3  ;;  %v12203_v39 = vld [vmem:[#allocation134_spill] sm:$0xff]  ;;  %v12239_v47 = vld [vmem:[#allocation36_spill] sm:$0xff] }
0x10a4   : > { %v9589_v3 = vpop.permute.xlu1 %4481  ;;  %4635 = vrot.lane.b32.xlu1 %v12189_v60, %s11893_s3  ;;  %v9593_v29 = vpop.permute.xlu0 %4128 }
0x10a5   : > { %12188 = vst [vmem:[#allocation208_spill] sm:$0xff] %v9589_v3  ;;  %12190 = vst [vmem:[#allocation166_spill] sm:$0xff] %v9593_v29  ;;  %4675 = vrot.lane.b32.xlu0 %v3735_v50, %s11893_s3  ;;  %v3811_v50 = vsel %vm457_vm7, %v12203_v39, %v12202_v51  ;;  %v12246_v3 = vld [vmem:[#allocation146_spill] sm:$0xff] }
0x10a8   : > { %v9599_v55 = vpop.permute.xlu1 %4505  ;;  %4611 = vrot.lane.b32.xlu1 %v12193_v40, %s11893_s3  ;;  %v9603_v38 = vpop.permute.xlu0 %4152 }
0x10a9   : > { %12192 = vst [vmem:[#allocation209_spill] sm:$0xff] %v9599_v55  ;;  %12194 = vst [vmem:[#allocation164_spill] sm:$0xff] %v9603_v38  ;;  %4699 = vrot.lane.b32.xlu0 %v4224_v10, %s11893_s3 }
0x10ac   : > { %v9613_v37 = vpop.permute.xlu1 %4341  ;;  %4044 = vrot.lane.b32.xlu1 %v3779_v26, %s11830_s22  ;;  %v9616_v25 = vpop.permute.xlu0 %4176  ;;  %v3695_v26 = vsel %vm12206_vm0, %v12052_v0, %v12138_v53  ;;  %vm12332_vm0 = vcmask 932864  }
0x10ad   : > { %12198 = vst [vmem:[#allocation22_spill] sm:$0xff] %v9613_v37  ;;  %12199 = vst [vmem:[#allocation132_spill] sm:$0xff] %v9616_v25  ;;  %4651 = vrot.lane.b32.xlu0 %v3715_v31, %s11893_s3  ;;  %v12209_v31 = vld [vmem:[#allocation136_spill] sm:$0xff] }
0x10ae   : > { %v3843_v33 = vsel %vm469_vm8, %v12209_v31, %v12208_v5  ;;  %v12218_v5 = vld [vmem:[#allocation123_spill] sm:$0xff] }
0x10b0   : > { %v9626_v10 = vpop.permute.xlu1 %4365  ;;  %4068 = vrot.lane.b32.xlu1 %v3811_v50, %s11830_s22  ;;  %v9629_v17 = vpop.permute.xlu0 %4200  ;;  %v12212_v50 = vld [vmem:[#allocation122_spill] sm:$0xff] }
0x10b1   : > { %12204 = vst [vmem:[#allocation24_spill] sm:$0xff] %v9626_v10  ;;  %12205 = vst [vmem:[#allocation134_spill] sm:$0xff] %v9629_v17  ;;  %4627 = vrot.lane.b32.xlu0 %v3695_v26, %s11893_s3  ;;  %v12213_v17 = vld [vmem:[#allocation28_spill] sm:$0xff] }
0x10b2   : > { %v12214_v11 = vunpack.i.l.bf16 %v12213_v17 }
0x10b4   : > { %v9639_v4 = vpop.permute.xlu1 %4389  ;;  %4092 = vrot.lane.b32.xlu1 %v3843_v33, %s11830_s22  ;;  %v9642_v51 = vpop.permute.xlu0 %4669  ;;  %v3875_v53 = vsel %vm481_vm6, %v12215_v57, %v12214_v11  ;;  %v12219_v33 = vld [vmem:[#allocation30_spill] sm:$0xff]  ;;  %v12224_v11 = vld [vmem:[#allocation125_spill] sm:$0xff] }
0x10b5   : > { %12210 = vst [vmem:[#allocation26_spill] sm:$0xff] %v9639_v4  ;;  %12211 = vst [vmem:[#allocation136_spill] sm:$0xff] %v9642_v51  ;;  %4535 = vrot.lane.b32.xlu0 %v12212_v50, %s11893_s3  ;;  %v12220_v12 = vunpack.i.l.bf16 %v12219_v33  ;;  %v12221_v51 = vld [vmem:[#allocation139_spill] sm:$0xff] }
0x10b7   : > { %v3907_v18 = vsel %vm493_vm5, %v12221_v51, %v12220_v12  ;;  %v12230_v12 = vld [vmem:[#allocation140_spill] sm:$0xff] }
0x10b8   : > { %v9650_v0 = vpop.permute.xlu1 %4413  ;;  %4116 = vrot.lane.b32.xlu1 %v3875_v53, %s11830_s22  ;;  %v9653_v26 = vpop.permute.xlu0 %4693  ;;  %v12225_v53 = vld [vmem:[#allocation32_spill] sm:$0xff] }
0x10b9   : > { %12216 = vst [vmem:[#allocation122_spill] sm:$0xff] %v9650_v0  ;;  %12217 = vst [vmem:[#allocation28_spill] sm:$0xff] %v9653_v26  ;;  %4559 = vrot.lane.b32.xlu0 %v12218_v5, %s11893_s3  ;;  %v12226_v55 = vunpack.i.l.bf16 %v12225_v53  ;;  %v12227_v26 = vld [vmem:[#allocation141_spill] sm:$0xff] }
0x10bb   : > { %v3939_v21 = vsel %vm505_vm3, %v12227_v26, %v12226_v55 }
0x10bc   : > { %v9661_v58 = vpop.permute.xlu1 %4437  ;;  %4140 = vrot.lane.b32.xlu1 %v3907_v18, %s11830_s22  ;;  %v9664_v35 = vpop.permute.xlu0 %4645  ;;  %v12231_v18 = vld [vmem:[#allocation11_spill] sm:$0xff] }
0x10bd   : > { %12222 = vst [vmem:[#allocation137_spill] sm:$0xff] %v9661_v58  ;;  %12223 = vst [vmem:[#allocation123_spill] sm:$0xff] %v9664_v35  ;;  %4583 = vrot.lane.b32.xlu0 %v12224_v11, %s11893_s3  ;;  %v6139_v1 = vunpack.i.l.bf16 %v12231_v18  ;;  %v12232_v35 = vld [vmem:[#allocation34_spill] sm:$0xff] }
0x10be   : > { %v12233_v56 = vunpack.i.l.bf16 %v12232_v35 }
0x10c0   : > { %v9672_v0 = vpop.permute.xlu1 %4461  ;;  %4164 = vrot.lane.b32.xlu1 %v3939_v21, %s11830_s22  ;;  %v9675_v30 = vpop.permute.xlu0 %4621  ;;  %v3971_v58 = vsel %vm517_vm4, %v12234_v41, %v12233_v56  ;;  %v3370_v21 = vsel %vm445_vm1, %v6139_v1, %v12237_v8  ;;  %v12245_v1 = vld [vmem:[#allocation13_spill] sm:$0xff] }
0x10c1   : > { %12228 = vst [vmem:[#allocation30_spill] sm:$0xff] %v9672_v0  ;;  %12229 = vst [vmem:[#allocation139_spill] sm:$0xff] %v9675_v30  ;;  %4703 = vrot.lane.b32.xlu0 %v12230_v12, %s11893_s3  ;;  %v12238_v30 = vld [vmem:[#allocation12_spill] sm:$0xff]  ;;  %v12240_v0 = vunpack.i.l.bf16 %v12239_v47 }
0x10c2   : > { %v6149_v6 = vunpack.i.l.bf16 %v12238_v30 }
0x10c3   : > { %v4003_v63 = vsel %vm529_vm2, %v12241_v44, %v12240_v0 }
0x10c4   : > { %v9684_v15 = vpop.permute.xlu1 %4485  ;;  %4188 = vrot.lane.b32.xlu1 %v3971_v58, %s11830_s22  ;;  %v9687_v55 = vpop.permute.xlu0 %4697  ;;  %v12244_v58 = vld [vmem:[#allocation110_spill] sm:$0xff] }
0x10c5   : > { %12235 = vst [vmem:[#allocation125_spill] sm:$0xff] %v9684_v15  ;;  %12236 = vst [vmem:[#allocation32_spill] sm:$0xff] %v9687_v55  ;;  %4343 = vrot.lane.b32.xlu0 %v3370_v21, %s11893_s3  ;;  %v3402_v55 = vsel %vm457_vm7, %v6149_v6, %v12244_v58  ;;  %v6159_v21 = vunpack.i.l.bf16 %v12245_v1  ;;  %v3371_v15 = vsel %vm445_vm1, %v12237_v8, %v12246_v3  ;;  %v12250_v6 = vld [vmem:[#allocation14_spill] sm:$0xff] }
0x10c8   : > { %v9697_v52 = vpop.permute.xlu1 %4509  ;;  %4212 = vrot.lane.b32.xlu1 %v4003_v63, %s11830_s22  ;;  %v9700_v56 = vpop.permute.xlu0 %4605  ;;  %v12249_v63 = vld [vmem:[#allocation112_spill] sm:$0xff] }
0x10c9   : > { %12242 = vst [vmem:[#allocation141_spill] sm:$0xff] %v9697_v52  ;;  %12243 = vst [vmem:[#allocation140_spill] sm:$0xff] %v9700_v56  ;;  %4367 = vrot.lane.b32.xlu0 %v3402_v55, %s11893_s3  ;;  %v3434_v56 = vsel %vm469_vm8, %v6159_v21, %v12249_v63  ;;  %v6169_v52 = vunpack.i.l.bf16 %v12250_v6  ;;  %v12251_v55 = vld [vmem:[#allocation148_spill] sm:$0xff]  ;;  %v12255_v21 = vld [vmem:[#allocation15_spill] sm:$0xff] }
0x10ca   : > { %v3403_v37 = vsel %vm457_vm7, %v12244_v58, %v12251_v55  ;;  %v6179_v32 = vunpack.i.l.bf16 %v12255_v21 }
0x10cc   : > { %v9709_v9 = vpop.permute.xlu1 %4533  ;;  %4345 = vrot.lane.b32.xlu1 %v3371_v15, %s11893_s3  ;;  %v9712_v0 = vpop.permute.xlu0 %4036  ;;  %v12254_v15 = vld [vmem:[#allocation113_spill] sm:$0xff] }
0x10cd   : > { %12247 = vst [vmem:[#allocation11_spill] sm:$0xff] %v9709_v9  ;;  %12248 = vst [vmem:[#allocation34_spill] sm:$0xff] %v9712_v0  ;;  %4391 = vrot.lane.b32.xlu0 %v3434_v56, %s11893_s3  ;;  %v3466_v9 = vsel %vm481_vm6, %v6169_v52, %v12254_v15  ;;  %v12256_v56 = vld [vmem:[#allocation149_spill] sm:$0xff]  ;;  %v12260_v52 = vld [vmem:[#allocation16_spill] sm:$0xff] }
0x10ce   : > { %v3435_v10 = vsel %vm469_vm8, %v12249_v63, %v12256_v56  ;;  %v6189_v28 = vunpack.i.l.bf16 %v12260_v52 }
0x10d0   : > { %v9721_v14 = vpop.permute.xlu1 %4557  ;;  %4369 = vrot.lane.b32.xlu1 %v3403_v37, %s11893_s3  ;;  %v9724_v8 = vpop.permute.xlu0 %4060  ;;  %v12259_v37 = vld [vmem:[#allocation115_spill] sm:$0xff] }
0x10d1   : > { %12252 = vst [vmem:[#allocation142_spill] sm:$0xff] %v9721_v14  ;;  %12253 = vst [vmem:[#allocation108_spill] sm:$0xff] %v9724_v8  ;;  %4415 = vrot.lane.b32.xlu0 %v3466_v9, %s11893_s3  ;;  %v3498_v14 = vsel %vm493_vm5, %v6179_v32, %v12259_v37  ;;  %v12261_v9 = vld [vmem:[#allocation151_spill] sm:$0xff]  ;;  %v12265_v32 = vld [vmem:[#allocation18_spill] sm:$0xff] }
0x10d2   : > { %v3467_v4 = vsel %vm481_vm6, %v12254_v15, %v12261_v9  ;;  %v6199_v8 = vunpack.i.l.bf16 %v12265_v32 }
0x10d4   : > { %v9733_v2 = vpop.permute.xlu1 %4581  ;;  %4393 = vrot.lane.b32.xlu1 %v3435_v10, %s11893_s3  ;;  %v9736_v58 = vpop.permute.xlu0 %4084  ;;  %v12264_v10 = vld [vmem:[#allocation117_spill] sm:$0xff] }
0x10d5   : > { %12257 = vst [vmem:[#allocation12_spill] sm:$0xff] %v9733_v2  ;;  %12258 = vst [vmem:[#allocation36_spill] sm:$0xff] %v9736_v58  ;;  %4439 = vrot.lane.b32.xlu0 %v3498_v14, %s11893_s3  ;;  %v3530_v2 = vsel %vm505_vm3, %v6189_v28, %v12264_v10  ;;  %v12266_v14 = vld [vmem:[#allocation153_spill] sm:$0xff]  ;;  %v12270_v28 = vld [vmem:[#allocation20_spill] sm:$0xff] }
0x10d6   : > { %v3499_v58 = vsel %vm493_vm5, %v12259_v37, %v12266_v14 }
0x10d8   : > { %v9745_v0 = vpop.permute.xlu1 %4677  ;;  %4417 = vrot.lane.b32.xlu1 %v3467_v4, %s11893_s3  ;;  %v9748_v63 = vpop.permute.xlu0 %4108  ;;  %v12269_v4 = vld [vmem:[#allocation118_spill] sm:$0xff] }
0x10d9   : > { %12262 = vst [vmem:[#allocation145_spill] sm:$0xff] %v9745_v0  ;;  %12263 = vst [vmem:[#allocation110_spill] sm:$0xff] %v9748_v63  ;;  %4463 = vrot.lane.b32.xlu0 %v3530_v2, %s11893_s3  ;;  %v3562_v63 = vsel %vm517_vm4, %v6199_v8, %v12269_v4  ;;  %v6209_v0 = vunpack.i.l.bf16 %v12270_v28  ;;  %v12271_v2 = vld [vmem:[#allocation154_spill] sm:$0xff]  ;;  %v12275_v8 = vld [vmem:[#allocation156_spill] sm:$0xff] }
0x10da   : > { %v3531_v38 = vsel %vm505_vm3, %v12264_v10, %v12271_v2 }
0x10dc   : > { %v9757_v29 = vpop.permute.xlu1 %4653  ;;  %4441 = vrot.lane.b32.xlu1 %v3499_v58, %s11893_s3  ;;  %v9760_v15 = vpop.permute.xlu0 %4132  ;;  %v12274_v58 = vld [vmem:[#allocation120_spill] sm:$0xff] }
0x10dd   : > { %12267 = vst [vmem:[#allocation13_spill] sm:$0xff] %v9757_v29  ;;  %12268 = vst [vmem:[#allocation146_spill] sm:$0xff] %v9760_v15  ;;  %4487 = vrot.lane.b32.xlu0 %v3562_v63, %s11893_s3  ;;  %v3594_v29 = vsel %vm529_vm2, %v6209_v0, %v12274_v58  ;;  %v3563_v63 = vsel %vm517_vm4, %v12269_v4, %v12275_v8  ;;  %v12279_v4 = vld [vmem:[#allocation159_spill] sm:$0xff] }
0x10e0   : > { %v9769_v25 = vpop.permute.xlu1 %4629  ;;  %4465 = vrot.lane.b32.xlu1 %v3531_v38, %s11893_s3  ;;  %v9772_v37 = vpop.permute.xlu0 %4156  ;;  %v12277_v38 = vld [vmem:[#allocation158_spill] sm:$0xff] }
0x10e1   : > { %12272 = vst [vmem:[#allocation112_spill] sm:$0xff] %v9769_v25  ;;  %12273 = vst [vmem:[#allocation14_spill] sm:$0xff] %v9772_v37  ;;  %4511 = vrot.lane.b32.xlu0 %v3594_v29, %s11893_s3  ;;  %v3595_v25 = vsel %vm529_vm2, %v12274_v58, %v12277_v38  ;;  %v12281_v58 = vld [vmem:[#allocation161_spill] sm:$0xff] }
0x10e4   : > { %v9780_v15 = vpop.permute.xlu1 %4038  ;;  %4489 = vrot.lane.b32.xlu1 %v3563_v63, %s11893_s3  ;;  %v9783_v10 = vpop.permute.xlu0 %4180  ;;  %v3616_v63 = vsel %vm541_vm13, %v12212_v50, %v12279_v4  ;;  %v12284_v50 = vld [vmem:[#allocation163_spill] sm:$0xff] }
0x10e5   : > { %12276 = vst [vmem:[#allocation148_spill] sm:$0xff] %v9783_v10  ;;  %4347 = vrot.lane.b32.xlu0 %v12246_v3, %s11893_s3 }
0x10e8   : > { %v9790_v0 = vpop.permute.xlu1 %4062  ;;  %4513 = vrot.lane.b32.xlu1 %v3595_v25, %s11893_s3  ;;  %v9793_v29 = vpop.permute.xlu0 %4204  ;;  %v3636_v25 = vsel %vm553_vm14, %v12218_v5, %v12281_v58  ;;  %v12285_v5 = vld [vmem:[#allocation39_spill] sm:$0xff] }
0x10e9   : > { %12278 = vst [vmem:[#allocation113_spill] sm:$0xff] %v9793_v29  ;;  %4371 = vrot.lane.b32.xlu0 %v12251_v55, %s11893_s3  ;;  %v6299_v10 = vunpack.i.l.bf16 %v12285_v5 }
0x10ec   : > { %v9800_v37 = vpop.permute.xlu1 %4086  ;;  %4537 = vrot.lane.b32.xlu1 %v3616_v63, %s11893_s3  ;;  %v9803_v3 = vpop.permute.xlu0 %4339  ;;  %v3656_v63 = vsel %vm565_vm15, %v12224_v11, %v12284_v50 }
0x10ed   : > { %12280 = vst [vmem:[#allocation15_spill] sm:$0xff] %v9803_v3  ;;  %4395 = vrot.lane.b32.xlu0 %v12256_v56, %s11893_s3 }
0x10f0   : > { %v9810_v29 = vpop.permute.xlu1 %4110  ;;  %4561 = vrot.lane.b32.xlu1 %v3636_v25, %s11893_s3  ;;  %v9813_v55 = vpop.permute.xlu0 %4363  ;;  %v12286_v25 = vld [vmem:[#allocation147_spill] sm:$0xff] }
0x10f1   : > { %12282 = vst [vmem:[#allocation149_spill] sm:$0xff] %v9810_v29  ;;  %12283 = vst [vmem:[#allocation115_spill] sm:$0xff] %v9813_v55  ;;  %4419 = vrot.lane.b32.xlu0 %v12261_v9, %s11893_s3  ;;  %v4227_v29 = vsel %vm788_vm12, %v12286_v25, %v6299_v10 }
0x10f4   : > { %v9820_v3 = vpop.permute.xlu1 %4134  ;;  %4585 = vrot.lane.b32.xlu1 %v3656_v63, %s11893_s3  ;;  %v9823_v56 = vpop.permute.xlu0 %4387 }
0x10f5   : > { %4443 = vrot.lane.b32.xlu0 %v12266_v14, %s11893_s3 }
0x10f8   : > { %v9830_v55 = vpop.permute.xlu1 %4158  ;;  %4707 = vrot.lane.b32.xlu1 %v4227_v29, %s11893_s3  ;;  %v9833_v9 = vpop.permute.xlu0 %4411 }
0x10f9   : > { %12287 = vst [vmem:[#allocation16_spill] sm:$0xff] %v9833_v9  ;;  %4467 = vrot.lane.b32.xlu0 %v12271_v2, %s11893_s3 }
0x10fc   : > { %v9837_v11 = vpop.permute.xlu1 %4182  ;;  %4541 = vrot.lane.b32.xlu1 %v8943_v42, %s11893_s3  ;;  %v9841_v63 = vpop.permute.xlu0 %4435 }
0x10fd   : > { %12288 = vst [vmem:[#allocation151_spill] sm:$0xff] %v9841_v63  ;;  %4491 = vrot.lane.b32.xlu0 %v12275_v8, %s11893_s3  ;;  %v12303_v63 = vld [vmem:[#allocation152_spill] sm:$0xff] }
0x1100   : > { %v9845_v14 = vpop.permute.xlu1 %4206  ;;  %4565 = vrot.lane.b32.xlu1 %v8956_v45, %s11893_s3  ;;  %v9849_v10 = vpop.permute.xlu0 %4459 }
0x1101   : > { %12289 = vst [vmem:[#allocation117_spill] sm:$0xff] %v9845_v14  ;;  %12290 = vst [vmem:[#allocation18_spill] sm:$0xff] %v9849_v10  ;;  %4515 = vrot.lane.b32.xlu0 %v12277_v38, %s11893_s3  ;;  %v6150_v10 = vunpack.i.h.bf16 %v12238_v30  ;;  %v12311_v30 = vld [vmem:[#allocation157_spill] sm:$0xff] }
0x1104   : > { %v9853_v2 = vpop.permute.xlu1 %4701  ;;  %4589 = vrot.lane.b32.xlu1 %v8965_v36, %s11893_s3  ;;  %v9857_v29 = vpop.permute.xlu0 %4483 }
0x1105   : > { %12291 = vst [vmem:[#allocation153_spill] sm:$0xff] %v9853_v2  ;;  %12292 = vst [vmem:[#allocation118_spill] sm:$0xff] %v9857_v29  ;;  %4539 = vrot.lane.b32.xlu0 %v12279_v4, %s11893_s3 }
0x1108   : > { %v9861_v8 = vpop.permute.xlu1 %4679  ;;  %4685 = vrot.lane.b32.xlu1 %v9011_v13, %s11893_s3  ;;  %v9865_v14 = vpop.permute.xlu0 %4507 }
0x1109   : > { %12293 = vst [vmem:[#allocation20_spill] sm:$0xff] %v9861_v8  ;;  %12294 = vst [vmem:[#allocation154_spill] sm:$0xff] %v9865_v14  ;;  %4563 = vrot.lane.b32.xlu0 %v12281_v58, %s11893_s3  ;;  %v12299_v14 = vld [vmem:[#allocation121_spill] sm:$0xff] }
0x110a   : > { %v3778_v58 = vsel %vm445_vm1, %v12299_v14, %v12197_v23 }
0x110c   : > { %v9869_v38 = vpop.permute.xlu1 %4655  ;;  %4661 = vrot.lane.b32.xlu1 %v8998_v59, %s11893_s3  ;;  %v9873_v2 = vpop.permute.xlu0 %4531 }
0x110d   : > { %12295 = vst [vmem:[#allocation120_spill] sm:$0xff] %v9869_v38  ;;  %12296 = vst [vmem:[#allocation156_spill] sm:$0xff] %v9873_v2  ;;  %4587 = vrot.lane.b32.xlu0 %v12284_v50, %s11893_s3  ;;  %v12302_v50 = vld [vmem:[#allocation124_spill] sm:$0xff]  ;;  %v6140_v2 = vunpack.i.h.bf16 %v12231_v18 }
0x110f   : > { %v3372_v23 = vsel %vm445_vm1, %v6140_v2, %v12303_v63 }
0x1110   : > { %v9877_v4 = vpop.permute.xlu1 %4631  ;;  %4637 = vrot.lane.b32.xlu1 %v8985_v27, %s11893_s3  ;;  %v9881_v8 = vpop.permute.xlu0 %4555 }
0x1111   : > { %12297 = vst [vmem:[#allocation158_spill] sm:$0xff] %v9877_v4  ;;  %12298 = vst [vmem:[#allocation159_spill] sm:$0xff] %v9881_v8  ;;  %4042 = vrot.lane.b32.xlu0 %v3778_v58, %s11830_s22  ;;  %v3810_v4 = vsel %vm457_vm7, %v12302_v50, %v12203_v39  ;;  %v12307_v39 = vld [vmem:[#allocation155_spill] sm:$0xff]  ;;  %v12310_v50 = vld [vmem:[#allocation129_spill] sm:$0xff] }
0x1112   : > { %v3404_v18 = vsel %vm457_vm7, %v6150_v10, %v12307_v39 }
0x1114   : > { %v9887_v38 = vpop.permute.xlu1 %4607  ;;  %4613 = vrot.lane.b32.xlu1 %v8976_v19, %s11893_s3  ;;  %v9891_v9 = vpop.permute.xlu0 %4579 }
0x1115   : > { %12300 = vst [vmem:[#allocation161_spill] sm:$0xff] %v9887_v38  ;;  %12301 = vst [vmem:[#allocation163_spill] sm:$0xff] %v9891_v9  ;;  %4066 = vrot.lane.b32.xlu0 %v3810_v4, %s11830_s22  ;;  %v12306_v38 = vld [vmem:[#allocation126_spill] sm:$0xff]  ;;  %v12354_v9 = vld [vmem:[#allocation75_spill] sm:$0xff] }
0x1116   : > { %v3842_v8 = vsel %vm469_vm8, %v12306_v38, %v12209_v31  ;;  %v12314_v38 = vld [vmem:[#allocation131_spill] sm:$0xff] }
0x1118   : > { %4349 = vrot.lane.b32.xlu1 %v3372_v23, %s11893_s3  ;;  %v9901_v14 = vpop.permute.xlu1 %4683  ;;  %v9903_v58 = vpop.permute.xlu0 %4603  ;;  %v3874_v23 = vsel %vm481_vm6, %v12310_v50, %v12215_v57  ;;  %v12315_v57 = vld [vmem:[#allocation160_spill] sm:$0xff] }
0x1119   : > { %12304 = vst [vmem:[#allocation39_spill] sm:$0xff] %v9901_v14  ;;  %12305 = vst [vmem:[#allocation147_spill] sm:$0xff] %v9903_v58  ;;  %4090 = vrot.lane.b32.xlu0 %v3842_v8, %s11830_s22  ;;  %v6160_v58 = vunpack.i.h.bf16 %v12245_v1  ;;  %v12349_v14 = vunpack.i.h.bf16 %v12201_v54 }
0x111b   : > { %v3436_v31 = vsel %vm469_vm8, %v6160_v58, %v12311_v30 }
0x111c   : > { %4373 = vrot.lane.b32.xlu1 %v3404_v18, %s11893_s3  ;;  %v9913_v2 = vpop.permute.xlu1 %4659  ;;  %v9915_v4 = vpop.permute.xlu0 %4675  ;;  %v3906_v18 = vsel %vm493_vm5, %v12314_v38, %v12221_v51  ;;  %v12319_v51 = vld [vmem:[#allocation162_spill] sm:$0xff] }
0x111d   : > { %12308 = vst [vmem:[#allocation121_spill] sm:$0xff] %v9913_v2  ;;  %12309 = vst [vmem:[#allocation124_spill] sm:$0xff] %v9915_v4  ;;  %4114 = vrot.lane.b32.xlu0 %v3874_v23, %s11830_s22  ;;  %v6170_v2 = vunpack.i.h.bf16 %v12250_v6  ;;  %v12318_v23 = vld [vmem:[#allocation133_spill] sm:$0xff] }
0x111f   : > { %v3468_v1 = vsel %vm481_vm6, %v6170_v2, %v12315_v57 }
0x1120   : > { %4397 = vrot.lane.b32.xlu1 %v3436_v31, %s11893_s3  ;;  %v9925_v10 = vpop.permute.xlu1 %4635  ;;  %v9927_v8 = vpop.permute.xlu0 %4699  ;;  %v3938_v31 = vsel %vm505_vm3, %v12318_v23, %v12227_v26  ;;  %v12322_v26 = vld [vmem:[#allocation165_spill] sm:$0xff] }
0x1121   : > { %12312 = vst [vmem:[#allocation152_spill] sm:$0xff] %v9925_v10  ;;  %12313 = vst [vmem:[#allocation126_spill] sm:$0xff] %v9927_v8  ;;  %4138 = vrot.lane.b32.xlu0 %v3906_v18, %s11830_s22  ;;  %v6180_v8 = vunpack.i.h.bf16 %v12255_v21  ;;  %v12321_v18 = vld [vmem:[#allocation135_spill] sm:$0xff] }
0x1123   : > { %v3500_v6 = vsel %vm493_vm5, %v6180_v8, %v12319_v51 }
0x1124   : > { %4421 = vrot.lane.b32.xlu1 %v3468_v1, %s11893_s3  ;;  %v9937_v58 = vpop.permute.xlu1 %4611  ;;  %v9939_v50 = vpop.permute.xlu0 %4651  ;;  %v3970_v1 = vsel %vm517_vm4, %v12321_v18, %v12234_v41  ;;  %v12325_v41 = vld [vmem:[#allocation167_spill] sm:$0xff] }
0x1125   : > { %12316 = vst [vmem:[#allocation155_spill] sm:$0xff] %v9937_v58  ;;  %12317 = vst [vmem:[#allocation129_spill] sm:$0xff] %v9939_v50  ;;  %4162 = vrot.lane.b32.xlu0 %v3938_v31, %s11830_s22  ;;  %v6190_v58 = vunpack.i.h.bf16 %v12260_v52  ;;  %v12324_v31 = vld [vmem:[#allocation138_spill] sm:$0xff] }
0x1127   : > { %v3532_v21 = vsel %vm505_vm3, %v6190_v58, %v12322_v26 }
0x1128   : > { %4445 = vrot.lane.b32.xlu1 %v3500_v6, %s11893_s3  ;;  %v9949_v2 = vpop.permute.xlu1 %4044  ;;  %v9951_v38 = vpop.permute.xlu0 %4627  ;;  %v4002_v6 = vsel %vm529_vm2, %v12324_v31, %v12241_v44  ;;  %v12328_v44 = vld [vmem:[#allocation169_spill] sm:$0xff] }
0x1129   : > { %12320 = vst [vmem:[#allocation157_spill] sm:$0xff] %v9951_v38  ;;  %4186 = vrot.lane.b32.xlu0 %v3970_v1, %s11830_s22  ;;  %v6200_v38 = vunpack.i.h.bf16 %v12265_v32  ;;  %v3736_v1 = vsel %vm12327_vm10, %v8795_v46, %v8933_v7  ;;  %vm12335_vm10 = vcmask 941056  }
0x112b   : > { %v3564_v52 = vsel %vm517_vm4, %v6200_v38, %v12325_v41 }
0x112c   : > { %4469 = vrot.lane.b32.xlu1 %v3532_v21, %s11893_s3  ;;  %v9961_v8 = vpop.permute.xlu1 %4068  ;;  %v9963_v23 = vpop.permute.xlu0 %4535  ;;  %v6210_v21 = vunpack.i.h.bf16 %v12270_v28  ;;  %v3716_v28 = vsel %vm12332_vm0, %v12178_v24, %v12186_v22  ;;  %v3676_v22 = vsel %vm577_vm11, %v12183_v61, %v12193_v40  ;;  %v12344_v61 = vunpack.i.h.bf16 %v12195_v16  ;;  %v12345_v40 = vld [vmem:[#allocation67_spill] sm:$0xff] }
0x112d   : > { %12323 = vst [vmem:[#allocation131_spill] sm:$0xff] %v9963_v23  ;;  %4210 = vrot.lane.b32.xlu0 %v4002_v6, %s11830_s22  ;;  %v4226_v6 = vsel %vm788_vm12, %v12230_v12, %v12286_v25  ;;  %v3696_v25 = vsel %vm12335_vm10, %v12181_v49, %v12189_v60  ;;  %v12340_v60 = vld [vmem:[#allocation38_spill] sm:$0xff]  ;;  %v12350_v23 = vld [vmem:[#allocation71_spill] sm:$0xff] }
0x112e   : > { %v3596_v32 = vsel %vm529_vm2, %v6210_v21, %v12328_v44 }
0x1130   : > { %4493 = vrot.lane.b32.xlu1 %v3564_v52, %s11893_s3  ;;  %v9973_v58 = vpop.permute.xlu1 %4092  ;;  %v9975_v18 = vpop.permute.xlu0 %4559 }
0x1131   : > { %12326 = vst [vmem:[#allocation160_spill] sm:$0xff] %v9975_v18  ;;  %4681 = vrot.lane.b32.xlu0 %v3736_v1, %s11893_s3  ;;  %v12333_v1 = vld [vmem:[#allocation171_spill] sm:$0xff]  ;;  %v3813_v18 = vsel %vm457_vm7, %v12350_v23, %v12349_v14  ;;  %v12356_v14 = vld [vmem:[#allocation178_spill] sm:$0xff] }
0x1134   : > { %4517 = vrot.lane.b32.xlu1 %v3596_v32, %s11893_s3  ;;  %v9985_v38 = vpop.permute.xlu1 %4116  ;;  %v9987_v31 = vpop.permute.xlu0 %4583  ;;  %v12336_v32 = vld [vmem:[#allocation172_spill] sm:$0xff] }
0x1135   : > { %12329 = vst [vmem:[#allocation133_spill] sm:$0xff] %v9985_v38  ;;  %12330 = vst [vmem:[#allocation162_spill] sm:$0xff] %v9987_v31  ;;  %4705 = vrot.lane.b32.xlu0 %v4226_v6, %s11893_s3  ;;  %v12347_v38 = vld [vmem:[#allocation175_spill] sm:$0xff] }
0x1136   : > { %v12359_v31 = vld [vmem:[#allocation79_spill] sm:$0xff] }
0x1138   : > { %v9993_v46 = vpop.permute.xlu1 %4140  ;;  %4353 = vrot.lane.b32.xlu1 %v8945_v62, %s11893_s3  ;;  %v9997_v7 = vpop.permute.xlu0 %4703 }
0x1139   : > { %12331 = vst [vmem:[#allocation135_spill] sm:$0xff] %v9997_v7  ;;  %4657 = vrot.lane.b32.xlu0 %v3716_v28, %s11893_s3  ;;  %v12339_v28 = vld [vmem:[#allocation173_spill] sm:$0xff]  ;;  %v12342_v7 = vld [vmem:[#allocation174_spill] sm:$0xff] }
0x113c   : > { %v10003_v52 = vpop.permute.xlu1 %4164  ;;  %4377 = vrot.lane.b32.xlu1 %v12333_v1, %s11893_s3  ;;  %v10007_v12 = vpop.permute.xlu0 %4343 }
0x113d   : > { %12334 = vst [vmem:[#allocation165_spill] sm:$0xff] %v10007_v12  ;;  %4633 = vrot.lane.b32.xlu0 %v3696_v25, %s11893_s3 }
0x1140   : > { %v10013_v21 = vpop.permute.xlu1 %4188  ;;  %4401 = vrot.lane.b32.xlu1 %v12336_v32, %s11893_s3  ;;  %v10017_v24 = vpop.permute.xlu0 %4367 }
0x1141   : > { %12337 = vst [vmem:[#allocation138_spill] sm:$0xff] %v10017_v24  ;;  %4609 = vrot.lane.b32.xlu0 %v3676_v22, %s11893_s3  ;;  %v3781_v22 = vsel %vm445_vm1, %v12345_v40, %v12344_v61  ;;  %v12351_v61 = vld [vmem:[#allocation176_spill] sm:$0xff] }
0x1144   : > { %v10023_v6 = vpop.permute.xlu1 %4212  ;;  %4425 = vrot.lane.b32.xlu1 %v12339_v28, %s11893_s3  ;;  %v10027_v49 = vpop.permute.xlu0 %4391 }
0x1145   : > { %12338 = vst [vmem:[#allocation167_spill] sm:$0xff] %v10023_v6  ;;  %4709 = vrot.lane.b32.xlu0 %v12340_v60, %s11893_s3 }
0x1148   : > { %v10031_v25 = vpop.permute.xlu1 %4345  ;;  %4449 = vrot.lane.b32.xlu1 %v12342_v7, %s11893_s3  ;;  %v10035_v10 = vpop.permute.xlu0 %4415 }
0x1149   : > { %12341 = vst [vmem:[#allocation169_spill] sm:$0xff] %v10031_v25  ;;  %12343 = vst [vmem:[#allocation171_spill] sm:$0xff] %v10035_v10  ;;  %4050 = vrot.lane.b32.xlu0 %v3781_v22, %s11830_s22  ;;  %v12353_v10 = vunpack.i.h.bf16 %v12207_v43 }
0x114b   : > { %v3845_v29 = vsel %vm469_vm8, %v12354_v9, %v12353_v10  ;;  %v12361_v10 = vld [vmem:[#allocation180_spill] sm:$0xff] }
0x114c   : > { %v10042_v50 = vpop.permute.xlu1 %4369  ;;  %4473 = vrot.lane.b32.xlu1 %v12347_v38, %s11893_s3  ;;  %v10046_v4 = vpop.permute.xlu0 %4439 }
0x114d   : > { %12346 = vst [vmem:[#allocation172_spill] sm:$0xff] %v10042_v50  ;;  %12348 = vst [vmem:[#allocation173_spill] sm:$0xff] %v10046_v4  ;;  %4074 = vrot.lane.b32.xlu0 %v3813_v18, %s11830_s22  ;;  %v12358_v4 = vunpack.i.h.bf16 %v12213_v17 }
0x114f   : > { %v3877_v12 = vsel %vm481_vm6, %v12359_v31, %v12358_v4  ;;  %v12366_v4 = vld [vmem:[#allocation182_spill] sm:$0xff] }
0x1150   : > { %v10053_v16 = vpop.permute.xlu1 %4393  ;;  %4497 = vrot.lane.b32.xlu1 %v12351_v61, %s11893_s3  ;;  %v10057_v22 = vpop.permute.xlu0 %4463 }
0x1151   : > { %12352 = vst [vmem:[#allocation38_spill] sm:$0xff] %v10057_v22  ;;  %4098 = vrot.lane.b32.xlu0 %v3845_v29, %s11830_s22  ;;  %v12364_v22 = vld [vmem:[#allocation77_spill] sm:$0xff] }
0x1154   : > { %v10064_v54 = vpop.permute.xlu1 %4417  ;;  %4521 = vrot.lane.b32.xlu1 %v12356_v14, %s11893_s3  ;;  %v10068_v18 = vpop.permute.xlu0 %4487 }
0x1155   : > { %12355 = vst [vmem:[#allocation174_spill] sm:$0xff] %v10064_v54  ;;  %12357 = vst [vmem:[#allocation67_spill] sm:$0xff] %v10068_v18  ;;  %4122 = vrot.lane.b32.xlu0 %v3877_v12, %s11830_s22  ;;  %v12363_v54 = vunpack.i.h.bf16 %v12219_v33  ;;  %v12369_v18 = vld [vmem:[#allocation187_spill] sm:$0xff] }
0x1157   : > { %v3909_v25 = vsel %vm493_vm5, %v12364_v22, %v12363_v54  ;;  %v12371_v54 = vld [vmem:[#allocation184_spill] sm:$0xff] }
0x1158   : > { %v10075_v43 = vpop.permute.xlu1 %4441  ;;  %4545 = vrot.lane.b32.xlu1 %v12361_v10, %s11893_s3  ;;  %v10079_v29 = vpop.permute.xlu0 %4511 }
0x1159   : > { %12360 = vst [vmem:[#allocation175_spill] sm:$0xff] %v10075_v43  ;;  %12362 = vst [vmem:[#allocation71_spill] sm:$0xff] %v10079_v29  ;;  %4146 = vrot.lane.b32.xlu0 %v3909_v25, %s11830_s22  ;;  %v12368_v43 = vunpack.i.h.bf16 %v12225_v53  ;;  %v12373_v29 = vunpack.i.h.bf16 %v12232_v35 }
0x115b   : > { %v3941_v6 = vsel %vm505_vm3, %v12369_v18, %v12368_v43  ;;  %v12376_v43 = vld [vmem:[#allocation65_spill] sm:$0xff] }
0x115c   : > { %v10086_v17 = vpop.permute.xlu1 %4465  ;;  %4569 = vrot.lane.b32.xlu1 %v12366_v4, %s11893_s3  ;;  %v10090_v12 = vpop.permute.xlu0 %4347 }
0x115d   : > { %12365 = vst [vmem:[#allocation176_spill] sm:$0xff] %v10086_v17  ;;  %12367 = vst [vmem:[#allocation75_spill] sm:$0xff] %v10090_v12  ;;  %4170 = vrot.lane.b32.xlu0 %v3941_v6, %s11830_s22  ;;  %v12374_v17 = vld [vmem:[#allocation76_spill] sm:$0xff]  ;;  %v12378_v12 = vld [vmem:[#allocation78_spill] sm:$0xff] }
0x115e   : > { %v3973_v24 = vsel %vm517_vm4, %v12374_v17, %v12373_v29  ;;  %v12380_v29 = vld [vmem:[#allocation21_spill] sm:$0xff] }
0x1160   : > { %v10097_v33 = vpop.permute.xlu1 %4489  ;;  %4593 = vrot.lane.b32.xlu1 %v12371_v54, %s11893_s3  ;;  %v10101_v25 = vpop.permute.xlu0 %4371 }
0x1161   : > { %12370 = vst [vmem:[#allocation178_spill] sm:$0xff] %v10097_v33  ;;  %12372 = vst [vmem:[#allocation79_spill] sm:$0xff] %v10101_v25  ;;  %4194 = vrot.lane.b32.xlu0 %v3973_v24, %s11830_s22  ;;  %v12377_v33 = vunpack.i.h.bf16 %v12239_v47  ;;  %v12383_v47 = vld [vmem:[#allocation19_spill] sm:$0xff] }
0x1163   : > { %v4005_v50 = vsel %vm529_vm2, %v12378_v12, %v12377_v33 }
0x1164   : > { %v10108_v53 = vpop.permute.xlu1 %4513  ;;  %4689 = vrot.lane.b32.xlu1 %v12376_v43, %s11893_s3  ;;  %v10112_v6 = vpop.permute.xlu0 %4395 }
0x1165   : > { %12375 = vst [vmem:[#allocation180_spill] sm:$0xff] %v10108_v53  ;;  %4218 = vrot.lane.b32.xlu0 %v4005_v50, %s11830_s22  ;;  %v3373_v53 = vsel %vm445_vm1, %v12303_v63, %v8945_v62  ;;  %v3405_v50 = vsel %vm457_vm7, %v12307_v39, %v12333_v1  ;;  %v3437_v63 = vsel %vm469_vm8, %v12311_v30, %v12336_v32  ;;  %v12389_v30 = vld [vmem:[#allocation179_spill] sm:$0xff] }
0x1166   : > { %v3812_v32 = vsel %vm457_vm7, %v12389_v30, %v12350_v23  ;;  %vm5701_vm7 = vcmask 7168  }
0x1168   : > { %v10119_v35 = vpop.permute.xlu1 %4537  ;;  %4665 = vrot.lane.b32.xlu1 %v12380_v29, %s11893_s3  ;;  %v10123_v24 = vpop.permute.xlu0 %4419 }
0x1169   : > { %12379 = vst [vmem:[#allocation77_spill] sm:$0xff] %v10119_v35  ;;  %12381 = vst [vmem:[#allocation182_spill] sm:$0xff] %v10123_v24  ;;  %4351 = vrot.lane.b32.xlu0 %v3373_v53, %s11893_s3  ;;  %v12385_v35 = vld [vmem:[#allocation17_spill] sm:$0xff] }
0x116a   : > { %v12387_v53 = vld [vmem:[#allocation177_spill] sm:$0xff] }
0x116c   : > { %v10129_v25 = vpop.permute.xlu1 %4561  ;;  %4641 = vrot.lane.b32.xlu1 %v12383_v47, %s11893_s3  ;;  %v10133_v33 = vpop.permute.xlu0 %4443 }
0x116d   : > { %12382 = vst [vmem:[#allocation187_spill] sm:$0xff] %v10129_v25  ;;  %12384 = vst [vmem:[#allocation184_spill] sm:$0xff] %v10133_v33  ;;  %4375 = vrot.lane.b32.xlu0 %v3405_v50, %s11893_s3  ;;  %v3780_v33 = vsel %vm445_vm1, %v12387_v53, %v12345_v40  ;;  %v3469_v50 = vsel %vm481_vm6, %v12315_v57, %v12339_v28  ;;  %v12392_v57 = vld [vmem:[#allocation181_spill] sm:$0xff]  ;;  %vm12406_vm1 = vcmask 924672  }
0x116e   : > { %v3844_v28 = vsel %vm469_vm8, %v12392_v57, %v12354_v9  ;;  %v3597_v57 = vsel %vm529_vm2, %v12328_v44, %v12356_v14  ;;  %v12400_v44 = vld [vmem:[#allocation63_spill] sm:$0xff] }
0x116f   : > { %v3972_v14 = vsel %vm517_vm4, %v12400_v44, %v12374_v17 }
0x1170   : > { %v10139_v24 = vpop.permute.xlu1 %4585  ;;  %4617 = vrot.lane.b32.xlu1 %v12385_v35, %s11893_s3  ;;  %v10143_v62 = vpop.permute.xlu0 %4467 }
0x1171   : > { %12386 = vst [vmem:[#allocation76_spill] sm:$0xff] %v10143_v62  ;;  %4399 = vrot.lane.b32.xlu0 %v3437_v63, %s11893_s3 }
0x1174   : > { %v10152_v39 = vpop.permute.xlu1 %4707  ;;  %4048 = vrot.lane.b32.xlu1 %v3780_v33, %s11830_s22  ;;  %v10155_v1 = vpop.permute.xlu0 %4491  ;;  %v3501_v33 = vsel %vm493_vm5, %v12319_v51, %v12342_v7  ;;  %v12394_v51 = vld [vmem:[#allocation183_spill] sm:$0xff] }
0x1175   : > { %12388 = vst [vmem:[#allocation65_spill] sm:$0xff] %v10152_v39  ;;  %4423 = vrot.lane.b32.xlu0 %v3469_v50, %s11893_s3  ;;  %v3533_v50 = vsel %vm505_vm3, %v12322_v26, %v12347_v38  ;;  %v3876_v7 = vsel %vm481_vm6, %v12394_v51, %v12359_v31  ;;  %v12396_v26 = vld [vmem:[#allocation61_spill] sm:$0xff]  ;;  %vm6486_vm6 = vmmov 0  }
0x1176   : > { %v3908_v38 = vsel %vm493_vm5, %v12396_v26, %v12364_v22  ;;  %v3657_v26 = vsel %vm565_vm15, %v8965_v36, %v12371_v54  ;;  %v12420_v39 = vld [vmem:[#allocation25_spill] sm:$0xff]  ;;  %vm4907_vm5 = vcmask 72704  }
0x1178   : > { %v10164_v63 = vpop.permute.xlu1 %4541  ;;  %4072 = vrot.lane.b32.xlu1 %v3812_v32, %s11830_s22  ;;  %v10167_v40 = vpop.permute.xlu0 %4515  ;;  %v3565_v32 = vsel %vm517_vm4, %v12325_v41, %v12351_v61  ;;  %v12398_v41 = vld [vmem:[#allocation62_spill] sm:$0xff]  ;;  %vm12412_vm4 = vmmov %vm12335_vm10 }
0x1179   : > { %12390 = vst [vmem:[#allocation78_spill] sm:$0xff] %v10164_v63  ;;  %12391 = vst [vmem:[#allocation21_spill] sm:$0xff] %v10167_v40  ;;  %4447 = vrot.lane.b32.xlu0 %v3501_v33, %s11893_s3  ;;  %v3940_v61 = vsel %vm505_vm3, %v12398_v41, %v12369_v18  ;;  %v3737_v41 = vsel %vm12406_vm1, %v9011_v13, %v12376_v43  ;;  %v12431_v40 = vld [vmem:[#allocation34_spill] sm:$0xff] }
0x117c   : > { %v10176_v53 = vpop.permute.xlu1 %4565  ;;  %4096 = vrot.lane.b32.xlu1 %v3844_v28, %s11830_s22  ;;  %v10179_v23 = vpop.permute.xlu0 %4539 }
0x117d   : > { %12393 = vst [vmem:[#allocation19_spill] sm:$0xff] %v10179_v23  ;;  %4471 = vrot.lane.b32.xlu0 %v3533_v50, %s11893_s3  ;;  %v3617_v50 = vsel %vm541_vm13, %v8943_v42, %v12361_v10  ;;  %v12402_v42 = vld [vmem:[#allocation64_spill] sm:$0xff]  ;;  %v12434_v23 = vld [vmem:[#allocation146_spill] sm:$0xff] }
0x117e   : > { %v4004_v10 = vsel %vm529_vm2, %v12402_v42, %v12378_v12  ;;  %vm12409_vm2 = vmmov %vm12332_vm0 }
0x1180   : > { %v10188_v30 = vpop.permute.xlu1 %4589  ;;  %4120 = vrot.lane.b32.xlu1 %v3876_v7, %s11830_s22  ;;  %v10191_v9 = vpop.permute.xlu0 %4563  ;;  %v3637_v7 = vsel %vm553_vm14, %v8956_v45, %v12366_v4  ;;  %v12404_v45 = vld [vmem:[#allocation80_spill] sm:$0xff] }
0x1181   : > { %12395 = vst [vmem:[#allocation17_spill] sm:$0xff] %v10191_v9  ;;  %4495 = vrot.lane.b32.xlu0 %v3565_v32, %s11893_s3  ;;  %v4228_v44 = vsel %vm788_vm12, %v12340_v60, %v12404_v45  ;;  %v4246_v9 = vsel %vm788_vm12, %v12420_v39, %v9573_v20 }
0x1184   : > { %v10200_v33 = vpop.permute.xlu1 %4685  ;;  %4144 = vrot.lane.b32.xlu1 %v3908_v38, %s11830_s22  ;;  %v10203_v31 = vpop.permute.xlu0 %4587  ;;  %v6300_v38 = vunpack.i.h.bf16 %v12285_v5 }
0x1185   : > { %12397 = vst [vmem:[#allocation177_spill] sm:$0xff] %v10200_v33  ;;  %4519 = vrot.lane.b32.xlu0 %v3597_v57, %s11893_s3  ;;  %v12430_v33 = vld [vmem:[#allocation85_spill] sm:$0xff] }
0x1186   : > { %v4229_v4 = vsel %vm788_vm12, %v12404_v45, %v6300_v38 }
0x1188   : > { %v10212_v28 = vpop.permute.xlu1 %4661  ;;  %4168 = vrot.lane.b32.xlu1 %v3940_v61, %s11830_s22  ;;  %v10215_v22 = vpop.permute.xlu0 %4042  ;;  %v12407_v61 = vld [vmem:[#allocation44_spill] sm:$0xff] }
0x1189   : > { %12399 = vst [vmem:[#allocation179_spill] sm:$0xff] %v10212_v28  ;;  %4543 = vrot.lane.b32.xlu0 %v3617_v50, %s11893_s3  ;;  %v6324_v50 = vunpack.i.l.bf16 %v12407_v61  ;;  %v12427_v28 = vld [vmem:[#allocation188_spill] sm:$0xff] }
0x118b   : > { %v4247_v36 = vsel %vm788_vm12, %v9573_v20, %v6324_v50  ;;  %v12413_v50 = vld [vmem:[#allocation52_spill] sm:$0xff]  ;;  %v4232_v20 = vsel %vm788_vm12, %v12431_v40, %v9780_v15 }
0x118c   : > { %v10224_v51 = vpop.permute.xlu1 %4637  ;;  %4192 = vrot.lane.b32.xlu1 %v3972_v14, %s11830_s22  ;;  %v10227_v18 = vpop.permute.xlu0 %4066  ;;  %v12408_v14 = vld [vmem:[#allocation42_spill] sm:$0xff] }
0x118d   : > { %12401 = vst [vmem:[#allocation181_spill] sm:$0xff] %v10224_v51  ;;  %4567 = vrot.lane.b32.xlu0 %v3637_v7, %s11893_s3  ;;  %v6314_v7 = vunpack.i.l.bf16 %v12408_v14 }
0x118f   : > { %v4239_v13 = vsel %vm788_vm12, %v9563_v48, %v6314_v7 }
0x1190   : > { %v10236_v32 = vpop.permute.xlu1 %4613  ;;  %4216 = vrot.lane.b32.xlu1 %v4004_v10, %s11830_s22  ;;  %v10239_v17 = vpop.permute.xlu0 %4090  ;;  %v3717_v10 = vsel %vm12409_vm2, %v8998_v59, %v12380_v29  ;;  %v12414_v59 = vld [vmem:[#allocation132_spill] sm:$0xff] }
0x1191   : > { %12403 = vst [vmem:[#allocation183_spill] sm:$0xff] %v10236_v32  ;;  %4591 = vrot.lane.b32.xlu0 %v3657_v26, %s11893_s3  ;;  %v12410_v26 = vld [vmem:[#allocation40_spill] sm:$0xff]  ;;  %v12421_v32 = vld [vmem:[#allocation166_spill] sm:$0xff] }
0x1192   : > { %v6304_v38 = vunpack.i.l.bf16 %v12410_v26 }
0x1194   : > { %v10248_v57 = vpop.permute.xlu1 %4349  ;;  %4713 = vrot.lane.b32.xlu1 %v4229_v4, %s11893_s3  ;;  %v10251_v12 = vpop.permute.xlu0 %4114  ;;  %v4231_v60 = vsel %vm788_vm12, %v9553_v34, %v6304_v38 }
0x1195   : > { %12405 = vst [vmem:[#allocation61_spill] sm:$0xff] %v10251_v12  ;;  %4687 = vrot.lane.b32.xlu0 %v3737_v41, %s11893_s3  ;;  %v3697_v41 = vsel %vm12412_vm4, %v8985_v27, %v12383_v47  ;;  %v12417_v27 = vld [vmem:[#allocation164_spill] sm:$0xff] }
0x1196   : > { %v12425_v12 = vld [vmem:[#allocation36_spill] sm:$0xff] }
0x1198   : > { %v10260_v5 = vpop.permute.xlu1 %4373  ;;  %4767 = vrot.lane.b32.xlu1 %v4247_v36, %s11893_s3  ;;  %v10263_v54 = vpop.permute.xlu0 %4138  ;;  %v6364_v36 = vunpack.i.l.bf16 %v12413_v50 }
0x1199   : > { %4711 = vrot.lane.b32.xlu0 %v4228_v44, %s11893_s3 }
0x119a   : > { %v4279_v29 = vsel %vm788_vm12, %v12414_v59, %v6364_v36  ;;  %v12419_v36 = vld [vmem:[#allocation48_spill] sm:$0xff] }
0x119c   : > { %v10272_v43 = vpop.permute.xlu1 %4397  ;;  %4743 = vrot.lane.b32.xlu1 %v4239_v13, %s11893_s3  ;;  %v10275_v42 = vpop.permute.xlu0 %4162  ;;  %v3677_v13 = vsel %vm577_vm11, %v8976_v19, %v12385_v35 }
0x119d   : > { %4663 = vrot.lane.b32.xlu0 %v3717_v10, %s11893_s3  ;;  %v12416_v10 = vld [vmem:[#allocation50_spill] sm:$0xff] }
0x119e   : > { %v6354_v38 = vunpack.i.l.bf16 %v12416_v10 }
0x11a0   : > { %v10284_v45 = vpop.permute.xlu1 %4421  ;;  %4719 = vrot.lane.b32.xlu1 %v4231_v60, %s11893_s3  ;;  %v10287_v4 = vpop.permute.xlu0 %4186  ;;  %v4271_v47 = vsel %vm788_vm12, %v12417_v27, %v6354_v38  ;;  %v12423_v38 = vld [vmem:[#allocation23_spill] sm:$0xff] }
0x11a1   : > { %12411 = vst [vmem:[#allocation62_spill] sm:$0xff] %v10284_v45  ;;  %4639 = vrot.lane.b32.xlu0 %v3697_v41, %s11893_s3 }
0x11a4   : > { %v10296_v44 = vpop.permute.xlu1 %4445  ;;  %4863 = vrot.lane.b32.xlu1 %v4279_v29, %s11893_s3  ;;  %v10299_v7 = vpop.permute.xlu0 %4210  ;;  %v6344_v29 = vunpack.i.l.bf16 %v12419_v36 }
0x11a5   : > { %12415 = vst [vmem:[#allocation63_spill] sm:$0xff] %v10296_v44  ;;  %4615 = vrot.lane.b32.xlu0 %v3677_v13, %s11893_s3  ;;  %v4248_v44 = vsel %vm788_vm12, %v12425_v12, %v9800_v37 }
0x11a6   : > { %v4263_v19 = vsel %vm788_vm12, %v12421_v32, %v6344_v29 }
0x11a8   : > { %v10308_v60 = vpop.permute.xlu1 %4469  ;;  %4839 = vrot.lane.b32.xlu1 %v4271_v47, %s11893_s3  ;;  %v10311_v41 = vpop.permute.xlu0 %4681  ;;  %v4295_v47 = vld [vmem:[%s11501_s5 + $0x8] sm:$0xff] }
0x11a9   : > { %12418 = vst [vmem:[#allocation64_spill] sm:$0xff] %v10311_v41  ;;  %4763 = vrot.lane.b32.xlu0 %v12420_v39, %s11893_s3  ;;  %5375 = vmatprep.mubr.f32.mxu1 %v4295_v47 }
0x11ac   : > { %v10318_v35 = vpop.permute.xlu1 %4493  ;;  %4815 = vrot.lane.b32.xlu1 %v4263_v19, %s11893_s3  ;;  %v10321_v13 = vpop.permute.xlu0 %4705 }
0x11ad   : > { %12422 = vst [vmem:[#allocation80_spill] sm:$0xff] %v10321_v13  ;;  %4739 = vrot.lane.b32.xlu0 %v12423_v38, %s11893_s3  ;;  %v12428_v13 = vld [vmem:[#allocation108_spill] sm:$0xff] }
0x11b0   : > { %v10328_v51 = vpop.permute.xlu1 %4517  ;;  %4769 = vrot.lane.b32.xlu1 %v12425_v12, %s11893_s3  ;;  %v10332_v29 = vpop.permute.xlu0 %4657 }
0x11b1   : > { %12424 = vst [vmem:[#allocation44_spill] sm:$0xff] %v10328_v51  ;;  %12426 = vst [vmem:[#allocation42_spill] sm:$0xff] %v10332_v29  ;;  %4715 = vrot.lane.b32.xlu0 %v12427_v28, %s11893_s3  ;;  %v12433_v29 = vld [vmem:[#allocation84_spill] sm:$0xff] }
0x11b4   : > { %v10336_v19 = vpop.permute.xlu1 %4353  ;;  %4745 = vrot.lane.b32.xlu1 %v12428_v13, %s11893_s3  ;;  %v10340_v41 = vpop.permute.xlu0 %4633 }
0x11b5   : > { %12429 = vst [vmem:[#allocation40_spill] sm:$0xff] %v10340_v41  ;;  %4859 = vrot.lane.b32.xlu0 %v12430_v33, %s11893_s3  ;;  %v12436_v41 = vld [vmem:[#allocation82_spill] sm:$0xff] }
0x11b8   : > { %v10344_v47 = vpop.permute.xlu1 %4377  ;;  %4721 = vrot.lane.b32.xlu1 %v12431_v40, %s11893_s3  ;;  %v10348_v51 = vpop.permute.xlu0 %4609 }
0x11b9   : > { %12432 = vst [vmem:[#allocation52_spill] sm:$0xff] %v10348_v51  ;;  %4835 = vrot.lane.b32.xlu0 %v12433_v29, %s11893_s3 }
0x11bc   : > { %v10352_v45 = vpop.permute.xlu1 %4401  ;;  %4817 = vrot.lane.b32.xlu1 %v12434_v23, %s11893_s3  ;;  %v10356_v63 = vpop.permute.xlu0 %4709 }
0x11bd   : > { %12435 = vst [vmem:[#allocation132_spill] sm:$0xff] %v10356_v63  ;;  %4811 = vrot.lane.b32.xlu0 %v12436_v41, %s11893_s3  ;;  %v4240_v63 = vsel %vm788_vm12, %v12428_v13, %v9790_v0  ;;  %v6365_v13 = vunpack.i.h.bf16 %v12413_v50 }
0x11c0   : > { %v10363_v25 = vpop.permute.xlu1 %4425  ;;  %4771 = vrot.lane.b32.xlu1 %v4248_v44, %s11893_s3  ;;  %v10366_v51 = vpop.permute.xlu0 %4050  ;;  %v4238_v44 = vsel %vm788_vm12, %v12423_v38, %v9563_v48  ;;  %v4281_v48 = vsel %vm788_vm12, %v9837_v11, %v6365_v13 }
0x11c1   : > { %4765 = vrot.lane.b32.xlu0 %v4246_v9, %s11893_s3 }
0x11c4   : > { %v10375_v62 = vpop.permute.xlu1 %4449  ;;  %4747 = vrot.lane.b32.xlu1 %v4240_v63, %s11893_s3  ;;  %v10378_v12 = vpop.permute.xlu0 %4074  ;;  %v4230_v63 = vsel %vm788_vm12, %v12427_v28, %v9553_v34  ;;  %v4297_v28 = vld [vmem:[%s11501_s5 + $0x18] sm:$0xff] }
0x11c5   : > { %4741 = vrot.lane.b32.xlu0 %v4238_v44, %s11893_s3  ;;  %v4278_v44 = vsel %vm788_vm12, %v12430_v33, %v12414_v59  ;;  %v4270_v33 = vsel %vm788_vm12, %v12433_v29, %v12417_v27  ;;  %5446 = vmatprep.mubr.f32.mxu0 %v4297_v28  ;;  %v4264_v59 = vsel %vm788_vm12, %v12434_v23, %v9820_v3  ;;  %v6325_v28 = vunpack.i.h.bf16 %v12407_v61 }
0x11c8   : > { %v10387_v39 = vpop.permute.xlu1 %4473  ;;  %4723 = vrot.lane.b32.xlu1 %v4232_v20, %s11893_s3  ;;  %v10390_v9 = vpop.permute.xlu0 %4098  ;;  %v6355_v20 = vunpack.i.h.bf16 %v12416_v10 }
0x11c9   : > { %4717 = vrot.lane.b32.xlu0 %v4230_v63, %s11893_s3 }
0x11ca   : > { %v4273_v34 = vsel %vm788_vm12, %v9830_v55, %v6355_v20  ;;  %v12441_v20 = vld [vmem:[#allocation148_spill] sm:$0xff] }
0x11cc   : > { %v10399_v38 = vpop.permute.xlu1 %4497  ;;  %4869 = vrot.lane.b32.xlu1 %v4281_v48, %s11893_s3  ;;  %v10402_v40 = vpop.permute.xlu0 %4122  ;;  %v4262_v48 = vsel %vm788_vm12, %v12436_v41, %v12421_v32  ;;  %v12443_v41 = vld [vmem:[#allocation45_spill] sm:$0xff] }
0x11cd   : > { %12437 = vst [vmem:[#allocation50_spill] sm:$0xff] %v10402_v40  ;;  %4861 = vrot.lane.b32.xlu0 %v4278_v44, %s11893_s3  ;;  %v6345_v44 = vunpack.i.h.bf16 %v12419_v36  ;;  %v6329_v36 = vunpack.i.l.bf16 %v12443_v41  ;;  %v6315_v40 = vunpack.i.h.bf16 %v12408_v14 }
0x11cf   : > { %v4265_v27 = vsel %vm788_vm12, %v9820_v3, %v6345_v44  ;;  %v12444_v3 = vld [vmem:[#allocation14_spill] sm:$0xff]  ;;  %v4249_v44 = vsel %vm788_vm12, %v9800_v37, %v6325_v28  ;;  %v6305_v37 = vunpack.i.h.bf16 %v12410_v26 }
0x11d0   : > { %v10414_v50 = vpop.permute.xlu1 %4521  ;;  %4845 = vrot.lane.b32.xlu1 %v4273_v34, %s11893_s3  ;;  %v10417_v63 = vpop.permute.xlu0 %4146 }
0x11d1   : > { %12438 = vst [vmem:[#allocation164_spill] sm:$0xff] %v10417_v63  ;;  %4837 = vrot.lane.b32.xlu0 %v4270_v33, %s11893_s3  ;;  %v4251_v33 = vsel %vm788_vm12, %v9973_v58, %v6329_v36 }
0x11d4   : > { %v10426_v10 = vpop.permute.xlu1 %4545  ;;  %4819 = vrot.lane.b32.xlu1 %v4264_v59, %s11893_s3  ;;  %v10429_v13 = vpop.permute.xlu0 %4170 }
0x11d5   : > { %12439 = vst [vmem:[#allocation48_spill] sm:$0xff] %v10429_v13  ;;  %4813 = vrot.lane.b32.xlu0 %v4262_v48, %s11893_s3  ;;  %v12446_v13 = vld [vmem:[#allocation41_spill] sm:$0xff] }
0x11d8   : > { %v10438_v29 = vpop.permute.xlu1 %4569  ;;  %4821 = vrot.lane.b32.xlu1 %v4265_v27, %s11893_s3  ;;  %v10441_v23 = vpop.permute.xlu0 %4194  ;;  %v12445_v27 = vld [vmem:[#allocation43_spill] sm:$0xff] }
0x11d9   : > { %12440 = vst [vmem:[#allocation25_spill] sm:$0xff] %v10441_v23  ;;  %4865 = vrot.lane.b32.xlu0 %v12441_v20, %s11893_s3  ;;  %v6309_v23 = vunpack.i.l.bf16 %v12446_v13 }
0x11db   : > { %v4235_v14 = vsel %vm788_vm12, %v9949_v2, %v6309_v23 }
0x11dc   : > { %v10445_v34 = vpop.permute.xlu1 %4593  ;;  %4823 = vrot.lane.b32.xlu1 %v10263_v54, %s11893_s3  ;;  %v10449_v32 = vpop.permute.xlu0 %4218 }
0x11dd   : > { %12442 = vst [vmem:[#allocation166_spill] sm:$0xff] %v10449_v32  ;;  %4841 = vrot.lane.b32.xlu0 %v12444_v3, %s11893_s3  ;;  %v6319_v32 = vunpack.i.l.bf16 %v12445_v27 }
0x11df   : > { %v4243_v61 = vsel %vm788_vm12, %v9961_v8, %v6319_v32 }
0x11e0   : > { %v10457_v59 = vpop.permute.xlu1 %4689  ;;  %4779 = vrot.lane.b32.xlu1 %v4251_v33, %s11893_s3  ;;  %v10460_v48 = vpop.permute.xlu0 %4351  ;;  %v4241_v33 = vsel %vm788_vm12, %v9790_v0, %v6315_v40 }
0x11e1   : > { %4773 = vrot.lane.b32.xlu0 %v4249_v44, %s11893_s3  ;;  %v4233_v44 = vsel %vm788_vm12, %v9780_v15, %v6305_v37 }
0x11e4   : > { %v10469_v63 = vpop.permute.xlu1 %4665  ;;  %4755 = vrot.lane.b32.xlu1 %v4243_v61, %s11893_s3  ;;  %v4376_v36 = vpop.permute.xlu0 %4375  ;;  %v12447_v61 = vld [vmem:[#allocation53_spill] sm:$0xff] }
0x11e5   : > { %4749 = vrot.lane.b32.xlu0 %v4241_v33, %s11893_s3  ;;  %v6369_v0 = vunpack.i.l.bf16 %v12447_v61  ;;  %v4937_v33 = vsel %vm4907_vm5, %v10053_v16, %v10112_v6  ;;  %v12449_v6 = vld [vmem:[#allocation26_spill] sm:$0xff] }
0x11e7   : > { %v4283_v23 = vsel %vm788_vm12, %v10013_v21, %v6369_v0  ;;  %v12450_v0 = vld [vmem:[#allocation206_spill] sm:$0xff] }
0x11e8   : > { %v10479_v28 = vpop.permute.xlu1 %4641  ;;  %4731 = vrot.lane.b32.xlu1 %v4235_v14, %s11893_s3  ;;  %v4400_v32 = vpop.permute.xlu0 %4399  ;;  %v12448_v14 = vld [vmem:[#allocation51_spill] sm:$0xff] }
0x11e9   : > { %4725 = vrot.lane.b32.xlu0 %v4233_v44, %s11893_s3  ;;  %v4939_v40 = vsel %vm4907_vm5, %v4400_v32, %v10352_v45  ;;  %v4938_v26 = vsel %vm4907_vm5, %v10272_v43, %v4400_v32  ;;  %v4280_v43 = vsel %vm788_vm12, %v12441_v20, %v9837_v11  ;;  %v4936_v45 = vsel %vm4907_vm5, %v10027_v49, %v10053_v16  ;;  %v12451_v20 = vld [vmem:[#allocation111_spill] sm:$0xff]  ;;  %v12452_v49 = vld [vmem:[#allocation193_spill] sm:$0xff] }
0x11ea   : > { %5311 = vmatprep.subr.mxu1 %v4939_v40  ;;  %v6359_v32 = vunpack.i.l.bf16 %v12448_v14  ;;  %v4935_v44 = vsel %vm4907_vm5, %v9823_v56, %v12449_v6  ;;  %v4934_v40 = vsel %vm4907_vm5, %v12450_v0, %v9823_v56  ;;  %v4933_v16 = vsel %vm4907_vm5, %v12452_v49, %v12451_v20 }
0x11eb   : > { %5312 = vmatpush1.msra.mxu1 %v4938_v26  ;;  %v12453_v26 = vld [vmem:[#allocation93_spill] sm:$0xff]  ;;  %v4272_v56 = vsel %vm788_vm12, %v12444_v3, %v9830_v55  ;;  %v4931_v6 = vsel %vm4907_vm5, %v4376_v36, %v10344_v47  ;;  %v12457_v47 = vld [vmem:[#allocation138_spill] sm:$0xff] }
0x11ec   : > { %v10495_v15 = vpop.permute.xlu1 %4617  ;;  %4875 = vrot.lane.b32.xlu1 %v4283_v23, %s11893_s3  ;;  %5313 = vmatprep.subr.mxu1 %v4937_v33  ;;  %v10498_v37 = vpop.permute.xlu0 %4423  ;;  %v4275_v11 = vsel %vm788_vm12, %v10003_v52, %v6359_v32  ;;  %v4932_v23 = vsel %vm4907_vm5, %v12453_v26, %v12452_v49  ;;  %v12460_v26 = vld [vmem:[#allocation205_spill] sm:$0xff] }
0x11ed   : > { %4867 = vrot.lane.b32.xlu0 %v4280_v43, %s11893_s3  ;;  %5314 = vmatpush1.msra.mxu1 %v4936_v45  ;;  %v12454_v45 = vld [vmem:[#allocation49_spill] sm:$0xff] }
0x11ee   : > { %5315 = vmatprep.subr.mxu1 %v4935_v44  ;;  %v6349_v32 = vunpack.i.l.bf16 %v12454_v45  ;;  %v4930_v44 = vsel %vm4907_vm5, %v10260_v5, %v4376_v36  ;;  %v12458_v5 = vld [vmem:[#allocation24_spill] sm:$0xff]  ;;  %v12459_v36 = vld [vmem:[#allocation115_spill] sm:$0xff] }
0x11ef   : > { %5316 = vmatpush1.msra.mxu1 %v4934_v40  ;;  %v12455_v40 = vld [vmem:[#allocation79_spill] sm:$0xff] }
0x11f0   : > { %v10522_v33 = vpop.permute.xlu1 %4048  ;;  %4851 = vrot.lane.b32.xlu1 %v4275_v11, %s11893_s3  ;;  %5317 = vmatprep.subr.mxu1 %v4933_v16  ;;  %v10525_v43 = vpop.permute.xlu0 %4447  ;;  %v4267_v0 = vsel %vm788_vm12, %v9993_v46, %v6349_v32  ;;  %v12456_v11 = vld [vmem:[#allocation172_spill] sm:$0xff]  ;;  %v4927_v16 = vsel %vm4907_vm5, %v12459_v36, %v12458_v5 }
0x11f1   : > { %4843 = vrot.lane.b32.xlu0 %v4272_v56, %s11893_s3  ;;  %5318 = vmatpush1.msra.mxu1 %v4932_v23  ;;  %v4929_v55 = vsel %vm4907_vm5, %v12456_v11, %v12455_v40  ;;  %v4928_v49 = vsel %vm4907_vm5, %v12457_v47, %v12456_v11  ;;  %v4926_v23 = vsel %vm4907_vm5, %v12460_v26, %v12459_v36  ;;  %v12461_v56 = vld [vmem:[#allocation167_spill] sm:$0xff] }
0x11f2   : > { %5319 = vmatprep.subr.mxu1 %v4931_v6  ;;  %v4290_v32 = vsel %vm788_vm12, %v10299_v7, %v12461_v56  ;;  %v12462_v6 = vld [vmem:[#allocation99_spill] sm:$0xff]  ;;  %v4923_v36 = vsel %vm4907_vm5, %v10460_v48, %v10336_v19  ;;  %v12468_v19 = vld [vmem:[#allocation165_spill] sm:$0xff] }
0x11f3   : > { %5320 = vmatpush1.msra.mxu1 %v4930_v44  ;;  %v12463_v44 = vld [vmem:[#allocation191_spill] sm:$0xff] }
0x11f4   : > { %v10541_v3 = vpop.permute.xlu1 %4072  ;;  %4827 = vrot.lane.b32.xlu1 %v4267_v0, %s11893_s3  ;;  %5321 = vmatprep.subr.mxu1 %v4929_v55  ;;  %v10544_v20 = vpop.permute.xlu0 %4471  ;;  %v4925_v0 = vsel %vm4907_vm5, %v12463_v44, %v12462_v6  ;;  %v12464_v40 = vld [vmem:[#allocation91_spill] sm:$0xff] }
0x11f5   : > { %4775 = vrot.lane.b32.xlu0 %v10239_v17, %s11893_s3  ;;  %5322 = vmatpush1.msra.mxu1 %v4928_v49  ;;  %v4924_v11 = vsel %vm4907_vm5, %v12464_v40, %v12463_v44  ;;  %v12465_v49 = vld [vmem:[#allocation55_spill] sm:$0xff] }
0x11f6   : > { %5323 = vmatprep.subr.mxu1 %v4927_v16  ;;  %v6379_v5 = vunpack.i.l.bf16 %v12465_v49  ;;  %v4922_v16 = vsel %vm4907_vm5, %v10248_v57, %v10460_v48  ;;  %v12469_v57 = vld [vmem:[#allocation22_spill] sm:$0xff]  ;;  %v12470_v48 = vld [vmem:[#allocation15_spill] sm:$0xff]  ;;  %v12480_v49 = vld [vmem:[#allocation57_spill] sm:$0xff] }
0x11f7   : > { %5324 = vmatpush1.msra.mxu1 %v4926_v23  ;;  %v12466_v23 = vld [vmem:[#allocation75_spill] sm:$0xff]  ;;  %v6385_v45 = vunpack.i.h.bf16 %v12480_v49 }
0x11f8   : > { %v10566_v55 = vpop.permute.xlu1 %4096  ;;  %4897 = vrot.lane.b32.xlu1 %v4290_v32, %s11893_s3  ;;  %5325 = vmatprep.subr.mxu1 %v4925_v0  ;;  %v10569_v47 = vpop.permute.xlu0 %4495  ;;  %v4291_v26 = vsel %vm788_vm12, %v12461_v56, %v6379_v5  ;;  %v12467_v32 = vld [vmem:[#allocation169_spill] sm:$0xff]  ;;  %v4919_v56 = vsel %vm4907_vm5, %v12470_v48, %v12469_v57 }
0x11f9   : > { %4751 = vrot.lane.b32.xlu0 %v10227_v18, %s11893_s3  ;;  %5326 = vmatpush1.msra.mxu1 %v4924_v11  ;;  %v4921_v6 = vsel %vm4907_vm5, %v12467_v32, %v12466_v23  ;;  %v4920_v40 = vsel %vm4907_vm5, %v12468_v19, %v12467_v32  ;;  %v12471_v11 = vld [vmem:[#allocation203_spill] sm:$0xff]  ;;  %v12474_v23 = vld [vmem:[#allocation58_spill] sm:$0xff] }
0x11fa   : > { %5327 = vmatprep.subr.mxu1 %v4923_v36  ;;  %v4918_v5 = vsel %vm4907_vm5, %v12471_v11, %v12470_v48  ;;  %v12472_v36 = vld [vmem:[#allocation88_spill] sm:$0xff]  ;;  %v6390_v32 = vunpack.i.h.bf16 %v12474_v23  ;;  %v12476_v48 = vld [vmem:[#allocation73_spill] sm:$0xff] }
0x11fb   : > { %5328 = vmatpush1.msra.mxu1 %v4922_v16  ;;  %v12473_v16 = vld [vmem:[#allocation37_spill] sm:$0xff] }
0x11fc   : > { %v10585_v44 = vpop.permute.xlu1 %4120  ;;  %4899 = vrot.lane.b32.xlu1 %v4291_v26, %s11893_s3  ;;  %5329 = vmatprep.subr.mxu1 %v4921_v6  ;;  %v10588_v0 = vpop.permute.xlu0 %4519  ;;  %v4917_v26 = vsel %vm4907_vm5, %v12473_v16, %v12472_v36  ;;  %v12475_v6 = vld [vmem:[#allocation194_spill] sm:$0xff] }
0x11fd   : > { %4727 = vrot.lane.b32.xlu0 %v10215_v22, %s11893_s3  ;;  %5330 = vmatpush1.msra.mxu1 %v4920_v40  ;;  %v4916_v19 = vsel %vm4907_vm5, %v12475_v6, %v12473_v16  ;;  %v12478_v16 = vld [vmem:[#allocation150_spill] sm:$0xff]  ;;  %v12479_v6 = vld [vmem:[#allocation143_spill] sm:$0xff] }
0x11fe   : > { %5331 = vmatprep.subr.mxu1 %v4919_v56  ;;  %v12477_v56 = vld [vmem:[#allocation170_spill] sm:$0xff] }
0x11ff   : > { %5332 = vmatpush1.msra.mxu1 %v4918_v5  ;;  %v4915_v11 = vsel %vm4907_vm5, %v12477_v56, %v12476_v48  ;;  %v6389_v5 = vunpack.i.l.bf16 %v12474_v23  ;;  %v4914_v36 = vsel %vm4907_vm5, %v6390_v32, %v12477_v56  ;;  %v12481_v32 = vld [vmem:[#allocation119_spill] sm:$0xff] }
0x1200   : > { %v10608_v40 = vpop.permute.xlu1 %4144  ;;  %4781 = vrot.lane.b32.xlu1 %v10566_v55, %s11893_s3  ;;  %5333 = vmatprep.subr.mxu1 %v4917_v26  ;;  %v10612_v57 = vpop.permute.xlu0 %4543  ;;  %v4913_v26 = vsel %vm4907_vm5, %v12479_v6, %v12478_v16  ;;  %v12482_v48 = vld [vmem:[#allocation83_spill] sm:$0xff]  ;;  %v12483_v16 = vld [vmem:[#allocation68_spill] sm:$0xff] }
0x1201   : > { %4871 = vrot.lane.b32.xlu0 %v10287_v4, %s11893_s3  ;;  %5334 = vmatpush1.msra.mxu1 %v4916_v19  ;;  %v4912_v23 = vsel %vm4907_vm5, %v6389_v5, %v12479_v6  ;;  %v4911_v56 = vsel %vm4907_vm5, %v12482_v48, %v12481_v32 }
0x1202   : > { %5335 = vmatprep.subr.mxu1 %v4915_v11  ;;  %v6384_v11 = vunpack.i.l.bf16 %v12480_v49  ;;  %v4250_v49 = vsel %vm788_vm12, %v10239_v17, %v9973_v58  ;;  %v4970_v58 = vsel %vm4907_vm5, %v10318_v35, %v10569_v47  ;;  %v12485_v17 = vld [vmem:[#allocation178_spill] sm:$0xff]  ;;  %v4242_v35 = vsel %vm788_vm12, %v10227_v18, %v9961_v8  ;;  %v12490_v8 = vld [vmem:[#allocation12_spill] sm:$0xff]  ;;  %v12491_v18 = vld [vmem:[#allocation163_spill] sm:$0xff] }
0x1203   : > { %5336 = vmatpush1.msra.mxu1 %v4914_v36  ;;  %v4910_v36 = vsel %vm4907_vm5, %v6385_v45, %v12482_v48  ;;  %v4971_v45 = vsel %vm4907_vm5, %v10569_v47, %v10399_v38  ;;  %v4969_v48 = vsel %vm4907_vm5, %v12485_v17, %v10155_v1  ;;  %v5001_v38 = vsel %vm4907_vm5, %v10139_v24, %v10203_v31  ;;  %v12486_v1 = vld [vmem:[#allocation67_spill] sm:$0xff]  ;;  %v12487_v31 = vld [vmem:[#allocation162_spill] sm:$0xff] }
0x1204   : > { %v10626_v14 = vpop.permute.xlu1 %4168  ;;  %4757 = vrot.lane.b32.xlu1 %v10541_v3, %s11893_s3  ;;  %5337 = vmatprep.subr.mxu1 %v4913_v26  ;;  %v10630_v19 = vpop.permute.xlu0 %4567  ;;  %v12484_v26 = vld [vmem:[#allocation66_spill] sm:$0xff]  ;;  %v4968_v47 = vsel %vm4907_vm5, %v12486_v1, %v12485_v17  ;;  %v12496_v17 = vld [vmem:[#allocation204_spill] sm:$0xff]  ;;  %v4234_v1 = vsel %vm788_vm12, %v10215_v22, %v9949_v2  ;;  %v4962_v22 = vsel %vm4907_vm5, %v10308_v60, %v10544_v20 }
0x1205   : > { %4847 = vrot.lane.b32.xlu0 %v10275_v42, %s11893_s3  ;;  %5338 = vmatpush1.msra.mxu1 %v4912_v23  ;;  %v4909_v61 = vsel %vm4907_vm5, %v12484_v26, %v12483_v16  ;;  %v4908_v23 = vsel %vm4907_vm5, %v6384_v11, %v12484_v26  ;;  %v12488_v11 = vld [vmem:[#allocation125_spill] sm:$0xff]  ;;  %v4999_v26 = vsel %vm4907_vm5, %v12491_v18, %v12490_v8 }
0x1206   : > { %5339 = vmatprep.subr.mxu1 %v4911_v56  ;;  %v5000_v56 = vsel %vm4907_vm5, %v12487_v31, %v10139_v24  ;;  %v4995_v2 = vsel %vm4907_vm5, %v10630_v19, %v10438_v29  ;;  %v4282_v60 = vsel %vm788_vm12, %v10287_v4, %v10013_v21  ;;  %v12509_v21 = vld [vmem:[#allocation159_spill] sm:$0xff] }
0x1207   : > { %5340 = vmatpush1.msra.mxu1 %v4910_v36  ;;  %v12489_v36 = vld [vmem:[#allocation118_spill] sm:$0xff] }
0x1208   : > { %v10645_v5 = vpop.permute.xlu1 %4192  ;;  %4733 = vrot.lane.b32.xlu1 %v10522_v33, %s11893_s3  ;;  %5341 = vmatprep.subr.mxu1 %v4909_v61  ;;  %v4592_v6 = vpop.permute.xlu0 %4591  ;;  %v4967_v16 = vsel %vm4907_vm5, %v12489_v36, %v12488_v11 }
0x1209   : > { %4777 = vrot.lane.b32.xlu0 %v4250_v49, %s11893_s3  ;;  %5342 = vmatpush1.msra.mxu1 %v4908_v23  ;;  %v5003_v32 = vsel %vm4907_vm5, %v4592_v6, %v10445_v34  ;;  %v5002_v61 = vsel %vm4907_vm5, %v10188_v30, %v4592_v6  ;;  %v12492_v6 = vld [vmem:[#allocation208_spill] sm:$0xff]  ;;  %v12493_v23 = vld [vmem:[#allocation103_spill] sm:$0xff] }
0x120a   : > { %5343 = vmatprep.subr.mxu1 %v4971_v45  ;;  %5382 = vmatprep.subr.mxu0 %v5003_v32  ;;  %v4966_v49 = vsel %vm4907_vm5, %v12492_v6, %v12489_v36  ;;  %v4998_v24 = vsel %vm4907_vm5, %v12493_v23, %v12491_v18  ;;  %v12494_v32 = vld [vmem:[#allocation97_spill] sm:$0xff]  ;;  %v4963_v36 = vsel %vm4907_vm5, %v10544_v20, %v10387_v39  ;;  %v12500_v39 = vld [vmem:[#allocation76_spill] sm:$0xff]  ;;  %v12504_v20 = vld [vmem:[#allocation38_spill] sm:$0xff] }
0x120b   : > { %5344 = vmatpush2.msra.mxu1 %v4970_v58  ;;  %5383 = vmatpush1.msra.mxu0 %v5002_v61  ;;  %v12495_v61 = vld [vmem:[#allocation109_spill] sm:$0xff] }
0x120c   : > { %v10671_v34 = vpop.permute.xlu1 %4216  ;;  %5345 = vmatprep.subr.mxu1 %v4969_v48  ;;  %5384 = vmatprep.subr.mxu0 %v5001_v38  ;;  %v10673_v30 = vpop.permute.xlu0 %4687  ;;  %v4965_v58 = vsel %vm4907_vm5, %v12495_v61, %v12494_v32  ;;  %v12497_v48 = vld [vmem:[#allocation98_spill] sm:$0xff]  ;;  %v12502_v6 = vld [vmem:[#allocation17_spill] sm:$0xff] }
0x120d   : > { %4901 = vrot.lane.b32.xlu1 %v10671_v34, %s11893_s3  ;;  %4753 = vrot.lane.b32.xlu0 %v4242_v35, %s11893_s3  ;;  %v4997_v38 = vsel %vm4907_vm5, %v12497_v48, %v12496_v17  ;;  %v12508_v17 = vld [vmem:[#allocation142_spill] sm:$0xff] }
0x120e   : > { %5346 = vmatpush2.msra.mxu1 %v4968_v47  ;;  %5385 = vmatpush1.msra.mxu0 %v5000_v56  ;;  %v12498_v47 = vld [vmem:[#allocation96_spill] sm:$0xff]  ;;  %v12499_v56 = vld [vmem:[#allocation189_spill] sm:$0xff]  ;;  %v4991_v4 = vsel %vm4907_vm5, %v12509_v21, %v12508_v17 }
0x120f   : > { %5347 = vmatprep.subr.mxu1 %v4967_v16  ;;  %5386 = vmatprep.subr.mxu0 %v4999_v26  ;;  %v4964_v31 = vsel %vm4907_vm5, %v12498_v47, %v12495_v61  ;;  %v4996_v11 = vsel %vm4907_vm5, %v12499_v56, %v12497_v48  ;;  %v4994_v16 = vsel %vm4907_vm5, %v10176_v53, %v10630_v19  ;;  %v12501_v26 = vld [vmem:[#allocation176_spill] sm:$0xff]  ;;  %v12506_v61 = vld [vmem:[#allocation30_spill] sm:$0xff]  ;;  %v12523_v17 = vld [vmem:[#allocation77_spill] sm:$0xff] }
0x1210   : > { %5348 = vmatpush2.msra.mxu1 %v4966_v49  ;;  %5387 = vmatpush1.msra.mxu0 %v4998_v24  ;;  %v10699_v45 = vpop.permute.xlu1 %4713  ;;  %v10707_v35 = vpop.permute.xlu0 %4711  ;;  %v4961_v29 = vsel %vm4907_vm5, %v12501_v26, %v12500_v39  ;;  %v12503_v49 = vld [vmem:[#allocation187_spill] sm:$0xff]  ;;  %v4252_v53 = vsel %vm788_vm12, %v10566_v55, %v10390_v9  ;;  %v4960_v19 = vsel %vm4907_vm5, %v12504_v20, %v12501_v26  ;;  %v12505_v24 = vld [vmem:[#allocation160_spill] sm:$0xff]  ;;  %v12507_v55 = vld [vmem:[#allocation18_spill] sm:$0xff] }
0x1211   : > { %5349 = vmatprep.subr.mxu1 %v4965_v58  ;;  %5388 = vmatprep.subr.mxu0 %v4997_v38  ;;  %v4993_v23 = vsel %vm4907_vm5, %v12503_v49, %v12502_v6  ;;  %v4992_v32 = vsel %vm4907_vm5, %v12505_v24, %v12503_v49  ;;  %v4959_v58 = vsel %vm4907_vm5, %v12507_v55, %v12506_v61  ;;  %v12516_v6 = vld [vmem:[#allocation86_spill] sm:$0xff]  ;;  %v12520_v61 = vld [vmem:[#allocation184_spill] sm:$0xff] }
0x1212   : > { %4805 = vrot.lane.b32.xlu1 %v10585_v44, %s11893_s3  ;;  %4729 = vrot.lane.b32.xlu0 %v4234_v1, %s11893_s3  ;;  %v12510_v1 = vld [vmem:[#allocation207_spill] sm:$0xff]  ;;  %v4244_v26 = vsel %vm788_vm12, %v10541_v3, %v10378_v12  ;;  %v12519_v24 = vld [vmem:[#allocation78_spill] sm:$0xff] }
0x1213   : > { %5350 = vmatpush2.msra.mxu1 %v4964_v31  ;;  %5389 = vmatpush1.msra.mxu0 %v4996_v11  ;;  %v4958_v47 = vsel %vm4907_vm5, %v12510_v1, %v12507_v55  ;;  %v12511_v31 = vld [vmem:[#allocation102_spill] sm:$0xff]  ;;  %v12512_v11 = vld [vmem:[#allocation95_spill] sm:$0xff]  ;;  %v12524_v1 = vld [vmem:[#allocation173_spill] sm:$0xff] }
0x1214   : > { %5351 = vmatprep.subr.mxu1 %v4963_v36  ;;  %5390 = vmatprep.subr.mxu0 %v4995_v2  ;;  %v10733_v8 = vpop.permute.xlu1 %4767  ;;  %v10735_v18 = vpop.permute.xlu0 %4663  ;;  %v4990_v56 = vsel %vm4907_vm5, %v12511_v31, %v12509_v21  ;;  %v12513_v36 = vld [vmem:[#allocation197_spill] sm:$0xff]  ;;  %v12518_v3 = vld [vmem:[#allocation63_spill] sm:$0xff] }
0x1215   : > { %5352 = vmatpush2.msra.mxu1 %v4962_v22  ;;  %5391 = vmatpush1.msra.mxu0 %v4994_v16  ;;  %v4957_v2 = vsel %vm4907_vm5, %v12513_v36, %v12512_v11  ;;  %v12514_v22 = vld [vmem:[#allocation202_spill] sm:$0xff]  ;;  %v12515_v16 = vld [vmem:[#allocation87_spill] sm:$0xff]  ;;  %v4956_v49 = vsel %vm4907_vm5, %v12516_v6, %v12513_v36  ;;  %v12529_v36 = vld [vmem:[#allocation156_spill] sm:$0xff] }
0x1216   : > { %5353 = vmatprep.subr.mxu1 %v4961_v29  ;;  %5392 = vmatprep.subr.mxu0 %v4993_v23  ;;  %v4989_v39 = vsel %vm4907_vm5, %v12515_v16, %v12514_v22  ;;  %v4274_v29 = vsel %vm788_vm12, %v10275_v42, %v10003_v52  ;;  %v12517_v23 = vld [vmem:[#allocation33_spill] sm:$0xff]  ;;  %v4955_v52 = vsel %vm4907_vm5, %v10525_v43, %v10375_v62  ;;  %v12521_v55 = vld [vmem:[#allocation175_spill] sm:$0xff]  ;;  %v12533_v6 = vld [vmem:[#allocation196_spill] sm:$0xff] }
0x1217   : > { %4783 = vrot.lane.b32.xlu1 %v4252_v53, %s11893_s3  ;;  %4873 = vrot.lane.b32.xlu0 %v4282_v60, %s11893_s3  ;;  %v4988_v53 = vsel %vm4907_vm5, %v12517_v23, %v12515_v16  ;;  %v4987_v42 = vsel %vm4907_vm5, %v10612_v57, %v10426_v10  ;;  %v4953_v62 = vsel %vm4907_vm5, %v12521_v55, %v12520_v61  ;;  %v12525_v31 = vld [vmem:[#allocation131_spill] sm:$0xff]  ;;  %v12534_v23 = vld [vmem:[#allocation201_spill] sm:$0xff] }
0x1218   : > { %5354 = vmatpush2.msra.mxu1 %v4960_v19  ;;  %5393 = vmatpush1.msra.mxu0 %v4992_v32  ;;  %v10763_v48 = vpop.permute.xlu1 %4743  ;;  %v10765_v38 = vpop.permute.xlu0 %4639  ;;  %v4954_v19 = vsel %vm4907_vm5, %v12518_v3, %v10525_v43  ;;  %v4986_v32 = vsel %vm4907_vm5, %v12519_v24, %v10612_v57  ;;  %v4236_v43 = vsel %vm788_vm12, %v10522_v33, %v10366_v51  ;;  %v12528_v11 = vld [vmem:[#allocation11_spill] sm:$0xff] }
0x1219   : > { %5355 = vmatprep.subr.mxu1 %v4959_v58  ;;  %5394 = vmatprep.subr.mxu0 %v4991_v4  ;;  %v12522_v58 = vld [vmem:[#allocation19_spill] sm:$0xff]  ;;  %v4266_v57 = vsel %vm788_vm12, %v10263_v54, %v9993_v46  ;;  %v4984_v33 = vsel %vm4907_vm5, %v12525_v31, %v12523_v17 }
0x121a   : > { %5356 = vmatpush2.msra.mxu1 %v4958_v47  ;;  %5395 = vmatpush1.msra.mxu0 %v4990_v56  ;;  %v4985_v10 = vsel %vm4907_vm5, %v12523_v17, %v12522_v58  ;;  %v4952_v47 = vsel %vm4907_vm5, %v12524_v1, %v12521_v55  ;;  %v12526_v56 = vld [vmem:[#allocation137_spill] sm:$0xff]  ;;  %v12527_v46 = vld [vmem:[#allocation151_spill] sm:$0xff]  ;;  %v4947_v55 = vsel %vm4907_vm5, %v10498_v37, %v10363_v25  ;;  %v12538_v58 = vld [vmem:[#allocation62_spill] sm:$0xff] }
0x121b   : > { %5357 = vmatprep.subr.mxu1 %v4957_v2  ;;  %5396 = vmatprep.subr.mxu0 %v4989_v39  ;;  %v4951_v54 = vsel %vm4907_vm5, %v12527_v46, %v12526_v56  ;;  %v4983_v2 = vsel %vm4907_vm5, %v12529_v36, %v12528_v11  ;;  %v12530_v22 = vld [vmem:[#allocation127_spill] sm:$0xff]  ;;  %v12531_v39 = vld [vmem:[#allocation100_spill] sm:$0xff]  ;;  %v4946_v17 = vsel %vm4907_vm5, %v12538_v58, %v10498_v37  ;;  %v12541_v1 = vld [vmem:[#allocation174_spill] sm:$0xff] }
0x121c   : > { %4759 = vrot.lane.b32.xlu1 %v4244_v26, %s11893_s3  ;;  %4849 = vrot.lane.b32.xlu0 %v4274_v29, %s11893_s3  ;;  %v10793_v60 = vpop.permute.xlu1 %4719  ;;  %v10795_v20 = vpop.permute.xlu0 %4615  ;;  %v4950_v16 = vsel %vm4907_vm5, %v12530_v22, %v12527_v46  ;;  %v4982_v26 = vsel %vm4907_vm5, %v12531_v39, %v12529_v36  ;;  %v12532_v29 = vld [vmem:[#allocation92_spill] sm:$0xff]  ;;  %v12545_v46 = vld [vmem:[#allocation71_spill] sm:$0xff]  ;;  %v12546_v11 = vld [vmem:[#allocation122_spill] sm:$0xff] }
0x121d   : > { %5358 = vmatpush2.msra.mxu1 %v4956_v49  ;;  %5397 = vmatpush1.msra.mxu0 %v4988_v53  ;;  %v4949_v49 = vsel %vm4907_vm5, %v12533_v6, %v12532_v29  ;;  %v12535_v53 = vld [vmem:[#allocation106_spill] sm:$0xff]  ;;  %v12547_v36 = vld [vmem:[#allocation16_spill] sm:$0xff]  ;;  %v12548_v22 = vld [vmem:[#allocation141_spill] sm:$0xff] }
0x121e   : > { %5359 = vmatprep.subr.mxu1 %v4955_v52  ;;  %5398 = vmatprep.subr.mxu0 %v4987_v42  ;;  %v4981_v52 = vsel %vm4907_vm5, %v12535_v53, %v12534_v23  ;;  %v12556_v58 = vld [vmem:[#allocation101_spill] sm:$0xff] }
0x121f   : > { %5360 = vmatpush2.msra.mxu1 %v4954_v19  ;;  %5399 = vmatpush1.msra.mxu0 %v4986_v32  ;;  %v12536_v19 = vld [vmem:[#allocation104_spill] sm:$0xff]  ;;  %v12537_v32 = vld [vmem:[#allocation31_spill] sm:$0xff] }
0x1220   : > { %5361 = vmatprep.subr.mxu1 %v4953_v62  ;;  %5400 = vmatprep.subr.mxu0 %v4985_v10  ;;  %v10821_v21 = vpop.permute.xlu1 %4863  ;;  %v10823_v4 = vpop.permute.xlu0 %4763  ;;  %v4948_v24 = vsel %vm4907_vm5, %v12536_v19, %v12533_v6  ;;  %v4980_v61 = vsel %vm4907_vm5, %v12537_v32, %v12535_v53  ;;  %v4979_v62 = vsel %vm4907_vm5, %v10588_v0, %v10414_v50  ;;  %v12539_v10 = vld [vmem:[#allocation44_spill] sm:$0xff]  ;;  %v12542_v50 = vld [vmem:[#allocation21_spill] sm:$0xff]  ;;  %v12553_v19 = vld [vmem:[#allocation195_spill] sm:$0xff] }
0x1221   : > { %4735 = vrot.lane.b32.xlu1 %v4236_v43, %s11893_s3  ;;  %4825 = vrot.lane.b32.xlu0 %v4266_v57, %s11893_s3  ;;  %v4978_v43 = vsel %vm4907_vm5, %v12539_v10, %v10588_v0  ;;  %v12540_v57 = vld [vmem:[#allocation182_spill] sm:$0xff]  ;;  %v12544_v0 = vld [vmem:[#allocation171_spill] sm:$0xff]  ;;  %v12551_v6 = vld [vmem:[#allocation209_spill] sm:$0xff] }
0x1222   : > { %5362 = vmatpush2.msra.mxu1 %v4952_v47  ;;  %5401 = vmatpush1.msra.mxu0 %v4984_v33  ;;  %v4945_v25 = vsel %vm4907_vm5, %v12541_v1, %v12540_v57  ;;  %v12543_v33 = vld [vmem:[#allocation180_spill] sm:$0xff]  ;;  %v4944_v56 = vsel %vm4907_vm5, %v12544_v0, %v12541_v1  ;;  %v12554_v32 = vld [vmem:[#allocation199_spill] sm:$0xff]  ;;  %v6330_v57 = vunpack.i.h.bf16 %v12443_v41  ;;  %v5035_v1 = vsel %vm4907_vm5, %v10673_v30, %v10457_v59 }
0x1223   : > { %5363 = vmatprep.subr.mxu1 %v4951_v54  ;;  %5402 = vmatprep.subr.mxu0 %v4983_v2  ;;  %v4977_v37 = vsel %vm4907_vm5, %v12543_v33, %v12542_v50  ;;  %v4976_v54 = vsel %vm4907_vm5, %v12545_v46, %v12543_v33  ;;  %v4943_v2 = vsel %vm4907_vm5, %v12547_v36, %v12546_v11  ;;  %v12557_v10 = vld [vmem:[#allocation116_spill] sm:$0xff]  ;;  %v12558_v33 = vld [vmem:[#allocation177_spill] sm:$0xff]  ;;  %v12559_v0 = vld [vmem:[#allocation39_spill] sm:$0xff]  ;;  %v6320_v11 = vunpack.i.h.bf16 %v12445_v27 }
0x1224   : > { %5364 = vmatpush2.msra.mxu1 %v4950_v16  ;;  %5403 = vmatpush1.msra.mxu0 %v4982_v26  ;;  %v10851_v42 = vpop.permute.xlu1 %4839  ;;  %v10853_v3 = vpop.permute.xlu0 %4739  ;;  %v12549_v16 = vld [vmem:[#allocation154_spill] sm:$0xff]  ;;  %v12550_v26 = vld [vmem:[#allocation128_spill] sm:$0xff]  ;;  %v4253_v41 = vsel %vm788_vm12, %v10390_v9, %v6330_v57 }
0x1225   : > { %5365 = vmatprep.subr.mxu1 %v4949_v49  ;;  %5404 = vmatprep.subr.mxu0 %v4981_v52  ;;  %v4975_v39 = vsel %vm4907_vm5, %v12549_v16, %v12548_v22  ;;  %v4942_v29 = vsel %vm4907_vm5, %v12550_v26, %v12547_v36  ;;  %v4974_v49 = vsel %vm4907_vm5, %v12551_v6, %v12549_v16  ;;  %v12552_v52 = vld [vmem:[#allocation90_spill] sm:$0xff]  ;;  %v12561_v59 = vld [vmem:[#allocation20_spill] sm:$0xff]  ;;  %v12562_v36 = vld [vmem:[#allocation145_spill] sm:$0xff] }
0x1226   : > { %4877 = vrot.lane.b32.xlu0 %v10645_v5, %s11893_s3  ;;  %5366 = vmatpush2.msra.mxu1 %v4948_v24  ;;  %v4941_v24 = vsel %vm4907_vm5, %v12553_v19, %v12552_v52  ;;  %v12564_v9 = vld [vmem:[#allocation198_spill] sm:$0xff]  ;;  %v4245_v27 = vsel %vm788_vm12, %v10378_v12, %v6320_v11  ;;  %v12573_v57 = vld [vmem:[#allocation120_spill] sm:$0xff] }
0x1227   : > { %5405 = vmatpush1.msra.mxu0 %v4980_v61  ;;  %5367 = vmatprep.subr.mxu1 %v4947_v55  ;;  %v12555_v61 = vld [vmem:[#allocation94_spill] sm:$0xff] }
0x1228   : > { %5406 = vmatprep.subr.mxu0 %v4979_v62  ;;  %5368 = vmatpush2.msra.mxu1 %v4946_v17  ;;  %v10878_v47 = vpop.permute.xlu1 %4815  ;;  %v10880_v31 = vpop.permute.xlu0 %4715  ;;  %v4973_v55 = vsel %vm4907_vm5, %v12555_v61, %v12554_v32  ;;  %v4294_v62 = vld [vmem:[%s11501_s5] sm:$0xff]  ;;  %v4940_v17 = vsel %vm4907_vm5, %v12556_v58, %v12553_v19  ;;  %v12565_v26 = vld [vmem:[#allocation70_spill] sm:$0xff]  ;;  %v5027_v19 = vsel %vm4907_vm5, %v10735_v18, %v10469_v63 }
0x1229   : > { %5407 = vmatpush1.msra.mxu0 %v4978_v43  ;;  %5369 = vmatprep.subr.mxu1 %v4945_v25  ;;  %v4972_v43 = vsel %vm4907_vm5, %v12557_v10, %v12555_v61  ;;  %v12568_v61 = vld [vmem:[#allocation179_spill] sm:$0xff]  ;;  %v12570_v58 = vld [vmem:[#allocation42_spill] sm:$0xff]  ;;  %v12571_v63 = vld [vmem:[#allocation133_spill] sm:$0xff] }
0x122a   : > { %5408 = vmatprep.subr.mxu0 %v4977_v37  ;;  %4853 = vrot.lane.b32.xlu0 %v10626_v14, %s11893_s3  ;;  %v5034_v37 = vsel %vm4907_vm5, %v12558_v33, %v10673_v30  ;;  %v12563_v30 = vld [vmem:[#allocation124_spill] sm:$0xff]  ;;  %v5026_v12 = vsel %vm4907_vm5, %v12568_v61, %v10735_v18  ;;  %v12572_v10 = vld [vmem:[#allocation61_spill] sm:$0xff]  ;;  %v5024_v18 = vsel %vm4907_vm5, %v12573_v57, %v12570_v58 }
0x122b   : > { %5370 = vmatpush2.msra.mxu1 %v4944_v56  ;;  %5409 = vmatpush1.msra.mxu0 %v4976_v54  ;;  %v12560_v56 = vld [vmem:[#allocation64_spill] sm:$0xff] }
0x122c   : > { %5371 = vmatprep.subr.mxu1 %v4943_v2  ;;  %5410 = vmatprep.subr.mxu0 %v4975_v39  ;;  %v4770_v23 = vpop.permute.xlu1 %4769  ;;  %v10905_v53 = vpop.permute.xlu0 %4859  ;;  %v5033_v46 = vsel %vm4907_vm5, %v12560_v56, %v12559_v0  ;;  %v5032_v54 = vsel %vm4907_vm5, %v12561_v59, %v12560_v56  ;;  %v5031_v2 = vsel %vm4907_vm5, %v12563_v30, %v12562_v36  ;;  %v12578_v36 = vld [vmem:[#allocation72_spill] sm:$0xff] }
0x122d   : > { %5372 = vmatpush2.msra.mxu1 %v4942_v29  ;;  %5411 = vmatpush1.msra.mxu0 %v4974_v49  ;;  %v5030_v39 = vsel %vm4907_vm5, %v12564_v9, %v12563_v30  ;;  %v12566_v29 = vld [vmem:[#allocation136_spill] sm:$0xff]  ;;  %v12567_v49 = vld [vmem:[#allocation185_spill] sm:$0xff]  ;;  %v12579_v30 = vld [vmem:[#allocation123_spill] sm:$0xff] }
0x122e   : > { %5373 = vmatprep.subr.mxu1 %v4941_v24  ;;  %5412 = vmatprep.subr.mxu0 %v4973_v55  ;;  %v5029_v6 = vsel %vm4907_vm5, %v12566_v29, %v12565_v26  ;;  %v5028_v52 = vsel %vm4907_vm5, %v12567_v49, %v12566_v29 }
0x122f   : > { %4829 = vrot.lane.b32.xlu0 %v10608_v40, %s11893_s3  ;;  %5374 = vmatpush2.msra.mxu1 %v4940_v17 }
0x1230   : > { %5413 = vmatpush1.msra.mxu0 %v4972_v43  ;;  %5376 = vmatmul.mubr.f32.vlgmr.msra.gmra.mxu1 %v4294_v62  ;;  %v4746_v25 = vpop.permute.xlu1 %4745  ;;  %v10928_v50 = vpop.permute.xlu0 %4835  ;;  %v12569_v62 = vld [vmem:[#allocation121_spill] sm:$0xff]  ;;  %v4258_v43 = vsel %vm788_vm12, %v12572_v10, %v12571_v63 }
0x1231   : > { %5414 = vmatprep.subr.mxu0 %v5035_v1  ;;  %v5025_v17 = vsel %vm4907_vm5, %v12570_v58, %v12569_v62  ;;  %v12574_v1 = vld [vmem:[#allocation47_spill] sm:$0xff]  ;;  %v12586_v62 = vld [vmem:[#allocation60_spill] sm:$0xff] }
0x1232   : > { %5415 = vmatpush2.msra.mxu0 %v5034_v37  ;;  %v6339_v33 = vunpack.i.l.bf16 %v12574_v1  ;;  %v12576_v37 = vld [vmem:[#allocation129_spill] sm:$0xff] }
0x1233   : > { %5416 = vmatprep.subr.mxu0 %v5033_v46  ;;  %4785 = vrot.lane.b32.xlu0 %v4253_v41, %s11893_s3  ;;  %v12577_v41 = vld [vmem:[#allocation200_spill] sm:$0xff] }
0x1234   : > { %5417 = vmatpush2.msra.mxu0 %v5032_v54  ;;  %v4722_v22 = vpop.permute.xlu1 %4721  ;;  %v10946_v16 = vpop.permute.xlu0 %4811  ;;  %v5022_v59 = vsel %vm4907_vm5, %v12577_v41, %v12576_v37  ;;  %v4259_v9 = vsel %vm788_vm12, %v12571_v63, %v6339_v33  ;;  %v12591_v41 = vld [vmem:[#allocation139_spill] sm:$0xff] }
0x1235   : > { %5418 = vmatprep.subr.mxu0 %v5031_v2  ;;  %v5021_v2 = vsel %vm4907_vm5, %v12579_v30, %v12578_v36  ;;  %v12592_v36 = vld [vmem:[#allocation117_spill] sm:$0xff] }
0x1236   : > { %5419 = vmatpush2.msra.mxu0 %v5030_v39  ;;  %v12580_v39 = vld [vmem:[#allocation81_spill] sm:$0xff] }
0x1237   : > { %5420 = vmatprep.subr.mxu0 %v5029_v6  ;;  %4761 = vrot.lane.b32.xlu0 %v4245_v27, %s11893_s3  ;;  %v12581_v6 = vld [vmem:[#allocation181_spill] sm:$0xff] }
0x1238   : > { %5421 = vmatpush2.msra.mxu0 %v5028_v52  ;;  %v10963_v24 = vpop.permute.xlu1 %4817  ;;  %v10965_v32 = vpop.permute.xlu0 %4765  ;;  %v5018_v27 = vsel %vm4907_vm5, %v12581_v6, %v10765_v38 }
0x1239   : > { %5422 = vmatprep.subr.mxu0 %v5027_v19  ;;  %v10973_v55 = vsel %vm4907_vm5, %v10965_v32, %v10733_v8  ;;  %v12575_v8 = vld [vmem:[#allocation13_spill] sm:$0xff]  ;;  %v12583_v19 = vld [vmem:[#allocation40_spill] sm:$0xff] }
0x123a   : > { %5423 = vmatpush2.msra.mxu0 %v5026_v12  ;;  %v5023_v0 = vsel %vm4907_vm5, %v12576_v37, %v12575_v8 }
0x123b   : > { %5424 = vmatprep.subr.mxu0 %v5025_v17  ;;  %4801 = vrot.lane.b32.xlu0 %v4258_v43, %s11893_s3  ;;  %v12587_v17 = vld [vmem:[#allocation112_spill] sm:$0xff]  ;;  %v12589_v43 = vld [vmem:[#allocation107_spill] sm:$0xff] }
0x123c   : > { %5425 = vmatpush2.msra.mxu0 %v5024_v18  ;;  %v10989_v56 = vpop.permute.xlu1 %4771  ;;  %v10991_v46 = vpop.permute.xlu0 %4741 }
0x123d   : > { %5426 = vmatprep.subr.mxu0 %v5023_v0  ;;  %v10998_v54 = vsel %vm4907_vm5, %v4770_v23, %v10989_v56  ;;  %v11003_v11 = vsel %vm4907_vm5, %v10991_v46, %v10763_v48  ;;  %v5020_v23 = vsel %vm4907_vm5, %v12580_v39, %v12579_v30  ;;  %v5019_v48 = vsel %vm4907_vm5, %v10765_v38, %v10479_v28  ;;  %v12582_v28 = vld [vmem:[#allocation152_spill] sm:$0xff]  ;;  %v12584_v38 = vld [vmem:[#allocation158_spill] sm:$0xff]  ;;  %v12593_v30 = vld [vmem:[#allocation113_spill] sm:$0xff] }
0x123e   : > { %5427 = vmatpush2.msra.mxu0 %v5022_v59  ;;  %v5017_v61 = vsel %vm4907_vm5, %v12583_v19, %v12582_v28  ;;  %v5016_v12 = vsel %vm4907_vm5, %v12584_v38, %v12583_v19  ;;  %v12590_v0 = vld [vmem:[#allocation74_spill] sm:$0xff]  ;;  %v12596_v28 = vld [vmem:[#allocation155_spill] sm:$0xff]  ;;  %v12597_v19 = vld [vmem:[#allocation52_spill] sm:$0xff] }
0x123f   : > { %5428 = vmatprep.subr.mxu0 %v5021_v2  ;;  %4803 = vrot.lane.b32.xlu0 %v4259_v9, %s11893_s3  ;;  %v5013_v59 = vsel %vm4907_vm5, %v12591_v41, %v12590_v0  ;;  %v4288_v2 = vsel %vm788_vm12, %v12593_v30, %v12592_v36  ;;  %v6310_v9 = vunpack.i.h.bf16 %v12446_v13  ;;  %v12599_v38 = vld [vmem:[#allocation54_spill] sm:$0xff] }
0x1240   : > { %5429 = vmatpush2.msra.mxu0 %v5020_v23  ;;  %v11017_v26 = vpop.permute.xlu1 %4747  ;;  %v11019_v29 = vpop.permute.xlu0 %4717 }
0x1241   : > { %5430 = vmatprep.subr.mxu0 %v5019_v48  ;;  %v11026_v49 = vsel %vm4907_vm5, %v4746_v25, %v11017_v26  ;;  %v11031_v52 = vsel %vm4907_vm5, %v11019_v29, %v10793_v60  ;;  %v12585_v25 = vld [vmem:[#allocation59_spill] sm:$0xff]  ;;  %v12588_v60 = vld [vmem:[#allocation157_spill] sm:$0xff] }
0x1242   : > { %5431 = vmatpush2.msra.mxu0 %v5018_v27  ;;  %v5609_v58 = vadd.f32 %v12586_v62, %v12585_v25  ;;  %v5015_v63 = vsel %vm4907_vm5, %v12588_v60, %v12587_v17  ;;  %v5014_v57 = vsel %vm4907_vm5, %v12589_v43, %v12588_v60  ;;  %v12595_v48 = vld [vmem:[#allocation183_spill] sm:$0xff] }
0x1243   : > { %5432 = vmatprep.subr.mxu0 %v5017_v61  ;;  %4895 = vrot.lane.b32.xlu0 %v10299_v7, %s11893_s3  ;;  %v5010_v6 = vsel %vm4907_vm5, %v12595_v48, %v10795_v20  ;;  %v4237_v61 = vsel %vm788_vm12, %v10366_v51, %v6310_v9  ;;  %v12601_v25 = vld [vmem:[#allocation147_spill] sm:$0xff]  ;;  %v12602_v51 = vld [vmem:[#allocation105_spill] sm:$0xff]  ;;  %v12607_v9 = vld [vmem:[#allocation110_spill] sm:$0xff] }
0x1244   : > { %5433 = vmatpush2.msra.mxu0 %v5016_v12  ;;  %v11049_v18 = vpop.permute.xlu1 %4723  ;;  %v4862_v33 = vpop.permute.xlu0 %4861  ;;  %v6375_v12 = vunpack.i.h.bf16 %v12599_v38  ;;  %v5006_v60 = vsel %vm4907_vm5, %v12602_v51, %v12601_v25  ;;  %v12609_v48 = vld [vmem:[#allocation46_spill] sm:$0xff] }
0x1245   : > { %5434 = vmatprep.subr.mxu0 %v5015_v63  ;;  %5610 = vadd.xlane.f32.xlu1 %v5609_v58  ;;  %v11053_v7 = vsel %vm4907_vm5, %v4722_v22, %v11049_v18  ;;  %v11057_v8 = vsel %vm4907_vm5, %v10905_v53, %v4862_v33  ;;  %v11061_v37 = vsel %vm4907_vm5, %v4862_v33, %v10821_v21  ;;  %v12594_v22 = vld [vmem:[#allocation186_spill] sm:$0xff] }
0x1246   : > { %5435 = vmatpush2.msra.mxu0 %v5014_v57  ;;  %v5012_v53 = vsel %vm4907_vm5, %v12594_v22, %v12591_v41  ;;  %v5011_v21 = vsel %vm4907_vm5, %v10795_v20, %v10495_v15  ;;  %v5009_v15 = vsel %vm4907_vm5, %v12597_v19, %v12596_v28  ;;  %v12598_v20 = vld [vmem:[#allocation161_spill] sm:$0xff]  ;;  %v12603_v57 = vld [vmem:[#allocation130_spill] sm:$0xff]  ;;  %v4289_v41 = vsel %vm788_vm12, %v12592_v36, %v6375_v12 }
0x1247   : > { %5436 = vmatprep.subr.mxu0 %v5013_v59  ;;  %4891 = vrot.lane.b32.xlu0 %v4288_v2, %s11893_s3  ;;  %v12604_v33 = vld [vmem:[#allocation114_spill] sm:$0xff]  ;;  %v4296_v59 = vld [vmem:[%s11501_s5 + $0x10] sm:$0xff]  ;;  %v12606_v36 = vld [vmem:[#allocation149_spill] sm:$0xff] }
0x1248   : > { %5437 = vmatpush2.msra.mxu0 %v5012_v53  ;;  %v11077_v39 = vpop.permute.xlu1 %4869  ;;  %v4838_v23 = vpop.permute.xlu0 %4837  ;;  %v5005_v0 = vsel %vm4907_vm5, %v12604_v33, %v12603_v57 }
0x1249   : > { %5438 = vmatprep.subr.mxu0 %v5011_v21  ;;  %v11084_v27 = vsel %vm4907_vm5, %v10928_v50, %v4838_v23  ;;  %v11088_v13 = vsel %vm4907_vm5, %v4838_v23, %v10851_v42  ;;  %v5008_v50 = vsel %vm4907_vm5, %v12598_v20, %v12597_v19  ;;  %v12600_v42 = vld [vmem:[#allocation140_spill] sm:$0xff]  ;;  %v4256_v21 = vsel %vm788_vm12, %v12607_v9, %v12606_v36 }
0x124a   : > { %5439 = vmatpush2.msra.mxu0 %v5010_v6  ;;  %v5007_v62 = vsel %vm4907_vm5, %v12601_v25, %v12600_v42  ;;  %v12608_v23 = vmov 0.0   ;;  %v6335_v6 = vunpack.i.h.bf16 %v12609_v48  ;;  %v12611_v42 = vld [vmem:[#allocation25_spill] sm:$0xff] }
0x124b   : > { %5440 = vmatprep.subr.mxu0 %v5009_v15  ;;  %4737 = vrot.lane.b32.xlu0 %v4237_v61, %s11893_s3 }
0x124c   : > { %5441 = vmatpush2.msra.mxu0 %v5008_v50  ;;  %v11103_v58 = vpop.permute.xlu1 %4845  ;;  %v4814_v17 = vpop.permute.xlu0 %4813  ;;  %v4257_v61 = vsel %vm788_vm12, %v12606_v36, %v6335_v6 }
0x124d   : > { %5442 = vmatprep.subr.mxu0 %v5007_v62  ;;  %v11110_v63 = vsel %vm4907_vm5, %v10946_v16, %v4814_v17  ;;  %v11114_v43 = vsel %vm4907_vm5, %v4814_v17, %v10878_v47  ;;  %v12605_v16 = vld [vmem:[#allocation190_spill] sm:$0xff]  ;;  %v4284_v17 = vsel %vm788_vm12, %v10645_v5, %v12611_v42 }
0x124e   : > { %5443 = vmatpush2.msra.mxu0 %v5006_v60  ;;  %v5004_v47 = vsel %vm4907_vm5, %v12605_v16, %v12604_v33  ;;  %v6374_v16 = vunpack.i.l.bf16 %v12599_v38  ;;  %v12616_v38 = vld [vmem:[#allocation49_spill] sm:$0xff] }
0x124f   : > { %5444 = vmatprep.subr.mxu0 %v5005_v0  ;;  %4893 = vrot.lane.b32.xlu0 %v4289_v41, %s11893_s3  ;;  %v12613_v0 = vld [vmem:[#allocation48_spill] sm:$0xff]  ;;  %v6350_v6 = vunpack.i.h.bf16 %v12616_v38 }
0x1250   : > { %5445 = vmatpush2.msra.mxu0 %v5004_v47  ;;  %v4820_v2 = vpop.permute.xlu1 %4819  ;;  %v4866_v22 = vpop.permute.xlu0 %4865 }
0x1251   : > { %5447 = vmatmul.mubr.f32.vlgmr.msra.gmra.mxu0 %v4296_v59  ;;  %v11130_v53 = vsel %vm4907_vm5, %v10963_v24, %v4820_v2  ;;  %v12610_v24 = vld [vmem:[#allocation53_spill] sm:$0xff] }
0x1252   : > { %5588 = vmatprep.mubr.f32.mxu0 %v12608_v23  ;;  %v6370_v20 = vunpack.i.h.bf16 %v12610_v24  ;;  %v12617_v24 = vld [vmem:[#allocation164_spill] sm:$0xff] }
0x1253   : > { %4795 = vrot.lane.b32.xlu0 %v4256_v21, %s11893_s3 }
0x1254   : > { %v4822_v28 = vpop.permute.xlu1 %4821  ;;  %v4842_v19 = vpop.permute.xlu0 %4841  ;;  %v4285_v25 = vsel %vm788_vm12, %v12611_v42, %v6370_v20 }
0x1255   : > { %v11139_v15 = vsel %vm4907_vm5, %v4820_v2, %v4822_v28  ;;  %v12614_v2 = vld [vmem:[#allocation134_spill] sm:$0xff] }
0x1256   : > { %4799 = vrot.lane.b32.xlu1 %v12572_v10, %s11893_s3  ;;  %v4287_v36 = vsel %vm788_vm12, %v12614_v2, %v6374_v16  ;;  %v12621_v16 = vld [vmem:[#allocation168_spill] sm:$0xff] }
0x1257   : > { %4797 = vrot.lane.b32.xlu0 %v4257_v61, %s11893_s3 }
0x1258   : > { %v11147_v50 = vpop.permute.xlu1 %4823  ;;  %v4774_v12 = vpop.permute.xlu0 %4773 }
0x1259   : > { %v11153_v62 = vsel %vm4907_vm5, %v10989_v56, %v4774_v12  ;;  %v12612_v56 = vld [vmem:[#allocation51_spill] sm:$0xff]  ;;  %v4268_v12 = vsel %vm788_vm12, %v10608_v40, %v12617_v24 }
0x125a   : > { %4881 = vrot.lane.b32.xlu1 %v4285_v25, %s11893_s3  ;;  %v6360_v57 = vunpack.i.h.bf16 %v12612_v56  ;;  %v12620_v40 = vld [vmem:[#allocation55_spill] sm:$0xff] }
0x125b   : > { %4879 = vrot.lane.b32.xlu0 %v4284_v17, %s11893_s3  ;;  %v12618_v17 = vld [vmem:[#allocation50_spill] sm:$0xff] }
0x125c   : > { %v11160_v10 = vpop.permute.xlu1 %4779  ;;  %v4750_v51 = vpop.permute.xlu0 %4749  ;;  %v4277_v41 = vsel %vm788_vm12, %v12613_v0, %v6360_v57  ;;  %v6380_v57 = vunpack.i.h.bf16 %v12620_v40 }
0x125d   : > { %v11164_v60 = vsel %vm4907_vm5, %v11017_v26, %v4750_v51  ;;  %v4276_v26 = vsel %vm788_vm12, %v10626_v14, %v12613_v0  ;;  %v12615_v14 = vld [vmem:[#allocation35_spill] sm:$0xff]  ;;  %v4260_v51 = vsel %vm788_vm12, %v10585_v44, %v12618_v17 }
0x125e   : > { %4793 = vrot.lane.b32.xlu1 %v12607_v9, %s11893_s3  ;;  %v4286_v21 = vsel %vm788_vm12, %v12615_v14, %v12614_v2  ;;  %v12622_v2 = vld [vmem:[#allocation27_spill] sm:$0xff] }
0x125f   : > { %4889 = vrot.lane.b32.xlu0 %v12593_v30, %s11893_s3 }
0x1260   : > { %v11171_v5 = vpop.permute.xlu1 %4755  ;;  %v4726_v33 = vpop.permute.xlu0 %4725 }
0x1261   : > { %v11177_v59 = vsel %vm4907_vm5, %v11049_v18, %v4726_v33 }
0x1262   : > { %4857 = vrot.lane.b32.xlu1 %v4277_v41, %s11893_s3 }
0x1263   : > { %4855 = vrot.lane.b32.xlu0 %v4276_v26, %s11893_s3 }
0x1264   : > { %v11185_v30 = vpop.permute.xlu1 %4731  ;;  %v4868_v47 = vpop.permute.xlu0 %4867 }
0x1265   : > { %v11190_v9 = vsel %vm4907_vm5, %v4866_v22, %v4868_v47  ;;  %v11194_v18 = vsel %vm4907_vm5, %v4868_v47, %v11077_v39  ;;  %v4269_v22 = vsel %vm788_vm12, %v12617_v24, %v6350_v6 }
0x1266   : > { %4887 = vrot.lane.b32.xlu1 %v4287_v36, %s11893_s3  ;;  %v4254_v36 = vsel %vm788_vm12, %v12622_v2, %v12621_v16 }
0x1267   : > { %4885 = vrot.lane.b32.xlu0 %v4286_v21, %s11893_s3 }
0x1268   : > { %v4876_v28 = vpop.permute.xlu1 %4875  ;;  %v4844_v61 = vpop.permute.xlu0 %4843 }
0x1269   : > { %v11205_v20 = vsel %vm4907_vm5, %v4842_v19, %v4844_v61  ;;  %v11209_v39 = vsel %vm4907_vm5, %v4844_v61, %v11103_v58  ;;  %v12619_v19 = vld [vmem:[#allocation166_spill] sm:$0xff]  ;;  %v6340_v58 = vunpack.i.h.bf16 %v12574_v1 }
0x126a   : > { %4833 = vrot.lane.b32.xlu1 %v4269_v22, %s11893_s3  ;;  %v4292_v56 = vsel %vm788_vm12, %v10671_v34, %v12619_v19  ;;  %v4293_v44 = vsel %vm788_vm12, %v12619_v19, %v6380_v57  ;;  %v6334_v34 = vunpack.i.l.bf16 %v12609_v48  ;;  %v4299_v48 = vld [vmem:[%s11501_s5 + $0x28] sm:$0xff] }
0x126b   : > { %4831 = vrot.lane.b32.xlu0 %v4268_v12, %s11893_s3  ;;  %v4261_v41 = vsel %vm788_vm12, %v12618_v17, %v6340_v58  ;;  %5517 = vmatprep.mubr.f32.mxu1 %v4299_v48 }
0x126c   : > { %v4852_v42 = vpop.permute.xlu1 %4851  ;;  %v4776_v25 = vpop.permute.xlu0 %4775  ;;  %v4255_v47 = vsel %vm788_vm12, %v12621_v16, %v6334_v34 }
0x126e   : > { %4807 = vrot.lane.b32.xlu1 %v4260_v51, %s11893_s3 }
0x126f   : > { %4903 = vrot.lane.b32.xlu0 %v4292_v56, %s11893_s3 }
0x1270   : > { %v4828_v33 = vpop.permute.xlu1 %4827  ;;  %v11226_v0 = vpop.permute.xlu0 %4751 }
0x1272   : > { %4809 = vrot.lane.b32.xlu1 %v4261_v41, %s11893_s3 }
0x1273   : > { %4905 = vrot.lane.b32.xlu0 %v4293_v44, %s11893_s3 }
0x1274   : > { %v11235_v1 = vpop.permute.xlu1 %4897  ;;  %v11237_v26 = vpop.permute.xlu0 %4727 }
0x1276   : > { %4791 = vrot.lane.b32.xlu1 %v4255_v47, %s11893_s3 }
0x1277   : > { %4789 = vrot.lane.b32.xlu0 %v4254_v36, %s11893_s3 }
0x1278   : > { %v4900_v21 = vpop.permute.xlu1 %4899  ;;  %v4872_v38 = vpop.permute.xlu0 %4871 }
0x1279   : > { %v11251_v6 = vsel %vm4907_vm5, %v11235_v1, %v4900_v21 }
0x127a   : > { %4787 = vrot.lane.b32.xlu1 %v12622_v2, %s11893_s3 }
0x127b   : > { %4883 = vrot.lane.b32.xlu0 %v12615_v14, %s11893_s3  ;;  %s415_s3 = scalar_lea.vmem %s11507_s11, %s12637_s0 }
0x127c   : > { %v4848_v61 = vpop.permute.xlu0 %4847  ;;  %v4782_v12 = vpop.permute.xlu1 %4781 }
0x1280   : > { %v4778_v24 = vpop.permute.xlu0 %4777  ;;  %v4758_v51 = vpop.permute.xlu1 %4757 }
0x1284   : > { %v4754_v22 = vpop.permute.xlu0 %4753  ;;  %v4734_v14 = vpop.permute.xlu1 %4733 }
0x1288   : > { %v4730_v17 = vpop.permute.xlu0 %4729  ;;  %v11276_v47 = vpop.permute.xlu1 %4901 }
0x128c   : > { %v4874_v19 = vpop.permute.xlu0 %4873  ;;  %v11282_v36 = vpop.permute.xlu1 %4805 }
0x128d   : > { %v11258_v56 = vsel %vm4907_vm5, %v4872_v38, %v4874_v19  ;;  %v11261_v58 = vsel %vm4907_vm5, %v4874_v19, %v4876_v28 }
0x1290   : > { %v4850_v40 = vpop.permute.xlu0 %4849 }
0x1291   : > { %v11264_v57 = vsel %vm4907_vm5, %v4848_v61, %v4850_v40  ;;  %v11267_v41 = vsel %vm4907_vm5, %v4850_v40, %v4852_v42  ;;  %v4784_v42 = vpop.permute.xlu1 %4783  ;;  %v5064_v61 = vsel %vm4907_vm5, %v4776_v25, %v4778_v24 }
0x1294   : > { %v4826_v44 = vpop.permute.xlu0 %4825 }
0x1295   : > { %v11271_v34 = vsel %vm4907_vm5, %v11147_v50, %v4826_v44  ;;  %v11274_v16 = vsel %vm4907_vm5, %v4826_v44, %v4828_v33  ;;  %v5066_v50 = vsel %vm4907_vm5, %v4782_v12, %v4784_v42  ;;  %v5065_v33 = vsel %vm4907_vm5, %v4778_v24, %v11160_v10  ;;  %v4760_v40 = vpop.permute.xlu1 %4759 }
0x1296   : > { %v5060_v44 = vsel %vm4907_vm5, %v10823_v4, %v10965_v32  ;;  %v5058_v25 = vsel %vm4907_vm5, %v4758_v51, %v4760_v40  ;;  %v5052_v4 = vsel %vm4907_vm5, %v10853_v3, %v10991_v46  ;;  %v5048_v3 = vsel %vm4907_vm5, %v11237_v26, %v4730_v17  ;;  %v12623_v26 = vld [vmem:[#allocation132_spill] sm:$0xff] }
0x1298   : > { %v11278_v28 = vpop.permute.xlu0 %4877 }
0x129c   : > { %v11280_v2 = vpop.permute.xlu0 %4853 }
0x12a1   : > { %v11284_v21 = vpop.permute.xlu0 %4829 }
0x12a5   : > { %v4786_v38 = vpop.permute.xlu0 %4785 }
0x12a6   : > { %v5067_v48 = vsel %vm4907_vm5, %v4784_v42, %v4786_v38  ;;  %v12627_v42 = vld [vmem:[#allocation153_spill] sm:$0xff] }
0x12a7   : > { %5453 = vmatprep.subr.mxu1 %v5067_v48 }
0x12a8   : > { %5454 = vmatpush1.msra.mxu1 %v5066_v50  ;;  %v12630_v50 = vld [vmem:[#allocation89_spill] sm:$0xff] }
0x12a9   : > { %5455 = vmatprep.subr.mxu1 %v5065_v33  ;;  %v4762_v19 = vpop.permute.xlu0 %4761  ;;  %v12631_v33 = vld [vmem:[#allocation28_spill] sm:$0xff] }
0x12aa   : > { %5456 = vmatpush1.msra.mxu1 %v5064_v61  ;;  %v5059_v10 = vsel %vm4907_vm5, %v4760_v40, %v4762_v19  ;;  %v5037_v61 = vsel %vm4907_vm5, %v12631_v33, %v12630_v50  ;;  %v12632_v40 = vld [vmem:[#allocation192_spill] sm:$0xff] }
0x12ab   : > { %5457 = vmatprep.subr.mxu1 %v11153_v62  ;;  %v5057_v62 = vsel %vm4907_vm5, %v4754_v22, %v11171_v5  ;;  %v4736_v5 = vpop.permute.xlu1 %4735 }
0x12ac   : > { %5458 = vmatpush1.msra.mxu1 %v10998_v54  ;;  %v5056_v54 = vsel %vm4907_vm5, %v11226_v0, %v4754_v22  ;;  %v5050_v51 = vsel %vm4907_vm5, %v4734_v14, %v4736_v5 }
0x12ad   : > { %5459 = vmatprep.subr.mxu1 %v10973_v55  ;;  %v11297_v12 = vpop.permute.xlu0 %4801 }
0x12ae   : > { %5460 = vmatpush1.msra.mxu1 %v5060_v44  ;;  %v5036_v44 = vsel %vm4907_vm5, %v12632_v40, %v12631_v33 }
0x12af   : > { %5461 = vmatprep.subr.mxu1 %v5059_v10 }
0x12b0   : > { %5462 = vmatpush1.msra.mxu1 %v5058_v25 }
0x12b1   : > { %5463 = vmatprep.subr.mxu1 %v5057_v62  ;;  %v11305_v24 = vpop.permute.xlu0 %4803 }
0x12b2   : > { %5464 = vmatpush1.msra.mxu1 %v5056_v54 }
0x12b3   : > { %5465 = vmatprep.subr.mxu1 %v11164_v60 }
0x12b4   : > { %5466 = vmatpush1.msra.mxu1 %v11026_v49  ;;  %v5049_v49 = vsel %vm4907_vm5, %v4730_v17, %v11185_v30  ;;  %v5043_v30 = vsel %vm4907_vm5, %v10707_v35, %v10699_v45  ;;  %v12625_v17 = vld [vmem:[#allocation80_spill] sm:$0xff]  ;;  %v12628_v45 = vld [vmem:[#allocation126_spill] sm:$0xff] }
0x12b5   : > { %5467 = vmatprep.subr.mxu1 %v11003_v11  ;;  %v11313_v32 = vpop.permute.xlu0 %4895  ;;  %v5044_v11 = vsel %vm4907_vm5, %v10880_v31, %v11019_v29  ;;  %v12626_v29 = vld [vmem:[#allocation135_spill] sm:$0xff]  ;;  %v5039_v38 = vsel %vm4907_vm5, %v12628_v45, %v12627_v42 }
0x12b6   : > { %5468 = vmatpush1.msra.mxu1 %v5052_v4 }
0x12b9   : > { %v11315_v55 = vpop.permute.xlu0 %4891 }
0x12bd   : > { %v4738_v0 = vpop.permute.xlu0 %4737 }
0x12be   : > { %v5051_v22 = vsel %vm4907_vm5, %v4736_v5, %v4738_v0 }
0x12bf   : > { %5469 = vmatprep.subr.mxu1 %v5051_v22 }
0x12c0   : > { %5470 = vmatpush1.msra.mxu1 %v5050_v51 }
0x12c1   : > { %5471 = vmatprep.subr.mxu1 %v5049_v49  ;;  %v11323_v46 = vpop.permute.xlu0 %4893 }
0x12c2   : > { %5472 = vmatpush1.msra.mxu1 %v5048_v3 }
0x12c3   : > { %5473 = vmatprep.subr.mxu1 %v11177_v59  ;;  %v5042_v59 = vsel %vm4907_vm5, %v12623_v26, %v10707_v35  ;;  %v12629_v35 = vld [vmem:[#allocation32_spill] sm:$0xff] }
0x12c4   : > { %5474 = vmatpush1.msra.mxu1 %v11053_v7  ;;  %v12624_v7 = vld [vmem:[#allocation65_spill] sm:$0xff]  ;;  %v5038_v48 = vsel %vm4907_vm5, %v12629_v35, %v12628_v45  ;;  %v12635_v26 = vld [vmem:[#allocation144_spill] sm:$0xff] }
0x12c5   : > { %5475 = vmatprep.subr.mxu1 %v11031_v52  ;;  %v11331_v60 = vpop.permute.xlu0 %4795  ;;  %v5041_v14 = vsel %vm4907_vm5, %v12625_v17, %v12624_v7  ;;  %v5040_v52 = vsel %vm4907_vm5, %v12626_v29, %v12625_v17  ;;  %v12636_v35 = vld [vmem:[#allocation56_spill] sm:$0xff] }
0x12c6   : > { %5476 = vmatpush1.msra.mxu1 %v5044_v11 }
0x12c7   : > { %5477 = vmatprep.subr.mxu1 %v5043_v30 }
0x12c8   : > { %5478 = vmatpush1.msra.mxu1 %v5042_v59 }
0x12c9   : > { %5479 = vmatprep.subr.mxu1 %v5041_v14  ;;  %v11342_v31 = vpop.permute.xlu0 %4797  ;;  %v4298_v14 = vld [vmem:[%s11501_s5 + $0x20] sm:$0xff] }
0x12ca   : > { %5480 = vmatpush1.msra.mxu1 %v5040_v52 }
0x12cb   : > { %5481 = vmatprep.subr.mxu1 %v5039_v38 }
0x12cc   : > { %5482 = vmatpush1.msra.mxu1 %v5038_v48 }
0x12cd   : > { %5483 = vmatprep.subr.mxu1 %v5037_v61  ;;  %v4880_v19 = vpop.permute.xlu0 %4879 }
0x12ce   : > { %v11359_v10 = vpop.xlane.xlu1 %5610  ;;  %5484 = vmatpush1.msra.mxu1 %v5036_v44  ;;  %v5098_v0 = vsel %vm4907_vm5, %v11278_v28, %v4880_v19 }
0x12cf   : > { %v5622_v7 = vmul.f32 0.00390625, %v11359_v10 }
0x12d1   : > { %v4890_v25 = vpop.permute.xlu0 %4889 }
0x12d2   : > { %v11361_v62 = vpop.permute.xlu1 %4799 }
0x12d5   : > { %v4856_v54 = vpop.permute.xlu0 %4855 }
0x12d6   : > { %v4882_v4 = vpop.permute.xlu1 %4881  ;;  %v5090_v11 = vsel %vm4907_vm5, %v11280_v2, %v4856_v54 }
0x12d7   : > { %v5099_v5 = vsel %vm4907_vm5, %v4880_v19, %v4882_v4 }
0x12d8   : > { %5485 = vmatprep.subr.mxu1 %v5099_v5 }
0x12d9   : > { %5486 = vmatpush2.msra.mxu1 %v5098_v0  ;;  %v4886_v22 = vpop.permute.xlu0 %4885 }
0x12da   : > { %5487 = vmatprep.subr.mxu1 %v11261_v58  ;;  %v11367_v51 = vpop.permute.xlu1 %4793 }
0x12db   : > { %5488 = vmatpush2.msra.mxu1 %v11258_v56  ;;  %v5070_v59 = vsel %vm4907_vm5, %v11367_v51, %v11331_v60 }
0x12dc   : > { %5489 = vmatprep.subr.mxu1 %v11194_v18 }
0x12dd   : > { %5490 = vmatpush2.msra.mxu1 %v11190_v9  ;;  %v4832_v49 = vpop.permute.xlu0 %4831 }
0x12de   : > { %5491 = vmatprep.subr.mxu1 %v11061_v37  ;;  %v4858_v3 = vpop.permute.xlu1 %4857 }
0x12df   : > { %5492 = vmatpush2.msra.mxu1 %v11057_v8  ;;  %v5091_v28 = vsel %vm4907_vm5, %v4856_v54, %v4858_v3  ;;  %v5595_v54 = vld [vmem:[%s411_s13] sm:$0xff] }
0x12e0   : > { %5493 = vmatprep.subr.mxu1 %v5091_v28 }
0x12e1   : > { %5494 = vmatpush2.msra.mxu1 %v5090_v11  ;;  %v4904_v58 = vpop.permute.xlu0 %4903 }
0x12e2   : > { %5495 = vmatprep.subr.mxu1 %v11267_v41  ;;  %v4888_v56 = vpop.permute.xlu1 %4887  ;;  %v5106_v18 = vsel %vm4907_vm5, %v11276_v47, %v4904_v58  ;;  %v5102_v47 = vsel %vm4907_vm5, %v4890_v25, %v11315_v55 }
0x12e3   : > { %5496 = vmatpush2.msra.mxu1 %v11264_v57  ;;  %v5082_v57 = vsel %vm4907_vm5, %v11284_v21, %v4832_v49  ;;  %v4300_v21 = vld [vmem:[%s11501_s5 + $0x30] sm:$0xff] }
0x12e4   : > { %5497 = vmatprep.subr.mxu1 %v11209_v39 }
0x12e5   : > { %5498 = vmatpush2.msra.mxu1 %v11205_v20  ;;  %v4906_v37 = vpop.permute.xlu0 %4905 }
0x12e6   : > { %5499 = vmatprep.subr.mxu1 %v11088_v13  ;;  %v4834_v8 = vpop.permute.xlu1 %4833  ;;  %v5107_v9 = vsel %vm4907_vm5, %v4904_v58, %v4906_v37  ;;  %v5104_v13 = vsel %vm4907_vm5, %v11313_v32, %v11235_v1  ;;  %v5101_v1 = vsel %vm4907_vm5, %v4886_v22, %v4888_v56 }
0x12e7   : > { %5500 = vmatpush2.msra.mxu1 %v11084_v27  ;;  %v5083_v41 = vsel %vm4907_vm5, %v4832_v49, %v4834_v8  ;;  %5548 = vmatprep.subr.mxu0 %v5107_v9  ;;  %v5103_v27 = vsel %vm4907_vm5, %v11315_v55, %v11323_v46  ;;  %v12634_v55 = vld [vmem:[#allocation69_spill] sm:$0xff]  ;;  %v5072_v46 = vsel %vm4907_vm5, %v11361_v62, %v11297_v12 }
0x12e8   : > { %5501 = vmatprep.subr.mxu1 %v5083_v41  ;;  %5549 = vmatpush1.msra.mxu0 %v5106_v18 }
0x12e9   : > { %5502 = vmatpush2.msra.mxu1 %v5082_v57  ;;  %5550 = vmatprep.subr.mxu0 %v11251_v6  ;;  %v4790_v20 = vpop.permute.xlu0 %4789 }
0x12ea   : > { %5503 = vmatprep.subr.mxu1 %v11274_v16  ;;  %v4808_v39 = vpop.permute.xlu1 %4807  ;;  %5551 = vmatpush1.msra.mxu0 %v5104_v13 }
0x12eb   : > { %5504 = vmatpush2.msra.mxu1 %v11271_v34  ;;  %5552 = vmatprep.subr.mxu0 %v5103_v27  ;;  %v12633_v34 = vld [vmem:[#allocation29_spill] sm:$0xff] }
0x12ec   : > { %5505 = vmatprep.subr.mxu1 %v11139_v15  ;;  %5553 = vmatpush1.msra.mxu0 %v5102_v47  ;;  %v5625_v32 = vmul.f32 0.00390625, %v12633_v34 }
0x12ed   : > { %5506 = vmatpush2.msra.mxu1 %v11130_v53  ;;  %v4884_v6 = vpop.permute.xlu0 %4883  ;;  %5554 = vmatprep.subr.mxu0 %v5101_v1  ;;  %v5074_v53 = vsel %vm4907_vm5, %v11282_v36, %v4808_v39  ;;  %v5071_v36 = vsel %vm4907_vm5, %v11331_v60, %v11342_v31  ;;  %v5626_v60 = vld [vmem:[%s11503_s7] sm:$0xff] }
0x12ee   : > { %5507 = vmatprep.subr.mxu1 %v11114_v43  ;;  %v4810_v16 = vpop.permute.xlu1 %4809  ;;  %v5100_v2 = vsel %vm4907_vm5, %v4884_v6, %v4886_v22  ;;  %v5073_v43 = vsel %vm4907_vm5, %v11297_v12, %v11305_v24  ;;  %v5623_v24 = vmul.f32 0.00390625, %v12635_v26  ;;  %v5596_v22 = vld [vmem:[%s411_s13 + $0x8] sm:$0xff] }
0x12ef   : > { %5508 = vmatpush2.msra.mxu1 %v11110_v63  ;;  %v5075_v15 = vsel %vm4907_vm5, %v4808_v39, %v4810_v16  ;;  %5555 = vmatpush1.msra.mxu0 %v5100_v2  ;;  %v5624_v63 = vmul.f32 0.00390625, %v12634_v55 }
0x12f0   : > { %5509 = vmatprep.subr.mxu1 %v5075_v15  ;;  %5951 = vmatprep.subr.mxu0 %v12608_v23  ;;  %v5377_v52 = vpop.f32.mrf.mxu1 }
0x12f1   : > { %5510 = vmatpush2.msra.mxu1 %v5074_v53  ;;  %5936 = vmatmul.mubr.msk.f32.vlgmr.msra.gmra.mxu0 %vm2297_vm9, %v4300_v21  ;;  %v5378_v48 = vadd.f32 %v5377_v52, %v12636_v35 }
0x12f2   : > { %5511 = vmatprep.subr.mxu1 %v5073_v43  ;;  %v4792_v30 = vpop.permute.xlu1 %4791  ;;  %5952 = vmatpush3.msra.mxu0 %v5625_v32  ;;  %v5379_v38 = vpop.f32.mrf.mxu1 }
0x12f3   : > { %5512 = vmatpush2.msra.mxu1 %v5072_v46  ;;  %5953 = vmatprep.subr.mxu0 %v12608_v23  ;;  %v5069_v12 = vsel %vm4907_vm5, %v4790_v20, %v4792_v30  ;;  %v5380_v33 = vadd.f32 %v5379_v38, %v12636_v35 }
0x12f4   : > { %5513 = vmatprep.subr.mxu1 %v5071_v36  ;;  %5954 = vmatpush3.msra.mxu0 %v5624_v63 }
0x12f5   : > { %5514 = vmatpush2.msra.mxu1 %v5070_v59  ;;  %5955 = vmatprep.subr.mxu0 %v12608_v23 }
0x12f6   : > { %5515 = vmatprep.subr.mxu1 %v5069_v12  ;;  %v4788_v17 = vpop.permute.xlu1 %4787  ;;  %5956 = vmatpush3.msra.mxu0 %v5623_v24 }
0x12f7   : > { %v5068_v31 = vsel %vm4907_vm5, %v4788_v17, %v4790_v20  ;;  %5957 = vmatprep.subr.mxu0 %v12608_v23  ;;  %5959 = vmatprep.mubr.msk.f32.mxu0 %vm6486_vm6, %v12608_v23  ;;  %v5627_v23 = vld [vmem:[%s11504_s8] sm:$0xff] }
0x12f8   : > { %5516 = vmatpush2.msra.mxu1 %v5068_v31  ;;  %5958 = vmatpush3.msra.mxu0 %v5622_v7 }
0x12f9   : > { %5518 = vmatmul.mubr.f32.vlgmr.msra.gmra.mxu1 %v4298_v14  ;;  %5960 = vmatmul.mubr.msk.f32.vlgmr.msra.gmra.mxu0 %vm2297_vm9, %v5626_v60 }
0x1311   : > { %v5448_v29 = vpop.f32.mrf.mxu0 }
0x1312   : > { %v5449_v61 = vadd.f32 %v5448_v29, %v5378_v48 }
0x1313   : > { %v5450_v42 = vpop.f32.mrf.mxu0 }
0x1314   : > { %v5451_v44 = vadd.f32 %v5450_v42, %v5380_v33 }
0x13b1   : > { %v5590_v45 = vpop.f32.mrf.mxu0 }
0x13b3   : > { %v5592_v50 = vpop.f32.mrf.mxu0 }
0x13b9   : > { %v5519_v19 = vpop.f32.mrf.mxu1  ;;  %v5697_v40 = vpop.f32.mrf.mxu0 }
0x13ba   : > { %v5520_v10 = vadd.f32 %v5519_v19, %v5449_v61  ;;  %v5698_v25 = vadd.f32 %v5697_v40, %v5627_v23 }
0x13bb   : > { %v5521_v62 = vpop.f32.mrf.mxu1  ;;  %v5961_v4 = vpop.f32.mrf.mxu0 }
0x13bc   : > { %v5522_v5 = vadd.f32 %v5521_v62, %v5451_v44  ;;  %v5591_v0 = vadd.f32 %v5590_v45, %v5520_v10  ;;  %5702 = vst.msk [vmem:[%s415_s3] sm:$0xff] %vm5701_vm7, %v5698_v25 }
0x13be   : > { %v5597_v51 = vadd.f32 %v5595_v54, %v5591_v0  ;;  %v5593_v49 = vadd.f32 %v5592_v50, %v5522_v5 }
0x13c0   : > { %5599 = vst [vmem:[%s395_s29] sm:$0xff] %v5597_v51  ;;  %v5598_v3 = vadd.f32 %v5596_v22, %v5593_v49 }
0x13c2   : > { %5600 = vst.msk [vmem:[%s395_s29 + $0x8] sm:$0xff] %vm505_vm3, %v5598_v3 }
0x13c3   : > { %6410 = shalt.err (!%p6407_p3)
}
0x13c4   : > { %s6411_s24 = scalar_lea.hbm %s5720_s28, 256  ;;  %s6415_s13 = scalar_lea.hbm %s11506_s10, 512 }
0x13c5   : > { %p6412_p4 = scmp.ne.s32.totalorder %s5720_s28, %s6411_s24  ;;  %p6416_p9 = scmp.lt.s32.totalorder %s5720_s28, %s11506_s10 }
0x13c6   : > { %p6417_p10 = scmp.lt.s32.totalorder %s6415_s13, %s6411_s24 }
0x13c7   : > { %p6413_p7 = pnand %p6412_p4, %p6586_p5 }
0x13c8   : > { %p6418_p11 = por %p6417_p10, %p6416_p9 }
0x13c9   : > { %p6414_p8 = pneg %p6413_p7 }
0x13cb   : > { %p6419_p12 = pnand %p6418_p11, %p6414_p8 }
0x13cd   : > { %6422 = shalt.err (!%p6419_p12)
}
0x13ce   : > { %5962 = dma.vmem_to_hbm [thread:$0]  (%p6586_p5), %s5723_s16, 256, %s5720_s28, %s5704_s30  }
0x13cf PF: > { %p5968_p13 = scmp.ge.s32.totalorder %s6457_s20, 2  ;;  %s5737_s3 = sand.u32 1, %s6445_s17  }
0x13d0   : > { %s5738_s26 = scalar_lea.sflag [#allocation5], %s5737_s3 }
0x13d1   : > { %p5965_p0 = pnand %p5968_p13, %p6590_p6 }
0x13d3   : > { %p5966_p1 = pneg %p5965_p0 }
0x13d5   : > { %6440 = dma.done.wait (%p5966_p1), %s5738_s26, 256  }
0x13d6   : > { %6442 = vsyncadd (%p5966_p1), %s5738_s26, 4294967040  ;;  %s12639_s20 = sld [smem:[#allocation8_spill]]  ;;  %s12642_s17 = smov %s6449_s18 }
0x13d7   : > { %s12640_s29 = sld [smem:[#allocation7_spill]] }
0x13d8   : > { %s12641_s19 = sld [smem:[#allocation9_spill]] }
0x13dc   : > { %p22_p2 = scmp.ge.s32.totalorder %s12639_s20, 4  }
0x13dd   : > { %s12643_s18 = smov %s12640_s29 }
0x13de   :  { %24 = sbr.rel (!%p22_p2) target bundleno = 8 (0x8), region = 126 }
0x13e3   :  { %5750 = vsyncpa [#allocation5], 1 }
0x13e4   :  { %5752 = vsyncpa [#allocation5 + $0x1], 1 }

</bundles_post_ra>
